<compile_context>
chip_gen: v7x
topology: tpu7x:2x2x1
jax: 0.10.0
libtpu: 0.0.40
codegen_flags: <defaults>
</compile_context>

<pallas_src>
import jax
import jax.numpy as jnp
from jax.experimental import pallas as pl
from jax.experimental.pallas import tpu as pltpu

EPS = 1e-5
C = 32            # channels of both conv layers
DOUT = 256        # linear output features
K1 = 3 * 5 * 5    # conv1 im2col contraction (75)
K1_PAD = 128      # padded to an MXU-friendly 128


def _relu_bn(acc, bias, gamma, beta, n_rows):
    """bias-add -> ReLU -> BatchNorm (training-mode batch stats).

    One-pass stats (sum & sum-of-squares) folded into a single scale/shift FMA.
    acc: (rows, C) f32, channels along the lane dim.
    """
    acc = jnp.maximum(acc + bias, 0.0)
    s = jnp.sum(acc, axis=0, keepdims=True)
    ss = jnp.sum(acc * acc, axis=0, keepdims=True)
    mean = s * (1.0 / n_rows)
    var = ss * (1.0 / n_rows) - mean * mean
    scale = gamma * jax.lax.rsqrt(var + EPS)
    shift = beta - mean * scale
    return acc * scale + shift


def cnn_kernel(p1_ref, w1_ref, b1_ref, g1_ref, be1_ref,
               w2_ref, b2_ref, g2_ref, be2_ref,
               wl_ref, bl_ref,
               o_ref,
               s1_ref, pad2_ref, s2_ref, flat_ref):
    f32, bf16 = jnp.float32, jnp.bfloat16
    B = o_ref.shape[0]

    # ---- conv1: single im2col matmul (bf16 x bf16 -> f32) + ReLU + BN1 -------
    acc1 = jnp.dot(p1_ref[...], w1_ref[...], preferred_element_type=f32)  # (B*256, 32)
    y1 = _relu_bn(acc1, b1_ref[...], g1_ref[...], be1_ref[...], B * 16 * 16)

    # ---- maxpool1 (2x2): h-pairs on the value (sublane-preserving reshape),
    # ---- w-pairs fused with the scatter into the zero-padded conv2 slab ------
    v1 = y1.reshape(B, 8, 2, 16, C)                         # (b, h2, hi, w, c)
    s1_ref[...] = jnp.maximum(v1[:, :, 0], v1[:, :, 1])     # pooled over h -> (B,8,16,C)

    pad2_ref[...] = jnp.zeros(pad2_ref.shape, f32)          # valid region: [:,2:10,2:10,:]
    for j in range(8):                                      # pool over w, write column j+2
        pad2_ref[:, 2:10, 2 + j, :] = jnp.maximum(
            s1_ref[:, :, 2 * j, :], s1_ref[:, :, 2 * j + 1, :])   # (B, 8, C)

    # ---- conv2: in-VMEM im2col as 25 shifted (B*64,32)@(32,32) matmuls -------
    acc2 = jnp.zeros((B * 8 * 8, C), f32)
    for kh in range(5):
        for kw in range(5):
            win = pad2_ref[:, kh:kh + 8, kw:kw + 8, :]            # (B,8,8,C) f32
            patch = win.reshape(B * 8 * 8, C).astype(bf16)
            acc2 = acc2 + jnp.dot(patch, w2_ref[kh * 5 + kw],
                                  preferred_element_type=f32)
    y2 = _relu_bn(acc2, b2_ref[...], g2_ref[...], be2_ref[...], B * 8 * 8)

    # ---- maxpool2 (2x2): h-pairs on the value; w-pairs fused into building the
    # ---- lane-dense (B, 512) flat vector consumed by a single linear matmul --
    v2 = y2.reshape(B, 4, 2, 8, C)                          # (b, i, hi, w, c)
    s2_ref[...] = jnp.maximum(v2[:, :, 0], v2[:, :, 1])     # pooled over h -> (B,4,8,C)
    for i in range(4):
        for j in range(4):
            t = i * 4 + j
            flat_ref[:, t * C:(t + 1) * C] = jnp.maximum(
                s2_ref[:, i, 2 * j, :], s2_ref[:, i, 2 * j + 1, :])   # (B, C)

    # ---- linear: one (B,512)@(512,256) MXU matmul + bias ---------------------
    o_ref[...] = jnp.dot(flat_ref[...].astype(bf16), wl_ref[...],
                         preferred_element_type=f32) + bl_ref[...]


# ---------------------------------------------------------------------------
# Wrapper
# ---------------------------------------------------------------------------
def prep_params(p):
    """One-time re-layout of the PyTorch-shaped parameters (call once, outside jit)."""
    f32, bf16 = jnp.float32, jnp.bfloat16
    w1 = p["w1"].reshape(C, K1).T                                   # (75,32), rows=(cin,kh,kw)
    w1 = jnp.pad(w1, ((0, K1_PAD - K1), (0, 0))).astype(bf16)       # pad K to 128
    w2 = p["w2"].transpose(2, 3, 1, 0).reshape(25, C, C).astype(bf16)  # [kh*5+kw, cin, cout]
    # Kernel flattens the pooled (B,4,4,32) tensor in (i,j,c) order; PyTorch
    # flattens (B,32,4,4) in (c,i,j) order.  Fold the permutation into W:
    # wl_new[i*128 + j*32 + c, out] = wl[out, c*16 + i*4 + j].
    wl = (p["wl"].reshape(DOUT, C, 4, 4).transpose(2, 3, 1, 0)
          .reshape(16 * C, DOUT).astype(bf16))
    vec = lambda a, n: a.reshape(1, n).astype(f32)
    return dict(w1=w1, w2=w2, wl=wl,
                b1=vec(p["b1"], C), g1=vec(p["g1"], C), be1=vec(p["be1"], C),
                b2=vec(p["b2"], C), g2=vec(p["g2"], C), be2=vec(p["be2"], C),
                bl=vec(p["bl"], DOUT))


def _conv1_patches(x_nchw):
    """(B,3,16,16) NCHW -> (B*256, 128) bf16 im2col patches, K zero-padded to 128."""
    B, Cin, H, W = x_nchw.shape
    xp = jnp.pad(x_nchw, ((0, 0), (0, 0), (2, 2), (2, 2)))
    cols = [xp[:, :, dh:dh + H, dw:dw + W] for dh in range(5) for dw in range(5)]
    p = jnp.stack(cols, axis=-1)                              # (B, Cin, H, W, 25)
    p = p.transpose(0, 2, 3, 1, 4).reshape(B * H * W, Cin * 25)
    p = jnp.pad(p, ((0, 0), (0, K1_PAD - Cin * 25)))
    return p.astype(jnp.bfloat16)


@jax.jit
def cnn_forward(x_nchw, pp):
    """Pallas implementation of CNN.forward.  x_nchw: (B, 3, 16, 16) f32."""
    B = x_nchw.shape[0]
    p1 = _conv1_patches(x_nchw)                               # (B*256, 128) bf16

    vec32 = pl.BlockSpec((1, C), lambda i: (0, 0))
    return pl.pallas_call(
        cnn_kernel,
        grid=(1,),
        in_specs=[
            pl.BlockSpec(p1.shape, lambda i: (0, 0)),
            pl.BlockSpec((K1_PAD, C), lambda i: (0, 0)),
            vec32, vec32, vec32,
            pl.BlockSpec((25, C, C), lambda i: (0, 0, 0)),
            vec32, vec32, vec32,
            pl.BlockSpec((16 * C, DOUT), lambda i: (0, 0)),
            pl.BlockSpec((1, DOUT), lambda i: (0, 0)),
        ],
        out_specs=pl.BlockSpec((B, DOUT), lambda i: (0, 0)),
        out_shape=jax.ShapeDtypeStruct((B, DOUT), jnp.float32),
        scratch_shapes=[
            pltpu.VMEM((B, 8, 16, C), jnp.float32),    # h-pooled conv1 activations
            pltpu.VMEM((B, 12, 12, C), jnp.float32),   # zero-padded conv2 input slab
            pltpu.VMEM((B, 4, 8, C), jnp.float32),     # h-pooled conv2 activations
            pltpu.VMEM((B, 16 * C), jnp.float32),      # flattened (i,j,c) linear input
        ],
        compiler_params=pltpu.CompilerParams(dimension_semantics=("arbitrary",)),
    )(p1, pp["w1"], pp["b1"], pp["g1"], pp["be1"],
      pp["w2"], pp["b2"], pp["g2"], pp["be2"], pp["wl"], pp["bl"])


# ---------------------------------------------------------------------------
# Pure-JAX reference (correctness check only)
# ---------------------------------------------------------------------------
def ref_forward(x, p):
    hi = jax.lax.Precision.HIGHEST

    def conv(x, w, b):
        y = jax.lax.conv_general_dilated(
            x, w, (1, 1), [(2, 2), (2, 2)],
            dimension_numbers=("NCHW", "OIHW", "NCHW"), precision=hi)
        return y + b[None, :, None, None]

    def bn(x, g, be):
        mean = x.mean(axis=(0, 2, 3), keepdims=True)
        var = ((x - mean) ** 2).mean(axis=(0, 2, 3), keepdims=True)
        return ((x - mean) * jax.lax.rsqrt(var + EPS)
                * g[None, :, None, None] + be[None, :, None, None])

    def mp(x):
        B, Cc, H, W = x.shape
        return x.reshape(B, Cc, H // 2, 2, W // 2, 2).max(axis=(3, 5))

    h = mp(bn(jax.nn.relu(conv(x, p["w1"], p["b1"])), p["g1"], p["be1"]))
    h = mp(bn(jax.nn.relu(conv(h, p["w2"], p["b2"])), p["g2"], p["be2"]))
    h = h.reshape(x.shape[0], 32 * 4 * 4)
    return jnp.dot(h, p["wl"].T, precision=hi) + p["bl"]


# ---------------------------------------------------------------------------
if __name__ == "__main__":
    key = jax.random.PRNGKey(0)
    ks = jax.random.split(key, 11)

    params = {
        "w1": jax.random.normal(ks[0], (32, 3, 5, 5), jnp.float32) * 0.1,
        "b1": jax.random.normal(ks[1], (32,), jnp.float32) * 0.1,
        "g1": 1.0 + 0.1 * jax.random.normal(ks[2], (32,), jnp.float32),
        "be1": 0.1 * jax.random.normal(ks[3], (32,), jnp.float32),
        "w2": jax.random.normal(ks[4], (32, 32, 5, 5), jnp.float32) * 0.05,
        "b2": jax.random.normal(ks[5], (32,), jnp.float32) * 0.1,
        "g2": 1.0 + 0.1 * jax.random.normal(ks[6], (32,), jnp.float32),
        "be2": 0.1 * jax.random.normal(ks[7], (32,), jnp.float32),
        "wl": jax.random.normal(ks[8], (256, 512), jnp.float32) * 0.05,
        "bl": jax.random.normal(ks[9], (256,), jnp.float32) * 0.1,
    }

    # Input: batch=2, NCHW, 3x16x16 (16x16 spatial is implied by Linear(512, 256)).
    x = jax.random.normal(ks[10], (2, 3, 16, 16), jnp.float32)

    pp = prep_params(params)                       # one-time weight re-layout
    out = jax.block_until_ready(cnn_forward(x, pp))
    assert out.shape == (2, 256) and out.dtype == jnp.float32

    ref = jax.block_until_ready(ref_forward(x, params))
    err = float(jnp.max(jnp.abs(out - ref)))
    assert jnp.allclose(out, ref, atol=3e-2, rtol=2e-2), f"max abs diff {err}"

    print("KERNEL_OK")
</pallas_src>

<mosaic_0001>
module attributes {stable_mosaic.version = 11 : i64} {
  func.func @cnn_kernel(%arg0: i32, %arg1: memref<512x128xbf16, #tpu.memory_space<vmem>>, %arg2: memref<128x32xbf16, #tpu.memory_space<vmem>>, %arg3: memref<1x32xf32, #tpu.memory_space<vmem>>, %arg4: memref<1x32xf32, #tpu.memory_space<vmem>>, %arg5: memref<1x32xf32, #tpu.memory_space<vmem>>, %arg6: memref<25x32x32xbf16, #tpu.memory_space<vmem>>, %arg7: memref<1x32xf32, #tpu.memory_space<vmem>>, %arg8: memref<1x32xf32, #tpu.memory_space<vmem>>, %arg9: memref<1x32xf32, #tpu.memory_space<vmem>>, %arg10: memref<512x256xbf16, #tpu.memory_space<vmem>>, %arg11: memref<1x256xf32, #tpu.memory_space<vmem>>, %arg12: memref<2x256xf32, #tpu.memory_space<vmem>>, %arg13: memref<2x8x16x32xf32, #tpu.memory_space<vmem>>, %arg14: memref<2x12x12x32xf32, #tpu.memory_space<vmem>>, %arg15: memref<2x4x8x32xf32, #tpu.memory_space<vmem>>, %arg16: memref<2x512xf32, #tpu.memory_space<vmem>>) attributes {dimension_semantics = [#tpu.dimension_semantics<arbitrary>], iteration_bounds = array<i64: 1>, scalar_prefetch = 0 : i64, scratch_operands = 4 : i64, tpu.core_type = #tpu.core_type<tc>, window_params = [{pipeline_mode = #tpu.pipeline_mode<synchronous>, transform_indices = @transform_0, window_bounds = array<i64: 512, 128>}, {pipeline_mode = #tpu.pipeline_mode<synchronous>, transform_indices = @transform_1, window_bounds = array<i64: 128, 32>}, {pipeline_mode = #tpu.pipeline_mode<synchronous>, transform_indices = @transform_2, window_bounds = array<i64: 1, 32>}, {pipeline_mode = #tpu.pipeline_mode<synchronous>, transform_indices = @transform_3, window_bounds = array<i64: 1, 32>}, {pipeline_mode = #tpu.pipeline_mode<synchronous>, transform_indices = @transform_4, window_bounds = array<i64: 1, 32>}, {pipeline_mode = #tpu.pipeline_mode<synchronous>, transform_indices = @transform_5, window_bounds = array<i64: 25, 32, 32>}, {pipeline_mode = #tpu.pipeline_mode<synchronous>, transform_indices = @transform_6, window_bounds = array<i64: 1, 32>}, {pipeline_mode = #tpu.pipeline_mode<synchronous>, transform_indices = @transform_7, window_bounds = array<i64: 1, 32>}, {pipeline_mode = #tpu.pipeline_mode<synchronous>, transform_indices = @transform_8, window_bounds = array<i64: 1, 32>}, {pipeline_mode = #tpu.pipeline_mode<synchronous>, transform_indices = @transform_9, window_bounds = array<i64: 512, 256>}, {pipeline_mode = #tpu.pipeline_mode<synchronous>, transform_indices = @transform_10, window_bounds = array<i64: 1, 256>}, {pipeline_mode = #tpu.pipeline_mode<synchronous>, transform_indices = @transform_11, window_bounds = array<i64: 2, 256>}]} {
    %c0 = arith.constant 0 : index
    %c0_0 = arith.constant 0 : index
    %0 = vector.load %arg1[%c0, %c0_0] : memref<512x128xbf16, #tpu.memory_space<vmem>>, vector<512x128xbf16>
    %c0_1 = arith.constant 0 : index
    %c0_2 = arith.constant 0 : index
    %1 = vector.load %arg2[%c0_1, %c0_2] : memref<128x32xbf16, #tpu.memory_space<vmem>>, vector<128x32xbf16>
    %cst = arith.constant dense<0.000000e+00> : vector<512x32xf32>
    %2 = tpu.matmul %0, %1, %cst {dimension_numbers = #tpu.dot_dimension_numbers<[1], [0], [0], [1], [0, 0, 1, 1], [], []>} : vector<512x128xbf16>, vector<128x32xbf16>, vector<512x32xf32> -> vector<512x32xf32>
    %c0_3 = arith.constant 0 : index
    %c0_4 = arith.constant 0 : index
    %3 = vector.load %arg3[%c0_3, %c0_4] : memref<1x32xf32, #tpu.memory_space<vmem>>, vector<1x32xf32>
    %c0_5 = arith.constant 0 : index
    %c0_6 = arith.constant 0 : index
    %4 = vector.load %arg4[%c0_5, %c0_6] : memref<1x32xf32, #tpu.memory_space<vmem>>, vector<1x32xf32>
    %c0_7 = arith.constant 0 : index
    %c0_8 = arith.constant 0 : index
    %5 = vector.load %arg5[%c0_7, %c0_8] : memref<1x32xf32, #tpu.memory_space<vmem>>, vector<1x32xf32>
    %6 = vector.broadcast %3 : vector<1x32xf32> to vector<512x32xf32>
    %7 = arith.addf %2, %6 : vector<512x32xf32>
    %cst_9 = arith.constant 0.000000e+00 : f32
    %8 = vector.broadcast %cst_9 : f32 to vector<512x32xf32>
    %9 = arith.maximumf %7, %8 : vector<512x32xf32>
    %cst_10 = arith.constant dense<0.000000e+00> : vector<32xf32>
    %10 = vector.multi_reduction <add>, %9, %cst_10 [0] : vector<512x32xf32> to vector<32xf32>
    %11 = vector.shape_cast %10 : vector<32xf32> to vector<1x32xf32>
    %12 = arith.mulf %9, %9 : vector<512x32xf32>
    %cst_11 = arith.constant dense<0.000000e+00> : vector<32xf32>
    %13 = vector.multi_reduction <add>, %12, %cst_11 [0] : vector<512x32xf32> to vector<32xf32>
    %14 = vector.shape_cast %13 : vector<32xf32> to vector<1x32xf32>
    %cst_12 = arith.constant 0.001953125 : f32
    %15 = vector.broadcast %cst_12 : f32 to vector<1x32xf32>
    %16 = arith.mulf %11, %15 : vector<1x32xf32>
    %cst_13 = arith.constant 0.001953125 : f32
    %17 = vector.broadcast %cst_13 : f32 to vector<1x32xf32>
    %18 = arith.mulf %14, %17 : vector<1x32xf32>
    %19 = arith.mulf %16, %16 : vector<1x32xf32>
    %20 = arith.subf %18, %19 : vector<1x32xf32>
    %cst_14 = arith.constant 9.99999974E-6 : f32
    %21 = vector.broadcast %cst_14 : f32 to vector<1x32xf32>
    %22 = arith.addf %20, %21 : vector<1x32xf32>
    %23 = math.rsqrt %22 : vector<1x32xf32>
    %24 = arith.mulf %4, %23 : vector<1x32xf32>
    %25 = arith.mulf %16, %24 : vector<1x32xf32>
    %26 = arith.subf %5, %25 : vector<1x32xf32>
    %27 = vector.broadcast %24 : vector<1x32xf32> to vector<512x32xf32>
    %28 = arith.mulf %9, %27 : vector<512x32xf32>
    %29 = vector.broadcast %26 : vector<1x32xf32> to vector<512x32xf32>
    %30 = arith.addf %28, %29 : vector<512x32xf32>
    %31 = vector.shape_cast %30 : vector<512x32xf32> to vector<2x8x2x16x32xf32>
    %32 = vector.extract_strided_slice %31 {offsets = [0, 0, 0, 0, 0], sizes = [2, 8, 1, 16, 32], strides = [1, 1, 1, 1, 1]} : vector<2x8x2x16x32xf32> to vector<2x8x1x16x32xf32>
    %33 = vector.shape_cast %32 : vector<2x8x1x16x32xf32> to vector<2x8x16x32xf32>
    %34 = vector.extract_strided_slice %31 {offsets = [0, 0, 1, 0, 0], sizes = [2, 8, 1, 16, 32], strides = [1, 1, 1, 1, 1]} : vector<2x8x2x16x32xf32> to vector<2x8x1x16x32xf32>
    %35 = vector.shape_cast %34 : vector<2x8x1x16x32xf32> to vector<2x8x16x32xf32>
    %36 = arith.maximumf %33, %35 : vector<2x8x16x32xf32>
    %c0_15 = arith.constant 0 : index
    %c0_16 = arith.constant 0 : index
    %c0_17 = arith.constant 0 : index
    %c0_18 = arith.constant 0 : index
    %37 = vector.load %arg13[%c0_15, %c0_16, %c0_17, %c0_18] : memref<2x8x16x32xf32, #tpu.memory_space<vmem>>, vector<2x8x16x32xf32>
    tpu.vector_store %arg13[%c0_15, %c0_16, %c0_17, %c0_18], %36 {strides = array<i32>} : memref<2x8x16x32xf32, #tpu.memory_space<vmem>>, vector<2x8x16x32xf32>,
    %cst_19 = arith.constant 0.000000e+00 : f32
    %38 = vector.broadcast %cst_19 : f32 to vector<2x12x12x32xf32>
    %c0_20 = arith.constant 0 : index
    %c0_21 = arith.constant 0 : index
    %c0_22 = arith.constant 0 : index
    %c0_23 = arith.constant 0 : index
    %39 = vector.load %arg14[%c0_20, %c0_21, %c0_22, %c0_23] : memref<2x12x12x32xf32, #tpu.memory_space<vmem>>, vector<2x12x12x32xf32>
    tpu.vector_store %arg14[%c0_20, %c0_21, %c0_22, %c0_23], %38 {strides = array<i32>} : memref<2x12x12x32xf32, #tpu.memory_space<vmem>>, vector<2x12x12x32xf32>,
    %c0_24 = arith.constant 0 : index
    %c0_25 = arith.constant 0 : index
    %c0_26 = arith.constant 0 : index
    %c0_27 = arith.constant 0 : index
    %40 = vector.load %arg13[%c0_24, %c0_25, %c0_26, %c0_27] : memref<2x8x16x32xf32, #tpu.memory_space<vmem>>, vector<2x8x1x32xf32>
    %41 = vector.shape_cast %40 : vector<2x8x1x32xf32> to vector<2x8x32xf32>
    %c0_28 = arith.constant 0 : index
    %c0_29 = arith.constant 0 : index
    %c1 = arith.constant 1 : index
    %c0_30 = arith.constant 0 : index
    %42 = vector.load %arg13[%c0_28, %c0_29, %c1, %c0_30] : memref<2x8x16x32xf32, #tpu.memory_space<vmem>>, vector<2x8x1x32xf32>
    %43 = vector.shape_cast %42 : vector<2x8x1x32xf32> to vector<2x8x32xf32>
    %44 = arith.maximumf %41, %43 : vector<2x8x32xf32>
    %c0_31 = arith.constant 0 : index
    %c2 = arith.constant 2 : index
    %c2_32 = arith.constant 2 : index
    %c0_33 = arith.constant 0 : index
    %45 = vector.load %arg14[%c0_31, %c2, %c2_32, %c0_33] : memref<2x12x12x32xf32, #tpu.memory_space<vmem>>, vector<2x8x1x32xf32>
    %46 = vector.shape_cast %45 : vector<2x8x1x32xf32> to vector<2x8x32xf32>
    %47 = vector.shape_cast %44 : vector<2x8x32xf32> to vector<2x8x1x32xf32>
    tpu.vector_store %arg14[%c0_31, %c2, %c2_32, %c0_33], %47 {strides = array<i32>} : memref<2x12x12x32xf32, #tpu.memory_space<vmem>>, vector<2x8x1x32xf32>,
    %c0_34 = arith.constant 0 : index
    %c0_35 = arith.constant 0 : index
    %c2_36 = arith.constant 2 : index
    %c0_37 = arith.constant 0 : index
    %48 = vector.load %arg13[%c0_34, %c0_35, %c2_36, %c0_37] : memref<2x8x16x32xf32, #tpu.memory_space<vmem>>, vector<2x8x1x32xf32>
    %49 = vector.shape_cast %48 : vector<2x8x1x32xf32> to vector<2x8x32xf32>
    %c0_38 = arith.constant 0 : index
    %c0_39 = arith.constant 0 : index
    %c3 = arith.constant 3 : index
    %c0_40 = arith.constant 0 : index
    %50 = vector.load %arg13[%c0_38, %c0_39, %c3, %c0_40] : memref<2x8x16x32xf32, #tpu.memory_space<vmem>>, vector<2x8x1x32xf32>
    %51 = vector.shape_cast %50 : vector<2x8x1x32xf32> to vector<2x8x32xf32>
    %52 = arith.maximumf %49, %51 : vector<2x8x32xf32>
    %c0_41 = arith.constant 0 : index
    %c2_42 = arith.constant 2 : index
    %c3_43 = arith.constant 3 : index
    %c0_44 = arith.constant 0 : index
    %53 = vector.load %arg14[%c0_41, %c2_42, %c3_43, %c0_44] : memref<2x12x12x32xf32, #tpu.memory_space<vmem>>, vector<2x8x1x32xf32>
    %54 = vector.shape_cast %53 : vector<2x8x1x32xf32> to vector<2x8x32xf32>
    %55 = vector.shape_cast %52 : vector<2x8x32xf32> to vector<2x8x1x32xf32>
    tpu.vector_store %arg14[%c0_41, %c2_42, %c3_43, %c0_44], %55 {strides = array<i32>} : memref<2x12x12x32xf32, #tpu.memory_space<vmem>>, vector<2x8x1x32xf32>,
    %c0_45 = arith.constant 0 : index
    %c0_46 = arith.constant 0 : index
    %c4 = arith.constant 4 : index
    %c0_47 = arith.constant 0 : index
    %56 = vector.load %arg13[%c0_45, %c0_46, %c4, %c0_47] : memref<2x8x16x32xf32, #tpu.memory_space<vmem>>, vector<2x8x1x32xf32>
    %57 = vector.shape_cast %56 : vector<2x8x1x32xf32> to vector<2x8x32xf32>
    %c0_48 = arith.constant 0 : index
    %c0_49 = arith.constant 0 : index
    %c5 = arith.constant 5 : index
    %c0_50 = arith.constant 0 : index
    %58 = vector.load %arg13[%c0_48, %c0_49, %c5, %c0_50] : memref<2x8x16x32xf32, #tpu.memory_space<vmem>>, vector<2x8x1x32xf32>
    %59 = vector.shape_cast %58 : vector<2x8x1x32xf32> to vector<2x8x32xf32>
    %60 = arith.maximumf %57, %59 : vector<2x8x32xf32>
    %c0_51 = arith.constant 0 : index
    %c2_52 = arith.constant 2 : index
    %c4_53 = arith.constant 4 : index
    %c0_54 = arith.constant 0 : index
    %61 = vector.load %arg14[%c0_51, %c2_52, %c4_53, %c0_54] : memref<2x12x12x32xf32, #tpu.memory_space<vmem>>, vector<2x8x1x32xf32>
    %62 = vector.shape_cast %61 : vector<2x8x1x32xf32> to vector<2x8x32xf32>
    %63 = vector.shape_cast %60 : vector<2x8x32xf32> to vector<2x8x1x32xf32>
    tpu.vector_store %arg14[%c0_51, %c2_52, %c4_53, %c0_54], %63 {strides = array<i32>} : memref<2x12x12x32xf32, #tpu.memory_space<vmem>>, vector<2x8x1x32xf32>,
    %c0_55 = arith.constant 0 : index
    %c0_56 = arith.constant 0 : index
    %c6 = arith.constant 6 : index
    %c0_57 = arith.constant 0 : index
    %64 = vector.load %arg13[%c0_55, %c0_56, %c6, %c0_57] : memref<2x8x16x32xf32, #tpu.memory_space<vmem>>, vector<2x8x1x32xf32>
    %65 = vector.shape_cast %64 : vector<2x8x1x32xf32> to vector<2x8x32xf32>
    %c0_58 = arith.constant 0 : index
    %c0_59 = arith.constant 0 : index
    %c7 = arith.constant 7 : index
    %c0_60 = arith.constant 0 : index
    %66 = vector.load %arg13[%c0_58, %c0_59, %c7, %c0_60] : memref<2x8x16x32xf32, #tpu.memory_space<vmem>>, vector<2x8x1x32xf32>
    %67 = vector.shape_cast %66 : vector<2x8x1x32xf32> to vector<2x8x32xf32>
    %68 = arith.maximumf %65, %67 : vector<2x8x32xf32>
    %c0_61 = arith.constant 0 : index
    %c2_62 = arith.constant 2 : index
    %c5_63 = arith.constant 5 : index
    %c0_64 = arith.constant 0 : index
    %69 = vector.load %arg14[%c0_61, %c2_62, %c5_63, %c0_64] : memref<2x12x12x32xf32, #tpu.memory_space<vmem>>, vector<2x8x1x32xf32>
    %70 = vector.shape_cast %69 : vector<2x8x1x32xf32> to vector<2x8x32xf32>
    %71 = vector.shape_cast %68 : vector<2x8x32xf32> to vector<2x8x1x32xf32>
    tpu.vector_store %arg14[%c0_61, %c2_62, %c5_63, %c0_64], %71 {strides = array<i32>} : memref<2x12x12x32xf32, #tpu.memory_space<vmem>>, vector<2x8x1x32xf32>,
    %c0_65 = arith.constant 0 : index
    %c0_66 = arith.constant 0 : index
    %c8 = arith.constant 8 : index
    %c0_67 = arith.constant 0 : index
    %72 = vector.load %arg13[%c0_65, %c0_66, %c8, %c0_67] : memref<2x8x16x32xf32, #tpu.memory_space<vmem>>, vector<2x8x1x32xf32>
    %73 = vector.shape_cast %72 : vector<2x8x1x32xf32> to vector<2x8x32xf32>
    %c0_68 = arith.constant 0 : index
    %c0_69 = arith.constant 0 : index
    %c9 = arith.constant 9 : index
    %c0_70 = arith.constant 0 : index
    %74 = vector.load %arg13[%c0_68, %c0_69, %c9, %c0_70] : memref<2x8x16x32xf32, #tpu.memory_space<vmem>>, vector<2x8x1x32xf32>
    %75 = vector.shape_cast %74 : vector<2x8x1x32xf32> to vector<2x8x32xf32>
    %76 = arith.maximumf %73, %75 : vector<2x8x32xf32>
    %c0_71 = arith.constant 0 : index
    %c2_72 = arith.constant 2 : index
    %c6_73 = arith.constant 6 : index
    %c0_74 = arith.constant 0 : index
    %77 = vector.load %arg14[%c0_71, %c2_72, %c6_73, %c0_74] : memref<2x12x12x32xf32, #tpu.memory_space<vmem>>, vector<2x8x1x32xf32>
    %78 = vector.shape_cast %77 : vector<2x8x1x32xf32> to vector<2x8x32xf32>
    %79 = vector.shape_cast %76 : vector<2x8x32xf32> to vector<2x8x1x32xf32>
    tpu.vector_store %arg14[%c0_71, %c2_72, %c6_73, %c0_74], %79 {strides = array<i32>} : memref<2x12x12x32xf32, #tpu.memory_space<vmem>>, vector<2x8x1x32xf32>,
    %c0_75 = arith.constant 0 : index
    %c0_76 = arith.constant 0 : index
    %c10 = arith.constant 10 : index
    %c0_77 = arith.constant 0 : index
    %80 = vector.load %arg13[%c0_75, %c0_76, %c10, %c0_77] : memref<2x8x16x32xf32, #tpu.memory_space<vmem>>, vector<2x8x1x32xf32>
    %81 = vector.shape_cast %80 : vector<2x8x1x32xf32> to vector<2x8x32xf32>
    %c0_78 = arith.constant 0 : index
    %c0_79 = arith.constant 0 : index
    %c11 = arith.constant 11 : index
    %c0_80 = arith.constant 0 : index
    %82 = vector.load %arg13[%c0_78, %c0_79, %c11, %c0_80] : memref<2x8x16x32xf32, #tpu.memory_space<vmem>>, vector<2x8x1x32xf32>
    %83 = vector.shape_cast %82 : vector<2x8x1x32xf32> to vector<2x8x32xf32>
    %84 = arith.maximumf %81, %83 : vector<2x8x32xf32>
    %c0_81 = arith.constant 0 : index
    %c2_82 = arith.constant 2 : index
    %c7_83 = arith.constant 7 : index
    %c0_84 = arith.constant 0 : index
    %85 = vector.load %arg14[%c0_81, %c2_82, %c7_83, %c0_84] : memref<2x12x12x32xf32, #tpu.memory_space<vmem>>, vector<2x8x1x32xf32>
    %86 = vector.shape_cast %85 : vector<2x8x1x32xf32> to vector<2x8x32xf32>
    %87 = vector.shape_cast %84 : vector<2x8x32xf32> to vector<2x8x1x32xf32>
    tpu.vector_store %arg14[%c0_81, %c2_82, %c7_83, %c0_84], %87 {strides = array<i32>} : memref<2x12x12x32xf32, #tpu.memory_space<vmem>>, vector<2x8x1x32xf32>,
    %c0_85 = arith.constant 0 : index
    %c0_86 = arith.constant 0 : index
    %c12 = arith.constant 12 : index
    %c0_87 = arith.constant 0 : index
    %88 = vector.load %arg13[%c0_85, %c0_86, %c12, %c0_87] : memref<2x8x16x32xf32, #tpu.memory_space<vmem>>, vector<2x8x1x32xf32>
    %89 = vector.shape_cast %88 : vector<2x8x1x32xf32> to vector<2x8x32xf32>
    %c0_88 = arith.constant 0 : index
    %c0_89 = arith.constant 0 : index
    %c13 = arith.constant 13 : index
    %c0_90 = arith.constant 0 : index
    %90 = vector.load %arg13[%c0_88, %c0_89, %c13, %c0_90] : memref<2x8x16x32xf32, #tpu.memory_space<vmem>>, vector<2x8x1x32xf32>
    %91 = vector.shape_cast %90 : vector<2x8x1x32xf32> to vector<2x8x32xf32>
    %92 = arith.maximumf %89, %91 : vector<2x8x32xf32>
    %c0_91 = arith.constant 0 : index
    %c2_92 = arith.constant 2 : index
    %c8_93 = arith.constant 8 : index
    %c0_94 = arith.constant 0 : index
    %93 = vector.load %arg14[%c0_91, %c2_92, %c8_93, %c0_94] : memref<2x12x12x32xf32, #tpu.memory_space<vmem>>, vector<2x8x1x32xf32>
    %94 = vector.shape_cast %93 : vector<2x8x1x32xf32> to vector<2x8x32xf32>
    %95 = vector.shape_cast %92 : vector<2x8x32xf32> to vector<2x8x1x32xf32>
    tpu.vector_store %arg14[%c0_91, %c2_92, %c8_93, %c0_94], %95 {strides = array<i32>} : memref<2x12x12x32xf32, #tpu.memory_space<vmem>>, vector<2x8x1x32xf32>,
    %c0_95 = arith.constant 0 : index
    %c0_96 = arith.constant 0 : index
    %c14 = arith.constant 14 : index
    %c0_97 = arith.constant 0 : index
    %96 = vector.load %arg13[%c0_95, %c0_96, %c14, %c0_97] : memref<2x8x16x32xf32, #tpu.memory_space<vmem>>, vector<2x8x1x32xf32>
    %97 = vector.shape_cast %96 : vector<2x8x1x32xf32> to vector<2x8x32xf32>
    %c0_98 = arith.constant 0 : index
    %c0_99 = arith.constant 0 : index
    %c15 = arith.constant 15 : index
    %c0_100 = arith.constant 0 : index
    %98 = vector.load %arg13[%c0_98, %c0_99, %c15, %c0_100] : memref<2x8x16x32xf32, #tpu.memory_space<vmem>>, vector<2x8x1x32xf32>
    %99 = vector.shape_cast %98 : vector<2x8x1x32xf32> to vector<2x8x32xf32>
    %100 = arith.maximumf %97, %99 : vector<2x8x32xf32>
    %c0_101 = arith.constant 0 : index
    %c2_102 = arith.constant 2 : index
    %c9_103 = arith.constant 9 : index
    %c0_104 = arith.constant 0 : index
    %101 = vector.load %arg14[%c0_101, %c2_102, %c9_103, %c0_104] : memref<2x12x12x32xf32, #tpu.memory_space<vmem>>, vector<2x8x1x32xf32>
    %102 = vector.shape_cast %101 : vector<2x8x1x32xf32> to vector<2x8x32xf32>
    %103 = vector.shape_cast %100 : vector<2x8x32xf32> to vector<2x8x1x32xf32>
    tpu.vector_store %arg14[%c0_101, %c2_102, %c9_103, %c0_104], %103 {strides = array<i32>} : memref<2x12x12x32xf32, #tpu.memory_space<vmem>>, vector<2x8x1x32xf32>,
    %cst_105 = arith.constant 0.000000e+00 : f32
    %104 = vector.broadcast %cst_105 : f32 to vector<128x32xf32>
    %c0_106 = arith.constant 0 : index
    %c0_107 = arith.constant 0 : index
    %c0_108 = arith.constant 0 : index
    %c0_109 = arith.constant 0 : index
    %105 = vector.load %arg14[%c0_106, %c0_107, %c0_108, %c0_109] : memref<2x12x12x32xf32, #tpu.memory_space<vmem>>, vector<2x8x8x32xf32>
    %106 = vector.shape_cast %105 : vector<2x8x8x32xf32> to vector<128x32xf32>
    %107 = arith.truncf %106 : vector<128x32xf32> to vector<128x32xbf16>
    %c0_110 = arith.constant 0 : index
    %c0_111 = arith.constant 0 : index
    %c0_112 = arith.constant 0 : index
    %108 = vector.load %arg6[%c0_110, %c0_111, %c0_112] : memref<25x32x32xbf16, #tpu.memory_space<vmem>>, vector<1x32x32xbf16>
    %109 = vector.shape_cast %108 : vector<1x32x32xbf16> to vector<32x32xbf16>
    %cst_113 = arith.constant dense<0.000000e+00> : vector<128x32xf32>
    %110 = tpu.matmul %107, %109, %cst_113 {dimension_numbers = #tpu.dot_dimension_numbers<[1], [0], [0], [1], [0, 0, 1, 1], [], []>} : vector<128x32xbf16>, vector<32x32xbf16>, vector<128x32xf32> -> vector<128x32xf32>
    %111 = arith.addf %104, %110 : vector<128x32xf32>
    %c0_114 = arith.constant 0 : index
    %c0_115 = arith.constant 0 : index
    %c1_116 = arith.constant 1 : index
    %c0_117 = arith.constant 0 : index
    %112 = vector.load %arg14[%c0_114, %c0_115, %c1_116, %c0_117] : memref<2x12x12x32xf32, #tpu.memory_space<vmem>>, vector<2x8x8x32xf32>
    %113 = vector.shape_cast %112 : vector<2x8x8x32xf32> to vector<128x32xf32>
    %114 = arith.truncf %113 : vector<128x32xf32> to vector<128x32xbf16>
    %c1_118 = arith.constant 1 : index
    %c0_119 = arith.constant 0 : index
    %c0_120 = arith.constant 0 : index
    %115 = vector.load %arg6[%c1_118, %c0_119, %c0_120] : memref<25x32x32xbf16, #tpu.memory_space<vmem>>, vector<1x32x32xbf16>
    %116 = vector.shape_cast %115 : vector<1x32x32xbf16> to vector<32x32xbf16>
    %cst_121 = arith.constant dense<0.000000e+00> : vector<128x32xf32>
    %117 = tpu.matmul %114, %116, %cst_121 {dimension_numbers = #tpu.dot_dimension_numbers<[1], [0], [0], [1], [0, 0, 1, 1], [], []>} : vector<128x32xbf16>, vector<32x32xbf16>, vector<128x32xf32> -> vector<128x32xf32>
    %118 = arith.addf %111, %117 : vector<128x32xf32>
    %c0_122 = arith.constant 0 : index
    %c0_123 = arith.constant 0 : index
    %c2_124 = arith.constant 2 : index
    %c0_125 = arith.constant 0 : index
    %119 = vector.load %arg14[%c0_122, %c0_123, %c2_124, %c0_125] : memref<2x12x12x32xf32, #tpu.memory_space<vmem>>, vector<2x8x8x32xf32>
    %120 = vector.shape_cast %119 : vector<2x8x8x32xf32> to vector<128x32xf32>
    %121 = arith.truncf %120 : vector<128x32xf32> to vector<128x32xbf16>
    %c2_126 = arith.constant 2 : index
    %c0_127 = arith.constant 0 : index
    %c0_128 = arith.constant 0 : index
    %122 = vector.load %arg6[%c2_126, %c0_127, %c0_128] : memref<25x32x32xbf16, #tpu.memory_space<vmem>>, vector<1x32x32xbf16>
    %123 = vector.shape_cast %122 : vector<1x32x32xbf16> to vector<32x32xbf16>
    %cst_129 = arith.constant dense<0.000000e+00> : vector<128x32xf32>
    %124 = tpu.matmul %121, %123, %cst_129 {dimension_numbers = #tpu.dot_dimension_numbers<[1], [0], [0], [1], [0, 0, 1, 1], [], []>} : vector<128x32xbf16>, vector<32x32xbf16>, vector<128x32xf32> -> vector<128x32xf32>
    %125 = arith.addf %118, %124 : vector<128x32xf32>
    %c0_130 = arith.constant 0 : index
    %c0_131 = arith.constant 0 : index
    %c3_132 = arith.constant 3 : index
    %c0_133 = arith.constant 0 : index
    %126 = vector.load %arg14[%c0_130, %c0_131, %c3_132, %c0_133] : memref<2x12x12x32xf32, #tpu.memory_space<vmem>>, vector<2x8x8x32xf32>
    %127 = vector.shape_cast %126 : vector<2x8x8x32xf32> to vector<128x32xf32>
    %128 = arith.truncf %127 : vector<128x32xf32> to vector<128x32xbf16>
    %c3_134 = arith.constant 3 : index
    %c0_135 = arith.constant 0 : index
    %c0_136 = arith.constant 0 : index
    %129 = vector.load %arg6[%c3_134, %c0_135, %c0_136] : memref<25x32x32xbf16, #tpu.memory_space<vmem>>, vector<1x32x32xbf16>
    %130 = vector.shape_cast %129 : vector<1x32x32xbf16> to vector<32x32xbf16>
    %cst_137 = arith.constant dense<0.000000e+00> : vector<128x32xf32>
    %131 = tpu.matmul %128, %130, %cst_137 {dimension_numbers = #tpu.dot_dimension_numbers<[1], [0], [0], [1], [0, 0, 1, 1], [], []>} : vector<128x32xbf16>, vector<32x32xbf16>, vector<128x32xf32> -> vector<128x32xf32>
    %132 = arith.addf %125, %131 : vector<128x32xf32>
    %c0_138 = arith.constant 0 : index
    %c0_139 = arith.constant 0 : index
    %c4_140 = arith.constant 4 : index
    %c0_141 = arith.constant 0 : index
    %133 = vector.load %arg14[%c0_138, %c0_139, %c4_140, %c0_141] : memref<2x12x12x32xf32, #tpu.memory_space<vmem>>, vector<2x8x8x32xf32>
    %134 = vector.shape_cast %133 : vector<2x8x8x32xf32> to vector<128x32xf32>
    %135 = arith.truncf %134 : vector<128x32xf32> to vector<128x32xbf16>
    %c4_142 = arith.constant 4 : index
    %c0_143 = arith.constant 0 : index
    %c0_144 = arith.constant 0 : index
    %136 = vector.load %arg6[%c4_142, %c0_143, %c0_144] : memref<25x32x32xbf16, #tpu.memory_space<vmem>>, vector<1x32x32xbf16>
    %137 = vector.shape_cast %136 : vector<1x32x32xbf16> to vector<32x32xbf16>
    %cst_145 = arith.constant dense<0.000000e+00> : vector<128x32xf32>
    %138 = tpu.matmul %135, %137, %cst_145 {dimension_numbers = #tpu.dot_dimension_numbers<[1], [0], [0], [1], [0, 0, 1, 1], [], []>} : vector<128x32xbf16>, vector<32x32xbf16>, vector<128x32xf32> -> vector<128x32xf32>
    %139 = arith.addf %132, %138 : vector<128x32xf32>
    %c0_146 = arith.constant 0 : index
    %c1_147 = arith.constant 1 : index
    %c0_148 = arith.constant 0 : index
    %c0_149 = arith.constant 0 : index
    %140 = vector.load %arg14[%c0_146, %c1_147, %c0_148, %c0_149] : memref<2x12x12x32xf32, #tpu.memory_space<vmem>>, vector<2x8x8x32xf32>
    %141 = vector.shape_cast %140 : vector<2x8x8x32xf32> to vector<128x32xf32>
    %142 = arith.truncf %141 : vector<128x32xf32> to vector<128x32xbf16>
    %c5_150 = arith.constant 5 : index
    %c0_151 = arith.constant 0 : index
    %c0_152 = arith.constant 0 : index
    %143 = vector.load %arg6[%c5_150, %c0_151, %c0_152] : memref<25x32x32xbf16, #tpu.memory_space<vmem>>, vector<1x32x32xbf16>
    %144 = vector.shape_cast %143 : vector<1x32x32xbf16> to vector<32x32xbf16>
    %cst_153 = arith.constant dense<0.000000e+00> : vector<128x32xf32>
    %145 = tpu.matmul %142, %144, %cst_153 {dimension_numbers = #tpu.dot_dimension_numbers<[1], [0], [0], [1], [0, 0, 1, 1], [], []>} : vector<128x32xbf16>, vector<32x32xbf16>, vector<128x32xf32> -> vector<128x32xf32>
    %146 = arith.addf %139, %145 : vector<128x32xf32>
    %c0_154 = arith.constant 0 : index
    %c1_155 = arith.constant 1 : index
    %c1_156 = arith.constant 1 : index
    %c0_157 = arith.constant 0 : index
    %147 = vector.load %arg14[%c0_154, %c1_155, %c1_156, %c0_157] : memref<2x12x12x32xf32, #tpu.memory_space<vmem>>, vector<2x8x8x32xf32>
    %148 = vector.shape_cast %147 : vector<2x8x8x32xf32> to vector<128x32xf32>
    %149 = arith.truncf %148 : vector<128x32xf32> to vector<128x32xbf16>
    %c6_158 = arith.constant 6 : index
    %c0_159 = arith.constant 0 : index
    %c0_160 = arith.constant 0 : index
    %150 = vector.load %arg6[%c6_158, %c0_159, %c0_160] : memref<25x32x32xbf16, #tpu.memory_space<vmem>>, vector<1x32x32xbf16>
    %151 = vector.shape_cast %150 : vector<1x32x32xbf16> to vector<32x32xbf16>
    %cst_161 = arith.constant dense<0.000000e+00> : vector<128x32xf32>
    %152 = tpu.matmul %149, %151, %cst_161 {dimension_numbers = #tpu.dot_dimension_numbers<[1], [0], [0], [1], [0, 0, 1, 1], [], []>} : vector<128x32xbf16>, vector<32x32xbf16>, vector<128x32xf32> -> vector<128x32xf32>
    %153 = arith.addf %146, %152 : vector<128x32xf32>
    %c0_162 = arith.constant 0 : index
    %c1_163 = arith.constant 1 : index
    %c2_164 = arith.constant 2 : index
    %c0_165 = arith.constant 0 : index
    %154 = vector.load %arg14[%c0_162, %c1_163, %c2_164, %c0_165] : memref<2x12x12x32xf32, #tpu.memory_space<vmem>>, vector<2x8x8x32xf32>
    %155 = vector.shape_cast %154 : vector<2x8x8x32xf32> to vector<128x32xf32>
    %156 = arith.truncf %155 : vector<128x32xf32> to vector<128x32xbf16>
    %c7_166 = arith.constant 7 : index
    %c0_167 = arith.constant 0 : index
    %c0_168 = arith.constant 0 : index
    %157 = vector.load %arg6[%c7_166, %c0_167, %c0_168] : memref<25x32x32xbf16, #tpu.memory_space<vmem>>, vector<1x32x32xbf16>
    %158 = vector.shape_cast %157 : vector<1x32x32xbf16> to vector<32x32xbf16>
    %cst_169 = arith.constant dense<0.000000e+00> : vector<128x32xf32>
    %159 = tpu.matmul %156, %158, %cst_169 {dimension_numbers = #tpu.dot_dimension_numbers<[1], [0], [0], [1], [0, 0, 1, 1], [], []>} : vector<128x32xbf16>, vector<32x32xbf16>, vector<128x32xf32> -> vector<128x32xf32>
    %160 = arith.addf %153, %159 : vector<128x32xf32>
    %c0_170 = arith.constant 0 : index
    %c1_171 = arith.constant 1 : index
    %c3_172 = arith.constant 3 : index
    %c0_173 = arith.constant 0 : index
    %161 = vector.load %arg14[%c0_170, %c1_171, %c3_172, %c0_173] : memref<2x12x12x32xf32, #tpu.memory_space<vmem>>, vector<2x8x8x32xf32>
    %162 = vector.shape_cast %161 : vector<2x8x8x32xf32> to vector<128x32xf32>
    %163 = arith.truncf %162 : vector<128x32xf32> to vector<128x32xbf16>
    %c8_174 = arith.constant 8 : index
    %c0_175 = arith.constant 0 : index
    %c0_176 = arith.constant 0 : index
    %164 = vector.load %arg6[%c8_174, %c0_175, %c0_176] : memref<25x32x32xbf16, #tpu.memory_space<vmem>>, vector<1x32x32xbf16>
    %165 = vector.shape_cast %164 : vector<1x32x32xbf16> to vector<32x32xbf16>
    %cst_177 = arith.constant dense<0.000000e+00> : vector<128x32xf32>
    %166 = tpu.matmul %163, %165, %cst_177 {dimension_numbers = #tpu.dot_dimension_numbers<[1], [0], [0], [1], [0, 0, 1, 1], [], []>} : vector<128x32xbf16>, vector<32x32xbf16>, vector<128x32xf32> -> vector<128x32xf32>
    %167 = arith.addf %160, %166 : vector<128x32xf32>
    %c0_178 = arith.constant 0 : index
    %c1_179 = arith.constant 1 : index
    %c4_180 = arith.constant 4 : index
    %c0_181 = arith.constant 0 : index
    %168 = vector.load %arg14[%c0_178, %c1_179, %c4_180, %c0_181] : memref<2x12x12x32xf32, #tpu.memory_space<vmem>>, vector<2x8x8x32xf32>
    %169 = vector.shape_cast %168 : vector<2x8x8x32xf32> to vector<128x32xf32>
    %170 = arith.truncf %169 : vector<128x32xf32> to vector<128x32xbf16>
    %c9_182 = arith.constant 9 : index
    %c0_183 = arith.constant 0 : index
    %c0_184 = arith.constant 0 : index
    %171 = vector.load %arg6[%c9_182, %c0_183, %c0_184] : memref<25x32x32xbf16, #tpu.memory_space<vmem>>, vector<1x32x32xbf16>
    %172 = vector.shape_cast %171 : vector<1x32x32xbf16> to vector<32x32xbf16>
    %cst_185 = arith.constant dense<0.000000e+00> : vector<128x32xf32>
    %173 = tpu.matmul %170, %172, %cst_185 {dimension_numbers = #tpu.dot_dimension_numbers<[1], [0], [0], [1], [0, 0, 1, 1], [], []>} : vector<128x32xbf16>, vector<32x32xbf16>, vector<128x32xf32> -> vector<128x32xf32>
    %174 = arith.addf %167, %173 : vector<128x32xf32>
    %c0_186 = arith.constant 0 : index
    %c2_187 = arith.constant 2 : index
    %c0_188 = arith.constant 0 : index
    %c0_189 = arith.constant 0 : index
    %175 = vector.load %arg14[%c0_186, %c2_187, %c0_188, %c0_189] : memref<2x12x12x32xf32, #tpu.memory_space<vmem>>, vector<2x8x8x32xf32>
    %176 = vector.shape_cast %175 : vector<2x8x8x32xf32> to vector<128x32xf32>
    %177 = arith.truncf %176 : vector<128x32xf32> to vector<128x32xbf16>
    %c10_190 = arith.constant 10 : index
    %c0_191 = arith.constant 0 : index
    %c0_192 = arith.constant 0 : index
    %178 = vector.load %arg6[%c10_190, %c0_191, %c0_192] : memref<25x32x32xbf16, #tpu.memory_space<vmem>>, vector<1x32x32xbf16>
    %179 = vector.shape_cast %178 : vector<1x32x32xbf16> to vector<32x32xbf16>
    %cst_193 = arith.constant dense<0.000000e+00> : vector<128x32xf32>
    %180 = tpu.matmul %177, %179, %cst_193 {dimension_numbers = #tpu.dot_dimension_numbers<[1], [0], [0], [1], [0, 0, 1, 1], [], []>} : vector<128x32xbf16>, vector<32x32xbf16>, vector<128x32xf32> -> vector<128x32xf32>
    %181 = arith.addf %174, %180 : vector<128x32xf32>
    %c0_194 = arith.constant 0 : index
    %c2_195 = arith.constant 2 : index
    %c1_196 = arith.constant 1 : index
    %c0_197 = arith.constant 0 : index
    %182 = vector.load %arg14[%c0_194, %c2_195, %c1_196, %c0_197] : memref<2x12x12x32xf32, #tpu.memory_space<vmem>>, vector<2x8x8x32xf32>
    %183 = vector.shape_cast %182 : vector<2x8x8x32xf32> to vector<128x32xf32>
    %184 = arith.truncf %183 : vector<128x32xf32> to vector<128x32xbf16>
    %c11_198 = arith.constant 11 : index
    %c0_199 = arith.constant 0 : index
    %c0_200 = arith.constant 0 : index
    %185 = vector.load %arg6[%c11_198, %c0_199, %c0_200] : memref<25x32x32xbf16, #tpu.memory_space<vmem>>, vector<1x32x32xbf16>
    %186 = vector.shape_cast %185 : vector<1x32x32xbf16> to vector<32x32xbf16>
    %cst_201 = arith.constant dense<0.000000e+00> : vector<128x32xf32>
    %187 = tpu.matmul %184, %186, %cst_201 {dimension_numbers = #tpu.dot_dimension_numbers<[1], [0], [0], [1], [0, 0, 1, 1], [], []>} : vector<128x32xbf16>, vector<32x32xbf16>, vector<128x32xf32> -> vector<128x32xf32>
    %188 = arith.addf %181, %187 : vector<128x32xf32>
    %c0_202 = arith.constant 0 : index
    %c2_203 = arith.constant 2 : index
    %c2_204 = arith.constant 2 : index
    %c0_205 = arith.constant 0 : index
    %189 = vector.load %arg14[%c0_202, %c2_203, %c2_204, %c0_205] : memref<2x12x12x32xf32, #tpu.memory_space<vmem>>, vector<2x8x8x32xf32>
    %190 = vector.shape_cast %189 : vector<2x8x8x32xf32> to vector<128x32xf32>
    %191 = arith.truncf %190 : vector<128x32xf32> to vector<128x32xbf16>
    %c12_206 = arith.constant 12 : index
    %c0_207 = arith.constant 0 : index
    %c0_208 = arith.constant 0 : index
    %192 = vector.load %arg6[%c12_206, %c0_207, %c0_208] : memref<25x32x32xbf16, #tpu.memory_space<vmem>>, vector<1x32x32xbf16>
    %193 = vector.shape_cast %192 : vector<1x32x32xbf16> to vector<32x32xbf16>
    %cst_209 = arith.constant dense<0.000000e+00> : vector<128x32xf32>
    %194 = tpu.matmul %191, %193, %cst_209 {dimension_numbers = #tpu.dot_dimension_numbers<[1], [0], [0], [1], [0, 0, 1, 1], [], []>} : vector<128x32xbf16>, vector<32x32xbf16>, vector<128x32xf32> -> vector<128x32xf32>
    %195 = arith.addf %188, %194 : vector<128x32xf32>
    %c0_210 = arith.constant 0 : index
    %c2_211 = arith.constant 2 : index
    %c3_212 = arith.constant 3 : index
    %c0_213 = arith.constant 0 : index
    %196 = vector.load %arg14[%c0_210, %c2_211, %c3_212, %c0_213] : memref<2x12x12x32xf32, #tpu.memory_space<vmem>>, vector<2x8x8x32xf32>
    %197 = vector.shape_cast %196 : vector<2x8x8x32xf32> to vector<128x32xf32>
    %198 = arith.truncf %197 : vector<128x32xf32> to vector<128x32xbf16>
    %c13_214 = arith.constant 13 : index
    %c0_215 = arith.constant 0 : index
    %c0_216 = arith.constant 0 : index
    %199 = vector.load %arg6[%c13_214, %c0_215, %c0_216] : memref<25x32x32xbf16, #tpu.memory_space<vmem>>, vector<1x32x32xbf16>
    %200 = vector.shape_cast %199 : vector<1x32x32xbf16> to vector<32x32xbf16>
    %cst_217 = arith.constant dense<0.000000e+00> : vector<128x32xf32>
    %201 = tpu.matmul %198, %200, %cst_217 {dimension_numbers = #tpu.dot_dimension_numbers<[1], [0], [0], [1], [0, 0, 1, 1], [], []>} : vector<128x32xbf16>, vector<32x32xbf16>, vector<128x32xf32> -> vector<128x32xf32>
    %202 = arith.addf %195, %201 : vector<128x32xf32>
    %c0_218 = arith.constant 0 : index
    %c2_219 = arith.constant 2 : index
    %c4_220 = arith.constant 4 : index
    %c0_221 = arith.constant 0 : index
    %203 = vector.load %arg14[%c0_218, %c2_219, %c4_220, %c0_221] : memref<2x12x12x32xf32, #tpu.memory_space<vmem>>, vector<2x8x8x32xf32>
    %204 = vector.shape_cast %203 : vector<2x8x8x32xf32> to vector<128x32xf32>
    %205 = arith.truncf %204 : vector<128x32xf32> to vector<128x32xbf16>
    %c14_222 = arith.constant 14 : index
    %c0_223 = arith.constant 0 : index
    %c0_224 = arith.constant 0 : index
    %206 = vector.load %arg6[%c14_222, %c0_223, %c0_224] : memref<25x32x32xbf16, #tpu.memory_space<vmem>>, vector<1x32x32xbf16>
    %207 = vector.shape_cast %206 : vector<1x32x32xbf16> to vector<32x32xbf16>
    %cst_225 = arith.constant dense<0.000000e+00> : vector<128x32xf32>
    %208 = tpu.matmul %205, %207, %cst_225 {dimension_numbers = #tpu.dot_dimension_numbers<[1], [0], [0], [1], [0, 0, 1, 1], [], []>} : vector<128x32xbf16>, vector<32x32xbf16>, vector<128x32xf32> -> vector<128x32xf32>
    %209 = arith.addf %202, %208 : vector<128x32xf32>
    %c0_226 = arith.constant 0 : index
    %c3_227 = arith.constant 3 : index
    %c0_228 = arith.constant 0 : index
    %c0_229 = arith.constant 0 : index
    %210 = vector.load %arg14[%c0_226, %c3_227, %c0_228, %c0_229] : memref<2x12x12x32xf32, #tpu.memory_space<vmem>>, vector<2x8x8x32xf32>
    %211 = vector.shape_cast %210 : vector<2x8x8x32xf32> to vector<128x32xf32>
    %212 = arith.truncf %211 : vector<128x32xf32> to vector<128x32xbf16>
    %c15_230 = arith.constant 15 : index
    %c0_231 = arith.constant 0 : index
    %c0_232 = arith.constant 0 : index
    %213 = vector.load %arg6[%c15_230, %c0_231, %c0_232] : memref<25x32x32xbf16, #tpu.memory_space<vmem>>, vector<1x32x32xbf16>
    %214 = vector.shape_cast %213 : vector<1x32x32xbf16> to vector<32x32xbf16>
    %cst_233 = arith.constant dense<0.000000e+00> : vector<128x32xf32>
    %215 = tpu.matmul %212, %214, %cst_233 {dimension_numbers = #tpu.dot_dimension_numbers<[1], [0], [0], [1], [0, 0, 1, 1], [], []>} : vector<128x32xbf16>, vector<32x32xbf16>, vector<128x32xf32> -> vector<128x32xf32>
    %216 = arith.addf %209, %215 : vector<128x32xf32>
    %c0_234 = arith.constant 0 : index
    %c3_235 = arith.constant 3 : index
    %c1_236 = arith.constant 1 : index
    %c0_237 = arith.constant 0 : index
    %217 = vector.load %arg14[%c0_234, %c3_235, %c1_236, %c0_237] : memref<2x12x12x32xf32, #tpu.memory_space<vmem>>, vector<2x8x8x32xf32>
    %218 = vector.shape_cast %217 : vector<2x8x8x32xf32> to vector<128x32xf32>
    %219 = arith.truncf %218 : vector<128x32xf32> to vector<128x32xbf16>
    %c16 = arith.constant 16 : index
    %c0_238 = arith.constant 0 : index
    %c0_239 = arith.constant 0 : index
    %220 = vector.load %arg6[%c16, %c0_238, %c0_239] : memref<25x32x32xbf16, #tpu.memory_space<vmem>>, vector<1x32x32xbf16>
    %221 = vector.shape_cast %220 : vector<1x32x32xbf16> to vector<32x32xbf16>
    %cst_240 = arith.constant dense<0.000000e+00> : vector<128x32xf32>
    %222 = tpu.matmul %219, %221, %cst_240 {dimension_numbers = #tpu.dot_dimension_numbers<[1], [0], [0], [1], [0, 0, 1, 1], [], []>} : vector<128x32xbf16>, vector<32x32xbf16>, vector<128x32xf32> -> vector<128x32xf32>
    %223 = arith.addf %216, %222 : vector<128x32xf32>
    %c0_241 = arith.constant 0 : index
    %c3_242 = arith.constant 3 : index
    %c2_243 = arith.constant 2 : index
    %c0_244 = arith.constant 0 : index
    %224 = vector.load %arg14[%c0_241, %c3_242, %c2_243, %c0_244] : memref<2x12x12x32xf32, #tpu.memory_space<vmem>>, vector<2x8x8x32xf32>
    %225 = vector.shape_cast %224 : vector<2x8x8x32xf32> to vector<128x32xf32>
    %226 = arith.truncf %225 : vector<128x32xf32> to vector<128x32xbf16>
    %c17 = arith.constant 17 : index
    %c0_245 = arith.constant 0 : index
    %c0_246 = arith.constant 0 : index
    %227 = vector.load %arg6[%c17, %c0_245, %c0_246] : memref<25x32x32xbf16, #tpu.memory_space<vmem>>, vector<1x32x32xbf16>
    %228 = vector.shape_cast %227 : vector<1x32x32xbf16> to vector<32x32xbf16>
    %cst_247 = arith.constant dense<0.000000e+00> : vector<128x32xf32>
    %229 = tpu.matmul %226, %228, %cst_247 {dimension_numbers = #tpu.dot_dimension_numbers<[1], [0], [0], [1], [0, 0, 1, 1], [], []>} : vector<128x32xbf16>, vector<32x32xbf16>, vector<128x32xf32> -> vector<128x32xf32>
    %230 = arith.addf %223, %229 : vector<128x32xf32>
    %c0_248 = arith.constant 0 : index
    %c3_249 = arith.constant 3 : index
    %c3_250 = arith.constant 3 : index
    %c0_251 = arith.constant 0 : index
    %231 = vector.load %arg14[%c0_248, %c3_249, %c3_250, %c0_251] : memref<2x12x12x32xf32, #tpu.memory_space<vmem>>, vector<2x8x8x32xf32>
    %232 = vector.shape_cast %231 : vector<2x8x8x32xf32> to vector<128x32xf32>
    %233 = arith.truncf %232 : vector<128x32xf32> to vector<128x32xbf16>
    %c18 = arith.constant 18 : index
    %c0_252 = arith.constant 0 : index
    %c0_253 = arith.constant 0 : index
    %234 = vector.load %arg6[%c18, %c0_252, %c0_253] : memref<25x32x32xbf16, #tpu.memory_space<vmem>>, vector<1x32x32xbf16>
    %235 = vector.shape_cast %234 : vector<1x32x32xbf16> to vector<32x32xbf16>
    %cst_254 = arith.constant dense<0.000000e+00> : vector<128x32xf32>
    %236 = tpu.matmul %233, %235, %cst_254 {dimension_numbers = #tpu.dot_dimension_numbers<[1], [0], [0], [1], [0, 0, 1, 1], [], []>} : vector<128x32xbf16>, vector<32x32xbf16>, vector<128x32xf32> -> vector<128x32xf32>
    %237 = arith.addf %230, %236 : vector<128x32xf32>
    %c0_255 = arith.constant 0 : index
    %c3_256 = arith.constant 3 : index
    %c4_257 = arith.constant 4 : index
    %c0_258 = arith.constant 0 : index
    %238 = vector.load %arg14[%c0_255, %c3_256, %c4_257, %c0_258] : memref<2x12x12x32xf32, #tpu.memory_space<vmem>>, vector<2x8x8x32xf32>
    %239 = vector.shape_cast %238 : vector<2x8x8x32xf32> to vector<128x32xf32>
    %240 = arith.truncf %239 : vector<128x32xf32> to vector<128x32xbf16>
    %c19 = arith.constant 19 : index
    %c0_259 = arith.constant 0 : index
    %c0_260 = arith.constant 0 : index
    %241 = vector.load %arg6[%c19, %c0_259, %c0_260] : memref<25x32x32xbf16, #tpu.memory_space<vmem>>, vector<1x32x32xbf16>
    %242 = vector.shape_cast %241 : vector<1x32x32xbf16> to vector<32x32xbf16>
    %cst_261 = arith.constant dense<0.000000e+00> : vector<128x32xf32>
    %243 = tpu.matmul %240, %242, %cst_261 {dimension_numbers = #tpu.dot_dimension_numbers<[1], [0], [0], [1], [0, 0, 1, 1], [], []>} : vector<128x32xbf16>, vector<32x32xbf16>, vector<128x32xf32> -> vector<128x32xf32>
    %244 = arith.addf %237, %243 : vector<128x32xf32>
    %c0_262 = arith.constant 0 : index
    %c4_263 = arith.constant 4 : index
    %c0_264 = arith.constant 0 : index
    %c0_265 = arith.constant 0 : index
    %245 = vector.load %arg14[%c0_262, %c4_263, %c0_264, %c0_265] : memref<2x12x12x32xf32, #tpu.memory_space<vmem>>, vector<2x8x8x32xf32>
    %246 = vector.shape_cast %245 : vector<2x8x8x32xf32> to vector<128x32xf32>
    %247 = arith.truncf %246 : vector<128x32xf32> to vector<128x32xbf16>
    %c20 = arith.constant 20 : index
    %c0_266 = arith.constant 0 : index
    %c0_267 = arith.constant 0 : index
    %248 = vector.load %arg6[%c20, %c0_266, %c0_267] : memref<25x32x32xbf16, #tpu.memory_space<vmem>>, vector<1x32x32xbf16>
    %249 = vector.shape_cast %248 : vector<1x32x32xbf16> to vector<32x32xbf16>
    %cst_268 = arith.constant dense<0.000000e+00> : vector<128x32xf32>
    %250 = tpu.matmul %247, %249, %cst_268 {dimension_numbers = #tpu.dot_dimension_numbers<[1], [0], [0], [1], [0, 0, 1, 1], [], []>} : vector<128x32xbf16>, vector<32x32xbf16>, vector<128x32xf32> -> vector<128x32xf32>
    %251 = arith.addf %244, %250 : vector<128x32xf32>
    %c0_269 = arith.constant 0 : index
    %c4_270 = arith.constant 4 : index
    %c1_271 = arith.constant 1 : index
    %c0_272 = arith.constant 0 : index
    %252 = vector.load %arg14[%c0_269, %c4_270, %c1_271, %c0_272] : memref<2x12x12x32xf32, #tpu.memory_space<vmem>>, vector<2x8x8x32xf32>
    %253 = vector.shape_cast %252 : vector<2x8x8x32xf32> to vector<128x32xf32>
    %254 = arith.truncf %253 : vector<128x32xf32> to vector<128x32xbf16>
    %c21 = arith.constant 21 : index
    %c0_273 = arith.constant 0 : index
    %c0_274 = arith.constant 0 : index
    %255 = vector.load %arg6[%c21, %c0_273, %c0_274] : memref<25x32x32xbf16, #tpu.memory_space<vmem>>, vector<1x32x32xbf16>
    %256 = vector.shape_cast %255 : vector<1x32x32xbf16> to vector<32x32xbf16>
    %cst_275 = arith.constant dense<0.000000e+00> : vector<128x32xf32>
    %257 = tpu.matmul %254, %256, %cst_275 {dimension_numbers = #tpu.dot_dimension_numbers<[1], [0], [0], [1], [0, 0, 1, 1], [], []>} : vector<128x32xbf16>, vector<32x32xbf16>, vector<128x32xf32> -> vector<128x32xf32>
    %258 = arith.addf %251, %257 : vector<128x32xf32>
    %c0_276 = arith.constant 0 : index
    %c4_277 = arith.constant 4 : index
    %c2_278 = arith.constant 2 : index
    %c0_279 = arith.constant 0 : index
    %259 = vector.load %arg14[%c0_276, %c4_277, %c2_278, %c0_279] : memref<2x12x12x32xf32, #tpu.memory_space<vmem>>, vector<2x8x8x32xf32>
    %260 = vector.shape_cast %259 : vector<2x8x8x32xf32> to vector<128x32xf32>
    %261 = arith.truncf %260 : vector<128x32xf32> to vector<128x32xbf16>
    %c22 = arith.constant 22 : index
    %c0_280 = arith.constant 0 : index
    %c0_281 = arith.constant 0 : index
    %262 = vector.load %arg6[%c22, %c0_280, %c0_281] : memref<25x32x32xbf16, #tpu.memory_space<vmem>>, vector<1x32x32xbf16>
    %263 = vector.shape_cast %262 : vector<1x32x32xbf16> to vector<32x32xbf16>
    %cst_282 = arith.constant dense<0.000000e+00> : vector<128x32xf32>
    %264 = tpu.matmul %261, %263, %cst_282 {dimension_numbers = #tpu.dot_dimension_numbers<[1], [0], [0], [1], [0, 0, 1, 1], [], []>} : vector<128x32xbf16>, vector<32x32xbf16>, vector<128x32xf32> -> vector<128x32xf32>
    %265 = arith.addf %258, %264 : vector<128x32xf32>
    %c0_283 = arith.constant 0 : index
    %c4_284 = arith.constant 4 : index
    %c3_285 = arith.constant 3 : index
    %c0_286 = arith.constant 0 : index
    %266 = vector.load %arg14[%c0_283, %c4_284, %c3_285, %c0_286] : memref<2x12x12x32xf32, #tpu.memory_space<vmem>>, vector<2x8x8x32xf32>
    %267 = vector.shape_cast %266 : vector<2x8x8x32xf32> to vector<128x32xf32>
    %268 = arith.truncf %267 : vector<128x32xf32> to vector<128x32xbf16>
    %c23 = arith.constant 23 : index
    %c0_287 = arith.constant 0 : index
    %c0_288 = arith.constant 0 : index
    %269 = vector.load %arg6[%c23, %c0_287, %c0_288] : memref<25x32x32xbf16, #tpu.memory_space<vmem>>, vector<1x32x32xbf16>
    %270 = vector.shape_cast %269 : vector<1x32x32xbf16> to vector<32x32xbf16>
    %cst_289 = arith.constant dense<0.000000e+00> : vector<128x32xf32>
    %271 = tpu.matmul %268, %270, %cst_289 {dimension_numbers = #tpu.dot_dimension_numbers<[1], [0], [0], [1], [0, 0, 1, 1], [], []>} : vector<128x32xbf16>, vector<32x32xbf16>, vector<128x32xf32> -> vector<128x32xf32>
    %272 = arith.addf %265, %271 : vector<128x32xf32>
    %c0_290 = arith.constant 0 : index
    %c4_291 = arith.constant 4 : index
    %c4_292 = arith.constant 4 : index
    %c0_293 = arith.constant 0 : index
    %273 = vector.load %arg14[%c0_290, %c4_291, %c4_292, %c0_293] : memref<2x12x12x32xf32, #tpu.memory_space<vmem>>, vector<2x8x8x32xf32>
    %274 = vector.shape_cast %273 : vector<2x8x8x32xf32> to vector<128x32xf32>
    %275 = arith.truncf %274 : vector<128x32xf32> to vector<128x32xbf16>
    %c24 = arith.constant 24 : index
    %c0_294 = arith.constant 0 : index
    %c0_295 = arith.constant 0 : index
    %276 = vector.load %arg6[%c24, %c0_294, %c0_295] : memref<25x32x32xbf16, #tpu.memory_space<vmem>>, vector<1x32x32xbf16>
    %277 = vector.shape_cast %276 : vector<1x32x32xbf16> to vector<32x32xbf16>
    %cst_296 = arith.constant dense<0.000000e+00> : vector<128x32xf32>
    %278 = tpu.matmul %275, %277, %cst_296 {dimension_numbers = #tpu.dot_dimension_numbers<[1], [0], [0], [1], [0, 0, 1, 1], [], []>} : vector<128x32xbf16>, vector<32x32xbf16>, vector<128x32xf32> -> vector<128x32xf32>
    %279 = arith.addf %272, %278 : vector<128x32xf32>
    %c0_297 = arith.constant 0 : index
    %c0_298 = arith.constant 0 : index
    %280 = vector.load %arg7[%c0_297, %c0_298] : memref<1x32xf32, #tpu.memory_space<vmem>>, vector<1x32xf32>
    %c0_299 = arith.constant 0 : index
    %c0_300 = arith.constant 0 : index
    %281 = vector.load %arg8[%c0_299, %c0_300] : memref<1x32xf32, #tpu.memory_space<vmem>>, vector<1x32xf32>
    %c0_301 = arith.constant 0 : index
    %c0_302 = arith.constant 0 : index
    %282 = vector.load %arg9[%c0_301, %c0_302] : memref<1x32xf32, #tpu.memory_space<vmem>>, vector<1x32xf32>
    %283 = vector.broadcast %280 : vector<1x32xf32> to vector<128x32xf32>
    %284 = arith.addf %279, %283 : vector<128x32xf32>
    %cst_303 = arith.constant 0.000000e+00 : f32
    %285 = vector.broadcast %cst_303 : f32 to vector<128x32xf32>
    %286 = arith.maximumf %284, %285 : vector<128x32xf32>
    %cst_304 = arith.constant dense<0.000000e+00> : vector<32xf32>
    %287 = vector.multi_reduction <add>, %286, %cst_304 [0] : vector<128x32xf32> to vector<32xf32>
    %288 = vector.shape_cast %287 : vector<32xf32> to vector<1x32xf32>
    %289 = arith.mulf %286, %286 : vector<128x32xf32>
    %cst_305 = arith.constant dense<0.000000e+00> : vector<32xf32>
    %290 = vector.multi_reduction <add>, %289, %cst_305 [0] : vector<128x32xf32> to vector<32xf32>
    %291 = vector.shape_cast %290 : vector<32xf32> to vector<1x32xf32>
    %cst_306 = arith.constant 7.812500e-03 : f32
    %292 = vector.broadcast %cst_306 : f32 to vector<1x32xf32>
    %293 = arith.mulf %288, %292 : vector<1x32xf32>
    %cst_307 = arith.constant 7.812500e-03 : f32
    %294 = vector.broadcast %cst_307 : f32 to vector<1x32xf32>
    %295 = arith.mulf %291, %294 : vector<1x32xf32>
    %296 = arith.mulf %293, %293 : vector<1x32xf32>
    %297 = arith.subf %295, %296 : vector<1x32xf32>
    %cst_308 = arith.constant 9.99999974E-6 : f32
    %298 = vector.broadcast %cst_308 : f32 to vector<1x32xf32>
    %299 = arith.addf %297, %298 : vector<1x32xf32>
    %300 = math.rsqrt %299 : vector<1x32xf32>
    %301 = arith.mulf %281, %300 : vector<1x32xf32>
    %302 = arith.mulf %293, %301 : vector<1x32xf32>
    %303 = arith.subf %282, %302 : vector<1x32xf32>
    %304 = vector.broadcast %301 : vector<1x32xf32> to vector<128x32xf32>
    %305 = arith.mulf %286, %304 : vector<128x32xf32>
    %306 = vector.broadcast %303 : vector<1x32xf32> to vector<128x32xf32>
    %307 = arith.addf %305, %306 : vector<128x32xf32>
    %308 = vector.shape_cast %307 : vector<128x32xf32> to vector<2x4x2x8x32xf32>
    %309 = vector.extract_strided_slice %308 {offsets = [0, 0, 0, 0, 0], sizes = [2, 4, 1, 8, 32], strides = [1, 1, 1, 1, 1]} : vector<2x4x2x8x32xf32> to vector<2x4x1x8x32xf32>
    %310 = vector.shape_cast %309 : vector<2x4x1x8x32xf32> to vector<2x4x8x32xf32>
    %311 = vector.extract_strided_slice %308 {offsets = [0, 0, 1, 0, 0], sizes = [2, 4, 1, 8, 32], strides = [1, 1, 1, 1, 1]} : vector<2x4x2x8x32xf32> to vector<2x4x1x8x32xf32>
    %312 = vector.shape_cast %311 : vector<2x4x1x8x32xf32> to vector<2x4x8x32xf32>
    %313 = arith.maximumf %310, %312 : vector<2x4x8x32xf32>
    %c0_309 = arith.constant 0 : index
    %c0_310 = arith.constant 0 : index
    %c0_311 = arith.constant 0 : index
    %c0_312 = arith.constant 0 : index
    %314 = vector.load %arg15[%c0_309, %c0_310, %c0_311, %c0_312] : memref<2x4x8x32xf32, #tpu.memory_space<vmem>>, vector<2x4x8x32xf32>
    tpu.vector_store %arg15[%c0_309, %c0_310, %c0_311, %c0_312], %313 {strides = array<i32>} : memref<2x4x8x32xf32, #tpu.memory_space<vmem>>, vector<2x4x8x32xf32>,
    %c0_313 = arith.constant 0 : index
    %c0_314 = arith.constant 0 : index
    %c0_315 = arith.constant 0 : index
    %c0_316 = arith.constant 0 : index
    %315 = vector.load %arg15[%c0_313, %c0_314, %c0_315, %c0_316] : memref<2x4x8x32xf32, #tpu.memory_space<vmem>>, vector<2x1x1x32xf32>
    %316 = vector.shape_cast %315 : vector<2x1x1x32xf32> to vector<2x32xf32>
    %c0_317 = arith.constant 0 : index
    %c0_318 = arith.constant 0 : index
    %c1_319 = arith.constant 1 : index
    %c0_320 = arith.constant 0 : index
    %317 = vector.load %arg15[%c0_317, %c0_318, %c1_319, %c0_320] : memref<2x4x8x32xf32, #tpu.memory_space<vmem>>, vector<2x1x1x32xf32>
    %318 = vector.shape_cast %317 : vector<2x1x1x32xf32> to vector<2x32xf32>
    %319 = arith.maximumf %316, %318 : vector<2x32xf32>
    %c0_321 = arith.constant 0 : index
    %c0_322 = arith.constant 0 : index
    %320 = vector.load %arg16[%c0_321, %c0_322] : memref<2x512xf32, #tpu.memory_space<vmem>>, vector<2x32xf32>
    tpu.vector_store %arg16[%c0_321, %c0_322], %319 {strides = array<i32>} : memref<2x512xf32, #tpu.memory_space<vmem>>, vector<2x32xf32>,
    %c0_323 = arith.constant 0 : index
    %c0_324 = arith.constant 0 : index
    %c2_325 = arith.constant 2 : index
    %c0_326 = arith.constant 0 : index
    %321 = vector.load %arg15[%c0_323, %c0_324, %c2_325, %c0_326] : memref<2x4x8x32xf32, #tpu.memory_space<vmem>>, vector<2x1x1x32xf32>
    %322 = vector.shape_cast %321 : vector<2x1x1x32xf32> to vector<2x32xf32>
    %c0_327 = arith.constant 0 : index
    %c0_328 = arith.constant 0 : index
    %c3_329 = arith.constant 3 : index
    %c0_330 = arith.constant 0 : index
    %323 = vector.load %arg15[%c0_327, %c0_328, %c3_329, %c0_330] : memref<2x4x8x32xf32, #tpu.memory_space<vmem>>, vector<2x1x1x32xf32>
    %324 = vector.shape_cast %323 : vector<2x1x1x32xf32> to vector<2x32xf32>
    %325 = arith.maximumf %322, %324 : vector<2x32xf32>
    %c0_331 = arith.constant 0 : index
    %c32 = arith.constant 32 : index
    %326 = vector.load %arg16[%c0_331, %c32] : memref<2x512xf32, #tpu.memory_space<vmem>>, vector<2x32xf32>
    tpu.vector_store %arg16[%c0_331, %c32], %325 {strides = array<i32>} : memref<2x512xf32, #tpu.memory_space<vmem>>, vector<2x32xf32>,
    %c0_332 = arith.constant 0 : index
    %c0_333 = arith.constant 0 : index
    %c4_334 = arith.constant 4 : index
    %c0_335 = arith.constant 0 : index
    %327 = vector.load %arg15[%c0_332, %c0_333, %c4_334, %c0_335] : memref<2x4x8x32xf32, #tpu.memory_space<vmem>>, vector<2x1x1x32xf32>
    %328 = vector.shape_cast %327 : vector<2x1x1x32xf32> to vector<2x32xf32>
    %c0_336 = arith.constant 0 : index
    %c0_337 = arith.constant 0 : index
    %c5_338 = arith.constant 5 : index
    %c0_339 = arith.constant 0 : index
    %329 = vector.load %arg15[%c0_336, %c0_337, %c5_338, %c0_339] : memref<2x4x8x32xf32, #tpu.memory_space<vmem>>, vector<2x1x1x32xf32>
    %330 = vector.shape_cast %329 : vector<2x1x1x32xf32> to vector<2x32xf32>
    %331 = arith.maximumf %328, %330 : vector<2x32xf32>
    %c0_340 = arith.constant 0 : index
    %c64 = arith.constant 64 : index
    %332 = vector.load %arg16[%c0_340, %c64] : memref<2x512xf32, #tpu.memory_space<vmem>>, vector<2x32xf32>
    tpu.vector_store %arg16[%c0_340, %c64], %331 {strides = array<i32>} : memref<2x512xf32, #tpu.memory_space<vmem>>, vector<2x32xf32>,
    %c0_341 = arith.constant 0 : index
    %c0_342 = arith.constant 0 : index
    %c6_343 = arith.constant 6 : index
    %c0_344 = arith.constant 0 : index
    %333 = vector.load %arg15[%c0_341, %c0_342, %c6_343, %c0_344] : memref<2x4x8x32xf32, #tpu.memory_space<vmem>>, vector<2x1x1x32xf32>
    %334 = vector.shape_cast %333 : vector<2x1x1x32xf32> to vector<2x32xf32>
    %c0_345 = arith.constant 0 : index
    %c0_346 = arith.constant 0 : index
    %c7_347 = arith.constant 7 : index
    %c0_348 = arith.constant 0 : index
    %335 = vector.load %arg15[%c0_345, %c0_346, %c7_347, %c0_348] : memref<2x4x8x32xf32, #tpu.memory_space<vmem>>, vector<2x1x1x32xf32>
    %336 = vector.shape_cast %335 : vector<2x1x1x32xf32> to vector<2x32xf32>
    %337 = arith.maximumf %334, %336 : vector<2x32xf32>
    %c0_349 = arith.constant 0 : index
    %c96 = arith.constant 96 : index
    %338 = vector.load %arg16[%c0_349, %c96] : memref<2x512xf32, #tpu.memory_space<vmem>>, vector<2x32xf32>
    tpu.vector_store %arg16[%c0_349, %c96], %337 {strides = array<i32>} : memref<2x512xf32, #tpu.memory_space<vmem>>, vector<2x32xf32>,
    %c0_350 = arith.constant 0 : index
    %c1_351 = arith.constant 1 : index
    %c0_352 = arith.constant 0 : index
    %c0_353 = arith.constant 0 : index
    %339 = vector.load %arg15[%c0_350, %c1_351, %c0_352, %c0_353] : memref<2x4x8x32xf32, #tpu.memory_space<vmem>>, vector<2x1x1x32xf32>
    %340 = vector.shape_cast %339 : vector<2x1x1x32xf32> to vector<2x32xf32>
    %c0_354 = arith.constant 0 : index
    %c1_355 = arith.constant 1 : index
    %c1_356 = arith.constant 1 : index
    %c0_357 = arith.constant 0 : index
    %341 = vector.load %arg15[%c0_354, %c1_355, %c1_356, %c0_357] : memref<2x4x8x32xf32, #tpu.memory_space<vmem>>, vector<2x1x1x32xf32>
    %342 = vector.shape_cast %341 : vector<2x1x1x32xf32> to vector<2x32xf32>
    %343 = arith.maximumf %340, %342 : vector<2x32xf32>
    %c0_358 = arith.constant 0 : index
    %c128 = arith.constant 128 : index
    %344 = vector.load %arg16[%c0_358, %c128] : memref<2x512xf32, #tpu.memory_space<vmem>>, vector<2x32xf32>
    tpu.vector_store %arg16[%c0_358, %c128], %343 {strides = array<i32>} : memref<2x512xf32, #tpu.memory_space<vmem>>, vector<2x32xf32>,
    %c0_359 = arith.constant 0 : index
    %c1_360 = arith.constant 1 : index
    %c2_361 = arith.constant 2 : index
    %c0_362 = arith.constant 0 : index
    %345 = vector.load %arg15[%c0_359, %c1_360, %c2_361, %c0_362] : memref<2x4x8x32xf32, #tpu.memory_space<vmem>>, vector<2x1x1x32xf32>
    %346 = vector.shape_cast %345 : vector<2x1x1x32xf32> to vector<2x32xf32>
    %c0_363 = arith.constant 0 : index
    %c1_364 = arith.constant 1 : index
    %c3_365 = arith.constant 3 : index
    %c0_366 = arith.constant 0 : index
    %347 = vector.load %arg15[%c0_363, %c1_364, %c3_365, %c0_366] : memref<2x4x8x32xf32, #tpu.memory_space<vmem>>, vector<2x1x1x32xf32>
    %348 = vector.shape_cast %347 : vector<2x1x1x32xf32> to vector<2x32xf32>
    %349 = arith.maximumf %346, %348 : vector<2x32xf32>
    %c0_367 = arith.constant 0 : index
    %c160 = arith.constant 160 : index
    %350 = vector.load %arg16[%c0_367, %c160] : memref<2x512xf32, #tpu.memory_space<vmem>>, vector<2x32xf32>
    tpu.vector_store %arg16[%c0_367, %c160], %349 {strides = array<i32>} : memref<2x512xf32, #tpu.memory_space<vmem>>, vector<2x32xf32>,
    %c0_368 = arith.constant 0 : index
    %c1_369 = arith.constant 1 : index
    %c4_370 = arith.constant 4 : index
    %c0_371 = arith.constant 0 : index
    %351 = vector.load %arg15[%c0_368, %c1_369, %c4_370, %c0_371] : memref<2x4x8x32xf32, #tpu.memory_space<vmem>>, vector<2x1x1x32xf32>
    %352 = vector.shape_cast %351 : vector<2x1x1x32xf32> to vector<2x32xf32>
    %c0_372 = arith.constant 0 : index
    %c1_373 = arith.constant 1 : index
    %c5_374 = arith.constant 5 : index
    %c0_375 = arith.constant 0 : index
    %353 = vector.load %arg15[%c0_372, %c1_373, %c5_374, %c0_375] : memref<2x4x8x32xf32, #tpu.memory_space<vmem>>, vector<2x1x1x32xf32>
    %354 = vector.shape_cast %353 : vector<2x1x1x32xf32> to vector<2x32xf32>
    %355 = arith.maximumf %352, %354 : vector<2x32xf32>
    %c0_376 = arith.constant 0 : index
    %c192 = arith.constant 192 : index
    %356 = vector.load %arg16[%c0_376, %c192] : memref<2x512xf32, #tpu.memory_space<vmem>>, vector<2x32xf32>
    tpu.vector_store %arg16[%c0_376, %c192], %355 {strides = array<i32>} : memref<2x512xf32, #tpu.memory_space<vmem>>, vector<2x32xf32>,
    %c0_377 = arith.constant 0 : index
    %c1_378 = arith.constant 1 : index
    %c6_379 = arith.constant 6 : index
    %c0_380 = arith.constant 0 : index
    %357 = vector.load %arg15[%c0_377, %c1_378, %c6_379, %c0_380] : memref<2x4x8x32xf32, #tpu.memory_space<vmem>>, vector<2x1x1x32xf32>
    %358 = vector.shape_cast %357 : vector<2x1x1x32xf32> to vector<2x32xf32>
    %c0_381 = arith.constant 0 : index
    %c1_382 = arith.constant 1 : index
    %c7_383 = arith.constant 7 : index
    %c0_384 = arith.constant 0 : index
    %359 = vector.load %arg15[%c0_381, %c1_382, %c7_383, %c0_384] : memref<2x4x8x32xf32, #tpu.memory_space<vmem>>, vector<2x1x1x32xf32>
    %360 = vector.shape_cast %359 : vector<2x1x1x32xf32> to vector<2x32xf32>
    %361 = arith.maximumf %358, %360 : vector<2x32xf32>
    %c0_385 = arith.constant 0 : index
    %c224 = arith.constant 224 : index
    %362 = vector.load %arg16[%c0_385, %c224] : memref<2x512xf32, #tpu.memory_space<vmem>>, vector<2x32xf32>
    tpu.vector_store %arg16[%c0_385, %c224], %361 {strides = array<i32>} : memref<2x512xf32, #tpu.memory_space<vmem>>, vector<2x32xf32>,
    %c0_386 = arith.constant 0 : index
    %c2_387 = arith.constant 2 : index
    %c0_388 = arith.constant 0 : index
    %c0_389 = arith.constant 0 : index
    %363 = vector.load %arg15[%c0_386, %c2_387, %c0_388, %c0_389] : memref<2x4x8x32xf32, #tpu.memory_space<vmem>>, vector<2x1x1x32xf32>
    %364 = vector.shape_cast %363 : vector<2x1x1x32xf32> to vector<2x32xf32>
    %c0_390 = arith.constant 0 : index
    %c2_391 = arith.constant 2 : index
    %c1_392 = arith.constant 1 : index
    %c0_393 = arith.constant 0 : index
    %365 = vector.load %arg15[%c0_390, %c2_391, %c1_392, %c0_393] : memref<2x4x8x32xf32, #tpu.memory_space<vmem>>, vector<2x1x1x32xf32>
    %366 = vector.shape_cast %365 : vector<2x1x1x32xf32> to vector<2x32xf32>
    %367 = arith.maximumf %364, %366 : vector<2x32xf32>
    %c0_394 = arith.constant 0 : index
    %c256 = arith.constant 256 : index
    %368 = vector.load %arg16[%c0_394, %c256] : memref<2x512xf32, #tpu.memory_space<vmem>>, vector<2x32xf32>
    tpu.vector_store %arg16[%c0_394, %c256], %367 {strides = array<i32>} : memref<2x512xf32, #tpu.memory_space<vmem>>, vector<2x32xf32>,
    %c0_395 = arith.constant 0 : index
    %c2_396 = arith.constant 2 : index
    %c2_397 = arith.constant 2 : index
    %c0_398 = arith.constant 0 : index
    %369 = vector.load %arg15[%c0_395, %c2_396, %c2_397, %c0_398] : memref<2x4x8x32xf32, #tpu.memory_space<vmem>>, vector<2x1x1x32xf32>
    %370 = vector.shape_cast %369 : vector<2x1x1x32xf32> to vector<2x32xf32>
    %c0_399 = arith.constant 0 : index
    %c2_400 = arith.constant 2 : index
    %c3_401 = arith.constant 3 : index
    %c0_402 = arith.constant 0 : index
    %371 = vector.load %arg15[%c0_399, %c2_400, %c3_401, %c0_402] : memref<2x4x8x32xf32, #tpu.memory_space<vmem>>, vector<2x1x1x32xf32>
    %372 = vector.shape_cast %371 : vector<2x1x1x32xf32> to vector<2x32xf32>
    %373 = arith.maximumf %370, %372 : vector<2x32xf32>
    %c0_403 = arith.constant 0 : index
    %c288 = arith.constant 288 : index
    %374 = vector.load %arg16[%c0_403, %c288] : memref<2x512xf32, #tpu.memory_space<vmem>>, vector<2x32xf32>
    tpu.vector_store %arg16[%c0_403, %c288], %373 {strides = array<i32>} : memref<2x512xf32, #tpu.memory_space<vmem>>, vector<2x32xf32>,
    %c0_404 = arith.constant 0 : index
    %c2_405 = arith.constant 2 : index
    %c4_406 = arith.constant 4 : index
    %c0_407 = arith.constant 0 : index
    %375 = vector.load %arg15[%c0_404, %c2_405, %c4_406, %c0_407] : memref<2x4x8x32xf32, #tpu.memory_space<vmem>>, vector<2x1x1x32xf32>
    %376 = vector.shape_cast %375 : vector<2x1x1x32xf32> to vector<2x32xf32>
    %c0_408 = arith.constant 0 : index
    %c2_409 = arith.constant 2 : index
    %c5_410 = arith.constant 5 : index
    %c0_411 = arith.constant 0 : index
    %377 = vector.load %arg15[%c0_408, %c2_409, %c5_410, %c0_411] : memref<2x4x8x32xf32, #tpu.memory_space<vmem>>, vector<2x1x1x32xf32>
    %378 = vector.shape_cast %377 : vector<2x1x1x32xf32> to vector<2x32xf32>
    %379 = arith.maximumf %376, %378 : vector<2x32xf32>
    %c0_412 = arith.constant 0 : index
    %c320 = arith.constant 320 : index
    %380 = vector.load %arg16[%c0_412, %c320] : memref<2x512xf32, #tpu.memory_space<vmem>>, vector<2x32xf32>
    tpu.vector_store %arg16[%c0_412, %c320], %379 {strides = array<i32>} : memref<2x512xf32, #tpu.memory_space<vmem>>, vector<2x32xf32>,
    %c0_413 = arith.constant 0 : index
    %c2_414 = arith.constant 2 : index
    %c6_415 = arith.constant 6 : index
    %c0_416 = arith.constant 0 : index
    %381 = vector.load %arg15[%c0_413, %c2_414, %c6_415, %c0_416] : memref<2x4x8x32xf32, #tpu.memory_space<vmem>>, vector<2x1x1x32xf32>
    %382 = vector.shape_cast %381 : vector<2x1x1x32xf32> to vector<2x32xf32>
    %c0_417 = arith.constant 0 : index
    %c2_418 = arith.constant 2 : index
    %c7_419 = arith.constant 7 : index
    %c0_420 = arith.constant 0 : index
    %383 = vector.load %arg15[%c0_417, %c2_418, %c7_419, %c0_420] : memref<2x4x8x32xf32, #tpu.memory_space<vmem>>, vector<2x1x1x32xf32>
    %384 = vector.shape_cast %383 : vector<2x1x1x32xf32> to vector<2x32xf32>
    %385 = arith.maximumf %382, %384 : vector<2x32xf32>
    %c0_421 = arith.constant 0 : index
    %c352 = arith.constant 352 : index
    %386 = vector.load %arg16[%c0_421, %c352] : memref<2x512xf32, #tpu.memory_space<vmem>>, vector<2x32xf32>
    tpu.vector_store %arg16[%c0_421, %c352], %385 {strides = array<i32>} : memref<2x512xf32, #tpu.memory_space<vmem>>, vector<2x32xf32>,
    %c0_422 = arith.constant 0 : index
    %c3_423 = arith.constant 3 : index
    %c0_424 = arith.constant 0 : index
    %c0_425 = arith.constant 0 : index
    %387 = vector.load %arg15[%c0_422, %c3_423, %c0_424, %c0_425] : memref<2x4x8x32xf32, #tpu.memory_space<vmem>>, vector<2x1x1x32xf32>
    %388 = vector.shape_cast %387 : vector<2x1x1x32xf32> to vector<2x32xf32>
    %c0_426 = arith.constant 0 : index
    %c3_427 = arith.constant 3 : index
    %c1_428 = arith.constant 1 : index
    %c0_429 = arith.constant 0 : index
    %389 = vector.load %arg15[%c0_426, %c3_427, %c1_428, %c0_429] : memref<2x4x8x32xf32, #tpu.memory_space<vmem>>, vector<2x1x1x32xf32>
    %390 = vector.shape_cast %389 : vector<2x1x1x32xf32> to vector<2x32xf32>
    %391 = arith.maximumf %388, %390 : vector<2x32xf32>
    %c0_430 = arith.constant 0 : index
    %c384 = arith.constant 384 : index
    %392 = vector.load %arg16[%c0_430, %c384] : memref<2x512xf32, #tpu.memory_space<vmem>>, vector<2x32xf32>
    tpu.vector_store %arg16[%c0_430, %c384], %391 {strides = array<i32>} : memref<2x512xf32, #tpu.memory_space<vmem>>, vector<2x32xf32>,
    %c0_431 = arith.constant 0 : index
    %c3_432 = arith.constant 3 : index
    %c2_433 = arith.constant 2 : index
    %c0_434 = arith.constant 0 : index
    %393 = vector.load %arg15[%c0_431, %c3_432, %c2_433, %c0_434] : memref<2x4x8x32xf32, #tpu.memory_space<vmem>>, vector<2x1x1x32xf32>
    %394 = vector.shape_cast %393 : vector<2x1x1x32xf32> to vector<2x32xf32>
    %c0_435 = arith.constant 0 : index
    %c3_436 = arith.constant 3 : index
    %c3_437 = arith.constant 3 : index
    %c0_438 = arith.constant 0 : index
    %395 = vector.load %arg15[%c0_435, %c3_436, %c3_437, %c0_438] : memref<2x4x8x32xf32, #tpu.memory_space<vmem>>, vector<2x1x1x32xf32>
    %396 = vector.shape_cast %395 : vector<2x1x1x32xf32> to vector<2x32xf32>
    %397 = arith.maximumf %394, %396 : vector<2x32xf32>
    %c0_439 = arith.constant 0 : index
    %c416 = arith.constant 416 : index
    %398 = vector.load %arg16[%c0_439, %c416] : memref<2x512xf32, #tpu.memory_space<vmem>>, vector<2x32xf32>
    tpu.vector_store %arg16[%c0_439, %c416], %397 {strides = array<i32>} : memref<2x512xf32, #tpu.memory_space<vmem>>, vector<2x32xf32>,
    %c0_440 = arith.constant 0 : index
    %c3_441 = arith.constant 3 : index
    %c4_442 = arith.constant 4 : index
    %c0_443 = arith.constant 0 : index
    %399 = vector.load %arg15[%c0_440, %c3_441, %c4_442, %c0_443] : memref<2x4x8x32xf32, #tpu.memory_space<vmem>>, vector<2x1x1x32xf32>
    %400 = vector.shape_cast %399 : vector<2x1x1x32xf32> to vector<2x32xf32>
    %c0_444 = arith.constant 0 : index
    %c3_445 = arith.constant 3 : index
    %c5_446 = arith.constant 5 : index
    %c0_447 = arith.constant 0 : index
    %401 = vector.load %arg15[%c0_444, %c3_445, %c5_446, %c0_447] : memref<2x4x8x32xf32, #tpu.memory_space<vmem>>, vector<2x1x1x32xf32>
    %402 = vector.shape_cast %401 : vector<2x1x1x32xf32> to vector<2x32xf32>
    %403 = arith.maximumf %400, %402 : vector<2x32xf32>
    %c0_448 = arith.constant 0 : index
    %c448 = arith.constant 448 : index
    %404 = vector.load %arg16[%c0_448, %c448] : memref<2x512xf32, #tpu.memory_space<vmem>>, vector<2x32xf32>
    tpu.vector_store %arg16[%c0_448, %c448], %403 {strides = array<i32>} : memref<2x512xf32, #tpu.memory_space<vmem>>, vector<2x32xf32>,
    %c0_449 = arith.constant 0 : index
    %c3_450 = arith.constant 3 : index
    %c6_451 = arith.constant 6 : index
    %c0_452 = arith.constant 0 : index
    %405 = vector.load %arg15[%c0_449, %c3_450, %c6_451, %c0_452] : memref<2x4x8x32xf32, #tpu.memory_space<vmem>>, vector<2x1x1x32xf32>
    %406 = vector.shape_cast %405 : vector<2x1x1x32xf32> to vector<2x32xf32>
    %c0_453 = arith.constant 0 : index
    %c3_454 = arith.constant 3 : index
    %c7_455 = arith.constant 7 : index
    %c0_456 = arith.constant 0 : index
    %407 = vector.load %arg15[%c0_453, %c3_454, %c7_455, %c0_456] : memref<2x4x8x32xf32, #tpu.memory_space<vmem>>, vector<2x1x1x32xf32>
    %408 = vector.shape_cast %407 : vector<2x1x1x32xf32> to vector<2x32xf32>
    %409 = arith.maximumf %406, %408 : vector<2x32xf32>
    %c0_457 = arith.constant 0 : index
    %c480 = arith.constant 480 : index
    %410 = vector.load %arg16[%c0_457, %c480] : memref<2x512xf32, #tpu.memory_space<vmem>>, vector<2x32xf32>
    tpu.vector_store %arg16[%c0_457, %c480], %409 {strides = array<i32>} : memref<2x512xf32, #tpu.memory_space<vmem>>, vector<2x32xf32>,
    %c0_458 = arith.constant 0 : index
    %c0_459 = arith.constant 0 : index
    %411 = vector.load %arg16[%c0_458, %c0_459] : memref<2x512xf32, #tpu.memory_space<vmem>>, vector<2x512xf32>
    %412 = arith.truncf %411 : vector<2x512xf32> to vector<2x512xbf16>
    %c0_460 = arith.constant 0 : index
    %c0_461 = arith.constant 0 : index
    %413 = vector.load %arg10[%c0_460, %c0_461] : memref<512x256xbf16, #tpu.memory_space<vmem>>, vector<512x256xbf16>
    %cst_462 = arith.constant dense<0.000000e+00> : vector<2x256xf32>
    %414 = tpu.matmul %412, %413, %cst_462 {dimension_numbers = #tpu.dot_dimension_numbers<[1], [0], [0], [1], [0, 0, 1, 1], [], []>} : vector<2x512xbf16>, vector<512x256xbf16>, vector<2x256xf32> -> vector<2x256xf32>
    %c0_463 = arith.constant 0 : index
    %c0_464 = arith.constant 0 : index
    %415 = vector.load %arg11[%c0_463, %c0_464] : memref<1x256xf32, #tpu.memory_space<vmem>>, vector<1x256xf32>
    %416 = vector.broadcast %415 : vector<1x256xf32> to vector<2x256xf32>
    %417 = arith.addf %414, %416 : vector<2x256xf32>
    %c0_465 = arith.constant 0 : index
    %c0_466 = arith.constant 0 : index
    %418 = vector.load %arg12[%c0_465, %c0_466] : memref<2x256xf32, #tpu.memory_space<vmem>>, vector<2x256xf32>
    tpu.vector_store %arg12[%c0_465, %c0_466], %417 {strides = array<i32>} : memref<2x256xf32, #tpu.memory_space<vmem>>, vector<2x256xf32>,
    return
  }
  func.func @transform_0(%arg0: i32) -> (i32, i32) {
    %c0_i32 = arith.constant 0 : i32
    %c0_i32_0 = arith.constant 0 : i32
    %c0_i32_1 = arith.constant 0 : i32
    return %c0_i32, %c0_i32_0 : i32, i32
  }
  func.func @transform_1(%arg0: i32) -> (i32, i32) {
    %c0_i32 = arith.constant 0 : i32
    %c0_i32_0 = arith.constant 0 : i32
    %c0_i32_1 = arith.constant 0 : i32
    return %c0_i32, %c0_i32_0 : i32, i32
  }
  func.func @transform_2(%arg0: i32) -> (i32, i32) {
    %c0_i32 = arith.constant 0 : i32
    %c0_i32_0 = arith.constant 0 : i32
    %c0_i32_1 = arith.constant 0 : i32
    return %c0_i32, %c0_i32_0 : i32, i32
  }
  func.func @transform_3(%arg0: i32) -> (i32, i32) {
    %c0_i32 = arith.constant 0 : i32
    %c0_i32_0 = arith.constant 0 : i32
    %c0_i32_1 = arith.constant 0 : i32
    return %c0_i32, %c0_i32_0 : i32, i32
  }
  func.func @transform_4(%arg0: i32) -> (i32, i32) {
    %c0_i32 = arith.constant 0 : i32
    %c0_i32_0 = arith.constant 0 : i32
    %c0_i32_1 = arith.constant 0 : i32
    return %c0_i32, %c0_i32_0 : i32, i32
  }
  func.func @transform_5(%arg0: i32) -> (i32, i32, i32) {
    %c0_i32 = arith.constant 0 : i32
    %c0_i32_0 = arith.constant 0 : i32
    %c0_i32_1 = arith.constant 0 : i32
    %c0_i32_2 = arith.constant 0 : i32
    return %c0_i32, %c0_i32_0, %c0_i32_1 : i32, i32, i32
  }
  func.func @transform_6(%arg0: i32) -> (i32, i32) {
    %c0_i32 = arith.constant 0 : i32
    %c0_i32_0 = arith.constant 0 : i32
    %c0_i32_1 = arith.constant 0 : i32
    return %c0_i32, %c0_i32_0 : i32, i32
  }
  func.func @transform_7(%arg0: i32) -> (i32, i32) {
    %c0_i32 = arith.constant 0 : i32
    %c0_i32_0 = arith.constant 0 : i32
    %c0_i32_1 = arith.constant 0 : i32
    return %c0_i32, %c0_i32_0 : i32, i32
  }
  func.func @transform_8(%arg0: i32) -> (i32, i32) {
    %c0_i32 = arith.constant 0 : i32
    %c0_i32_0 = arith.constant 0 : i32
    %c0_i32_1 = arith.constant 0 : i32
    return %c0_i32, %c0_i32_0 : i32, i32
  }
  func.func @transform_9(%arg0: i32) -> (i32, i32) {
    %c0_i32 = arith.constant 0 : i32
    %c0_i32_0 = arith.constant 0 : i32
    %c0_i32_1 = arith.constant 0 : i32
    return %c0_i32, %c0_i32_0 : i32, i32
  }
  func.func @transform_10(%arg0: i32) -> (i32, i32) {
    %c0_i32 = arith.constant 0 : i32
    %c0_i32_0 = arith.constant 0 : i32
    %c0_i32_1 = arith.constant 0 : i32
    return %c0_i32, %c0_i32_0 : i32, i32
  }
  func.func @transform_11(%arg0: i32) -> (i32, i32) {
    %c0_i32 = arith.constant 0 : i32
    %c0_i32_0 = arith.constant 0 : i32
    %c0_i32_1 = arith.constant 0 : i32
    return %c0_i32, %c0_i32_0 : i32, i32
  }
}

</mosaic_0001>

<bundles_post_ra>
// kernel: cnn_forward.1
= control target key start
LH: loop header
LB: loop body
LE: loop exit
PB: predicated region body
PF: predicated region fallthrough
CT: control target
= control target key end

     0   :  { %s12569_s0 = inlined_call_operand.vmem [shape: bf16[512,128], index: 0, kind: input, shape index: {}]   ;;  %s12570_s1 = inlined_call_operand.vmem [shape: bf16[128,32], index: 1, kind: input, shape index: {}]   ;;  %s12571_s2 = inlined_call_operand.vmem [shape: f32[1,32], index: 2, kind: input, shape index: {}]   ;;  %s12572_s3 = inlined_call_operand.vmem [shape: f32[1,32], index: 3, kind: input, shape index: {}]   ;;  %s12573_s4 = inlined_call_operand.vmem [shape: f32[1,32], index: 4, kind: input, shape index: {}]   ;;  %s12574_s5 = inlined_call_operand.vmem [shape: bf16[25,32,32], index: 5, kind: input, shape index: {}]   ;;  %s12575_s6 = inlined_call_operand.vmem [shape: f32[1,32], index: 6, kind: input, shape index: {}]   ;;  %s12576_s7 = inlined_call_operand.vmem [shape: f32[1,32], index: 7, kind: input, shape index: {}]   ;;  %s12577_s8 = inlined_call_operand.vmem [shape: f32[1,32], index: 8, kind: input, shape index: {}]   ;;  %s12578_s9 = inlined_call_operand.vmem [shape: bf16[512,256], index: 9, kind: input, shape index: {}]   ;;  %s12579_s10 = inlined_call_operand.vmem [shape: f32[1,256], index: 10, kind: input, shape index: {}]   ;;  %s12580_s11 = inlined_call_operand.hbm [shape: f32[2,256], index: 11, kind: output, shape index: {}]  }
   0x1   :  { %v9232_v0 = vld [vmem:[%s12570_s1] sm:$0xff]   ;;  %v9233_v1 = vld [vmem:[%s12570_s1 + $0x8] sm:$0xff]   ;;  %v9234_v2 = vld [vmem:[%s12570_s1 + $0x10] sm:$0xff]  }
   0x2   :  { %8256 = vmatprep.subr.bf16.mxu0 %v9232_v0  ;;  %v9235_v3 = vld [vmem:[%s12570_s1 + $0x18] sm:$0xff]   ;;  %v9240_v4 = vld [vmem:[%s12569_s0] sm:$0xff]   ;;  %v9237_v6 = vld [vmem:[%s12570_s1 + $0x28] sm:$0xff]  }
   0x3   :  { %8257 = vmatpush3.bf16.msra.mxu0 %v9232_v0  ;;  %8272 = vmatprep.mubr.bf16.mxu0 %v9240_v4  ;;  %v9236_v5 = vld [vmem:[%s12570_s1 + $0x20] sm:$0xff]   ;;  %v9238_v7 = vld [vmem:[%s12570_s1 + $0x30] sm:$0xff]   ;;  %v9239_v8 = vld [vmem:[%s12570_s1 + $0x38] sm:$0xff]  }
   0x4   :  { %8258 = vmatprep.subr.bf16.mxu0 %v9233_v1  ;;  %v9241_v9 = vld [vmem:[%s12569_s0 + $0x8] sm:$0xff]   ;;  %v9242_v10 = vld [vmem:[%s12569_s0 + $0x10] sm:$0xff]   ;;  %v9243_v11 = vld [vmem:[%s12569_s0 + $0x18] sm:$0xff]  }
   0x5   :  { %v9244_v12 = vld [vmem:[%s12569_s0 + $0x20] sm:$0xff]   ;;  %v9245_v13 = vld [vmem:[%s12569_s0 + $0x28] sm:$0xff]   ;;  %v9246_v14 = vld [vmem:[%s12569_s0 + $0x30] sm:$0xff]  }
   0x6   :  { %v9247_v15 = vld [vmem:[%s12569_s0 + $0x38] sm:$0xff]   ;;  %v9248_v16 = vld [vmem:[%s12569_s0 + $0x40] sm:$0xff]   ;;  %v9249_v17 = vld [vmem:[%s12569_s0 + $0x48] sm:$0xff]  }
   0x7   :  { %8259 = vmatpush3.bf16.msra.mxu0 %v9233_v1  ;;  %v9250_v18 = vld [vmem:[%s12569_s0 + $0x50] sm:$0xff]   ;;  %v9251_v19 = vld [vmem:[%s12569_s0 + $0x58] sm:$0xff]   ;;  %v9252_v20 = vld [vmem:[%s12569_s0 + $0x60] sm:$0xff]  }
   0x8   :  { %8260 = vmatprep.subr.bf16.mxu0 %v9234_v2  ;;  %v9253_v21 = vld [vmem:[%s12569_s0 + $0x68] sm:$0xff]   ;;  %v9254_v22 = vld [vmem:[%s12569_s0 + $0x70] sm:$0xff]   ;;  %v9255_v23 = vld [vmem:[%s12569_s0 + $0x78] sm:$0xff]  }
   0x9   :  { %v9256_v24 = vld [vmem:[%s12569_s0 + $0x80] sm:$0xff]   ;;  %v9257_v25 = vld [vmem:[%s12569_s0 + $0x88] sm:$0xff]  }
   0xb   :  { %8261 = vmatpush3.bf16.msra.mxu0 %v9234_v2 }
   0xc   :  { %8262 = vmatprep.subr.bf16.mxu0 %v9235_v3 }
   0xf   :  { %8263 = vmatpush3.bf16.msra.mxu0 %v9235_v3 }
  0x10   :  { %8264 = vmatprep.subr.bf16.mxu0 %v9236_v5 }
  0x13   :  { %8265 = vmatpush3.bf16.msra.mxu0 %v9236_v5 }
  0x14   :  { %8266 = vmatprep.subr.bf16.mxu0 %v9237_v6 }
  0x17   :  { %8267 = vmatpush3.bf16.msra.mxu0 %v9237_v6 }
  0x18   :  { %8268 = vmatprep.subr.bf16.mxu0 %v9238_v7 }
  0x1b   :  { %8269 = vmatpush3.bf16.msra.mxu0 %v9238_v7 }
  0x1c   :  { %8270 = vmatprep.subr.bf16.mxu0 %v9239_v8 }
  0x1f   :  { %8271 = vmatpush3.bf16.msra.mxu0 %v9239_v8 }
  0x22   :  { %8273 = vmatmul.mubr.bf16.vlgmr.msra.gmra.mrb[0].mxu0 %v9241_v9 }
  0x23   :  { %8276 = vmatprep.mubr.bf16.mxu0 %v9242_v10 }
  0x2a   :  { %8277 = vmatmul.mubr.bf16.gmra.mrb[4].mxu0 %v9243_v11 }
  0x2b   :  { %8280 = vmatprep.mubr.bf16.mxu0 %v9244_v12 }
  0x32   :  { %8281 = vmatmul.mubr.bf16.gmra.mrb[8].mxu0 %v9245_v13 }
  0x33   :  { %8284 = vmatprep.mubr.bf16.mxu0 %v9246_v14 }
  0x3a   :  { %8285 = vmatmul.mubr.bf16.gmra.mrb[12].mxu0 %v9247_v15 }
  0x3b   :  { %8288 = vmatprep.mubr.bf16.mxu0 %v9248_v16 }
  0x42   :  { %8289 = vmatmul.mubr.bf16.gmra.mrb[16].mxu0 %v9249_v17 }
  0x43   :  { %8292 = vmatprep.mubr.bf16.mxu0 %v9250_v18 }
  0x4a   :  { %8293 = vmatmul.mubr.bf16.gmra.mrb[20].mxu0 %v9251_v19 }
  0x4b   :  { %8296 = vmatprep.mubr.bf16.mxu0 %v9252_v20 }
  0x52   :  { %8297 = vmatmul.mubr.bf16.gmra.mrb[24].mxu0 %v9253_v21 }
  0x53   :  { %8300 = vmatprep.mubr.bf16.mxu0 %v9254_v22 }
  0x5a   :  { %8301 = vmatmul.mubr.bf16.gmra.mrb[28].mxu0 %v9255_v23 }
  0x5b   :  { %8304 = vmatprep.mubr.bf16.mxu0 %v9256_v24 }
  0x5c   :  { %16 = vsyncpa [#allocation7], 0  ;;  %v9258_v26 = vld [vmem:[%s12569_s0 + $0x90] sm:$0xff]   ;;  %v9259_v27 = vld [vmem:[%s12569_s0 + $0x98] sm:$0xff]   ;;  %vm722_vm0 = vcmask 261120   ;;  %v9450_v34 = vmov 0.0  }
  0x5d   :  { %v9260_v28 = vld [vmem:[%s12569_s0 + $0xa0] sm:$0xff]   ;;  %v9261_v29 = vld [vmem:[%s12569_s0 + $0xa8] sm:$0xff]   ;;  %v9262_v30 = vld [vmem:[%s12569_s0 + $0xb0] sm:$0xff]   ;;  %1271 = vst.msk [vmem:[#allocation3 + $0x20] sm:$0xff] %vm722_vm0, %v9450_v34  ;;  %vm1267_vm1 = vcmask 257024   ;;  %vm1364_vm2 = vcmask 253952  }
  0x5e   :  { %v9263_v31 = vld [vmem:[%s12569_s0 + $0xb8] sm:$0xff]   ;;  %v9264_v32 = vld [vmem:[%s12569_s0 + $0xc0] sm:$0xff]   ;;  %v9265_v33 = vld [vmem:[%s12569_s0 + $0xc8] sm:$0xff]   ;;  %1266 = vst.msk [vmem:[#allocation3] sm:$0xff] %vm722_vm0, %v9450_v34  ;;  %vm6476_vm3 = vcmask 1041409   ;;  %vm6478_vm4 = vcmask 1043459  }
  0x5f   :  { %1269 = vst.msk [vmem:[#allocation3 + $0x10] sm:$0xff] %vm722_vm0, %v9450_v34  ;;  %1273 = vst.msk [vmem:[#allocation3 + $0x30] sm:$0xff] %vm722_vm0, %v9450_v34  ;;  %v9266_v35 = vld [vmem:[%s12569_s0 + $0xd0] sm:$0xff]   ;;  %v9267_v36 = vld [vmem:[%s12569_s0 + $0xd8] sm:$0xff]   ;;  %vm6480_vm5 = vcmask 1045509   ;;  %vm6482_vm6 = vcmask 1047559  }
  0x60   :  { %1275 = vst.msk [vmem:[#allocation3 + $0x40] sm:$0xff] %vm722_vm0, %v9450_v34  ;;  %1277 = vst.msk [vmem:[#allocation3 + $0x50] sm:$0xff] %vm722_vm0, %v9450_v34  ;;  %v9268_v37 = vld [vmem:[%s12569_s0 + $0xe0] sm:$0xff]   ;;  %v9269_v38 = vld [vmem:[%s12569_s0 + $0xe8] sm:$0xff]   ;;  %vm6485_vm7 = vcmask 254976   ;;  %s9454_s24 = smov 96  }
  0x61   :  { %1279 = vst.msk [vmem:[#allocation3 + $0x60] sm:$0xff] %vm722_vm0, %v9450_v34  ;;  %1281 = vst.msk [vmem:[#allocation3 + $0x70] sm:$0xff] %vm722_vm0, %v9450_v34  ;;  %v9270_v39 = vld [vmem:[%s12569_s0 + $0xf0] sm:$0xff]   ;;  %v9271_v40 = vld [vmem:[%s12569_s0 + $0xf8] sm:$0xff]   ;;  %vm6519_vm8 = vcmask 517376   ;;  %vm6553_vm9 = vcmask 779776  }
  0x62   :  { %8305 = vmatmul.mubr.bf16.gmra.mrb[32].mxu0 %v9257_v25  ;;  %1283 = vst.msk [vmem:[#allocation3 + $0x80] sm:$0xff] %vm722_vm0, %v9450_v34  ;;  %1285 = vst.msk [vmem:[#allocation3 + $0x90] sm:$0xff] %vm722_vm0, %v9450_v34  ;;  %v9687_v41 = vld [vmem:[%s12571_s2] ss:$0 sm:$0xff]  ;;  %vm6587_vm10 = vcmask 1042176  }
  0x63   :  { %8308 = vmatprep.mubr.bf16.mxu0 %v9258_v26  ;;  %1287 = vst.msk [vmem:[#allocation3 + $0xa0] sm:$0xff] %vm722_vm0, %v9450_v34  ;;  %1289 = vst.msk [vmem:[#allocation3 + $0xb0] sm:$0xff] %vm722_vm0, %v9450_v34 }
  0x64   :  { %1291 = vst.msk [vmem:[#allocation3 + $0xc0] sm:$0xff] %vm722_vm0, %v9450_v34  ;;  %1293 = vst.msk [vmem:[#allocation3 + $0xd0] sm:$0xff] %vm722_vm0, %v9450_v34 }
  0x65   :  { %1295 = vst.msk [vmem:[#allocation3 + $0xe0] sm:$0xff] %vm722_vm0, %v9450_v34  ;;  %1297 = vst.msk [vmem:[#allocation3 + $0xf0] sm:$0xff] %vm722_vm0, %v9450_v34 }
  0x66   :  { %1299 = vst.msk [vmem:[#allocation3 + $0x100] sm:$0xff] %vm722_vm0, %v9450_v34  ;;  %1301 = vst.msk [vmem:[#allocation3 + $0x110] sm:$0xff] %vm722_vm0, %v9450_v34 }
  0x67   :  { %1303 = vst.msk [vmem:[#allocation3 + $0x120] sm:$0xff] %vm722_vm0, %v9450_v34  ;;  %1305 = vst.msk [vmem:[#allocation3 + $0x130] sm:$0xff] %vm722_vm0, %v9450_v34 }
  0x68   :  { %1307 = vst.msk [vmem:[#allocation3 + $0x140] sm:$0xff] %vm722_vm0, %v9450_v34  ;;  %1309 = vst.msk [vmem:[#allocation3 + $0x150] sm:$0xff] %vm722_vm0, %v9450_v34 }
  0x69   :  { %1311 = vst.msk [vmem:[#allocation3 + $0x160] sm:$0xff] %vm722_vm0, %v9450_v34  ;;  %1313 = vst.msk [vmem:[#allocation3 + $0x170] sm:$0xff] %vm722_vm0, %v9450_v34 }
  0x6a   :  { %8309 = vmatmul.mubr.bf16.gmra.mrb[36].mxu0 %v9259_v27  ;;  %1272 = vst.msk [vmem:[#allocation3 + $0x28] sm:$0xf] %vm1267_vm1, %v9450_v34  ;;  %1268 = vst.msk [vmem:[#allocation3 + $0x8] sm:$0xf] %vm1267_vm1, %v9450_v34 }
  0x6b   :  { %8312 = vmatprep.mubr.bf16.mxu0 %v9260_v28  ;;  %1270 = vst.msk [vmem:[#allocation3 + $0x18] sm:$0xf] %vm1267_vm1, %v9450_v34  ;;  %1274 = vst.msk [vmem:[#allocation3 + $0x38] sm:$0xf] %vm1267_vm1, %v9450_v34 }
  0x6c   :  { %1276 = vst.msk [vmem:[#allocation3 + $0x48] sm:$0xf] %vm1267_vm1, %v9450_v34  ;;  %1278 = vst.msk [vmem:[#allocation3 + $0x58] sm:$0xf] %vm1267_vm1, %v9450_v34 }
  0x6d   :  { %1280 = vst.msk [vmem:[#allocation3 + $0x68] sm:$0xf] %vm1267_vm1, %v9450_v34  ;;  %1282 = vst.msk [vmem:[#allocation3 + $0x78] sm:$0xf] %vm1267_vm1, %v9450_v34 }
  0x6e   :  { %1284 = vst.msk [vmem:[#allocation3 + $0x88] sm:$0xf] %vm1267_vm1, %v9450_v34  ;;  %1286 = vst.msk [vmem:[#allocation3 + $0x98] sm:$0xf] %vm1267_vm1, %v9450_v34 }
  0x6f   :  { %1288 = vst.msk [vmem:[#allocation3 + $0xa8] sm:$0xf] %vm1267_vm1, %v9450_v34  ;;  %1290 = vst.msk [vmem:[#allocation3 + $0xb8] sm:$0xf] %vm1267_vm1, %v9450_v34 }
  0x70   :  { %1292 = vst.msk [vmem:[#allocation3 + $0xc8] sm:$0xf] %vm1267_vm1, %v9450_v34  ;;  %1294 = vst.msk [vmem:[#allocation3 + $0xd8] sm:$0xf] %vm1267_vm1, %v9450_v34 }
  0x71   :  { %1296 = vst.msk [vmem:[#allocation3 + $0xe8] sm:$0xf] %vm1267_vm1, %v9450_v34  ;;  %1298 = vst.msk [vmem:[#allocation3 + $0xf8] sm:$0xf] %vm1267_vm1, %v9450_v34 }
  0x72   :  { %8313 = vmatmul.mubr.bf16.gmra.mrb[40].mxu0 %v9261_v29  ;;  %1300 = vst.msk [vmem:[#allocation3 + $0x108] sm:$0xf] %vm1267_vm1, %v9450_v34  ;;  %1302 = vst.msk [vmem:[#allocation3 + $0x118] sm:$0xf] %vm1267_vm1, %v9450_v34 }
  0x73   :  { %8316 = vmatprep.mubr.bf16.mxu0 %v9262_v30  ;;  %1304 = vst.msk [vmem:[#allocation3 + $0x128] sm:$0xf] %vm1267_vm1, %v9450_v34  ;;  %1306 = vst.msk [vmem:[#allocation3 + $0x138] sm:$0xf] %vm1267_vm1, %v9450_v34 }
  0x74   :  { %1308 = vst.msk [vmem:[#allocation3 + $0x148] sm:$0xf] %vm1267_vm1, %v9450_v34  ;;  %1310 = vst.msk [vmem:[#allocation3 + $0x158] sm:$0xf] %vm1267_vm1, %v9450_v34 }
  0x75   :  { %1312 = vst.msk [vmem:[#allocation3 + $0x168] sm:$0xf] %vm1267_vm1, %v9450_v34  ;;  %1314 = vst.msk [vmem:[#allocation3 + $0x178] sm:$0xf] %vm1267_vm1, %v9450_v34 }
  0x7a   :  { %8317 = vmatmul.mubr.bf16.gmra.mrb[44].mxu0 %v9263_v31 }
  0x7b   :  { %8320 = vmatprep.mubr.bf16.mxu0 %v9264_v32 }
  0x82   :  { %8321 = vmatmul.mubr.bf16.gmra.mrb[48].mxu0 %v9265_v33 }
  0x83   :  { %8324 = vmatprep.mubr.bf16.mxu0 %v9266_v35 }
  0x8a   :  { %8325 = vmatmul.mubr.bf16.gmra.mrb[52].mxu0 %v9267_v36 }
  0x8b   :  { %8328 = vmatprep.mubr.bf16.mxu0 %v9268_v37 }
  0x92   :  { %8329 = vmatmul.mubr.bf16.gmra.mrb[56].mxu0 %v9269_v38 }
  0x93   :  { %8332 = vmatprep.mubr.bf16.mxu0 %v9270_v39 }
  0x9a   :  { %8333 = vmatmul.mubr.bf16.gmra.mrb[60].mxu0 %v9271_v40 }
  0xf5   :  { %v8274_v42 = vpop.f32.mrb[0].mxu0 }
  0xf6   :  { %v412_v43 = vadd.f32 %v8274_v42, %v9687_v41  ;;  %v403_v44 = vpop.f32.mrb[1].mxu0 }
  0xf7   :  { %v404_v45 = vadd.f32 %v9687_v41, %v403_v44  ;;  %v8275_v46 = vpop.f32.mrb[2].mxu0 }
  0xf8   :  { %v9691_v47 = vmax.f32 %v412_v43, 0.0  ;;  %v415_v48 = vadd.f32 %v8275_v46, %v9687_v41  ;;  %v406_v49 = vpop.f32.mrb[3].mxu0 }
  0xf9   :  { %v9694_v50 = vmax.f32 %v404_v45, 0.0  ;;  %v407_v51 = vadd.f32 %v9687_v41, %v406_v49 }
  0xfa   :  { %v9699_v53 = vmax.f32 %v415_v48, 0.0  ;;  %v858_v55 = vmul.f32 %v9691_v47, %v9691_v47  ;;  %v726_v60 = vsel %vm722_vm0, %v9691_v47, 0.0 }
  0xfb   :  { %v856_v52 = vmul.f32 %v9694_v50, %v9694_v50  ;;  %v9701_v54 = vmax.f32 %v407_v51, 0.0  ;;  %v723_v56 = vsel %vm722_vm0, %v9694_v50, 0.0 }
  0xfc   :  { %v859_v1 = vmul.f32 %v9699_v53, %v9699_v53  ;;  %v923_v5 = vsel %vm722_vm0, %v858_v55, 0.0  ;;  %v728_v10 = vsel %vm722_vm0, %v9699_v53, 0.0 }
  0xfd   :  { %v724_v57 = vsel %vm722_vm0, %v9701_v54, 0.0  ;;  %v857_v58 = vmul.f32 %v9701_v54, %v9701_v54  ;;  %v8278_v59 = vpop.f32.mrb[4].mxu0  ;;  %v920_v0 = vsel %vm722_vm0, %v856_v52, 0.0 }
  0xfe   :  { %v725_v61 = vadd.f32 %v724_v57, %v723_v56  ;;  %v428_v62 = vadd.f32 %v8278_v59, %v9687_v41  ;;  %v419_v63 = vpop.f32.mrb[5].mxu0  ;;  %v925_v16 = vsel %vm722_vm0, %v859_v1, 0.0 }
  0xff   :  { %v921_v2 = vsel %vm722_vm0, %v857_v58, 0.0  ;;  %v420_v3 = vadd.f32 %v9687_v41, %v419_v63  ;;  %v8279_v4 = vpop.f32.mrb[6].mxu0 }
 0x100   :  { %v727_v6 = vadd.f32 %v726_v60, %v725_v61  ;;  %v922_v7 = vadd.f32 %v921_v2, %v920_v0  ;;  %v431_v8 = vadd.f32 %v8279_v4, %v9687_v41  ;;  %v422_v9 = vpop.f32.mrb[7].mxu0  ;;  %v9723_v11 = vmax.f32 %v428_v62, 0.0 }
 0x101   :  { %v9725_v12 = vmax.f32 %v420_v3, 0.0  ;;  %v423_v13 = vadd.f32 %v9687_v41, %v422_v9 }
 0x102   :  { %v924_v14 = vadd.f32 %v923_v5, %v922_v7  ;;  %v729_v15 = vadd.f32 %v728_v10, %v727_v6  ;;  %v9735_v22 = vmax.f32 %v431_v8, 0.0  ;;  %v862_v23 = vmul.f32 %v9723_v11, %v9723_v11 }
 0x103   :  { %v730_v17 = vsel %vm722_vm0, %v9725_v12, 0.0  ;;  %v860_v18 = vmul.f32 %v9725_v12, %v9725_v12  ;;  %v9733_v19 = vmax.f32 %v423_v13, 0.0  ;;  %v734_v32 = vsel %vm722_vm0, %v9723_v11, 0.0 }
 0x104   :  { %v731_v20 = vadd.f32 %v730_v17, %v729_v15  ;;  %v926_v21 = vadd.f32 %v925_v16, %v924_v14  ;;  %v863_v35 = vmul.f32 %v9735_v22, %v9735_v22  ;;  %v736_v40 = vsel %vm722_vm0, %v9735_v22, 0.0 }
 0x105   :  { %v927_v24 = vsel %vm722_vm0, %v860_v18, 0.0  ;;  %v732_v25 = vsel %vm722_vm0, %v9733_v19, 0.0  ;;  %v8282_v26 = vpop.f32.mrb[8].mxu0  ;;  %v861_v29 = vmul.f32 %v9733_v19, %v9733_v19  ;;  %v931_v45 = vsel %vm722_vm0, %v862_v23, 0.0 }
 0x106   :  { %v928_v27 = vadd.f32 %v927_v24, %v926_v21  ;;  %v733_v28 = vadd.f32 %v732_v25, %v731_v20  ;;  %v444_v30 = vadd.f32 %v8282_v26, %v9687_v41  ;;  %v435_v31 = vpop.f32.mrb[9].mxu0  ;;  %v933_v56 = vsel %vm722_vm0, %v863_v35, 0.0 }
 0x107   :  { %v436_v33 = vadd.f32 %v9687_v41, %v435_v31  ;;  %v8283_v34 = vpop.f32.mrb[10].mxu0  ;;  %v929_v37 = vsel %vm722_vm0, %v861_v29, 0.0 }
 0x108   :  { %v735_v36 = vadd.f32 %v734_v32, %v733_v28  ;;  %v447_v38 = vadd.f32 %v8283_v34, %v9687_v41  ;;  %v438_v39 = vpop.f32.mrb[11].mxu0  ;;  %v930_v42 = vadd.f32 %v929_v37, %v928_v27  ;;  %v9758_v46 = vmax.f32 %v444_v30, 0.0 }
 0x109   :  { %v9754_v43 = vmax.f32 %v436_v33, 0.0  ;;  %v439_v44 = vadd.f32 %v9687_v41, %v438_v39 }
 0x10a   :  { %v737_v48 = vadd.f32 %v736_v40, %v735_v36  ;;  %v932_v49 = vadd.f32 %v931_v45, %v930_v42  ;;  %v9767_v58 = vmax.f32 %v447_v38, 0.0  ;;  %v866_v0 = vmul.f32 %v9758_v46, %v9758_v46 }
 0x10b   :  { %v738_v51 = vsel %vm722_vm0, %v9754_v43, 0.0  ;;  %v864_v52 = vmul.f32 %v9754_v43, %v9754_v43  ;;  %v9764_v55 = vmax.f32 %v439_v44, 0.0  ;;  %v742_v4 = vsel %vm722_vm0, %v9758_v46, 0.0 }
 0x10c   :  { %v739_v57 = vadd.f32 %v738_v51, %v737_v48  ;;  %v934_v59 = vadd.f32 %v933_v56, %v932_v49  ;;  %v867_v9 = vmul.f32 %v9767_v58, %v9767_v58  ;;  %v744_v15 = vsel %vm722_vm0, %v9767_v58, 0.0 }
 0x10d   :  { %v935_v60 = vsel %vm722_vm0, %v864_v52, 0.0  ;;  %v740_v61 = vsel %vm722_vm0, %v9764_v55, 0.0  ;;  %v865_v62 = vmul.f32 %v9764_v55, %v9764_v55  ;;  %v8286_v63 = vpop.f32.mrb[12].mxu0  ;;  %v939_v20 = vsel %vm722_vm0, %v866_v0, 0.0 }
 0x10e   :  { %v741_v1 = vadd.f32 %v740_v61, %v739_v57  ;;  %v460_v2 = vadd.f32 %v8286_v63, %v9687_v41  ;;  %v451_v3 = vpop.f32.mrb[13].mxu0  ;;  %v936_v5 = vadd.f32 %v935_v60, %v934_v59  ;;  %v941_v28 = vsel %vm722_vm0, %v867_v9, 0.0 }
 0x10f   :  { %v937_v6 = vsel %vm722_vm0, %v865_v62, 0.0  ;;  %v452_v7 = vadd.f32 %v9687_v41, %v451_v3  ;;  %v8287_v8 = vpop.f32.mrb[14].mxu0 }
 0x110   :  { %v743_v10 = vadd.f32 %v742_v4, %v741_v1  ;;  %v463_v13 = vadd.f32 %v8287_v8, %v9687_v41  ;;  %v454_v14 = vpop.f32.mrb[15].mxu0  ;;  %v938_v16 = vadd.f32 %v937_v6, %v936_v5  ;;  %v9790_v21 = vmax.f32 %v460_v2, 0.0 }
 0x111   :  { %v9786_v17 = vmax.f32 %v452_v7, 0.0  ;;  %v455_v18 = vadd.f32 %v9687_v41, %v454_v14 }
 0x112   :  { %v745_v23 = vadd.f32 %v744_v15, %v743_v10  ;;  %v940_v24 = vadd.f32 %v939_v20, %v938_v16  ;;  %v9799_v30 = vmax.f32 %v463_v13, 0.0  ;;  %v870_v36 = vmul.f32 %v9790_v21, %v9790_v21 }
 0x113   :  { %v746_v25 = vsel %vm722_vm0, %v9786_v17, 0.0  ;;  %v868_v26 = vmul.f32 %v9786_v17, %v9786_v17  ;;  %v9796_v27 = vmax.f32 %v455_v18, 0.0  ;;  %v750_v40 = vsel %vm722_vm0, %v9790_v21, 0.0 }
 0x114   :  { %v747_v29 = vadd.f32 %v746_v25, %v745_v23  ;;  %v942_v31 = vadd.f32 %v941_v28, %v940_v24  ;;  %v871_v49 = vmul.f32 %v9799_v30, %v9799_v30  ;;  %v752_v57 = vsel %vm722_vm0, %v9799_v30, 0.0 }
 0x115   :  { %v943_v32 = vsel %vm722_vm0, %v868_v26, 0.0  ;;  %v748_v33 = vsel %vm722_vm0, %v9796_v27, 0.0  ;;  %v869_v34 = vmul.f32 %v9796_v27, %v9796_v27  ;;  %v8290_v35 = vpop.f32.mrb[16].mxu0  ;;  %v947_v62 = vsel %vm722_vm0, %v870_v36, 0.0 }
 0x116   :  { %v749_v37 = vadd.f32 %v748_v33, %v747_v29  ;;  %v476_v38 = vadd.f32 %v8290_v35, %v9687_v41  ;;  %v467_v39 = vpop.f32.mrb[17].mxu0  ;;  %v944_v42 = vadd.f32 %v943_v32, %v942_v31  ;;  %v949_v5 = vsel %vm722_vm0, %v871_v49, 0.0 }
 0x117   :  { %v945_v44 = vsel %vm722_vm0, %v869_v34, 0.0  ;;  %v468_v45 = vadd.f32 %v9687_v41, %v467_v39  ;;  %v8291_v48 = vpop.f32.mrb[18].mxu0 }
 0x118   :  { %v751_v51 = vadd.f32 %v750_v40, %v749_v37  ;;  %v479_v52 = vadd.f32 %v8291_v48, %v9687_v41  ;;  %v470_v56 = vpop.f32.mrb[19].mxu0  ;;  %v946_v59 = vadd.f32 %v945_v44, %v944_v42  ;;  %v9822_v63 = vmax.f32 %v476_v38, 0.0 }
 0x119   :  { %v9818_v60 = vmax.f32 %v468_v45, 0.0  ;;  %v471_v61 = vadd.f32 %v9687_v41, %v470_v56 }
 0x11a   :  { %v753_v0 = vadd.f32 %v752_v57, %v751_v51  ;;  %v948_v1 = vadd.f32 %v947_v62, %v946_v59  ;;  %v9831_v7 = vmax.f32 %v479_v52, 0.0  ;;  %v874_v15 = vmul.f32 %v9822_v63, %v9822_v63 }
 0x11b   :  { %v754_v2 = vsel %vm722_vm0, %v9818_v60, 0.0  ;;  %v872_v3 = vmul.f32 %v9818_v60, %v9818_v60  ;;  %v9828_v4 = vmax.f32 %v471_v61, 0.0  ;;  %v758_v23 = vsel %vm722_vm0, %v9822_v63, 0.0 }
 0x11c   :  { %v755_v6 = vadd.f32 %v754_v2, %v753_v0  ;;  %v950_v8 = vadd.f32 %v949_v5, %v948_v1  ;;  %v875_v29 = vmul.f32 %v9831_v7, %v9831_v7  ;;  %v760_v34 = vsel %vm722_vm0, %v9831_v7, 0.0 }
 0x11d   :  { %v951_v9 = vsel %vm722_vm0, %v872_v3, 0.0  ;;  %v756_v10 = vsel %vm722_vm0, %v9828_v4, 0.0  ;;  %v873_v13 = vmul.f32 %v9828_v4, %v9828_v4  ;;  %v8294_v14 = vpop.f32.mrb[20].mxu0  ;;  %v955_v38 = vsel %vm722_vm0, %v874_v15, 0.0 }
 0x11e   :  { %v757_v16 = vadd.f32 %v756_v10, %v755_v6  ;;  %v492_v18 = vadd.f32 %v8294_v14, %v9687_v41  ;;  %v483_v20 = vpop.f32.mrb[21].mxu0  ;;  %v952_v24 = vadd.f32 %v951_v9, %v950_v8  ;;  %v957_v49 = vsel %vm722_vm0, %v875_v29, 0.0 }
 0x11f   :  { %v953_v25 = vsel %vm722_vm0, %v873_v13, 0.0  ;;  %v484_v26 = vadd.f32 %v9687_v41, %v483_v20  ;;  %v8295_v28 = vpop.f32.mrb[22].mxu0 }
 0x120   :  { %v759_v31 = vadd.f32 %v758_v23, %v757_v16  ;;  %v495_v32 = vadd.f32 %v8295_v28, %v9687_v41  ;;  %v486_v33 = vpop.f32.mrb[23].mxu0  ;;  %v954_v35 = vadd.f32 %v953_v25, %v952_v24  ;;  %v9854_v39 = vmax.f32 %v492_v18, 0.0 }
 0x121   :  { %v9850_v36 = vmax.f32 %v484_v26, 0.0  ;;  %v487_v37 = vadd.f32 %v9687_v41, %v486_v33 }
 0x122   :  { %v761_v40 = vadd.f32 %v760_v34, %v759_v31  ;;  %v956_v42 = vadd.f32 %v955_v38, %v954_v35  ;;  %v9863_v52 = vmax.f32 %v495_v32, 0.0  ;;  %v878_v0 = vmul.f32 %v9854_v39, %v9854_v39 }
 0x123   :  { %v762_v44 = vsel %vm722_vm0, %v9850_v36, 0.0  ;;  %v876_v45 = vmul.f32 %v9850_v36, %v9850_v36  ;;  %v9860_v48 = vmax.f32 %v487_v37, 0.0  ;;  %v766_v5 = vsel %vm722_vm0, %v9854_v39, 0.0 }
 0x124   :  { %v763_v51 = vadd.f32 %v762_v44, %v761_v40  ;;  %v958_v56 = vadd.f32 %v957_v49, %v956_v42  ;;  %v879_v13 = vmul.f32 %v9863_v52, %v9863_v52  ;;  %v768_v18 = vsel %vm722_vm0, %v9863_v52, 0.0 }
 0x125   :  { %v959_v57 = vsel %vm722_vm0, %v876_v45, 0.0  ;;  %v764_v59 = vsel %vm722_vm0, %v9860_v48, 0.0  ;;  %v877_v61 = vmul.f32 %v9860_v48, %v9860_v48  ;;  %v8298_v62 = vpop.f32.mrb[24].mxu0  ;;  %v963_v25 = vsel %vm722_vm0, %v878_v0, 0.0 }
 0x126   :  { %v765_v1 = vadd.f32 %v764_v59, %v763_v51  ;;  %v508_v2 = vadd.f32 %v8298_v62, %v9687_v41  ;;  %v499_v3 = vpop.f32.mrb[25].mxu0  ;;  %v960_v6 = vadd.f32 %v959_v57, %v958_v56  ;;  %v965_v34 = vsel %vm722_vm0, %v879_v13, 0.0 }
 0x127   :  { %v961_v8 = vsel %vm722_vm0, %v877_v61, 0.0  ;;  %v500_v9 = vadd.f32 %v9687_v41, %v499_v3  ;;  %v8299_v10 = vpop.f32.mrb[26].mxu0 }
 0x128   :  { %v767_v14 = vadd.f32 %v766_v5, %v765_v1  ;;  %v511_v15 = vadd.f32 %v8299_v10, %v9687_v41  ;;  %v502_v16 = vpop.f32.mrb[27].mxu0  ;;  %v962_v20 = vadd.f32 %v961_v8, %v960_v6  ;;  %v9886_v26 = vmax.f32 %v508_v2, 0.0 }
 0x129   :  { %v9882_v23 = vmax.f32 %v500_v9, 0.0  ;;  %v503_v24 = vadd.f32 %v9687_v41, %v502_v16 }
 0x12a   :  { %v769_v28 = vadd.f32 %v768_v18, %v767_v14  ;;  %v964_v29 = vadd.f32 %v963_v25, %v962_v20  ;;  %v9895_v37 = vmax.f32 %v511_v15, 0.0  ;;  %v882_v49 = vmul.f32 %v9886_v26, %v9886_v26 }
 0x12b   :  { %v770_v31 = vsel %vm722_vm0, %v9882_v23, 0.0  ;;  %v880_v32 = vmul.f32 %v9882_v23, %v9882_v23  ;;  %v9892_v33 = vmax.f32 %v503_v24, 0.0  ;;  %v774_v59 = vsel %vm722_vm0, %v9886_v26, 0.0 }
 0x12c   :  { %v771_v35 = vadd.f32 %v770_v31, %v769_v28  ;;  %v966_v38 = vadd.f32 %v965_v34, %v964_v29  ;;  %v883_v2 = vmul.f32 %v9895_v37, %v9895_v37  ;;  %v776_v8 = vsel %vm722_vm0, %v9895_v37, 0.0 }
 0x12d   :  { %v967_v40 = vsel %vm722_vm0, %v880_v32, 0.0  ;;  %v772_v42 = vsel %vm722_vm0, %v9892_v33, 0.0  ;;  %v881_v44 = vmul.f32 %v9892_v33, %v9892_v33  ;;  %v8302_v45 = vpop.f32.mrb[28].mxu0  ;;  %v971_v14 = vsel %vm722_vm0, %v882_v49, 0.0 }
 0x12e   :  { %v773_v51 = vadd.f32 %v772_v42, %v771_v35  ;;  %v524_v56 = vadd.f32 %v8302_v45, %v9687_v41  ;;  %v515_v57 = vpop.f32.mrb[29].mxu0  ;;  %v968_v61 = vadd.f32 %v967_v40, %v966_v38  ;;  %v973_v28 = vsel %vm722_vm0, %v883_v2, 0.0 }
 0x12f   :  { %v969_v62 = vsel %vm722_vm0, %v881_v44, 0.0  ;;  %v516_v0 = vadd.f32 %v9687_v41, %v515_v57  ;;  %v8303_v1 = vpop.f32.mrb[30].mxu0 }
 0x130   :  { %v775_v3 = vadd.f32 %v774_v59, %v773_v51  ;;  %v527_v5 = vadd.f32 %v8303_v1, %v9687_v41  ;;  %v518_v6 = vpop.f32.mrb[31].mxu0  ;;  %v970_v9 = vadd.f32 %v969_v62, %v968_v61  ;;  %v9918_v15 = vmax.f32 %v524_v56, 0.0 }
 0x131   :  { %v9914_v10 = vmax.f32 %v516_v0, 0.0  ;;  %v519_v13 = vadd.f32 %v9687_v41, %v518_v6 }
 0x132   :  { %v777_v16 = vadd.f32 %v776_v8, %v775_v3  ;;  %v972_v18 = vadd.f32 %v971_v14, %v970_v9  ;;  %v9927_v31 = vmax.f32 %v527_v5, 0.0  ;;  %v886_v42 = vmul.f32 %v9918_v15, %v9918_v15 }
 0x133   :  { %v778_v20 = vsel %vm722_vm0, %v9914_v10, 0.0  ;;  %v884_v24 = vmul.f32 %v9914_v10, %v9914_v10  ;;  %v9924_v25 = vmax.f32 %v519_v13, 0.0  ;;  %v782_v51 = vsel %vm722_vm0, %v9918_v15, 0.0 }
 0x134   :  { %v779_v29 = vadd.f32 %v778_v20, %v777_v16  ;;  %v974_v32 = vadd.f32 %v973_v28, %v972_v18  ;;  %v887_v62 = vmul.f32 %v9927_v31, %v9927_v31  ;;  %v784_v3 = vsel %vm722_vm0, %v9927_v31, 0.0 }
 0x135   :  { %v975_v34 = vsel %vm722_vm0, %v884_v24, 0.0  ;;  %v780_v35 = vsel %vm722_vm0, %v9924_v25, 0.0  ;;  %v885_v38 = vmul.f32 %v9924_v25, %v9924_v25  ;;  %v8306_v40 = vpop.f32.mrb[32].mxu0  ;;  %v979_v9 = vsel %vm722_vm0, %v886_v42, 0.0 }
 0x136   :  { %v781_v44 = vadd.f32 %v780_v35, %v779_v29  ;;  %v540_v45 = vadd.f32 %v8306_v40, %v9687_v41  ;;  %v531_v49 = vpop.f32.mrb[33].mxu0  ;;  %v976_v56 = vadd.f32 %v975_v34, %v974_v32  ;;  %v981_v28 = vsel %vm722_vm0, %v887_v62, 0.0 }
 0x137   :  { %v977_v57 = vsel %vm722_vm0, %v885_v38, 0.0  ;;  %v532_v59 = vadd.f32 %v9687_v41, %v531_v49  ;;  %v8307_v61 = vpop.f32.mrb[34].mxu0 }
 0x138   :  { %v783_v0 = vadd.f32 %v782_v51, %v781_v44  ;;  %v543_v1 = vadd.f32 %v8307_v61, %v9687_v41  ;;  %v534_v2 = vpop.f32.mrb[35].mxu0  ;;  %v978_v5 = vadd.f32 %v977_v57, %v976_v56  ;;  %v9950_v13 = vmax.f32 %v540_v45, 0.0 }
 0x139   :  { %v9946_v6 = vmax.f32 %v532_v59, 0.0  ;;  %v535_v8 = vadd.f32 %v9687_v41, %v534_v2 }
 0x13a   :  { %v785_v14 = vadd.f32 %v784_v3, %v783_v0  ;;  %v980_v16 = vadd.f32 %v979_v9, %v978_v5  ;;  %v9959_v32 = vmax.f32 %v543_v1, 0.0  ;;  %v890_v44 = vmul.f32 %v9950_v13, %v9950_v13 }
 0x13b   :  { %v786_v18 = vsel %vm722_vm0, %v9946_v6, 0.0  ;;  %v888_v20 = vmul.f32 %v9946_v6, %v9946_v6  ;;  %v9956_v24 = vmax.f32 %v535_v8, 0.0  ;;  %v790_v56 = vsel %vm722_vm0, %v9950_v13, 0.0 }
 0x13c   :  { %v787_v29 = vadd.f32 %v786_v18, %v785_v14  ;;  %v982_v34 = vadd.f32 %v981_v28, %v980_v16  ;;  %v891_v0 = vmul.f32 %v9959_v32, %v9959_v32  ;;  %v792_v5 = vsel %vm722_vm0, %v9959_v32, 0.0 }
 0x13d   :  { %v983_v35 = vsel %vm722_vm0, %v888_v20, 0.0  ;;  %v788_v38 = vsel %vm722_vm0, %v9956_v24, 0.0  ;;  %v889_v40 = vmul.f32 %v9956_v24, %v9956_v24  ;;  %v8310_v42 = vpop.f32.mrb[36].mxu0  ;;  %v987_v16 = vsel %vm722_vm0, %v890_v44, 0.0 }
 0x13e   :  { %v789_v45 = vadd.f32 %v788_v38, %v787_v29  ;;  %v556_v49 = vadd.f32 %v8310_v42, %v9687_v41  ;;  %v547_v51 = vpop.f32.mrb[37].mxu0  ;;  %v984_v57 = vadd.f32 %v983_v35, %v982_v34  ;;  %v989_v38 = vsel %vm722_vm0, %v891_v0, 0.0 }
 0x13f   :  { %v985_v59 = vsel %vm722_vm0, %v889_v40, 0.0  ;;  %v548_v61 = vadd.f32 %v9687_v41, %v547_v51  ;;  %v8311_v62 = vpop.f32.mrb[38].mxu0 }
 0x140   :  { %v791_v1 = vadd.f32 %v790_v56, %v789_v45  ;;  %v559_v2 = vadd.f32 %v8311_v62, %v9687_v41  ;;  %v550_v3 = vpop.f32.mrb[39].mxu0  ;;  %v986_v8 = vadd.f32 %v985_v59, %v984_v57  ;;  %v9982_v18 = vmax.f32 %v556_v49, 0.0 }
 0x141   :  { %v9978_v9 = vmax.f32 %v548_v61, 0.0  ;;  %v551_v14 = vadd.f32 %v9687_v41, %v550_v3 }
 0x142   :  { %12695 = vst [vmem:[#allocation9_spill] sm:$0xff] %v9982_v18  ;;  %v793_v20 = vadd.f32 %v792_v5, %v791_v1  ;;  %v988_v28 = vadd.f32 %v987_v16, %v986_v8  ;;  %v9991_v42 = vmax.f32 %v559_v2, 0.0  ;;  %v894_v57 = vmul.f32 %v9982_v18, %v9982_v18 }
 0x143   :  { %v794_v29 = vsel %vm722_vm0, %v9978_v9, 0.0  ;;  %v892_v34 = vmul.f32 %v9978_v9, %v9978_v9  ;;  %v9988_v35 = vmax.f32 %v551_v14, 0.0  ;;  %v798_v0 = vsel %vm722_vm0, %v9982_v18, 0.0 }
 0x144   :  { %v795_v40 = vadd.f32 %v794_v29, %v793_v20  ;;  %12696 = vst [vmem:[#allocation10_spill] sm:$0xff] %v9991_v42  ;;  %v990_v45 = vadd.f32 %v989_v38, %v988_v28  ;;  %v895_v8 = vmul.f32 %v9991_v42, %v9991_v42  ;;  %v800_v28 = vsel %vm722_vm0, %v9991_v42, 0.0 }
 0x145   :  { %v991_v44 = vsel %vm722_vm0, %v892_v34, 0.0  ;;  %v796_v49 = vsel %vm722_vm0, %v9988_v35, 0.0  ;;  %v893_v51 = vmul.f32 %v9988_v35, %v9988_v35  ;;  %v8314_v56 = vpop.f32.mrb[40].mxu0 }
 0x146   :  { %v797_v59 = vadd.f32 %v796_v49, %v795_v40  ;;  %v572_v61 = vadd.f32 %v8314_v56, %v9687_v41  ;;  %v563_v62 = vpop.f32.mrb[41].mxu0  ;;  %v992_v1 = vadd.f32 %v991_v44, %v990_v45  ;;  %v995_v40 = vsel %vm722_vm0, %v894_v57, 0.0 }
 0x147   :  { %v993_v2 = vsel %vm722_vm0, %v893_v51, 0.0  ;;  %v564_v3 = vadd.f32 %v9687_v41, %v563_v62  ;;  %v8315_v5 = vpop.f32.mrb[42].mxu0  ;;  %v997_v62 = vsel %vm722_vm0, %v895_v8, 0.0 }
 0x148   :  { %v799_v14 = vadd.f32 %v798_v0, %v797_v59  ;;  %v575_v16 = vadd.f32 %v8315_v5, %v9687_v41  ;;  %v566_v20 = vpop.f32.mrb[43].mxu0  ;;  %v994_v29 = vadd.f32 %v993_v2, %v992_v1  ;;  %v10014_v45 = vmax.f32 %v572_v61, 0.0 }
 0x149   :  { %v10010_v34 = vmax.f32 %v564_v3, 0.0  ;;  %v567_v38 = vadd.f32 %v9687_v41, %v566_v20 }
 0x14a   :  { %12698 = vst [vmem:[#allocation12_spill] sm:$0xff] %v10014_v45  ;;  %v801_v44 = vadd.f32 %v800_v28, %v799_v14  ;;  %v996_v49 = vadd.f32 %v995_v40, %v994_v29  ;;  %v10023_v1 = vmax.f32 %v575_v16, 0.0  ;;  %v898_v14 = vmul.f32 %v10014_v45, %v10014_v45 }
 0x14b   :  { %12697 = vst [vmem:[#allocation11_spill] sm:$0xff] %v10010_v34  ;;  %v802_v51 = vsel %vm722_vm0, %v10010_v34, 0.0  ;;  %v896_v56 = vmul.f32 %v10010_v34, %v10010_v34  ;;  %v10020_v59 = vmax.f32 %v567_v38, 0.0  ;;  %v806_v16 = vsel %vm722_vm0, %v10014_v45, 0.0 }
 0x14c   :  { %v803_v0 = vadd.f32 %v802_v51, %v801_v44  ;;  %12700 = vst [vmem:[#allocation14_spill] sm:$0xff] %v10023_v1  ;;  %v998_v2 = vadd.f32 %v997_v62, %v996_v49  ;;  %v899_v49 = vmul.f32 %v10023_v1, %v10023_v1 }
 0x14d   :  { %12699 = vst [vmem:[#allocation13_spill] sm:$0xff] %v10020_v59  ;;  %v999_v57 = vsel %vm722_vm0, %v896_v56, 0.0  ;;  %v804_v61 = vsel %vm722_vm0, %v10020_v59, 0.0  ;;  %v897_v3 = vmul.f32 %v10020_v59, %v10020_v59  ;;  %v8318_v5 = vpop.f32.mrb[44].mxu0 }
 0x14e   :  { %v805_v20 = vadd.f32 %v804_v61, %v803_v0  ;;  %v588_v28 = vadd.f32 %v8318_v5, %v9687_v41  ;;  %v579_v8 = vpop.f32.mrb[45].mxu0  ;;  %v1000_v29 = vadd.f32 %v999_v57, %v998_v2  ;;  %v808_v0 = vsel %vm722_vm0, %v10023_v1, 0.0 }
 0x14f   :  { %v1001_v38 = vsel %vm722_vm0, %v897_v3, 0.0  ;;  %v580_v40 = vadd.f32 %v9687_v41, %v579_v8  ;;  %v8319_v44 = vpop.f32.mrb[46].mxu0  ;;  %v1003_v57 = vsel %vm722_vm0, %v898_v14, 0.0 }
 0x150   :  { %v807_v51 = vadd.f32 %v806_v16, %v805_v20  ;;  %v591_v56 = vadd.f32 %v8319_v44, %v9687_v41  ;;  %v582_v62 = vpop.f32.mrb[47].mxu0  ;;  %v1002_v61 = vadd.f32 %v1001_v38, %v1000_v29  ;;  %v10046_v3 = vmax.f32 %v588_v28, 0.0 }
 0x151   :  { %v10042_v5 = vmax.f32 %v580_v40, 0.0  ;;  %v583_v2 = vadd.f32 %v9687_v41, %v582_v62  ;;  %v1005_v29 = vsel %vm722_vm0, %v899_v49, 0.0 }
 0x152   :  { %12702 = vst [vmem:[#allocation16_spill] sm:$0xff] %v10046_v3  ;;  %v809_v8 = vadd.f32 %v808_v0, %v807_v51  ;;  %v1004_v45 = vadd.f32 %v1003_v57, %v1002_v61  ;;  %v10055_v40 = vmax.f32 %v591_v56, 0.0  ;;  %v902_v61 = vmul.f32 %v10046_v3, %v10046_v3 }
 0x153   :  { %12701 = vst [vmem:[#allocation15_spill] sm:$0xff] %v10042_v5  ;;  %v810_v20 = vsel %vm722_vm0, %v10042_v5, 0.0  ;;  %v900_v16 = vmul.f32 %v10042_v5, %v10042_v5  ;;  %v10052_v44 = vmax.f32 %v583_v2, 0.0  ;;  %v814_v56 = vsel %vm722_vm0, %v10046_v3, 0.0 }
 0x154   :  { %v811_v38 = vadd.f32 %v810_v20, %v809_v8  ;;  %12704 = vst [vmem:[#allocation18_spill] sm:$0xff] %v10055_v40  ;;  %v1006_v62 = vadd.f32 %v1005_v29, %v1004_v45  ;;  %v903_v29 = vmul.f32 %v10055_v40, %v10055_v40 }
 0x155   :  { %12703 = vst [vmem:[#allocation17_spill] sm:$0xff] %v10052_v44  ;;  %v1007_v14 = vsel %vm722_vm0, %v900_v16, 0.0  ;;  %v812_v28 = vsel %vm722_vm0, %v10052_v44, 0.0  ;;  %v901_v51 = vmul.f32 %v10052_v44, %v10052_v44  ;;  %v8322_v0 = vpop.f32.mrb[48].mxu0 }
 0x156   :  { %v813_v2 = vadd.f32 %v812_v28, %v811_v38  ;;  %v604_v57 = vadd.f32 %v8322_v0, %v9687_v41  ;;  %v595_v49 = vpop.f32.mrb[49].mxu0  ;;  %v1008_v45 = vadd.f32 %v1007_v14, %v1006_v62  ;;  %v816_v38 = vsel %vm722_vm0, %v10055_v40, 0.0 }
 0x157   :  { %v1009_v8 = vsel %vm722_vm0, %v901_v51, 0.0  ;;  %v596_v20 = vadd.f32 %v9687_v41, %v595_v49  ;;  %v8323_v16 = vpop.f32.mrb[50].mxu0  ;;  %v1011_v14 = vsel %vm722_vm0, %v902_v61, 0.0 }
 0x158   :  { %v815_v44 = vadd.f32 %v814_v56, %v813_v2  ;;  %v607_v5 = vadd.f32 %v8323_v16, %v9687_v41  ;;  %v598_v1 = vpop.f32.mrb[51].mxu0  ;;  %v1010_v28 = vadd.f32 %v1009_v8, %v1008_v45  ;;  %v10078_v51 = vmax.f32 %v604_v57, 0.0 }
 0x159   :  { %v10074_v0 = vmax.f32 %v596_v20, 0.0  ;;  %v599_v62 = vadd.f32 %v9687_v41, %v598_v1  ;;  %v1013_v45 = vsel %vm722_vm0, %v903_v29, 0.0 }
 0x15a   :  { %12706 = vst [vmem:[#allocation20_spill] sm:$0xff] %v10078_v51  ;;  %v817_v49 = vadd.f32 %v816_v38, %v815_v44  ;;  %v1012_v3 = vadd.f32 %v1011_v14, %v1010_v28  ;;  %v10087_v20 = vmax.f32 %v607_v5, 0.0  ;;  %v906_v28 = vmul.f32 %v10078_v51, %v10078_v51 }
 0x15b   :  { %12705 = vst [vmem:[#allocation19_spill] sm:$0xff] %v10074_v0  ;;  %v818_v2 = vsel %vm722_vm0, %v10074_v0, 0.0  ;;  %v904_v56 = vmul.f32 %v10074_v0, %v10074_v0  ;;  %v10084_v16 = vmax.f32 %v599_v62, 0.0  ;;  %v822_v5 = vsel %vm722_vm0, %v10078_v51, 0.0 }
 0x15c   :  { %v819_v8 = vadd.f32 %v818_v2, %v817_v49  ;;  %12708 = vst [vmem:[#allocation22_spill] sm:$0xff] %v10087_v20  ;;  %v1014_v1 = vadd.f32 %v1013_v45, %v1012_v3  ;;  %v907_v45 = vmul.f32 %v10087_v20, %v10087_v20 }
 0x15d   :  { %12707 = vst [vmem:[#allocation21_spill] sm:$0xff] %v10084_v16  ;;  %v1015_v61 = vsel %vm722_vm0, %v904_v56, 0.0  ;;  %v820_v44 = vsel %vm722_vm0, %v10084_v16, 0.0  ;;  %v905_v57 = vmul.f32 %v10084_v16, %v10084_v16  ;;  %v8326_v38 = vpop.f32.mrb[52].mxu0 }
 0x15e   :  { %v821_v62 = vadd.f32 %v820_v44, %v819_v8  ;;  %v620_v14 = vadd.f32 %v8326_v38, %v9687_v41  ;;  %v611_v29 = vpop.f32.mrb[53].mxu0  ;;  %v1016_v3 = vadd.f32 %v1015_v61, %v1014_v1  ;;  %v824_v8 = vsel %vm722_vm0, %v10087_v20, 0.0 }
 0x15f   :  { %v1017_v49 = vsel %vm722_vm0, %v905_v57, 0.0  ;;  %v612_v2 = vadd.f32 %v9687_v41, %v611_v29  ;;  %v8327_v56 = vpop.f32.mrb[54].mxu0  ;;  %v1019_v61 = vsel %vm722_vm0, %v906_v28, 0.0 }
 0x160   :  { %v823_v16 = vadd.f32 %v822_v5, %v821_v62  ;;  %v623_v0 = vadd.f32 %v8327_v56, %v9687_v41  ;;  %v614_v40 = vpop.f32.mrb[55].mxu0  ;;  %v1018_v44 = vadd.f32 %v1017_v49, %v1016_v3  ;;  %v10110_v57 = vmax.f32 %v620_v14, 0.0 }
 0x161   :  { %v10106_v38 = vmax.f32 %v612_v2, 0.0  ;;  %v615_v1 = vadd.f32 %v9687_v41, %v614_v40  ;;  %v1021_v3 = vsel %vm722_vm0, %v907_v45, 0.0 }
 0x162   :  { %12710 = vst [vmem:[#allocation24_spill] sm:$0xff] %v10110_v57  ;;  %v825_v29 = vadd.f32 %v824_v8, %v823_v16  ;;  %v1020_v51 = vadd.f32 %v1019_v61, %v1018_v44  ;;  %v10119_v2 = vmax.f32 %v623_v0, 0.0  ;;  %v910_v44 = vmul.f32 %v10110_v57, %v10110_v57 }
 0x163   :  { %12709 = vst [vmem:[#allocation23_spill] sm:$0xff] %v10106_v38  ;;  %v826_v62 = vsel %vm722_vm0, %v10106_v38, 0.0  ;;  %v908_v5 = vmul.f32 %v10106_v38, %v10106_v38  ;;  %v10116_v56 = vmax.f32 %v615_v1, 0.0  ;;  %v830_v0 = vsel %vm722_vm0, %v10110_v57, 0.0 }
 0x164   :  { %v827_v49 = vadd.f32 %v826_v62, %v825_v29  ;;  %12712 = vst [vmem:[#allocation26_spill] sm:$0xff] %v10119_v2  ;;  %v1022_v40 = vadd.f32 %v1021_v3, %v1020_v51  ;;  %v911_v3 = vmul.f32 %v10119_v2, %v10119_v2 }
 0x165   :  { %12711 = vst [vmem:[#allocation25_spill] sm:$0xff] %v10116_v56  ;;  %v1023_v28 = vsel %vm722_vm0, %v908_v5, 0.0  ;;  %v828_v16 = vsel %vm722_vm0, %v10116_v56, 0.0  ;;  %v909_v14 = vmul.f32 %v10116_v56, %v10116_v56  ;;  %v8330_v8 = vpop.f32.mrb[56].mxu0 }
 0x166   :  { %v829_v1 = vadd.f32 %v828_v16, %v827_v49  ;;  %v636_v61 = vadd.f32 %v8330_v8, %v9687_v41  ;;  %v627_v45 = vpop.f32.mrb[57].mxu0  ;;  %v1024_v51 = vadd.f32 %v1023_v28, %v1022_v40  ;;  %v832_v49 = vsel %vm722_vm0, %v10119_v2, 0.0 }
 0x167   :  { %v1025_v29 = vsel %vm722_vm0, %v909_v14, 0.0  ;;  %v628_v62 = vadd.f32 %v9687_v41, %v627_v45  ;;  %v8331_v5 = vpop.f32.mrb[58].mxu0  ;;  %v1027_v28 = vsel %vm722_vm0, %v910_v44, 0.0 }
 0x168   :  { %v831_v56 = vadd.f32 %v830_v0, %v829_v1  ;;  %v639_v38 = vadd.f32 %v8331_v5, %v9687_v41  ;;  %v630_v20 = vpop.f32.mrb[59].mxu0  ;;  %v1026_v16 = vadd.f32 %v1025_v29, %v1024_v51  ;;  %v10142_v14 = vmax.f32 %v636_v61, 0.0 }
 0x169   :  { %v10138_v8 = vmax.f32 %v628_v62, 0.0  ;;  %v631_v40 = vadd.f32 %v9687_v41, %v630_v20  ;;  %v1029_v51 = vsel %vm722_vm0, %v911_v3, 0.0 }
 0x16a   :  { %12714 = vst [vmem:[#allocation28_spill] sm:$0xff] %v10142_v14  ;;  %v833_v45 = vadd.f32 %v832_v49, %v831_v56  ;;  %v1028_v57 = vadd.f32 %v1027_v28, %v1026_v16  ;;  %v10151_v62 = vmax.f32 %v639_v38, 0.0  ;;  %v914_v16 = vmul.f32 %v10142_v14, %v10142_v14 }
 0x16b   :  { %12713 = vst [vmem:[#allocation27_spill] sm:$0xff] %v10138_v8  ;;  %v834_v1 = vsel %vm722_vm0, %v10138_v8, 0.0  ;;  %v912_v0 = vmul.f32 %v10138_v8, %v10138_v8  ;;  %v10148_v5 = vmax.f32 %v631_v40, 0.0  ;;  %v838_v38 = vsel %vm722_vm0, %v10142_v14, 0.0 }
 0x16c   :  { %v835_v29 = vadd.f32 %v834_v1, %v833_v45  ;;  %12716 = vst [vmem:[#allocation30_spill] sm:$0xff] %v10151_v62  ;;  %v1030_v20 = vadd.f32 %v1029_v51, %v1028_v57  ;;  %v915_v51 = vmul.f32 %v10151_v62, %v10151_v62 }
 0x16d   :  { %12715 = vst [vmem:[#allocation29_spill] sm:$0xff] %v10148_v5  ;;  %v1031_v44 = vsel %vm722_vm0, %v912_v0, 0.0  ;;  %v836_v56 = vsel %vm722_vm0, %v10148_v5, 0.0  ;;  %v913_v61 = vmul.f32 %v10148_v5, %v10148_v5  ;;  %v8334_v49 = vpop.f32.mrb[60].mxu0 }
 0x16e   :  { %v837_v40 = vadd.f32 %v836_v56, %v835_v29  ;;  %v652_v28 = vadd.f32 %v8334_v49, %v9687_v41  ;;  %v643_v3 = vpop.f32.mrb[61].mxu0  ;;  %v1032_v57 = vadd.f32 %v1031_v44, %v1030_v20  ;;  %v840_v29 = vsel %vm722_vm0, %v10151_v62, 0.0 }
 0x16f   :  { %v1033_v45 = vsel %vm722_vm0, %v913_v61, 0.0  ;;  %v644_v1 = vadd.f32 %v9687_v41, %v643_v3  ;;  %v8335_v0 = vpop.f32.mrb[62].mxu0  ;;  %v1035_v44 = vsel %vm722_vm0, %v914_v16, 0.0  ;;  %v1037_v62 = vsel %vm722_vm0, %v915_v51, 0.0 }
 0x170   :  { %v839_v5 = vadd.f32 %v838_v38, %v837_v40  ;;  %v655_v8 = vadd.f32 %v8335_v0, %v9687_v41  ;;  %v646_v2 = vpop.f32.mrb[63].mxu0  ;;  %v1034_v56 = vadd.f32 %v1033_v45, %v1032_v57  ;;  %v10174_v61 = vmax.f32 %v652_v28, 0.0 }
 0x171   :  { %v10170_v49 = vmax.f32 %v644_v1, 0.0  ;;  %v647_v20 = vadd.f32 %v9687_v41, %v646_v2 }
 0x172   :  { %12718 = vst [vmem:[#allocation32_spill] sm:$0xff] %v10174_v61  ;;  %v841_v3 = vadd.f32 %v840_v29, %v839_v5  ;;  %v1036_v14 = vadd.f32 %v1035_v44, %v1034_v56  ;;  %v721_v45 = vmax.f32 %v655_v8, 0.0  ;;  %v918_v5 = vmul.f32 %v10174_v61, %v10174_v61 }
 0x173   :  { %12717 = vst [vmem:[#allocation31_spill] sm:$0xff] %v10170_v49  ;;  %v842_v40 = vsel %vm722_vm0, %v10170_v49, 0.0  ;;  %v916_v38 = vmul.f32 %v10170_v49, %v10170_v49  ;;  %v719_v0 = vmax.f32 %v647_v20, 0.0  ;;  %v846_v29 = vsel %vm722_vm0, %v10174_v61, 0.0 }
 0x174   :  { %v843_v57 = vadd.f32 %v842_v40, %v841_v3  ;;  %v1038_v1 = vadd.f32 %v1037_v62, %v1036_v14  ;;  %v919_v44 = vmul.f32 %v721_v45, %v721_v45  ;;  %v848_v8 = vsel %vm722_vm0, %v721_v45, 0.0 }
 0x175   :  { %v1039_v41 = vsel %vm722_vm0, %v916_v38, 0.0  ;;  %v844_v2 = vsel %vm722_vm0, %v719_v0, 0.0  ;;  %v917_v16 = vmul.f32 %v719_v0, %v719_v0  ;;  %v1043_v62 = vsel %vm722_vm0, %v918_v5, 0.0 }
 0x176   :  { %v845_v28 = vadd.f32 %v844_v2, %v843_v57  ;;  %v1040_v56 = vadd.f32 %v1039_v41, %v1038_v1  ;;  %v1045_v38 = vsel %vm722_vm0, %v919_v44, 0.0  ;;  %v1063_v44 = vlaneseq }
 0x177   :  { %v1041_v20 = vsel %vm722_vm0, %v917_v16, 0.0 }
 0x178   :  { %v847_v51 = vadd.f32 %v846_v29, %v845_v28  ;;  %v1042_v14 = vadd.f32 %v1041_v20, %v1040_v56 }
 0x17a   :  { %v849_v3 = vadd.f32 %v848_v8, %v847_v51  ;;  %v1044_v40 = vadd.f32 %v1043_v62, %v1042_v14  ;;  %v10191_v14 = vshrl.u32 %v1063_v44, 7  ;;  %v122_v62 = vld [vmem:[%s12573_s4] sm:$0x1]  ;;  %v12722_v44 = vld [vmem:[#allocation10_spill] sm:$0xff]  ;;  %s9455_s4 = smov [#allocation6]  }
 0x17c   :  { %v850_v49 = vrot.slane %v849_v3, 4  ;;  %v1046_v59 = vadd.f32 %v1045_v38, %v1044_v40  ;;  %12719 = vst [vmem:[#allocation33_spill] sm:$0xff] %v10191_v14  ;;  %v9273_v38 = vld [vmem:[%s12574_s5 + $0x80] sm:$0xff]  }
 0x17d   :  { %8496 = vmatprep.subr.bf16.mxu1 %v9273_v38 }
 0x17e   :  { %v851_v57 = vadd.f32 %v850_v49, %v849_v3  ;;  %v1047_v2 = vrot.slane %v1046_v59, 4  ;;  %8497 = vmatpush3.bf16.msra.mxu1 %v9273_v38  ;;  %v12727_v38 = vld [vmem:[#allocation15_spill] sm:$0xff] }
 0x180   :  { %v852_v34 = vrot.slane %v851_v57, 2  ;;  %v1048_v61 = vadd.f32 %v1047_v2, %v1046_v59  ;;  %v121_v59 = vld [vmem:[%s12572_s3] sm:$0x1]  ;;  %v9275_v2 = vld [vmem:[%s12574_s5 + $0x88] sm:$0xff]  }
 0x181   :  { %8498 = vmatprep.subr.bf16.mxu1 %v9275_v2 }
 0x182   :  { %v853_v1 = vadd.f32 %v852_v34, %v851_v57  ;;  %v1049_v41 = vrot.slane %v1048_v61, 2  ;;  %v10197_v34 = vsub.s32 0, %v10191_v14  ;;  %v9274_v57 = vld [vmem:[%s12574_s5 + $0x18] sm:$0xff]   ;;  %8499 = vmatpush3.bf16.msra.mxu1 %v9275_v2  ;;  %v12729_v2 = vld [vmem:[#allocation17_spill] sm:$0xff] }
 0x183   :  { %v12745_v14 = vld [vmem:[#allocation25_spill] sm:$0xff] }
 0x184   :  { %v854_v16 = vrot.slane %v853_v1, 1  ;;  %v1050_v42 = vadd.f32 %v1049_v41, %v1048_v61  ;;  %12720 = vst [vmem:[#allocation34_spill] sm:$0xff] %v10197_v34 }
 0x186   :  { %v855_v28 = vadd.f32 %v854_v16, %v853_v1  ;;  %v1051_v29 = vrot.slane %v1050_v42, 1 }
 0x188   :  { %v1053_v18 = vmul.f32 0.001953125, %v855_v28  ;;  %v1052_v56 = vadd.f32 %v1051_v29, %v1050_v42  ;;  %v9272_v42 = vld [vmem:[%s12574_s5 + $0x10] sm:$0xff]  }
 0x189   :  { %8336 = vmatprep.subr.bf16.mxu0 %v9272_v42 }
 0x18a   :  { %v1055_v20 = vmul.f32 %v1053_v18, %v1053_v18  ;;  %v1054_v5 = vmul.f32 0.001953125, %v1052_v56  ;;  %8337 = vmatpush3.bf16.msra.mxu0 %v9272_v42  ;;  %v12725_v42 = vld [vmem:[#allocation12_spill] sm:$0xff] }
 0x18b   :  { %8338 = vmatprep.subr.bf16.mxu0 %v9274_v57 }
 0x18c   :  { %v1056_v51 = vsub.f32 %v1054_v5, %v1055_v20 }
 0x18e   :  { %v1057_v8 = vadd.f32 1e-05, %v1056_v51  ;;  %8339 = vmatpush3.bf16.msra.mxu0 %v9274_v57 }
 0x190   :  { %9419 = vrsqrt.f32 %v1057_v8  ;;  %v12721_v8 = vld [vmem:[#allocation9_spill] sm:$0xff] }
 0x19a   :  { %v9420_v49 = vpop.eup %9419 }
 0x19b   :  { %v1059_v61 = vmul.f32 %v9420_v49, %v121_v59  ;;  %v12723_v59 = vld [vmem:[#allocation11_spill] sm:$0xff]  ;;  %v12724_v49 = vld [vmem:[#allocation13_spill] sm:$0xff] }
 0x19d   :  { %v1060_v3 = vmul.f32 %v1059_v61, %v1053_v18  ;;  %v10206_v40 = vrot.slane %v1059_v61, %v10197_v34 }
 0x19f   :  { %v1061_v1 = vsub.f32 %v122_v62, %v1060_v3  ;;  %v1129_v18 = vmul.f32 %v10206_v40, %v719_v0  ;;  %v1131_v41 = vmul.f32 %v10206_v40, %v721_v45  ;;  %v10221_v16 = vmul.f32 %v10206_v40, %v9694_v50  ;;  %v12726_v62 = vld [vmem:[#allocation14_spill] sm:$0xff] }
 0x1a0   :  { %v10225_v28 = vmul.f32 %v10206_v40, %v9701_v54  ;;  %v10229_v29 = vmul.f32 %v10206_v40, %v9691_v47  ;;  %v10233_v56 = vmul.f32 %v10206_v40, %v9699_v53  ;;  %v10237_v0 = vmul.f32 %v10206_v40, %v9725_v12 }
 0x1a1   :  { %v10240_v50 = vrot.slane %v1061_v1, %v10197_v34  ;;  %v10244_v54 = vmul.f32 %v10206_v40, %v9733_v19  ;;  %v10248_v47 = vmul.f32 %v10206_v40, %v9723_v11  ;;  %v10252_v53 = vmul.f32 %v10206_v40, %v9735_v22 }
 0x1a2   :  { %v10256_v12 = vmul.f32 %v10206_v40, %v9754_v43  ;;  %v10260_v45 = vmul.f32 %v10206_v40, %v9764_v55  ;;  %v10264_v19 = vmul.f32 %v10206_v40, %v9758_v46  ;;  %v10268_v11 = vmul.f32 %v10206_v40, %v9767_v58 }
 0x1a3   :  { %v1199_v22 = vadd.f32 %v10240_v50, %v1129_v18  ;;  %v1201_v20 = vadd.f32 %v10240_v50, %v1131_v41  ;;  %v10274_v43 = vmul.f32 %v10206_v40, %v9786_v17  ;;  %v10278_v55 = vmul.f32 %v10206_v40, %v9796_v27  ;;  %v12731_v18 = vld [vmem:[#allocation16_spill] sm:$0xff] }
 0x1a4   :  { %v10282_v46 = vmul.f32 %v10206_v40, %v9790_v21  ;;  %v10286_v58 = vmul.f32 %v10206_v40, %v9799_v30  ;;  %v10290_v5 = vmul.f32 %v10206_v40, %v9818_v60  ;;  %v10294_v17 = vmul.f32 %v10206_v40, %v9828_v4 }
 0x1a5   :  { %v1233_v27 = vmax.f32 %v1199_v22, %v1201_v20  ;;  %v10298_v51 = vmul.f32 %v10206_v40, %v9822_v63  ;;  %v10302_v21 = vmul.f32 %v10206_v40, %v9831_v7  ;;  %v10306_v30 = vmul.f32 %v10206_v40, %v9850_v36  ;;  %v12733_v22 = vld [vmem:[#allocation18_spill] sm:$0xff] }
 0x1a6   :  { %v10310_v60 = vmul.f32 %v10206_v40, %v9860_v48  ;;  %v10314_v4 = vmul.f32 %v10206_v40, %v9854_v39  ;;  %v10318_v63 = vmul.f32 %v10206_v40, %v9863_v52  ;;  %v10322_v7 = vmul.f32 %v10206_v40, %v9882_v23 }
 0x1a7   :  { %1265 = vst.msk [vmem:[#allocation2 + $0xf8] sm:$0xff] %vm722_vm0, %v1233_v27  ;;  %v10327_v36 = vmul.f32 %v10206_v40, %v9892_v33  ;;  %v10331_v48 = vmul.f32 %v10206_v40, %v9886_v26  ;;  %v10335_v39 = vmul.f32 %v10206_v40, %v9895_v37  ;;  %v10339_v52 = vmul.f32 %v10206_v40, %v9914_v10  ;;  %v12735_v27 = vld [vmem:[#allocation19_spill] sm:$0xff] }
 0x1a8   :  { %v10343_v23 = vmul.f32 %v10206_v40, %v9924_v25  ;;  %v10347_v33 = vmul.f32 %v10206_v40, %v9918_v15  ;;  %v10351_v26 = vmul.f32 %v10206_v40, %v9927_v31  ;;  %v10355_v37 = vmul.f32 %v10206_v40, %v9946_v6  ;;  %v9276_v6 = vld [vmem:[%s12574_s5 + $0x90] sm:$0xff]  }
 0x1a9   :  { %v10359_v10 = vmul.f32 %v10206_v40, %v9956_v24  ;;  %v10363_v25 = vmul.f32 %v10206_v40, %v9950_v13  ;;  %v10367_v15 = vmul.f32 %v10206_v40, %v9959_v32  ;;  %v10371_v31 = vmul.f32 %v10206_v40, %v9978_v9  ;;  %8516 = vmatprep.subr.bf16.mxu1 %v9276_v6  ;;  %v12739_v6 = vld [vmem:[#allocation20_spill] sm:$0xff] }
 0x1aa   :  { %v10378_v24 = vmul.f32 %v10206_v40, %v9988_v35  ;;  %v10382_v13 = vmul.f32 %v10206_v40, %v12721_v8  ;;  %v10386_v32 = vmul.f32 %v10206_v40, %v12722_v44  ;;  %v10390_v9 = vmul.f32 %v10206_v40, %v12723_v59  ;;  %v12737_v44 = vld [vmem:[#allocation21_spill] sm:$0xff] }
 0x1ab   :  { %v10394_v61 = vmul.f32 %v10206_v40, %v12724_v49  ;;  %v10398_v35 = vmul.f32 %v10206_v40, %v12725_v42  ;;  %v10402_v3 = vmul.f32 %v10206_v40, %v12726_v62  ;;  %v10406_v57 = vmul.f32 %v10206_v40, %v12727_v38  ;;  %v12741_v42 = vld [vmem:[#allocation22_spill] sm:$0xff]  ;;  %v12743_v38 = vld [vmem:[#allocation23_spill] sm:$0xff] }
 0x1ac   :  { %v10410_v1 = vmul.f32 %v10206_v40, %v12729_v2  ;;  %v10414_v41 = vmul.f32 %v10206_v40, %v12731_v18  ;;  %v10418_v20 = vmul.f32 %v10206_v40, %v12733_v22  ;;  %v10422_v8 = vmul.f32 %v10206_v40, %v12735_v27 }
 0x1ad   :  { %12728 = vst [vmem:[#allocation9_spill] sm:$0xff] %v10406_v57  ;;  %v10426_v59 = vmul.f32 %v10206_v40, %v12737_v44  ;;  %v10430_v49 = vmul.f32 %v10206_v40, %v12739_v6  ;;  %v10434_v62 = vmul.f32 %v10206_v40, %v12741_v42  ;;  %v10438_v2 = vmul.f32 %v10206_v40, %v12743_v38  ;;  %v12747_v44 = vld [vmem:[#allocation24_spill] sm:$0xff]  ;;  %v12749_v6 = vld [vmem:[#allocation26_spill] sm:$0xff]  ;;  %v12751_v42 = vld [vmem:[#allocation27_spill] sm:$0xff] }
 0x1ae   :  { %12730 = vst [vmem:[#allocation10_spill] sm:$0xff] %v10410_v1  ;;  %12732 = vst [vmem:[#allocation11_spill] sm:$0xff] %v10414_v41  ;;  %v1588_v18 = vld [vmem:[#allocation2 + $0xf8] sm:$0x1]  ;;  %v1604_v22 = vld [vmem:[#allocation2 + $0xf9] sm:$0x1]  ;;  %v10442_v34 = vmul.f32 %v10206_v40, %v12745_v14 }
 0x1af   :  { %12734 = vst [vmem:[#allocation13_spill] sm:$0xff] %v10418_v20  ;;  %12736 = vst [vmem:[#allocation12_spill] sm:$0xff] %v10422_v8  ;;  %v1652_v27 = vld [vmem:[#allocation2 + $0xfa] sm:$0x1]  ;;  %v1620_v38 = vmax.f32 %v1588_v18, %v1604_v22  ;;  %v1716_v8 = vld [vmem:[#allocation2 + $0xfc] sm:$0x1] }
 0x1b0   :  { %12738 = vst [vmem:[#allocation14_spill] sm:$0xff] %v10426_v59  ;;  %12740 = vst [vmem:[#allocation15_spill] sm:$0xff] %v10430_v49  ;;  %v10446_v59 = vmul.f32 %v10206_v40, %v12747_v44  ;;  %v10450_v49 = vmul.f32 %v10206_v40, %v12749_v6  ;;  %v1732_v20 = vld [vmem:[#allocation2 + $0xfd] sm:$0x1]  ;;  %v12753_v41 = vld [vmem:[#allocation29_spill] sm:$0xff] }
 0x1b1   :  { %12742 = vst [vmem:[#allocation17_spill] sm:$0xff] %v10434_v62  ;;  %12744 = vst [vmem:[#allocation16_spill] sm:$0xff] %v10438_v2  ;;  %v10454_v62 = vmul.f32 %v10206_v40, %v12751_v42  ;;  %v1668_v2 = vld [vmem:[#allocation2 + $0xfb] sm:$0x1]  ;;  %v10458_v14 = vmul.f32 %v10206_v40, %v12753_v41  ;;  %v1748_v1 = vmax.f32 %v1716_v8, %v1732_v20  ;;  %v1780_v42 = vld [vmem:[#allocation2 + $0xfe] sm:$0x1] }
 0x1b2   :  { %12746 = vst [vmem:[#allocation18_spill] sm:$0xff] %v10442_v34  ;;  %12748 = vst [vmem:[#allocation19_spill] sm:$0xff] %v10446_v59  ;;  %v12755_v34 = vld [vmem:[#allocation28_spill] sm:$0xff]  ;;  %v12756_v59 = vld [vmem:[#allocation30_spill] sm:$0xff]  ;;  %v10483_v20 = vadd.f32 %v10240_v50, %v10225_v28  ;;  %v10487_v8 = vadd.f32 %v10240_v50, %v10229_v29  ;;  %v10501_v28 = vadd.f32 %v10240_v50, %v10244_v54 }
 0x1b3   :  { %12750 = vst [vmem:[#allocation21_spill] sm:$0xff] %v10450_v49  ;;  %12752 = vst [vmem:[#allocation20_spill] sm:$0xff] %v10454_v62  ;;  %v10462_v44 = vmul.f32 %v10206_v40, %v12755_v34  ;;  %v10466_v6 = vmul.f32 %v10206_v40, %v12756_v59  ;;  %v1684_v49 = vmax.f32 %v1652_v27, %v1668_v2  ;;  %v1796_v62 = vld [vmem:[#allocation2 + $0xff] sm:$0x1]  ;;  %v12758_v57 = vld [vmem:[#allocation32_spill] sm:$0xff] }
 0x1b4   :  { %12754 = vst [vmem:[#allocation22_spill] sm:$0xff] %v10458_v14  ;;  %v12757_v18 = vld [vmem:[#allocation31_spill] sm:$0xff]  ;;  %v10474_v41 = vmul.f32 %v10206_v40, %v12758_v57  ;;  %v1812_v14 = vmax.f32 %v1780_v42, %v1796_v62  ;;  %1636 = vst.msk [vmem:[#allocation3 + $0x156] sm:$0x1] %vm1364_vm2, %v1620_v38  ;;  %v10479_v34 = vadd.f32 %v10240_v50, %v10221_v16 }
 0x1b5   :  { %v10470_v22 = vmul.f32 %v10206_v40, %v12757_v18  ;;  %1700 = vst.msk [vmem:[#allocation3 + $0x157] sm:$0x1] %vm1364_vm2, %v1684_v49  ;;  %1764 = vst.msk [vmem:[#allocation3 + $0x158] sm:$0x1] %vm1364_vm2, %v1748_v1  ;;  %v10493_v40 = vadd.f32 %v10240_v50, %v10233_v56  ;;  %v10497_v16 = vadd.f32 %v10240_v50, %v10237_v0  ;;  %v12759_v1 = vld [vmem:[#allocation9_spill] sm:$0xff]  ;;  %v12760_v59 = vld [vmem:[#allocation10_spill] sm:$0xff] }
 0x1b6   :  { %v10505_v29 = vadd.f32 %v10240_v50, %v10248_v47  ;;  %1828 = vst.msk [vmem:[#allocation3 + $0x159] sm:$0x1] %vm1364_vm2, %v1812_v14  ;;  %v10510_v57 = vadd.f32 %v10240_v50, %v10252_v53  ;;  %v10514_v56 = vadd.f32 %v10240_v50, %v10256_v12  ;;  %v10518_v0 = vadd.f32 %v10240_v50, %v10260_v45  ;;  %v12762_v49 = vld [vmem:[#allocation11_spill] sm:$0xff]  ;;  %v12763_v62 = vld [vmem:[#allocation13_spill] sm:$0xff]  ;;  %v12764_v27 = vld [vmem:[#allocation12_spill] sm:$0xff] }
 0x1b7   :  { %v10522_v54 = vadd.f32 %v10240_v50, %v10264_v19  ;;  %v10526_v47 = vadd.f32 %v10240_v50, %v10268_v11  ;;  %v10530_v53 = vadd.f32 %v10240_v50, %v10274_v43  ;;  %v10534_v12 = vadd.f32 %v10240_v50, %v10278_v55  ;;  %v12766_v38 = vld [vmem:[#allocation14_spill] sm:$0xff]  ;;  %v12768_v42 = vld [vmem:[#allocation15_spill] sm:$0xff] }
 0x1b8   :  { %v10538_v45 = vadd.f32 %v10240_v50, %v10282_v46  ;;  %v10542_v19 = vadd.f32 %v10240_v50, %v10286_v58  ;;  %v10546_v11 = vadd.f32 %v10240_v50, %v10290_v5  ;;  %v10550_v43 = vadd.f32 %v10240_v50, %v10294_v17 }
 0x1b9   :  { %v10554_v55 = vadd.f32 %v10240_v50, %v10298_v51  ;;  %v10558_v46 = vadd.f32 %v10240_v50, %v10302_v21  ;;  %v10562_v58 = vadd.f32 %v10240_v50, %v10306_v30  ;;  %v10566_v5 = vadd.f32 %v10240_v50, %v10310_v60 }
 0x1ba   :  { %v10570_v17 = vadd.f32 %v10240_v50, %v10314_v4  ;;  %v10574_v51 = vadd.f32 %v10240_v50, %v10318_v63  ;;  %v10578_v21 = vadd.f32 %v10240_v50, %v10322_v7  ;;  %v10582_v30 = vadd.f32 %v10240_v50, %v10327_v36 }
 0x1bb   :  { %v10586_v60 = vadd.f32 %v10240_v50, %v10331_v48  ;;  %v10590_v4 = vadd.f32 %v10240_v50, %v10335_v39  ;;  %v10594_v63 = vadd.f32 %v10240_v50, %v10339_v52  ;;  %v10598_v7 = vadd.f32 %v10240_v50, %v10343_v23 }
 0x1bc   :  { %v10602_v36 = vadd.f32 %v10240_v50, %v10347_v33  ;;  %v10606_v48 = vadd.f32 %v10240_v50, %v10351_v26  ;;  %v10610_v39 = vadd.f32 %v10240_v50, %v10355_v37  ;;  %v10614_v52 = vadd.f32 %v10240_v50, %v10359_v10 }
 0x1bd   :  { %v10618_v23 = vadd.f32 %v10240_v50, %v10363_v25  ;;  %v10622_v33 = vadd.f32 %v10240_v50, %v10367_v15  ;;  %v10626_v26 = vadd.f32 %v10240_v50, %v10371_v31  ;;  %v10630_v37 = vadd.f32 %v10240_v50, %v10378_v24 }
 0x1be   :  { %v10634_v10 = vadd.f32 %v10240_v50, %v10382_v13  ;;  %v10638_v25 = vadd.f32 %v10240_v50, %v10386_v32  ;;  %v10642_v15 = vadd.f32 %v10240_v50, %v10390_v9  ;;  %v10646_v31 = vadd.f32 %v10240_v50, %v10394_v61  ;;  %v9278_v13 = vld [vmem:[%s12574_s5] sm:$0xff]  }
 0x1bf   :  { %v10650_v24 = vadd.f32 %v10240_v50, %v10398_v35  ;;  %v10657_v32 = vadd.f32 %v10240_v50, %v10402_v3  ;;  %v10661_v9 = vadd.f32 %v10240_v50, %v12759_v1  ;;  %v10665_v61 = vadd.f32 %v10240_v50, %v12760_v59  ;;  %8356 = vmatprep.subr.bf16.mxu0 %v9278_v13  ;;  %v12769_v1 = vld [vmem:[#allocation17_spill] sm:$0xff]  ;;  %v12775_v13 = vld [vmem:[#allocation20_spill] sm:$0xff] }
 0x1c0   :  { %v10669_v35 = vadd.f32 %v10240_v50, %v12762_v49  ;;  %v10673_v2 = vadd.f32 %v10240_v50, %v12763_v62  ;;  %v10677_v3 = vadd.f32 %v10240_v50, %v12764_v27  ;;  %v10681_v14 = vadd.f32 %v10240_v50, %v12766_v38  ;;  %v12771_v49 = vld [vmem:[#allocation16_spill] sm:$0xff] }
 0x1c1   :  { %12761 = vst [vmem:[#allocation23_spill] sm:$0xff] %v10665_v61  ;;  %v10685_v18 = vadd.f32 %v10240_v50, %v12768_v42  ;;  %v10689_v59 = vadd.f32 %v10240_v50, %v12769_v1  ;;  %v10693_v62 = vadd.f32 %v10240_v50, %v12771_v49  ;;  %v12772_v61 = vld [vmem:[#allocation18_spill] sm:$0xff]  ;;  %v10709_v1 = vadd.f32 %v10240_v50, %v12775_v13 }
 0x1c2   :  { %12765 = vst [vmem:[#allocation25_spill] sm:$0xff] %v10677_v3  ;;  %12767 = vst [vmem:[#allocation24_spill] sm:$0xff] %v10681_v14  ;;  %v10697_v27 = vadd.f32 %v10240_v50, %v12772_v61  ;;  %v12773_v3 = vld [vmem:[#allocation19_spill] sm:$0xff]  ;;  %v12774_v14 = vld [vmem:[#allocation21_spill] sm:$0xff]  ;;  %v10717_v61 = vadd.f32 %v10240_v50, %v10462_v44  ;;  %v10729_v13 = vadd.f32 %v10240_v50, %v10474_v41 }
 0x1c3   :  { %12770 = vst [vmem:[#allocation26_spill] sm:$0xff] %v10689_v59  ;;  %v10701_v38 = vadd.f32 %v10240_v50, %v12773_v3  ;;  %v10705_v42 = vadd.f32 %v10240_v50, %v12774_v14  ;;  %v12776_v59 = vld [vmem:[#allocation22_spill] sm:$0xff]  ;;  %v10721_v3 = vadd.f32 %v10240_v50, %v10466_v6  ;;  %v10725_v14 = vadd.f32 %v10240_v50, %v10470_v22 }
 0x1c4   :  { %v10713_v49 = vadd.f32 %v10240_v50, %v12776_v59  ;;  %v1202_v59 = vmax.f32 %v10479_v34, %v10487_v8  ;;  %v1204_v44 = vmax.f32 %v10497_v16, %v10505_v29  ;;  %v1205_v6 = vmax.f32 %v10501_v28, %v10510_v57 }
 0x1c5   :  { %12778 = vst [vmem:[#allocation29_spill] sm:$0xff] %v10725_v14  ;;  %v1206_v22 = vmax.f32 %v10514_v56, %v10522_v54  ;;  %v1207_v14 = vmax.f32 %v10518_v0, %v10526_v47  ;;  %v1208_v50 = vmax.f32 %v10530_v53, %v10538_v45  ;;  %v1209_v41 = vmax.f32 %v10534_v12, %v10542_v19  ;;  %v1857_v12 = vld [vmem:[#allocation3 + $0x1] sm:$0xff]  ;;  %v1858_v45 = vld [vmem:[#allocation3 + $0x11] sm:$0xff] }
 0x1c6   :  { %12777 = vst [vmem:[#allocation27_spill] sm:$0xff] %v10713_v49  ;;  %v1203_v49 = vmax.f32 %v10483_v20, %v10493_v40  ;;  %v1210_v34 = vmax.f32 %v10546_v11, %v10554_v55  ;;  %1234 = vst.msk [vmem:[#allocation2] sm:$0xff] %vm722_vm0, %v1202_v59  ;;  %v1211_v20 = vmax.f32 %v10550_v43, %v10558_v46 }
 0x1c7   :  { %v1212_v8 = vmax.f32 %v10562_v58, %v10570_v17  ;;  %v1213_v40 = vmax.f32 %v10566_v5, %v10574_v51  ;;  %v1214_v16 = vmax.f32 %v10578_v21, %v10586_v60  ;;  %1236 = vst.msk [vmem:[#allocation2 + $0x10] sm:$0xff] %vm722_vm0, %v1204_v44  ;;  %1237 = vst.msk [vmem:[#allocation2 + $0x18] sm:$0xff] %vm722_vm0, %v1205_v6 }
 0x1c8   :  { %1235 = vst.msk [vmem:[#allocation2 + $0x8] sm:$0xff] %vm722_vm0, %v1203_v49  ;;  %1238 = vst.msk [vmem:[#allocation2 + $0x20] sm:$0xff] %vm722_vm0, %v1206_v22  ;;  %v1215_v28 = vmax.f32 %v10582_v30, %v10590_v4  ;;  %v1216_v29 = vmax.f32 %v10594_v63, %v10602_v36  ;;  %v1217_v57 = vmax.f32 %v10598_v7, %v10606_v48  ;;  %v12779_v43 = vld [vmem:[#allocation23_spill] sm:$0xff] }
 0x1c9   :  { %v1218_v56 = vmax.f32 %v10610_v39, %v10618_v23  ;;  %1239 = vst.msk [vmem:[#allocation2 + $0x28] sm:$0xff] %vm722_vm0, %v1207_v14  ;;  %1240 = vst.msk [vmem:[#allocation2 + $0x30] sm:$0xff] %vm722_vm0, %v1208_v50  ;;  %v1219_v0 = vmax.f32 %v10614_v52, %v10622_v33  ;;  %v1220_v54 = vmax.f32 %v10626_v26, %v10634_v10  ;;  %v12780_v46 = vld [vmem:[#allocation25_spill] sm:$0xff]  ;;  %v12782_v17 = vld [vmem:[#allocation24_spill] sm:$0xff] }
 0x1ca   :  { %1241 = vst.msk [vmem:[#allocation2 + $0x38] sm:$0xff] %vm722_vm0, %v1209_v41  ;;  %1242 = vst.msk [vmem:[#allocation2 + $0x40] sm:$0xff] %vm722_vm0, %v1210_v34  ;;  %v1221_v47 = vmax.f32 %v10630_v37, %v10638_v25  ;;  %v1222_v53 = vmax.f32 %v10642_v15, %v10650_v24  ;;  %v1223_v19 = vmax.f32 %v10646_v31, %v10657_v32  ;;  %v12781_v5 = vld [vmem:[#allocation26_spill] sm:$0xff] }
 0x1cb   :  { %1243 = vst.msk [vmem:[#allocation2 + $0x48] sm:$0xff] %vm722_vm0, %v1211_v20  ;;  %1244 = vst.msk [vmem:[#allocation2 + $0x50] sm:$0xff] %vm722_vm0, %v1212_v8  ;;  %v1224_v11 = vmax.f32 %v10661_v9, %v10669_v35  ;;  %v1225_v55 = vmax.f32 %v12779_v43, %v10673_v2  ;;  %v1226_v58 = vmax.f32 %v12780_v46, %v10685_v18 }
 0x1cc   :  { %1245 = vst.msk [vmem:[#allocation2 + $0x58] sm:$0xff] %vm722_vm0, %v1213_v40  ;;  %1246 = vst.msk [vmem:[#allocation2 + $0x60] sm:$0xff] %vm722_vm0, %v1214_v16  ;;  %v1227_v51 = vmax.f32 %v12782_v17, %v12781_v5  ;;  %v1228_v21 = vmax.f32 %v10693_v62, %v10701_v38  ;;  %v1229_v30 = vmax.f32 %v10697_v27, %v10705_v42  ;;  %v12784_v7 = vld [vmem:[#allocation29_spill] sm:$0xff] }
 0x1cd   :  { %1247 = vst.msk [vmem:[#allocation2 + $0x68] sm:$0xff] %vm722_vm0, %v1215_v28  ;;  %1248 = vst.msk [vmem:[#allocation2 + $0x70] sm:$0xff] %vm722_vm0, %v1216_v29  ;;  %v1230_v60 = vmax.f32 %v10709_v1, %v10717_v61  ;;  %v12783_v4 = vld [vmem:[#allocation27_spill] sm:$0xff]  ;;  %v1232_v36 = vmax.f32 %v12784_v7, %v10729_v13  ;;  %v1873_v48 = vpack.c.bf16 %v1858_v45, %v1857_v12 }
 0x1ce   :  { %1249 = vst.msk [vmem:[#allocation2 + $0x78] sm:$0xff] %vm722_vm0, %v1217_v57  ;;  %1250 = vst.msk [vmem:[#allocation2 + $0x80] sm:$0xff] %vm722_vm0, %v1218_v56  ;;  %v1231_v63 = vmax.f32 %v12783_v4, %v10721_v3  ;;  %v1315_v39 = vld [vmem:[#allocation2] sm:$0x1]  ;;  %v1331_v52 = vld [vmem:[#allocation2 + $0x1] sm:$0x1] }
 0x1cf   :  { %1251 = vst.msk [vmem:[#allocation2 + $0x88] sm:$0xff] %vm722_vm0, %v1219_v0  ;;  %1252 = vst.msk [vmem:[#allocation2 + $0x90] sm:$0xff] %vm722_vm0, %v1220_v54  ;;  %v1316_v23 = vld [vmem:[#allocation2 + $0x10] sm:$0x1]  ;;  %v1317_v33 = vld [vmem:[#allocation2 + $0x20] sm:$0x1]  ;;  %v1347_v37 = vmax.f32 %v1315_v39, %v1331_v52  ;;  %8340 = vmatprep.mubr.msk.bf16.mxu0 %vm722_vm0, %v1873_v48 }
 0x1d0   :  { %1253 = vst.msk [vmem:[#allocation2 + $0x98] sm:$0xff] %vm722_vm0, %v1221_v47  ;;  %1254 = vst.msk [vmem:[#allocation2 + $0xa0] sm:$0xff] %vm722_vm0, %v1222_v53  ;;  %v1332_v26 = vld [vmem:[#allocation2 + $0x11] sm:$0x1]  ;;  %v1318_v10 = vld [vmem:[#allocation2 + $0x30] sm:$0x1] }
 0x1d1   :  { %1255 = vst.msk [vmem:[#allocation2 + $0xa8] sm:$0xff] %vm722_vm0, %v1223_v19  ;;  %1256 = vst.msk [vmem:[#allocation2 + $0xb0] sm:$0xff] %vm722_vm0, %v1224_v11  ;;  %v1319_v25 = vld [vmem:[#allocation2 + $0x40] sm:$0x1]  ;;  %v1333_v15 = vld [vmem:[#allocation2 + $0x21] sm:$0x1]  ;;  %v1348_v31 = vmax.f32 %v1316_v23, %v1332_v26 }
 0x1d2   :  { %1257 = vst.msk [vmem:[#allocation2 + $0xb8] sm:$0xff] %vm722_vm0, %v1225_v55  ;;  %1258 = vst.msk [vmem:[#allocation2 + $0xc0] sm:$0xff] %vm722_vm0, %v1226_v58  ;;  %v1320_v24 = vld [vmem:[#allocation2 + $0x50] sm:$0x1]  ;;  %v1334_v9 = vld [vmem:[#allocation2 + $0x31] sm:$0x1]  ;;  %v1349_v35 = vmax.f32 %v1317_v33, %v1333_v15 }
 0x1d3   :  { %1259 = vst.msk [vmem:[#allocation2 + $0xc8] sm:$0xff] %vm722_vm0, %v1227_v51  ;;  %1260 = vst.msk [vmem:[#allocation2 + $0xd0] sm:$0xff] %vm722_vm0, %v1228_v21  ;;  %v1321_v32 = vld [vmem:[#allocation2 + $0x60] sm:$0x1]  ;;  %v1335_v62 = vld [vmem:[#allocation2 + $0x41] sm:$0x1]  ;;  %v1350_v27 = vmax.f32 %v1318_v10, %v1334_v9 }
 0x1d4   :  { %1261 = vst.msk [vmem:[#allocation2 + $0xd8] sm:$0xff] %vm722_vm0, %v1229_v30  ;;  %1262 = vst.msk [vmem:[#allocation2 + $0xe0] sm:$0xff] %vm722_vm0, %v1230_v60  ;;  %v1322_v2 = vld [vmem:[#allocation2 + $0x70] sm:$0x1]  ;;  %v1336_v1 = vld [vmem:[#allocation2 + $0x51] sm:$0x1]  ;;  %v1351_v49 = vmax.f32 %v1319_v25, %v1335_v62 }
 0x1d5   :  { %1263 = vst.msk [vmem:[#allocation2 + $0xe8] sm:$0xff] %vm722_vm0, %v1231_v63  ;;  %1264 = vst.msk [vmem:[#allocation2 + $0xf0] sm:$0xff] %vm722_vm0, %v1232_v36  ;;  %v1323_v18 = vld [vmem:[#allocation2 + $0x80] sm:$0x1]  ;;  %v1337_v14 = vld [vmem:[#allocation2 + $0x61] sm:$0x1]  ;;  %v1352_v13 = vmax.f32 %v1320_v24, %v1336_v1 }
 0x1d6   :  { %1365 = vst.msk [vmem:[#allocation3 + $0x22] sm:$0x1] %vm1364_vm2, %v1347_v37  ;;  %1366 = vst.msk [vmem:[#allocation3 + $0x32] sm:$0x1] %vm1364_vm2, %v1348_v31  ;;  %v1324_v38 = vld [vmem:[#allocation2 + $0x90] sm:$0x1]  ;;  %v1353_v22 = vmax.f32 %v1321_v32, %v1337_v14 }
 0x1d7   :  { %v1325_v42 = vld [vmem:[#allocation2 + $0xa0] sm:$0x1]  ;;  %1367 = vst.msk [vmem:[#allocation3 + $0x42] sm:$0x1] %vm1364_vm2, %v1349_v35  ;;  %1368 = vst.msk [vmem:[#allocation3 + $0x52] sm:$0x1] %vm1364_vm2, %v1350_v27 }
 0x1d8   :  { %v1326_v61 = vld [vmem:[#allocation2 + $0xb0] sm:$0x1]  ;;  %v1338_v6 = vld [vmem:[#allocation2 + $0x71] sm:$0x1]  ;;  %1369 = vst.msk [vmem:[#allocation3 + $0x62] sm:$0x1] %vm1364_vm2, %v1351_v49 }
 0x1d9   :  { %v1327_v3 = vld [vmem:[#allocation2 + $0xc0] sm:$0x1]  ;;  %v1339_v41 = vld [vmem:[#allocation2 + $0x81] sm:$0x1]  ;;  %v1340_v34 = vld [vmem:[#allocation2 + $0x91] sm:$0x1]  ;;  %v1354_v20 = vmax.f32 %v1322_v2, %v1338_v6 }
 0x1da   :  { %v1328_v59 = vld [vmem:[#allocation2 + $0xd0] sm:$0x1]  ;;  %1370 = vst.msk [vmem:[#allocation3 + $0x72] sm:$0x1] %vm1364_vm2, %v1352_v13  ;;  %v1341_v8 = vld [vmem:[#allocation2 + $0xa1] sm:$0x1]  ;;  %v1355_v28 = vmax.f32 %v1323_v18, %v1339_v41  ;;  %v1356_v29 = vmax.f32 %v1324_v38, %v1340_v34 }
 0x1db   :  { %v1329_v44 = vld [vmem:[#allocation2 + $0xe0] sm:$0x1]  ;;  %v1342_v40 = vld [vmem:[#allocation2 + $0xb1] sm:$0x1]  ;;  %v1343_v16 = vld [vmem:[#allocation2 + $0xc1] sm:$0x1]  ;;  %v1357_v54 = vmax.f32 %v1325_v42, %v1341_v8 }
 0x1dc   :  { %v1330_v50 = vld [vmem:[#allocation2 + $0xf0] sm:$0x1]  ;;  %1371 = vst.msk [vmem:[#allocation3 + $0x82] sm:$0x1] %vm1364_vm2, %v1353_v22  ;;  %v1344_v57 = vld [vmem:[#allocation2 + $0xd1] sm:$0x1]  ;;  %v1358_v47 = vmax.f32 %v1326_v61, %v1342_v40  ;;  %v1359_v53 = vmax.f32 %v1327_v3, %v1343_v16 }
 0x1dd   :  { %v1345_v56 = vld [vmem:[#allocation2 + $0xe1] sm:$0x1]  ;;  %v1346_v0 = vld [vmem:[#allocation2 + $0xf1] sm:$0x1]  ;;  %1372 = vst.msk [vmem:[#allocation3 + $0x92] sm:$0x1] %vm1364_vm2, %v1354_v20  ;;  %v1360_v12 = vmax.f32 %v1328_v59, %v1344_v57 }
 0x1de   :  { %v1361_v45 = vmax.f32 %v1329_v44, %v1345_v56  ;;  %v1362_v19 = vmax.f32 %v1330_v50, %v1346_v0  ;;  %1373 = vst.msk [vmem:[#allocation3 + $0xe2] sm:$0x1] %vm1364_vm2, %v1355_v28  ;;  %1374 = vst.msk [vmem:[#allocation3 + $0xf2] sm:$0x1] %vm1364_vm2, %v1356_v29  ;;  %v1381_v11 = vld [vmem:[#allocation2 + $0x2] sm:$0x1] }
 0x1df   :  { %v1382_v43 = vld [vmem:[#allocation2 + $0x12] sm:$0x1]  ;;  %v1383_v55 = vld [vmem:[#allocation2 + $0x22] sm:$0x1]  ;;  %1375 = vst.msk [vmem:[#allocation3 + $0x102] sm:$0x1] %vm1364_vm2, %v1357_v54 }
 0x1e0   :  { %1376 = vst.msk [vmem:[#allocation3 + $0x112] sm:$0x1] %vm1364_vm2, %v1358_v47  ;;  %1377 = vst.msk [vmem:[#allocation3 + $0x122] sm:$0x1] %vm1364_vm2, %v1359_v53  ;;  %v1384_v46 = vld [vmem:[#allocation2 + $0x32] sm:$0x1] }
 0x1e1   :  { %v1385_v58 = vld [vmem:[#allocation2 + $0x42] sm:$0x1]  ;;  %v1386_v5 = vld [vmem:[#allocation2 + $0x52] sm:$0x1]  ;;  %1378 = vst.msk [vmem:[#allocation3 + $0x132] sm:$0x1] %vm1364_vm2, %v1360_v12 }
 0x1e2   :  { %1379 = vst.msk [vmem:[#allocation3 + $0x142] sm:$0x1] %vm1364_vm2, %v1361_v45  ;;  %1380 = vst.msk [vmem:[#allocation3 + $0x152] sm:$0x1] %vm1364_vm2, %v1362_v19  ;;  %v1387_v17 = vld [vmem:[#allocation2 + $0x62] sm:$0x1] }
 0x1e3   :  { %v1388_v51 = vld [vmem:[#allocation2 + $0x72] sm:$0x1]  ;;  %v1389_v21 = vld [vmem:[#allocation2 + $0x82] sm:$0x1]  ;;  %v1397_v48 = vld [vmem:[#allocation2 + $0x3] sm:$0x1] }
 0x1e4   :  { %v1390_v30 = vld [vmem:[#allocation2 + $0x92] sm:$0x1]  ;;  %v1391_v60 = vld [vmem:[#allocation2 + $0xa2] sm:$0x1]  ;;  %v1398_v39 = vld [vmem:[#allocation2 + $0x13] sm:$0x1]  ;;  %v1413_v10 = vmax.f32 %v1381_v11, %v1397_v48 }
 0x1e5   :  { %v1392_v4 = vld [vmem:[#allocation2 + $0xb2] sm:$0x1]  ;;  %v1393_v63 = vld [vmem:[#allocation2 + $0xc2] sm:$0x1]  ;;  %v1399_v52 = vld [vmem:[#allocation2 + $0x23] sm:$0x1]  ;;  %v1414_v25 = vmax.f32 %v1382_v43, %v1398_v39 }
 0x1e6   :  { %v1394_v7 = vld [vmem:[#allocation2 + $0xd2] sm:$0x1]  ;;  %v1395_v36 = vld [vmem:[#allocation2 + $0xe2] sm:$0x1]  ;;  %v1400_v33 = vld [vmem:[#allocation2 + $0x33] sm:$0x1]  ;;  %v1415_v15 = vmax.f32 %v1383_v55, %v1399_v52 }
 0x1e7   :  { %v1396_v23 = vld [vmem:[#allocation2 + $0xf2] sm:$0x1]  ;;  %v1401_v26 = vld [vmem:[#allocation2 + $0x43] sm:$0x1]  ;;  %v1402_v37 = vld [vmem:[#allocation2 + $0x53] sm:$0x1]  ;;  %v1416_v9 = vmax.f32 %v1384_v46, %v1400_v33 }
 0x1e8   :  { %v1403_v31 = vld [vmem:[#allocation2 + $0x63] sm:$0x1]  ;;  %v1404_v24 = vld [vmem:[#allocation2 + $0x73] sm:$0x1]  ;;  %v1417_v35 = vmax.f32 %v1385_v58, %v1401_v26  ;;  %v1418_v2 = vmax.f32 %v1386_v5, %v1402_v37  ;;  %1429 = vst.msk [vmem:[#allocation3 + $0x23] sm:$0x1] %vm1364_vm2, %v1413_v10 }
 0x1e9   :  { %v1405_v32 = vld [vmem:[#allocation2 + $0x83] sm:$0x1]  ;;  %v1406_v18 = vld [vmem:[#allocation2 + $0x93] sm:$0x1]  ;;  %v1419_v38 = vmax.f32 %v1387_v17, %v1403_v31  ;;  %v1420_v42 = vmax.f32 %v1388_v51, %v1404_v24  ;;  %1430 = vst.msk [vmem:[#allocation3 + $0x33] sm:$0x1] %vm1364_vm2, %v1414_v25 }
 0x1ea   :  { %v1407_v62 = vld [vmem:[#allocation2 + $0xa3] sm:$0x1]  ;;  %v1408_v27 = vld [vmem:[#allocation2 + $0xb3] sm:$0x1]  ;;  %v1421_v1 = vmax.f32 %v1389_v21, %v1405_v32  ;;  %1431 = vst.msk [vmem:[#allocation3 + $0x43] sm:$0x1] %vm1364_vm2, %v1415_v15  ;;  %v1422_v14 = vmax.f32 %v1390_v30, %v1406_v18 }
 0x1eb   :  { %v1409_v49 = vld [vmem:[#allocation2 + $0xc3] sm:$0x1]  ;;  %v1410_v61 = vld [vmem:[#allocation2 + $0xd3] sm:$0x1]  ;;  %v1423_v13 = vmax.f32 %v1391_v60, %v1407_v62  ;;  %v1424_v59 = vmax.f32 %v1392_v4, %v1408_v27  ;;  %1432 = vst.msk [vmem:[#allocation3 + $0x53] sm:$0x1] %vm1364_vm2, %v1416_v9 }
 0x1ec   :  { %v1411_v3 = vld [vmem:[#allocation2 + $0xe3] sm:$0x1]  ;;  %1433 = vst.msk [vmem:[#allocation3 + $0x63] sm:$0x1] %vm1364_vm2, %v1417_v35  ;;  %1434 = vst.msk [vmem:[#allocation3 + $0x73] sm:$0x1] %vm1364_vm2, %v1418_v2  ;;  %v1425_v6 = vmax.f32 %v1393_v63, %v1409_v49  ;;  %v1426_v22 = vmax.f32 %v1394_v7, %v1410_v61 }
 0x1ed   :  { %v1412_v44 = vld [vmem:[#allocation2 + $0xf3] sm:$0x1]  ;;  %v1427_v50 = vmax.f32 %v1395_v36, %v1411_v3  ;;  %1435 = vst.msk [vmem:[#allocation3 + $0x83] sm:$0x1] %vm1364_vm2, %v1419_v38  ;;  %1436 = vst.msk [vmem:[#allocation3 + $0x93] sm:$0x1] %vm1364_vm2, %v1420_v42 }
 0x1ee   :  { %1437 = vst.msk [vmem:[#allocation3 + $0xe3] sm:$0x1] %vm1364_vm2, %v1421_v1  ;;  %v1428_v41 = vmax.f32 %v1396_v23, %v1412_v44  ;;  %v1445_v34 = vld [vmem:[#allocation2 + $0x4] sm:$0x1]  ;;  %1438 = vst.msk [vmem:[#allocation3 + $0xf3] sm:$0x1] %vm1364_vm2, %v1422_v14 }
 0x1ef   :  { %1439 = vst.msk [vmem:[#allocation3 + $0x103] sm:$0x1] %vm1364_vm2, %v1423_v13  ;;  %1440 = vst.msk [vmem:[#allocation3 + $0x113] sm:$0x1] %vm1364_vm2, %v1424_v59  ;;  %v1446_v20 = vld [vmem:[#allocation2 + $0x14] sm:$0x1] }
 0x1f0   :  { %v1447_v8 = vld [vmem:[#allocation2 + $0x24] sm:$0x1]  ;;  %v1448_v40 = vld [vmem:[#allocation2 + $0x34] sm:$0x1]  ;;  %1441 = vst.msk [vmem:[#allocation3 + $0x123] sm:$0x1] %vm1364_vm2, %v1425_v6 }
 0x1f1   :  { %1442 = vst.msk [vmem:[#allocation3 + $0x133] sm:$0x1] %vm1364_vm2, %v1426_v22  ;;  %1443 = vst.msk [vmem:[#allocation3 + $0x143] sm:$0x1] %vm1364_vm2, %v1427_v50  ;;  %v1449_v16 = vld [vmem:[#allocation2 + $0x44] sm:$0x1] }
 0x1f2   :  { %v1450_v28 = vld [vmem:[#allocation2 + $0x54] sm:$0x1]  ;;  %v1451_v29 = vld [vmem:[#allocation2 + $0x64] sm:$0x1]  ;;  %1444 = vst.msk [vmem:[#allocation3 + $0x153] sm:$0x1] %vm1364_vm2, %v1428_v41 }
 0x1f3   :  { %v1452_v57 = vld [vmem:[#allocation2 + $0x74] sm:$0x1]  ;;  %v1453_v56 = vld [vmem:[#allocation2 + $0x84] sm:$0x1]  ;;  %v1461_v12 = vld [vmem:[#allocation2 + $0x5] sm:$0x1] }
 0x1f4   :  { %v1454_v0 = vld [vmem:[#allocation2 + $0x94] sm:$0x1]  ;;  %v1455_v54 = vld [vmem:[#allocation2 + $0xa4] sm:$0x1]  ;;  %v1462_v43 = vld [vmem:[#allocation2 + $0x15] sm:$0x1]  ;;  %v1477_v58 = vmax.f32 %v1445_v34, %v1461_v12 }
 0x1f5   :  { %v1456_v47 = vld [vmem:[#allocation2 + $0xb4] sm:$0x1]  ;;  %v1457_v53 = vld [vmem:[#allocation2 + $0xc4] sm:$0x1]  ;;  %v1463_v55 = vld [vmem:[#allocation2 + $0x25] sm:$0x1]  ;;  %v1478_v21 = vmax.f32 %v1446_v20, %v1462_v43 }
 0x1f6   :  { %v1458_v45 = vld [vmem:[#allocation2 + $0xd4] sm:$0x1]  ;;  %v1459_v19 = vld [vmem:[#allocation2 + $0xe4] sm:$0x1]  ;;  %v1464_v46 = vld [vmem:[#allocation2 + $0x35] sm:$0x1]  ;;  %v1479_v30 = vmax.f32 %v1447_v8, %v1463_v55 }
 0x1f7   :  { %v1460_v11 = vld [vmem:[#allocation2 + $0xf4] sm:$0x1]  ;;  %v1465_v5 = vld [vmem:[#allocation2 + $0x45] sm:$0x1]  ;;  %v1466_v17 = vld [vmem:[#allocation2 + $0x55] sm:$0x1]  ;;  %v1480_v60 = vmax.f32 %v1448_v40, %v1464_v46 }
 0x1f8   :  { %v1467_v51 = vld [vmem:[#allocation2 + $0x65] sm:$0x1]  ;;  %v1468_v4 = vld [vmem:[#allocation2 + $0x75] sm:$0x1]  ;;  %v1481_v36 = vmax.f32 %v1449_v16, %v1465_v5  ;;  %v1482_v48 = vmax.f32 %v1450_v28, %v1466_v17  ;;  %1493 = vst.msk [vmem:[#allocation3 + $0x24] sm:$0x1] %vm1364_vm2, %v1477_v58 }
 0x1f9   :  { %v1469_v63 = vld [vmem:[#allocation2 + $0x85] sm:$0x1]  ;;  %v1470_v7 = vld [vmem:[#allocation2 + $0x95] sm:$0x1]  ;;  %v1483_v39 = vmax.f32 %v1451_v29, %v1467_v51  ;;  %v1484_v26 = vmax.f32 %v1452_v57, %v1468_v4  ;;  %1494 = vst.msk [vmem:[#allocation3 + $0x34] sm:$0x1] %vm1364_vm2, %v1478_v21 }
 0x1fa   :  { %v1471_v52 = vld [vmem:[#allocation2 + $0xa5] sm:$0x1]  ;;  %v1472_v23 = vld [vmem:[#allocation2 + $0xb5] sm:$0x1]  ;;  %v1485_v37 = vmax.f32 %v1453_v56, %v1469_v63  ;;  %v1486_v10 = vmax.f32 %v1454_v0, %v1470_v7  ;;  %1495 = vst.msk [vmem:[#allocation3 + $0x44] sm:$0x1] %vm1364_vm2, %v1479_v30 }
 0x1fb   :  { %v1473_v33 = vld [vmem:[#allocation2 + $0xc5] sm:$0x1]  ;;  %1496 = vst.msk [vmem:[#allocation3 + $0x54] sm:$0x1] %vm1364_vm2, %v1480_v60  ;;  %v1474_v25 = vld [vmem:[#allocation2 + $0xd5] sm:$0x1]  ;;  %v1487_v24 = vmax.f32 %v1455_v54, %v1471_v52  ;;  %v1488_v32 = vmax.f32 %v1456_v47, %v1472_v23 }
 0x1fc   :  { %v1475_v15 = vld [vmem:[#allocation2 + $0xe5] sm:$0x1]  ;;  %v1476_v31 = vld [vmem:[#allocation2 + $0xf5] sm:$0x1]  ;;  %v1489_v9 = vmax.f32 %v1457_v53, %v1473_v33  ;;  %1497 = vst.msk [vmem:[#allocation3 + $0x64] sm:$0x1] %vm1364_vm2, %v1481_v36  ;;  %v1490_v35 = vmax.f32 %v1458_v45, %v1474_v25 }
 0x1fd   :  { %1498 = vst.msk [vmem:[#allocation3 + $0x74] sm:$0x1] %vm1364_vm2, %v1482_v48  ;;  %1499 = vst.msk [vmem:[#allocation3 + $0x84] sm:$0x1] %vm1364_vm2, %v1483_v39  ;;  %v1491_v2 = vmax.f32 %v1459_v19, %v1475_v15  ;;  %v1492_v18 = vmax.f32 %v1460_v11, %v1476_v31  ;;  %v1509_v62 = vld [vmem:[#allocation2 + $0x6] sm:$0x1] }
 0x1fe   :  { %1500 = vst.msk [vmem:[#allocation3 + $0x94] sm:$0x1] %vm1364_vm2, %v1484_v26  ;;  %1501 = vst.msk [vmem:[#allocation3 + $0xe4] sm:$0x1] %vm1364_vm2, %v1485_v37  ;;  %v1510_v27 = vld [vmem:[#allocation2 + $0x16] sm:$0x1] }
 0x1ff   :  { %1502 = vst.msk [vmem:[#allocation3 + $0xf4] sm:$0x1] %vm1364_vm2, %v1486_v10  ;;  %1503 = vst.msk [vmem:[#allocation3 + $0x104] sm:$0x1] %vm1364_vm2, %v1487_v24  ;;  %v1511_v38 = vld [vmem:[#allocation2 + $0x26] sm:$0x1] }
 0x200   :  { %1504 = vst.msk [vmem:[#allocation3 + $0x114] sm:$0x1] %vm1364_vm2, %v1488_v32  ;;  %1505 = vst.msk [vmem:[#allocation3 + $0x124] sm:$0x1] %vm1364_vm2, %v1489_v9  ;;  %v1512_v42 = vld [vmem:[#allocation2 + $0x36] sm:$0x1] }
 0x201   :  { %v1513_v1 = vld [vmem:[#allocation2 + $0x46] sm:$0x1]  ;;  %1506 = vst.msk [vmem:[#allocation3 + $0x134] sm:$0x1] %vm1364_vm2, %v1490_v35  ;;  %1507 = vst.msk [vmem:[#allocation3 + $0x144] sm:$0x1] %vm1364_vm2, %v1491_v2 }
 0x202   :  { %1508 = vst.msk [vmem:[#allocation3 + $0x154] sm:$0x1] %vm1364_vm2, %v1492_v18  ;;  %v1514_v49 = vld [vmem:[#allocation2 + $0x56] sm:$0x1]  ;;  %v1515_v61 = vld [vmem:[#allocation2 + $0x66] sm:$0x1] }
 0x203   :  { %v1516_v3 = vld [vmem:[#allocation2 + $0x76] sm:$0x1]  ;;  %v1517_v14 = vld [vmem:[#allocation2 + $0x86] sm:$0x1]  ;;  %v1525_v50 = vld [vmem:[#allocation2 + $0x7] sm:$0x1] }
 0x204   :  { %v1518_v13 = vld [vmem:[#allocation2 + $0x96] sm:$0x1]  ;;  %v1519_v59 = vld [vmem:[#allocation2 + $0xa6] sm:$0x1]  ;;  %v1526_v41 = vld [vmem:[#allocation2 + $0x17] sm:$0x1]  ;;  %v1541_v28 = vmax.f32 %v1509_v62, %v1525_v50 }
 0x205   :  { %v1520_v44 = vld [vmem:[#allocation2 + $0xb6] sm:$0x1]  ;;  %v1521_v6 = vld [vmem:[#allocation2 + $0xc6] sm:$0x1]  ;;  %v1527_v8 = vld [vmem:[#allocation2 + $0x27] sm:$0x1]  ;;  %v1542_v29 = vmax.f32 %v1510_v27, %v1526_v41 }
 0x206   :  { %v1522_v22 = vld [vmem:[#allocation2 + $0xd6] sm:$0x1]  ;;  %v1523_v34 = vld [vmem:[#allocation2 + $0xe6] sm:$0x1]  ;;  %v1528_v40 = vld [vmem:[#allocation2 + $0x37] sm:$0x1]  ;;  %v1543_v54 = vmax.f32 %v1511_v38, %v1527_v8 }
 0x207   :  { %v1524_v20 = vld [vmem:[#allocation2 + $0xf6] sm:$0x1]  ;;  %v1529_v16 = vld [vmem:[#allocation2 + $0x47] sm:$0x1]  ;;  %v1530_v57 = vld [vmem:[#allocation2 + $0x57] sm:$0x1]  ;;  %v1544_v47 = vmax.f32 %v1512_v42, %v1528_v40 }
 0x208   :  { %v1531_v56 = vld [vmem:[#allocation2 + $0x67] sm:$0x1]  ;;  %v1532_v0 = vld [vmem:[#allocation2 + $0x77] sm:$0x1]  ;;  %v1545_v53 = vmax.f32 %v1513_v1, %v1529_v16  ;;  %v1546_v11 = vmax.f32 %v1514_v49, %v1530_v57  ;;  %1557 = vst.msk [vmem:[#allocation3 + $0x25] sm:$0x1] %vm1364_vm2, %v1541_v28 }
 0x209   :  { %v1533_v12 = vld [vmem:[#allocation2 + $0x87] sm:$0x1]  ;;  %v1534_v45 = vld [vmem:[#allocation2 + $0x97] sm:$0x1]  ;;  %v1547_v43 = vmax.f32 %v1515_v61, %v1531_v56  ;;  %v1548_v55 = vmax.f32 %v1516_v3, %v1532_v0  ;;  %1558 = vst.msk [vmem:[#allocation3 + $0x35] sm:$0x1] %vm1364_vm2, %v1542_v29 }
 0x20a   :  { %v1535_v19 = vld [vmem:[#allocation2 + $0xa7] sm:$0x1]  ;;  %v1536_v46 = vld [vmem:[#allocation2 + $0xb7] sm:$0x1]  ;;  %v1549_v17 = vmax.f32 %v1517_v14, %v1533_v12  ;;  %v1550_v51 = vmax.f32 %v1518_v13, %v1534_v45  ;;  %1559 = vst.msk [vmem:[#allocation3 + $0x45] sm:$0x1] %vm1364_vm2, %v1543_v54 }
 0x20b   :  { %v1537_v58 = vld [vmem:[#allocation2 + $0xc7] sm:$0x1]  ;;  %v1538_v5 = vld [vmem:[#allocation2 + $0xd7] sm:$0x1]  ;;  %v1551_v21 = vmax.f32 %v1519_v59, %v1535_v19  ;;  %1560 = vst.msk [vmem:[#allocation3 + $0x55] sm:$0x1] %vm1364_vm2, %v1544_v47  ;;  %v1552_v4 = vmax.f32 %v1520_v44, %v1536_v46 }
 0x20c   :  { %1561 = vst.msk [vmem:[#allocation3 + $0x65] sm:$0x1] %vm1364_vm2, %v1545_v53  ;;  %v1539_v30 = vld [vmem:[#allocation2 + $0xe7] sm:$0x1]  ;;  %v1540_v60 = vld [vmem:[#allocation2 + $0xf7] sm:$0x1]  ;;  %v1553_v63 = vmax.f32 %v1521_v6, %v1537_v58  ;;  %v1554_v7 = vmax.f32 %v1522_v22, %v1538_v5 }
 0x20d   :  { %1562 = vst.msk [vmem:[#allocation3 + $0x75] sm:$0x1] %vm1364_vm2, %v1546_v11  ;;  %1563 = vst.msk [vmem:[#allocation3 + $0x85] sm:$0x1] %vm1364_vm2, %v1547_v43  ;;  %v1555_v36 = vmax.f32 %v1523_v34, %v1539_v30  ;;  %v1556_v48 = vmax.f32 %v1524_v20, %v1540_v60  ;;  %v1573_v39 = vld [vmem:[#allocation2 + $0x8] sm:$0x1] }
 0x20e   :  { %1564 = vst.msk [vmem:[#allocation3 + $0x95] sm:$0x1] %vm1364_vm2, %v1548_v55  ;;  %1565 = vst.msk [vmem:[#allocation3 + $0xe5] sm:$0x1] %vm1364_vm2, %v1549_v17  ;;  %v1574_v52 = vld [vmem:[#allocation2 + $0x18] sm:$0x1] }
 0x20f   :  { %1566 = vst.msk [vmem:[#allocation3 + $0xf5] sm:$0x1] %vm1364_vm2, %v1550_v51  ;;  %1567 = vst.msk [vmem:[#allocation3 + $0x105] sm:$0x1] %vm1364_vm2, %v1551_v21  ;;  %v1575_v23 = vld [vmem:[#allocation2 + $0x28] sm:$0x1] }
 0x210   :  { %v1576_v33 = vld [vmem:[#allocation2 + $0x38] sm:$0x1]  ;;  %1568 = vst.msk [vmem:[#allocation3 + $0x115] sm:$0x1] %vm1364_vm2, %v1552_v4  ;;  %1569 = vst.msk [vmem:[#allocation3 + $0x125] sm:$0x1] %vm1364_vm2, %v1553_v63 }
 0x211   :  { %1570 = vst.msk [vmem:[#allocation3 + $0x135] sm:$0x1] %vm1364_vm2, %v1554_v7  ;;  %v1577_v26 = vld [vmem:[#allocation2 + $0x48] sm:$0x1]  ;;  %v1578_v37 = vld [vmem:[#allocation2 + $0x58] sm:$0x1] }
 0x212   :  { %v1579_v10 = vld [vmem:[#allocation2 + $0x68] sm:$0x1]  ;;  %1571 = vst.msk [vmem:[#allocation3 + $0x145] sm:$0x1] %vm1364_vm2, %v1555_v36  ;;  %1572 = vst.msk [vmem:[#allocation3 + $0x155] sm:$0x1] %vm1364_vm2, %v1556_v48 }
 0x213   :  { %v1580_v25 = vld [vmem:[#allocation2 + $0x78] sm:$0x1]  ;;  %v1581_v15 = vld [vmem:[#allocation2 + $0x88] sm:$0x1]  ;;  %v1589_v35 = vld [vmem:[#allocation2 + $0x9] sm:$0x1] }
 0x214   :  { %v1582_v31 = vld [vmem:[#allocation2 + $0x98] sm:$0x1]  ;;  %v1583_v24 = vld [vmem:[#allocation2 + $0xa8] sm:$0x1]  ;;  %v1590_v62 = vld [vmem:[#allocation2 + $0x19] sm:$0x1]  ;;  %v1605_v42 = vmax.f32 %v1573_v39, %v1589_v35 }
 0x215   :  { %v1584_v32 = vld [vmem:[#allocation2 + $0xb8] sm:$0x1]  ;;  %v1585_v9 = vld [vmem:[#allocation2 + $0xc8] sm:$0x1]  ;;  %v1591_v27 = vld [vmem:[#allocation2 + $0x29] sm:$0x1]  ;;  %v1606_v3 = vmax.f32 %v1574_v52, %v1590_v62 }
 0x216   :  { %v1586_v2 = vld [vmem:[#allocation2 + $0xd8] sm:$0x1]  ;;  %v1587_v18 = vld [vmem:[#allocation2 + $0xe8] sm:$0x1]  ;;  %v1592_v38 = vld [vmem:[#allocation2 + $0x39] sm:$0x1]  ;;  %v1607_v14 = vmax.f32 %v1575_v23, %v1591_v27 }
 0x217   :  { %v1593_v1 = vld [vmem:[#allocation2 + $0x49] sm:$0x1]  ;;  %v1594_v49 = vld [vmem:[#allocation2 + $0x59] sm:$0x1]  ;;  %v1608_v13 = vmax.f32 %v1576_v33, %v1592_v38  ;;  %1621 = vst.msk [vmem:[#allocation3 + $0x26] sm:$0x1] %vm1364_vm2, %v1605_v42 }
 0x218   :  { %v1595_v61 = vld [vmem:[#allocation2 + $0x69] sm:$0x1]  ;;  %v1596_v59 = vld [vmem:[#allocation2 + $0x79] sm:$0x1]  ;;  %v1609_v22 = vmax.f32 %v1577_v26, %v1593_v1  ;;  %v1610_v50 = vmax.f32 %v1578_v37, %v1594_v49  ;;  %1622 = vst.msk [vmem:[#allocation3 + $0x36] sm:$0x1] %vm1364_vm2, %v1606_v3 }
 0x219   :  { %v1597_v44 = vld [vmem:[#allocation2 + $0x89] sm:$0x1]  ;;  %v1598_v6 = vld [vmem:[#allocation2 + $0x99] sm:$0x1]  ;;  %v1611_v41 = vmax.f32 %v1579_v10, %v1595_v61  ;;  %v1612_v40 = vmax.f32 %v1580_v25, %v1596_v59  ;;  %1623 = vst.msk [vmem:[#allocation3 + $0x46] sm:$0x1] %vm1364_vm2, %v1607_v14 }
 0x21a   :  { %v1599_v34 = vld [vmem:[#allocation2 + $0xa9] sm:$0x1]  ;;  %v1600_v20 = vld [vmem:[#allocation2 + $0xb9] sm:$0x1]  ;;  %v1613_v16 = vmax.f32 %v1581_v15, %v1597_v44  ;;  %v1614_v28 = vmax.f32 %v1582_v31, %v1598_v6  ;;  %1624 = vst.msk [vmem:[#allocation3 + $0x56] sm:$0x1] %vm1364_vm2, %v1608_v13 }
 0x21b   :  { %v1601_v8 = vld [vmem:[#allocation2 + $0xc9] sm:$0x1]  ;;  %v1602_v29 = vld [vmem:[#allocation2 + $0xd9] sm:$0x1]  ;;  %v1615_v56 = vmax.f32 %v1583_v24, %v1599_v34  ;;  %v1616_v0 = vmax.f32 %v1584_v32, %v1600_v20  ;;  %1625 = vst.msk [vmem:[#allocation3 + $0x66] sm:$0x1] %vm1364_vm2, %v1609_v22 }
 0x21c   :  { %v1603_v57 = vld [vmem:[#allocation2 + $0xe9] sm:$0x1]  ;;  %v1617_v54 = vmax.f32 %v1585_v9, %v1601_v8  ;;  %1626 = vst.msk [vmem:[#allocation3 + $0x76] sm:$0x1] %vm1364_vm2, %v1610_v50  ;;  %1627 = vst.msk [vmem:[#allocation3 + $0x86] sm:$0x1] %vm1364_vm2, %v1611_v41  ;;  %v1618_v47 = vmax.f32 %v1586_v2, %v1602_v29 }
 0x21d   :  { %v1619_v53 = vmax.f32 %v1587_v18, %v1603_v57  ;;  %v1637_v12 = vld [vmem:[#allocation2 + $0xa] sm:$0x1]  ;;  %1628 = vst.msk [vmem:[#allocation3 + $0x96] sm:$0x1] %vm1364_vm2, %v1612_v40  ;;  %1629 = vst.msk [vmem:[#allocation3 + $0xe6] sm:$0x1] %vm1364_vm2, %v1613_v16 }
 0x21e   :  { %1630 = vst.msk [vmem:[#allocation3 + $0xf6] sm:$0x1] %vm1364_vm2, %v1614_v28  ;;  %v1638_v45 = vld [vmem:[#allocation2 + $0x1a] sm:$0x1]  ;;  %v1639_v19 = vld [vmem:[#allocation2 + $0x2a] sm:$0x1] }
 0x21f   :  { %v1640_v11 = vld [vmem:[#allocation2 + $0x3a] sm:$0x1]  ;;  %1631 = vst.msk [vmem:[#allocation3 + $0x106] sm:$0x1] %vm1364_vm2, %v1615_v56  ;;  %1632 = vst.msk [vmem:[#allocation3 + $0x116] sm:$0x1] %vm1364_vm2, %v1616_v0 }
 0x220   :  { %1633 = vst.msk [vmem:[#allocation3 + $0x126] sm:$0x1] %vm1364_vm2, %v1617_v54  ;;  %v1641_v43 = vld [vmem:[#allocation2 + $0x4a] sm:$0x1]  ;;  %v1642_v55 = vld [vmem:[#allocation2 + $0x5a] sm:$0x1] }
 0x221   :  { %v1643_v46 = vld [vmem:[#allocation2 + $0x6a] sm:$0x1]  ;;  %1634 = vst.msk [vmem:[#allocation3 + $0x136] sm:$0x1] %vm1364_vm2, %v1618_v47  ;;  %1635 = vst.msk [vmem:[#allocation3 + $0x146] sm:$0x1] %vm1364_vm2, %v1619_v53 }
 0x222   :  { %v1644_v58 = vld [vmem:[#allocation2 + $0x7a] sm:$0x1]  ;;  %v1645_v5 = vld [vmem:[#allocation2 + $0x8a] sm:$0x1]  ;;  %v1653_v60 = vld [vmem:[#allocation2 + $0xb] sm:$0x1] }
 0x223   :  { %v1646_v17 = vld [vmem:[#allocation2 + $0x9a] sm:$0x1]  ;;  %v1647_v51 = vld [vmem:[#allocation2 + $0xaa] sm:$0x1]  ;;  %v1654_v7 = vld [vmem:[#allocation2 + $0x1b] sm:$0x1]  ;;  %v1669_v39 = vmax.f32 %v1637_v12, %v1653_v60 }
 0x224   :  { %v1648_v21 = vld [vmem:[#allocation2 + $0xba] sm:$0x1]  ;;  %v1649_v30 = vld [vmem:[#allocation2 + $0xca] sm:$0x1]  ;;  %v1655_v36 = vld [vmem:[#allocation2 + $0x2b] sm:$0x1]  ;;  %v1670_v26 = vmax.f32 %v1638_v45, %v1654_v7 }
 0x225   :  { %v1650_v4 = vld [vmem:[#allocation2 + $0xda] sm:$0x1]  ;;  %v1651_v63 = vld [vmem:[#allocation2 + $0xea] sm:$0x1]  ;;  %v1656_v48 = vld [vmem:[#allocation2 + $0x3b] sm:$0x1]  ;;  %v1671_v37 = vmax.f32 %v1639_v19, %v1655_v36 }
 0x226   :  { %v1657_v52 = vld [vmem:[#allocation2 + $0x4b] sm:$0x1]  ;;  %v1658_v23 = vld [vmem:[#allocation2 + $0x5b] sm:$0x1]  ;;  %v1672_v10 = vmax.f32 %v1640_v11, %v1656_v48  ;;  %1685 = vst.msk [vmem:[#allocation3 + $0x27] sm:$0x1] %vm1364_vm2, %v1669_v39 }
 0x227   :  { %v1659_v33 = vld [vmem:[#allocation2 + $0x6b] sm:$0x1]  ;;  %v1660_v25 = vld [vmem:[#allocation2 + $0x7b] sm:$0x1]  ;;  %v1673_v24 = vmax.f32 %v1641_v43, %v1657_v52  ;;  %v1674_v32 = vmax.f32 %v1642_v55, %v1658_v23  ;;  %1686 = vst.msk [vmem:[#allocation3 + $0x37] sm:$0x1] %vm1364_vm2, %v1670_v26 }
 0x228   :  { %v1661_v15 = vld [vmem:[#allocation2 + $0x8b] sm:$0x1]  ;;  %v1662_v31 = vld [vmem:[#allocation2 + $0x9b] sm:$0x1]  ;;  %v1675_v9 = vmax.f32 %v1643_v46, %v1659_v33  ;;  %v1676_v62 = vmax.f32 %v1644_v58, %v1660_v25  ;;  %1687 = vst.msk [vmem:[#allocation3 + $0x47] sm:$0x1] %vm1364_vm2, %v1671_v37 }
 0x229   :  { %v1663_v35 = vld [vmem:[#allocation2 + $0xab] sm:$0x1]  ;;  %v1664_v2 = vld [vmem:[#allocation2 + $0xbb] sm:$0x1]  ;;  %v1677_v27 = vmax.f32 %v1645_v5, %v1661_v15  ;;  %v1678_v38 = vmax.f32 %v1646_v17, %v1662_v31  ;;  %1688 = vst.msk [vmem:[#allocation3 + $0x57] sm:$0x1] %vm1364_vm2, %v1672_v10 }
 0x22a   :  { %v1665_v18 = vld [vmem:[#allocation2 + $0xcb] sm:$0x1]  ;;  %v1666_v42 = vld [vmem:[#allocation2 + $0xdb] sm:$0x1]  ;;  %v1679_v49 = vmax.f32 %v1647_v51, %v1663_v35  ;;  %v1680_v61 = vmax.f32 %v1648_v21, %v1664_v2  ;;  %1689 = vst.msk [vmem:[#allocation3 + $0x67] sm:$0x1] %vm1364_vm2, %v1673_v24 }
 0x22b   :  { %v1667_v1 = vld [vmem:[#allocation2 + $0xeb] sm:$0x1]  ;;  %v1681_v3 = vmax.f32 %v1649_v30, %v1665_v18  ;;  %1690 = vst.msk [vmem:[#allocation3 + $0x77] sm:$0x1] %vm1364_vm2, %v1674_v32  ;;  %1691 = vst.msk [vmem:[#allocation3 + $0x87] sm:$0x1] %vm1364_vm2, %v1675_v9  ;;  %v1682_v14 = vmax.f32 %v1650_v4, %v1666_v42 }
 0x22c   :  { %v1683_v13 = vmax.f32 %v1651_v63, %v1667_v1  ;;  %v1701_v59 = vld [vmem:[#allocation2 + $0xc] sm:$0x1]  ;;  %1692 = vst.msk [vmem:[#allocation3 + $0x97] sm:$0x1] %vm1364_vm2, %v1676_v62  ;;  %1693 = vst.msk [vmem:[#allocation3 + $0xe7] sm:$0x1] %vm1364_vm2, %v1677_v27 }
 0x22d   :  { %1694 = vst.msk [vmem:[#allocation3 + $0xf7] sm:$0x1] %vm1364_vm2, %v1678_v38  ;;  %v1702_v44 = vld [vmem:[#allocation2 + $0x1c] sm:$0x1]  ;;  %v1703_v6 = vld [vmem:[#allocation2 + $0x2c] sm:$0x1] }
 0x22e   :  { %v1704_v22 = vld [vmem:[#allocation2 + $0x3c] sm:$0x1]  ;;  %1695 = vst.msk [vmem:[#allocation3 + $0x107] sm:$0x1] %vm1364_vm2, %v1679_v49  ;;  %1696 = vst.msk [vmem:[#allocation3 + $0x117] sm:$0x1] %vm1364_vm2, %v1680_v61 }
 0x22f   :  { %1697 = vst.msk [vmem:[#allocation3 + $0x127] sm:$0x1] %vm1364_vm2, %v1681_v3  ;;  %v1705_v50 = vld [vmem:[#allocation2 + $0x4c] sm:$0x1]  ;;  %v1706_v41 = vld [vmem:[#allocation2 + $0x5c] sm:$0x1] }
 0x230   :  { %v1707_v34 = vld [vmem:[#allocation2 + $0x6c] sm:$0x1]  ;;  %1698 = vst.msk [vmem:[#allocation3 + $0x137] sm:$0x1] %vm1364_vm2, %v1682_v14  ;;  %1699 = vst.msk [vmem:[#allocation3 + $0x147] sm:$0x1] %vm1364_vm2, %v1683_v13 }
 0x231   :  { %v1708_v20 = vld [vmem:[#allocation2 + $0x7c] sm:$0x1]  ;;  %v1709_v8 = vld [vmem:[#allocation2 + $0x8c] sm:$0x1]  ;;  %v1717_v57 = vld [vmem:[#allocation2 + $0xd] sm:$0x1] }
 0x232   :  { %v1710_v40 = vld [vmem:[#allocation2 + $0x9c] sm:$0x1]  ;;  %v1711_v16 = vld [vmem:[#allocation2 + $0xac] sm:$0x1]  ;;  %v1718_v54 = vld [vmem:[#allocation2 + $0x1d] sm:$0x1]  ;;  %v1733_v12 = vmax.f32 %v1701_v59, %v1717_v57 }
 0x233   :  { %v1712_v28 = vld [vmem:[#allocation2 + $0xbc] sm:$0x1]  ;;  %v1713_v29 = vld [vmem:[#allocation2 + $0xcc] sm:$0x1]  ;;  %v1719_v47 = vld [vmem:[#allocation2 + $0x2d] sm:$0x1]  ;;  %v1734_v43 = vmax.f32 %v1702_v44, %v1718_v54 }
 0x234   :  { %v1714_v56 = vld [vmem:[#allocation2 + $0xdc] sm:$0x1]  ;;  %v1715_v0 = vld [vmem:[#allocation2 + $0xec] sm:$0x1]  ;;  %v1720_v53 = vld [vmem:[#allocation2 + $0x3d] sm:$0x1]  ;;  %v1735_v55 = vmax.f32 %v1703_v6, %v1719_v47 }
 0x235   :  { %v1721_v45 = vld [vmem:[#allocation2 + $0x4d] sm:$0x1]  ;;  %v1722_v19 = vld [vmem:[#allocation2 + $0x5d] sm:$0x1]  ;;  %v1736_v46 = vmax.f32 %v1704_v22, %v1720_v53  ;;  %1749 = vst.msk [vmem:[#allocation3 + $0x28] sm:$0x1] %vm1364_vm2, %v1733_v12 }
 0x236   :  { %v1723_v11 = vld [vmem:[#allocation2 + $0x6d] sm:$0x1]  ;;  %v1724_v58 = vld [vmem:[#allocation2 + $0x7d] sm:$0x1]  ;;  %v1737_v51 = vmax.f32 %v1705_v50, %v1721_v45  ;;  %v1738_v21 = vmax.f32 %v1706_v41, %v1722_v19  ;;  %1750 = vst.msk [vmem:[#allocation3 + $0x38] sm:$0x1] %vm1364_vm2, %v1734_v43 }
 0x237   :  { %v1725_v5 = vld [vmem:[#allocation2 + $0x8d] sm:$0x1]  ;;  %v1726_v17 = vld [vmem:[#allocation2 + $0x9d] sm:$0x1]  ;;  %v1739_v30 = vmax.f32 %v1707_v34, %v1723_v11  ;;  %v1740_v7 = vmax.f32 %v1708_v20, %v1724_v58  ;;  %1751 = vst.msk [vmem:[#allocation3 + $0x48] sm:$0x1] %vm1364_vm2, %v1735_v55 }
 0x238   :  { %v1727_v60 = vld [vmem:[#allocation2 + $0xad] sm:$0x1]  ;;  %v1728_v4 = vld [vmem:[#allocation2 + $0xbd] sm:$0x1]  ;;  %v1741_v36 = vmax.f32 %v1709_v8, %v1725_v5  ;;  %v1742_v48 = vmax.f32 %v1710_v40, %v1726_v17  ;;  %1752 = vst.msk [vmem:[#allocation3 + $0x58] sm:$0x1] %vm1364_vm2, %v1736_v46 }
 0x239   :  { %v1729_v63 = vld [vmem:[#allocation2 + $0xcd] sm:$0x1]  ;;  %v1730_v39 = vld [vmem:[#allocation2 + $0xdd] sm:$0x1]  ;;  %v1743_v23 = vmax.f32 %v1711_v16, %v1727_v60  ;;  %v1744_v33 = vmax.f32 %v1712_v28, %v1728_v4  ;;  %1753 = vst.msk [vmem:[#allocation3 + $0x68] sm:$0x1] %vm1364_vm2, %v1737_v51 }
 0x23a   :  { %v1731_v52 = vld [vmem:[#allocation2 + $0xed] sm:$0x1]  ;;  %v1745_v26 = vmax.f32 %v1713_v29, %v1729_v63  ;;  %1754 = vst.msk [vmem:[#allocation3 + $0x78] sm:$0x1] %vm1364_vm2, %v1738_v21  ;;  %1755 = vst.msk [vmem:[#allocation3 + $0x88] sm:$0x1] %vm1364_vm2, %v1739_v30  ;;  %v1746_v37 = vmax.f32 %v1714_v56, %v1730_v39 }
 0x23b   :  { %v1747_v10 = vmax.f32 %v1715_v0, %v1731_v52  ;;  %v1766_v25 = vld [vmem:[#allocation2 + $0x1e] sm:$0x1]  ;;  %v1767_v15 = vld [vmem:[#allocation2 + $0x2e] sm:$0x1]  ;;  %1756 = vst.msk [vmem:[#allocation3 + $0x98] sm:$0x1] %vm1364_vm2, %v1740_v7 }
 0x23c   :  { %1757 = vst.msk [vmem:[#allocation3 + $0xe8] sm:$0x1] %vm1364_vm2, %v1741_v36  ;;  %1758 = vst.msk [vmem:[#allocation3 + $0xf8] sm:$0x1] %vm1364_vm2, %v1742_v48  ;;  %v1768_v31 = vld [vmem:[#allocation2 + $0x3e] sm:$0x1] }
 0x23d   :  { %v1769_v24 = vld [vmem:[#allocation2 + $0x4e] sm:$0x1]  ;;  %v1770_v32 = vld [vmem:[#allocation2 + $0x5e] sm:$0x1]  ;;  %1759 = vst.msk [vmem:[#allocation3 + $0x108] sm:$0x1] %vm1364_vm2, %v1743_v23 }
 0x23e   :  { %1760 = vst.msk [vmem:[#allocation3 + $0x118] sm:$0x1] %vm1364_vm2, %v1744_v33  ;;  %1761 = vst.msk [vmem:[#allocation3 + $0x128] sm:$0x1] %vm1364_vm2, %v1745_v26  ;;  %v1771_v9 = vld [vmem:[#allocation2 + $0x6e] sm:$0x1] }
 0x23f   :  { %v1772_v35 = vld [vmem:[#allocation2 + $0x7e] sm:$0x1]  ;;  %v1773_v2 = vld [vmem:[#allocation2 + $0x8e] sm:$0x1]  ;;  %1762 = vst.msk [vmem:[#allocation3 + $0x138] sm:$0x1] %vm1364_vm2, %v1746_v37 }
 0x240   :  { %1763 = vst.msk [vmem:[#allocation3 + $0x148] sm:$0x1] %vm1364_vm2, %v1747_v10  ;;  %v1774_v18 = vld [vmem:[#allocation2 + $0x9e] sm:$0x1]  ;;  %v1775_v62 = vld [vmem:[#allocation2 + $0xae] sm:$0x1] }
 0x241   :  { %v1776_v27 = vld [vmem:[#allocation2 + $0xbe] sm:$0x1]  ;;  %v1777_v38 = vld [vmem:[#allocation2 + $0xce] sm:$0x1]  ;;  %v1782_v49 = vld [vmem:[#allocation2 + $0x1f] sm:$0x1] }
 0x242   :  { %v1778_v42 = vld [vmem:[#allocation2 + $0xde] sm:$0x1]  ;;  %v1779_v1 = vld [vmem:[#allocation2 + $0xee] sm:$0x1]  ;;  %v1783_v61 = vld [vmem:[#allocation2 + $0x2f] sm:$0x1]  ;;  %v1798_v59 = vmax.f32 %v1766_v25, %v1782_v49 }
 0x243   :  { %v1784_v3 = vld [vmem:[#allocation2 + $0x3f] sm:$0x1]  ;;  %v1785_v14 = vld [vmem:[#allocation2 + $0x4f] sm:$0x1]  ;;  %v1799_v44 = vmax.f32 %v1767_v15, %v1783_v61  ;;  %v10945_v55 = vld [vmem:[#allocation3 + $0x21] sm:$0xff] }
 0x244   :  { %v1786_v13 = vld [vmem:[#allocation2 + $0x5f] sm:$0x1]  ;;  %v1787_v6 = vld [vmem:[#allocation2 + $0x6f] sm:$0x1]  ;;  %v1800_v41 = vmax.f32 %v1768_v31, %v1784_v3  ;;  %v1801_v34 = vmax.f32 %v1769_v24, %v1785_v14  ;;  %1814 = vst.msk [vmem:[#allocation3 + $0x39] sm:$0x1] %vm1364_vm2, %v1798_v59 }
 0x245   :  { %v1788_v22 = vld [vmem:[#allocation2 + $0x7f] sm:$0x1]  ;;  %v1789_v50 = vld [vmem:[#allocation2 + $0x8f] sm:$0x1]  ;;  %v1802_v20 = vmax.f32 %v1770_v32, %v1786_v13  ;;  %v1803_v28 = vmax.f32 %v1771_v9, %v1787_v6  ;;  %1815 = vst.msk [vmem:[#allocation3 + $0x49] sm:$0x1] %vm1364_vm2, %v1799_v44 }
 0x246   :  { %v1790_v8 = vld [vmem:[#allocation2 + $0x9f] sm:$0x1]  ;;  %v1791_v40 = vld [vmem:[#allocation2 + $0xaf] sm:$0x1]  ;;  %v1804_v29 = vmax.f32 %v1772_v35, %v1788_v22  ;;  %v1805_v57 = vmax.f32 %v1773_v2, %v1789_v50  ;;  %1816 = vst.msk [vmem:[#allocation3 + $0x59] sm:$0x1] %vm1364_vm2, %v1800_v41 }
 0x247   :  { %v1792_v16 = vld [vmem:[#allocation2 + $0xbf] sm:$0x1]  ;;  %v1793_v56 = vld [vmem:[#allocation2 + $0xcf] sm:$0x1]  ;;  %v1806_v47 = vmax.f32 %v1774_v18, %v1790_v8  ;;  %v1807_v53 = vmax.f32 %v1775_v62, %v1791_v40  ;;  %1817 = vst.msk [vmem:[#allocation3 + $0x69] sm:$0x1] %vm1364_vm2, %v1801_v34 }
 0x248   :  { %v1794_v0 = vld [vmem:[#allocation2 + $0xdf] sm:$0x1]  ;;  %v1795_v54 = vld [vmem:[#allocation2 + $0xef] sm:$0x1]  ;;  %v1808_v12 = vmax.f32 %v1776_v27, %v1792_v16  ;;  %1818 = vst.msk [vmem:[#allocation3 + $0x79] sm:$0x1] %vm1364_vm2, %v1802_v20  ;;  %v1809_v19 = vmax.f32 %v1777_v38, %v1793_v56 }
 0x249   :  { %v9279_v45 = vld [vmem:[%s12574_s5 + $0x8] sm:$0xff]   ;;  %v1810_v11 = vmax.f32 %v1778_v42, %v1794_v0  ;;  %v1811_v43 = vmax.f32 %v1779_v1, %v1795_v54  ;;  %1819 = vst.msk [vmem:[#allocation3 + $0x89] sm:$0x1] %vm1364_vm2, %v1803_v28  ;;  %1820 = vst.msk [vmem:[#allocation3 + $0x99] sm:$0x1] %vm1364_vm2, %v1804_v29  ;;  %v10947_v46 = vld [vmem:[#allocation3 + $0x31] sm:$0xff] }
 0x24a   :  { %1821 = vst.msk [vmem:[#allocation3 + $0xe9] sm:$0x1] %vm1364_vm2, %v1805_v57  ;;  %12785 = vst [vmem:[#allocation28_spill] sm:$0xff] %v10945_v55  ;;  %v1765_v58 = vld [vmem:[#allocation2 + $0xe] sm:$0x1]  ;;  %v10954_v5 = vpack.c.bf16 %v10947_v46, %v10945_v55  ;;  %v10956_v51 = vld [vmem:[#allocation3 + $0x41] sm:$0xff] }
 0x24b   :  { %12786 = vst [vmem:[#allocation30_spill] sm:$0xff] %v10947_v46  ;;  %1822 = vst.msk [vmem:[#allocation3 + $0xf9] sm:$0x1] %vm1364_vm2, %v1806_v47  ;;  %v1781_v17 = vld [vmem:[#allocation2 + $0xf] sm:$0x1]  ;;  %v10958_v21 = vld [vmem:[#allocation3 + $0x51] sm:$0xff] }
 0x24c   :  { %1823 = vst.msk [vmem:[#allocation3 + $0x109] sm:$0x1] %vm1364_vm2, %v1807_v53  ;;  %1824 = vst.msk [vmem:[#allocation3 + $0x119] sm:$0x1] %vm1364_vm2, %v1808_v12  ;;  %v1797_v30 = vmax.f32 %v1765_v58, %v1781_v17  ;;  %v10965_v60 = vpack.c.bf16 %v10958_v21, %v10956_v51  ;;  %v10967_v4 = vld [vmem:[#allocation3 + $0x61] sm:$0xff]  ;;  %8341 = vmatmul.mubr.msk.bf16.vlgmr.msra.gmra.mrb[64].mxu0 %vm722_vm0, %v10954_v5  ;;  %v10973_v7 = vld [vmem:[#allocation3 + $0xf1] sm:$0xff] }
 0x24d   :  { %12787 = vst [vmem:[#allocation31_spill] sm:$0xff] %v10956_v51  ;;  %12788 = vst [vmem:[#allocation32_spill] sm:$0xff] %v10958_v21  ;;  %v10975_v36 = vld [vmem:[#allocation3 + $0x101] sm:$0xff]  ;;  %v10977_v48 = vld [vmem:[#allocation3 + $0x111] sm:$0xff] }
 0x24e   :  { %1825 = vst.msk [vmem:[#allocation3 + $0x129] sm:$0x1] %vm1364_vm2, %v1809_v19  ;;  %1826 = vst.msk [vmem:[#allocation3 + $0x139] sm:$0x1] %vm1364_vm2, %v1810_v11  ;;  %8344 = vmatprep.mubr.msk.bf16.mxu0 %vm722_vm0, %v10965_v60  ;;  %v1865_v52 = vld [vmem:[#allocation3 + $0xc1] sm:$0xff]  ;;  %v10991_v10 = vld [vmem:[#allocation3 + $0x71] sm:$0xff] }
 0x24f   :  { %1827 = vst.msk [vmem:[#allocation3 + $0x149] sm:$0x1] %vm1364_vm2, %v1811_v43  ;;  %12789 = vst [vmem:[#allocation9_spill] sm:$0xff] %v10965_v60  ;;  %v10984_v23 = vld [vmem:[#allocation3 + $0x121] sm:$0xff]  ;;  %v10993_v25 = vld [vmem:[#allocation3 + $0xd1] sm:$0xff]  ;;  %v11025_v14 = vpack.c.bf16 %v10991_v10, %v10967_v4 }
 0x250   :  { %12790 = vst [vmem:[#allocation10_spill] sm:$0xff] %v10967_v4  ;;  %12791 = vst [vmem:[#allocation11_spill] sm:$0xff] %v10973_v7  ;;  %v9423_v33 = vld [vmem:[%s12574_s5] sm:$0xff]   ;;  %v10995_v15 = vld [vmem:[#allocation3 + $0x30] sm:$0xff]  ;;  %v1877_v38 = vpack.c.bf16 %v10993_v25, %v1865_v52 }
 0x251   :  { %12792 = vst [vmem:[#allocation13_spill] sm:$0xff] %v10975_v36  ;;  %12793 = vst [vmem:[#allocation12_spill] sm:$0xff] %v10977_v48  ;;  %8357 = vmatpush3.bf16.msra.mxu0 %v9423_v33  ;;  %v3224_v37 = vld [vmem:[#allocation3 + $0x43] sm:$0xff]  ;;  %v3225_v24 = vld [vmem:[#allocation3 + $0x53] sm:$0xff] }
 0x252   :  { %1813 = vst.msk [vmem:[#allocation3 + $0x29] sm:$0x1] %vm1364_vm2, %v1797_v30  ;;  %12794 = vst [vmem:[#allocation14_spill] sm:$0xff] %v10984_v23  ;;  %8358 = vmatprep.subr.bf16.mxu0 %v9279_v45  ;;  %v3226_v32 = vld [vmem:[#allocation3 + $0x63] sm:$0xff]  ;;  %v10999_v9 = vld [vmem:[#allocation3 + $0x73] sm:$0xff]  ;;  %v11005_v62 = vpack.c.bf16 %v3225_v24, %v3224_v37 }
 0x253   :  { %12795 = vst [vmem:[#allocation15_spill] sm:$0xff] %v10991_v10  ;;  %12796 = vst [vmem:[#allocation17_spill] sm:$0xff] %v10993_v25  ;;  %v3223_v35 = vld [vmem:[#allocation3 + $0x33] sm:$0xff]  ;;  %v11001_v2 = vld [vmem:[#allocation3 + $0xe3] sm:$0xff]  ;;  %v11008_v27 = vpack.c.bf16 %v10999_v9, %v3226_v32  ;;  %v3239_v11 = vpack.c.bf16 %v3226_v32, %v3225_v24  ;;  %v11143_v24 = vpack.c.bf16 %v10977_v48, %v10975_v36 }
 0x254   :  { %v11003_v18 = vld [vmem:[#allocation3 + $0x40] sm:$0xff]  ;;  %v11011_v42 = vld [vmem:[#allocation3 + $0xf3] sm:$0xff]  ;;  %12799 = vst [vmem:[#allocation19_spill] sm:$0xff] %v11025_v14  ;;  %v3238_v8 = vpack.c.bf16 %v3224_v37, %v3223_v35  ;;  %8345 = vmatmul.mubr.msk.bf16.gmra.mrb[68].mxu0 %vm722_vm0, %v11025_v14 }
 0x255   :  { %12797 = vst [vmem:[#allocation16_spill] sm:$0xff] %v11008_v27  ;;  %v11013_v1 = vld [vmem:[#allocation3 + $0x103] sm:$0xff]  ;;  %v11015_v49 = vld [vmem:[#allocation3 + $0x113] sm:$0xff]  ;;  %8359 = vmatpush3.bf16.msra.mxu0 %v9279_v45  ;;  %v11019_v61 = vpack.c.bf16 %v11003_v18, %v10995_v15  ;;  %v11033_v44 = vpack.c.bf16 %v11011_v42, %v11001_v2  ;;  %8348 = vmatprep.mubr.msk.bf16.mxu0 %vm722_vm0, %v1877_v38  ;;  %12813 = vst [vmem:[#allocation39_spill] sm:$0xff] %v11143_v24 }
 0x256   :  { %v11021_v3 = vld [vmem:[#allocation3 + $0x13] sm:$0xff]  ;;  %v11027_v13 = vld [vmem:[#allocation3 + $0x123] sm:$0xff]  ;;  %v11037_v6 = vpack.c.bf16 %v11015_v49, %v11013_v1 }
 0x257   :  { %12798 = vst [vmem:[#allocation18_spill] sm:$0xff] %v11019_v61  ;;  %v11029_v59 = vld [vmem:[#allocation3 + $0x133] sm:$0xff]  ;;  %12800 = vst [vmem:[#allocation21_spill] sm:$0xff] %v11033_v44  ;;  %v11043_v41 = vld [vmem:[#allocation3 + $0x44] sm:$0xff] }
 0x258   :  { %12801 = vst [vmem:[#allocation20_spill] sm:$0xff] %v11037_v6  ;;  %v11039_v22 = vld [vmem:[#allocation3 + $0x50] sm:$0xff]  ;;  %v11047_v34 = vpack.c.bf16 %v11029_v59, %v11027_v13  ;;  %v11057_v29 = vld [vmem:[#allocation3 + $0x64] sm:$0xff]  ;;  %v9277_v53 = vld [vmem:[%s12574_s5 + $0x98] sm:$0xff]  }
 0x259   :  { %v11041_v50 = vld [vmem:[#allocation3 + $0x34] sm:$0xff]  ;;  %v3222_v20 = vld [vmem:[#allocation3 + $0x23] sm:$0xff] }
 0x25a   :  { %12802 = vst [vmem:[#allocation22_spill] sm:$0xff] %v11047_v34  ;;  %v11051_v40 = vld [vmem:[#allocation3 + $0x24] sm:$0xff]  ;;  %v11053_v16 = vld [vmem:[#allocation3 + $0x54] sm:$0xff]  ;;  %v3237_v28 = vpack.c.bf16 %v3222_v20, %v11021_v3  ;;  %v11063_v0 = vpack.c.bf16 %v3223_v35, %v3222_v20 }
 0x25b   :  { %v11059_v57 = vld [vmem:[#allocation3 + $0x60] sm:$0xff]  ;;  %v11061_v56 = vld [vmem:[#allocation3 + $0xd0] sm:$0xff]  ;;  %v11067_v54 = vpack.c.bf16 %v11041_v50, %v11051_v40  ;;  %v11078_v45 = vpack.c.bf16 %v11053_v16, %v11043_v41 }
 0x25c   :  { %v11069_v47 = vld [vmem:[#allocation3 + $0xe1] sm:$0xff]  ;;  %v11074_v12 = vld [vmem:[#allocation3 + $0x74] sm:$0xff]  ;;  %v11082_v19 = vpack.c.bf16 %v11059_v57, %v11039_v22  ;;  %8500 = vmatprep.mubr.msk.bf16.mxu1 %vm722_vm0, %v3237_v28 }
 0x25d   :  { %12803 = vst [vmem:[#allocation23_spill] sm:$0xff] %v11067_v54  ;;  %12804 = vst [vmem:[#allocation25_spill] sm:$0xff] %v11069_v47  ;;  %v11085_v43 = vld [vmem:[#allocation3 + $0xe4] sm:$0xff]  ;;  %v11089_v17 = vld [vmem:[#allocation3 + $0xf0] sm:$0xff]  ;;  %v11093_v30 = vpack.c.bf16 %v11074_v12, %v11057_v29  ;;  %8501 = vmatmul.mubr.msk.bf16.vlgmr.msra.gmra.mrb[0].mxu1 %vm722_vm0, %v3238_v8  ;;  %v11120_v28 = vpack.c.bf16 %v10973_v7, %v11069_v47 }
 0x25e   :  { %12805 = vst [vmem:[#allocation26_spill] sm:$0xff] %v11078_v45  ;;  %12806 = vst [vmem:[#allocation24_spill] sm:$0xff] %v11082_v19  ;;  %v11087_v58 = vld [vmem:[#allocation3 + $0xe0] sm:$0xff]  ;;  %v11098_v33 = vld [vmem:[#allocation3 + $0x110] sm:$0xff]  ;;  %8504 = vmatprep.mubr.msk.bf16.mxu1 %vm722_vm0, %v3239_v11 }
 0x25f   :  { %12807 = vst [vmem:[#allocation27_spill] sm:$0xff] %v11093_v30  ;;  %v11096_v52 = vld [vmem:[#allocation3 + $0x100] sm:$0xff]  ;;  %v11100_v37 = vld [vmem:[#allocation3 + $0x12] sm:$0xff]  ;;  %12809 = vst [vmem:[#allocation35_spill] sm:$0xff] %v11120_v28  ;;  %8349 = vmatmul.mubr.msk.bf16.gmra.mrb[72].mxu0 %vm722_vm0, %v11120_v28 }
 0x260   :  { %v9424_v32 = vld [vmem:[%s12574_s5 + $0x90] sm:$0xff]   ;;  %v11110_v38 = vld [vmem:[#allocation3 + $0x104] sm:$0xff]  ;;  %v11116_v8 = vpack.c.bf16 %v11096_v52, %v11089_v17  ;;  %8352 = vmatprep.mubr.msk.bf16.mxu0 %vm722_vm0, %v11143_v24 }
 0x261   :  { %8517 = vmatpush3.bf16.msra.mxu1 %v9424_v32  ;;  %v11108_v35 = vld [vmem:[#allocation3 + $0xf4] sm:$0xff]  ;;  %v11125_v32 = vld [vmem:[%s12574_s5 + $0xa0] sm:$0xff]  }
 0x262   :  { %v11112_v20 = vld [vmem:[#allocation3 + $0x114] sm:$0xff]  ;;  %12808 = vst [vmem:[#allocation29_spill] sm:$0xff] %v11116_v8  ;;  %8518 = vmatprep.subr.bf16.mxu1 %v9277_v53  ;;  %v11127_v11 = vld [vmem:[#allocation3 + $0x124] sm:$0xff]  ;;  %v11133_v26 = vpack.c.bf16 %v11108_v35, %v11085_v43 }
 0x263   :  { %v11129_v31 = vld [vmem:[#allocation3 + $0x120] sm:$0xff]  ;;  %v11137_v39 = vpack.c.bf16 %v11112_v20, %v11110_v38  ;;  %v11150_v47 = vld [vmem:[#allocation3 + $0x134] sm:$0xff] }
 0x264   :  { %12810 = vst [vmem:[#allocation36_spill] sm:$0xff] %v11133_v26  ;;  %v11139_v63 = vld [vmem:[#allocation3 + $0x83] sm:$0xff]  ;;  %v11154_v25 = vpack.c.bf16 %v11129_v31, %v11098_v33  ;;  %v11156_v21 = vld [vmem:[#allocation3 + $0xd3] sm:$0xff]  ;;  %v11166_v36 = vpack.c.bf16 %v11150_v47, %v11127_v11 }
 0x265   :  { %12811 = vst [vmem:[#allocation37_spill] sm:$0xff] %v11137_v39  ;;  %12812 = vst [vmem:[#allocation38_spill] sm:$0xff] %v11139_v63  ;;  %v11148_v7 = vld [vmem:[%s12574_s5 + $0x20] sm:$0xff]   ;;  %v11162_v48 = vld [vmem:[#allocation3 + $0xd2] sm:$0xff]  ;;  %8519 = vmatpush3.bf16.msra.mxu1 %v9277_v53  ;;  %v3240_v8 = vpack.c.bf16 %v11139_v63, %v10999_v9  ;;  %v3241_v39 = vpack.c.bf16 %v11001_v2, %v11156_v21 }
 0x266   :  { %12814 = vst [vmem:[#allocation40_spill] sm:$0xff] %v11154_v25  ;;  %v11160_v4 = vld [vmem:[#allocation3 + $0x22] sm:$0xff]  ;;  %12815 = vst [vmem:[#allocation41_spill] sm:$0xff] %v11166_v36  ;;  %v11170_v46 = vld [vmem:[#allocation3 + $0x70] sm:$0xff]  ;;  %8536 = vmatprep.subr.bf16.mxu1 %v11125_v32  ;;  %8376 = vmatprep.subr.bf16.mxu0 %v11148_v7 }
 0x267   :  { %v11172_v51 = vld [vmem:[#allocation3 + $0x32] sm:$0xff]  ;;  %v11174_v55 = vld [vmem:[#allocation3 + $0x42] sm:$0xff]  ;;  %8505 = vmatmul.mubr.msk.bf16.gmra.mrb[4].mxu1 %vm722_vm0, %v3240_v8 }
 0x268   :  { %v1829_v19 = vld [vmem:[#allocation3] sm:$0xff]  ;;  %v11182_v61 = vld [vmem:[#allocation3 + $0x52] sm:$0xff]  ;;  %8508 = vmatprep.mubr.msk.bf16.mxu1 %vm722_vm0, %v3241_v39 }
 0x269   :  { %v11184_v53 = vld [vmem:[#allocation3 + $0x62] sm:$0xff]  ;;  %v11190_v26 = vld [vmem:[#allocation3 + $0x131] sm:$0xff] }
 0x26a   :  { %12816 = vst [vmem:[#allocation42_spill] sm:$0xff] %v11190_v26  ;;  %v11192_v25 = vld [vmem:[#allocation3 + $0x10] sm:$0xff]  ;;  %v11194_v9 = vld [vmem:[#allocation3 + $0x80] sm:$0xff]  ;;  %v11221_v28 = vpack.c.bf16 %v11190_v26, %v10984_v23 }
 0x26b   :  { %12817 = vst [vmem:[#allocation43_spill] sm:$0xff] %v11192_v25  ;;  %v11199_v30 = vld [vmem:[#allocation3 + $0x130] sm:$0xff]  ;;  %v11201_v45 = vld [vmem:[#allocation3 + $0xe2] sm:$0xff]  ;;  %v11207_v2 = vpack.c.bf16 %v11194_v9, %v11170_v46  ;;  %v1845_v36 = vpack.c.bf16 %v11192_v25, %v1829_v19  ;;  %v3242_v25 = vpack.c.bf16 %v11013_v1, %v11011_v42 }
 0x26c   :  { %v11203_v54 = vld [vmem:[#allocation3 + $0xf2] sm:$0xff]  ;;  %v11211_v24 = vld [vmem:[#allocation3 + $0x102] sm:$0xff]  ;;  %12819 = vst [vmem:[#allocation45_spill] sm:$0xff] %v11221_v28  ;;  %8353 = vmatmul.mubr.msk.bf16.gmra.mrb[76].mxu0 %vm722_vm0, %v11221_v28 }
 0x26d   :  { %12818 = vst [vmem:[#allocation44_spill] sm:$0xff] %v11207_v2  ;;  %v11213_v34 = vld [vmem:[#allocation3 + $0x112] sm:$0xff]  ;;  %v11215_v63 = vld [vmem:[#allocation3 + $0x122] sm:$0xff]  ;;  %v11227_v39 = vpack.c.bf16 %v11211_v24, %v11203_v54  ;;  %8360 = vmatprep.mubr.msk.bf16.mxu0 %vm722_vm0, %v1845_v36 }
 0x26e   :  { %v11223_v6 = vld [vmem:[#allocation3 + $0x140] sm:$0xff]  ;;  %v11231_v19 = vpack.c.bf16 %v11215_v63, %v11213_v34  ;;  %v11242_v23 = vld [vmem:[#allocation3 + $0x72] sm:$0xff] }
 0x26f   :  { %12820 = vst [vmem:[#allocation46_spill] sm:$0xff] %v11227_v39  ;;  %v11235_v2 = vpack.c.bf16 %v11223_v6, %v11199_v30  ;;  %v11239_v8 = vld [vmem:[#allocation3 + $0x81] sm:$0xff]  ;;  %v11254_v28 = vld [vmem:[#allocation3 + $0x132] sm:$0xff]  ;;  %8509 = vmatmul.mubr.msk.bf16.gmra.mrb[8].mxu1 %vm722_vm0, %v3242_v25 }
 0x270   :  { %12821 = vst [vmem:[#allocation47_spill] sm:$0xff] %v11231_v19  ;;  %12823 = vst [vmem:[#allocation49_spill] sm:$0xff] %v11239_v8  ;;  %v11248_v19 = vld [vmem:[#allocation3 + $0x141] sm:$0xff]  ;;  %v11279_v36 = vld [vmem:[#allocation3 + $0x14] sm:$0xff] }
 0x271   :  { %12822 = vst [vmem:[#allocation48_spill] sm:$0xff] %v11235_v2  ;;  %12824 = vst [vmem:[#allocation50_spill] sm:$0xff] %v11248_v19  ;;  %v3243_v2 = vpack.c.bf16 %v11027_v13, %v11015_v49  ;;  %v11252_v44 = vld [vmem:[#allocation3 + $0x20] sm:$0xff]  ;;  %v9283_v49 = vld [vmem:[%s12574_s5 + $0x28] sm:$0xff]  }
 0x272   :  { %12825 = vst [vmem:[#allocation51_spill] sm:$0xff] %v11252_v44  ;;  %v11256_v14 = vld [vmem:[#allocation3 + $0x82] sm:$0xff]  ;;  %v11268_v1 = vpack.c.bf16 %v10995_v15, %v11252_v44  ;;  %v11289_v15 = vld [vmem:[#allocation3 + $0x51] sm:$0xff] }
 0x273   :  { %12826 = vst [vmem:[#allocation52_spill] sm:$0xff] %v11256_v14  ;;  %8512 = vmatprep.mubr.msk.bf16.mxu1 %vm722_vm0, %v3243_v2  ;;  %v11264_v42 = vld [vmem:[#allocation3 + $0x142] sm:$0xff]  ;;  %v11283_v2 = vpack.c.bf16 %v11039_v22, %v11003_v18  ;;  %12831 = vst [vmem:[#allocation57_spill] sm:$0xff] %v11289_v15  ;;  %v11293_v10 = vld [vmem:[#allocation3 + $0x71] sm:$0xff]  ;;  %v3415_v22 = vpack.c.bf16 %v11051_v40, %v11279_v36 }
 0x274   :  { %12827 = vst [vmem:[#allocation53_spill] sm:$0xff] %v11264_v42  ;;  %v11275_v13 = vpack.c.bf16 %v11264_v42, %v11254_v28  ;;  %v11277_v25 = vld [vmem:[#allocation3 + $0x143] sm:$0xff]  ;;  %8361 = vmatmul.mubr.msk.bf16.vlgmr.msra.gmra.mrb[64].mxu0 %vm722_vm0, %v11268_v1  ;;  %v11300_v18 = vld [vmem:[#allocation3 + $0x111] sm:$0xff] }
 0x275   :  { %12829 = vst [vmem:[#allocation55_spill] sm:$0xff] %v11277_v25  ;;  %v11285_v39 = vld [vmem:[#allocation3 + $0x41] sm:$0xff]  ;;  %8364 = vmatprep.mubr.msk.bf16.mxu0 %vm722_vm0, %v11283_v2  ;;  %8377 = vmatpush3.bf16.msra.mxu0 %v11148_v7  ;;  %12833 = vst [vmem:[#allocation59_spill] sm:$0xff] %v11300_v18  ;;  %v3244_v44 = vpack.c.bf16 %v11277_v25, %v11029_v59  ;;  %v11309_v14 = vld [vmem:[%s12574_s5 + $0x30] sm:$0xff]  }
 0x276   :  { %12828 = vst [vmem:[#allocation54_spill] sm:$0xff] %v11275_v13  ;;  %12830 = vst [vmem:[#allocation56_spill] sm:$0xff] %v11285_v39  ;;  %v11291_v26 = vld [vmem:[#allocation3 + $0x61] sm:$0xff]  ;;  %8378 = vmatprep.subr.bf16.mxu0 %v9283_v49  ;;  %v11313_v8 = vld [vmem:[#allocation3 + $0x131] sm:$0xff] }
 0x277   :  { %v1837_v13 = vld [vmem:[#allocation3 + $0xc0] sm:$0xff]  ;;  %12835 = vst [vmem:[#allocation61_spill] sm:$0xff] %v11313_v8  ;;  %v11323_v15 = vld [vmem:[#allocation3 + $0x52] sm:$0xff]  ;;  %8513 = vmatmul.mubr.msk.bf16.gmra.mrb[12].mxu1 %vm722_vm0, %v3244_v44  ;;  %v11344_v44 = vpack.c.bf16 %v11170_v46, %v11059_v57 }
 0x278   :  { %v11298_v42 = vld [vmem:[#allocation3 + $0x101] sm:$0xff]  ;;  %12837 = vst [vmem:[#allocation63_spill] sm:$0xff] %v11323_v15  ;;  %v11330_v27 = vld [vmem:[#allocation3 + $0x72] sm:$0xff]  ;;  %8520 = vmatprep.mubr.msk.bf16.mxu1 %vm722_vm0, %v3415_v22  ;;  %v1849_v40 = vpack.c.bf16 %v11061_v56, %v1837_v13  ;;  %v3416_v15 = vpack.c.bf16 %v11043_v41, %v11041_v50  ;;  %v1850_v41 = vpack.c.bf16 %v11089_v17, %v11087_v58 }
 0x279   :  { %12832 = vst [vmem:[#allocation58_spill] sm:$0xff] %v11298_v42  ;;  %v11311_v19 = vld [vmem:[#allocation3 + $0x121] sm:$0xff]  ;;  %12839 = vst [vmem:[#allocation65_spill] sm:$0xff] %v11330_v27  ;;  %8379 = vmatpush3.bf16.msra.mxu0 %v9283_v49  ;;  %v11338_v18 = vld [vmem:[#allocation3 + $0x53] sm:$0xff] }
 0x27a   :  { %12834 = vst [vmem:[#allocation60_spill] sm:$0xff] %v11311_v19  ;;  %v11321_v59 = vld [vmem:[#allocation3 + $0x42] sm:$0xff]  ;;  %12841 = vst [vmem:[#allocation67_spill] sm:$0xff] %v11338_v18  ;;  %8396 = vmatprep.subr.bf16.mxu0 %v11309_v14  ;;  %v11347_v25 = vld [vmem:[#allocation3 + $0x153] sm:$0xff] }
 0x27b   :  { %12836 = vst [vmem:[#allocation62_spill] sm:$0xff] %v11321_v59  ;;  %v11325_v39 = vld [vmem:[#allocation3 + $0x62] sm:$0xff]  ;;  %v11351_v60 = vld [vmem:[#allocation3 + $0x73] sm:$0xff]  ;;  %v3417_v59 = vpack.c.bf16 %v11057_v29, %v11053_v16 }
 0x27c   :  { %12838 = vst [vmem:[#allocation64_spill] sm:$0xff] %v11325_v39  ;;  %v11332_v7 = vld [vmem:[#allocation3 + $0x43] sm:$0xff]  ;;  %12843 = vst [vmem:[#allocation69_spill] sm:$0xff] %v11351_v60  ;;  %v11355_v13 = vld [vmem:[#allocation3 + $0x94] sm:$0xff]  ;;  %8365 = vmatmul.mubr.msk.bf16.gmra.mrb[68].mxu0 %vm722_vm0, %v11344_v44 }
 0x27d   :  { %12840 = vst [vmem:[#allocation66_spill] sm:$0xff] %v11332_v7  ;;  %v11349_v8 = vld [vmem:[#allocation3 + $0x63] sm:$0xff]  ;;  %v11359_v42 = vld [vmem:[#allocation3 + $0x113] sm:$0xff]  ;;  %8368 = vmatprep.mubr.msk.bf16.mxu0 %vm722_vm0, %v1849_v40 }
 0x27e   :  { %12842 = vst [vmem:[#allocation68_spill] sm:$0xff] %v11349_v8  ;;  %v11357_v22 = vld [vmem:[#allocation3 + $0x103] sm:$0xff]  ;;  %12845 = vst [vmem:[#allocation71_spill] sm:$0xff] %v11359_v42  ;;  %v11367_v27 = vld [vmem:[#allocation3 + $0x133] sm:$0xff] }
 0x27f   :  { %12844 = vst [vmem:[#allocation70_spill] sm:$0xff] %v11357_v22  ;;  %v11365_v57 = vld [vmem:[#allocation3 + $0x123] sm:$0xff]  ;;  %v11379_v46 = vld [vmem:[#allocation3 + $0x54] sm:$0xff]  ;;  %8521 = vmatmul.mubr.msk.bf16.vlgmr.msra.gmra.mrb[0].mxu1 %vm722_vm0, %v3416_v15 }
 0x280   :  { %v11369_v39 = vld [vmem:[#allocation3 + $0x143] sm:$0xff]  ;;  %12847 = vst [vmem:[#allocation73_spill] sm:$0xff] %v11379_v46  ;;  %v11389_v40 = vld [vmem:[#allocation3 + $0x74] sm:$0xff]  ;;  %8537 = vmatpush3.bf16.msra.mxu1 %v11125_v32  ;;  %8524 = vmatprep.mubr.msk.bf16.mxu1 %vm722_vm0, %v3417_v59  ;;  %v1851_v32 = vpack.c.bf16 %v11098_v33, %v11096_v52  ;;  %v1852_v33 = vpack.c.bf16 %v11199_v30, %v11129_v31 }
 0x281   :  { %12846 = vst [vmem:[#allocation72_spill] sm:$0xff] %v11369_v39  ;;  %v9281_v18 = vld [vmem:[%s12574_s5 + $0xa8] sm:$0xff]   ;;  %v11397_v19 = vld [vmem:[#allocation3 + $0x154] sm:$0xff] }
 0x282   :  { %v11377_v7 = vld [vmem:[#allocation3 + $0x44] sm:$0xff]  ;;  %v11401_v8 = vld [vmem:[#allocation3 + $0x114] sm:$0xff]  ;;  %8538 = vmatprep.subr.bf16.mxu1 %v9281_v18 }
 0x283   :  { %v11387_v49 = vld [vmem:[#allocation3 + $0x64] sm:$0xff]  ;;  %v11410_v22 = vld [vmem:[#allocation3 + $0x134] sm:$0xff] }
 0x284   :  { %v11391_v42 = vld [vmem:[#allocation3 + $0x84] sm:$0xff]  ;;  %v9284_v15 = vld [vmem:[%s12574_s5 + $0xb0] sm:$0xff]   ;;  %8369 = vmatmul.mubr.msk.bf16.gmra.mrb[72].mxu0 %vm722_vm0, %v1850_v41  ;;  %8539 = vmatpush3.bf16.msra.mxu1 %v9281_v18  ;;  %v3421_v18 = vpack.c.bf16 %v11127_v11, %v11112_v20  ;;  %v9287_v31 = vld [vmem:[%s12574_s5 + $0x38] sm:$0xff]  }
 0x285   :  { %12848 = vst [vmem:[#allocation74_spill] sm:$0xff] %v11391_v42  ;;  %v11399_v60 = vld [vmem:[#allocation3 + $0x104] sm:$0xff]  ;;  %v11431_v59 = vld [vmem:[#allocation3 + $0xd4] sm:$0xff]  ;;  %8372 = vmatprep.mubr.msk.bf16.mxu0 %vm722_vm0, %v1851_v32  ;;  %8556 = vmatprep.subr.bf16.mxu1 %v9284_v15 }
 0x286   :  { %v11408_v39 = vld [vmem:[#allocation3 + $0x124] sm:$0xff]  ;;  %v6091_v16 = vpack.c.bf16 %v11401_v8, %v11399_v60  ;;  %v3419_v50 = vpack.c.bf16 %v11085_v43, %v11431_v59  ;;  %v11454_v43 = vpack.c.bf16 %v11172_v51, %v11160_v4 }
 0x287   :  { %v11412_v46 = vld [vmem:[#allocation3 + $0x144] sm:$0xff] }
 0x288   :  { %v11427_v42 = vld [vmem:[#allocation3 + $0x84] sm:$0xff] }
 0x289   :  { %v3418_v17 = vpack.c.bf16 %v11427_v42, %v11074_v12  ;;  %v2152_v29 = vld [vmem:[#allocation3 + $0x2] sm:$0xff]  ;;  %v3420_v12 = vpack.c.bf16 %v11110_v38, %v11108_v35  ;;  %v11463_v35 = vpack.c.bf16 %v11182_v61, %v11174_v55 }
 0x28a   :  { %v2168_v52 = vpack.c.bf16 %v11100_v37, %v2152_v29  ;;  %v11459_v30 = vld [vmem:[#allocation3 + $0x144] sm:$0xff] }
 0x28b   :  { %8525 = vmatmul.mubr.msk.bf16.gmra.mrb[4].mxu1 %vm722_vm0, %v3418_v17  ;;  %v3422_v38 = vpack.c.bf16 %v11459_v30, %v11150_v47  ;;  %v2160_v20 = vld [vmem:[#allocation3 + $0xc2] sm:$0xff]  ;;  %v9285_v47 = vld [vmem:[%s12574_s5 + $0xb8] sm:$0xff]   ;;  %v11500_v17 = vld [vmem:[#allocation3 + $0x90] sm:$0xff] }
 0x28c   :  { %8528 = vmatprep.mubr.msk.bf16.mxu1 %vm722_vm0, %v3419_v50  ;;  %8373 = vmatmul.mubr.msk.bf16.gmra.mrb[76].mxu0 %vm722_vm0, %v1852_v33  ;;  %v9290_v11 = vld [vmem:[%s12574_s5 + $0x40] sm:$0xff]   ;;  %v2172_v50 = vpack.c.bf16 %v11162_v48, %v2160_v20 }
 0x28d   :  { %8380 = vmatprep.mubr.msk.bf16.mxu0 %vm722_vm0, %v2168_v52  ;;  %v9288_v29 = vld [vmem:[%s12574_s5 + $0xc0] sm:$0xff]   ;;  %v11504_v52 = vpack.c.bf16 %v11213_v34, %v11211_v24  ;;  %v11517_v34 = vpack.c.bf16 %v11254_v28, %v11215_v63  ;;  %v9291_v24 = vld [vmem:[%s12574_s5 + $0x48] sm:$0xff]   ;;  %v9294_v28 = vld [vmem:[%s12574_s5 + $0x50] sm:$0xff]  }
 0x28e   :  { %v2508_v20 = vld [vmem:[#allocation3 + $0x4] sm:$0xff] }
 0x293   :  { %8529 = vmatmul.mubr.msk.bf16.gmra.mrb[8].mxu1 %vm722_vm0, %v3420_v12  ;;  %v12852_v12 = vld [vmem:[#allocation21_spill] sm:$0xff] }
 0x294   :  { %8532 = vmatprep.mubr.msk.bf16.mxu1 %vm722_vm0, %v3421_v18  ;;  %8381 = vmatmul.mubr.msk.bf16.vlgmr.msra.gmra.mrb[64].mxu0 %vm722_vm0, %v11454_v43  ;;  %v12853_v18 = vld [vmem:[#allocation20_spill] sm:$0xff] }
 0x295   :  { %8384 = vmatprep.mubr.msk.bf16.mxu0 %vm722_vm0, %v11463_v35  ;;  %8397 = vmatpush3.bf16.msra.mxu0 %v11309_v14  ;;  %v11481_v14 = vpack.c.bf16 %v11242_v23, %v11184_v53 }
 0x296   :  { %8398 = vmatprep.subr.bf16.mxu0 %v9287_v31 }
 0x299   :  { %8399 = vmatpush3.bf16.msra.mxu0 %v9287_v31  ;;  %v12854_v31 = vld [vmem:[#allocation49_spill] sm:$0xff] }
 0x29a   :  { %8416 = vmatprep.subr.bf16.mxu0 %v9290_v11 }
 0x29b   :  { %8533 = vmatmul.mubr.msk.bf16.gmra.mrb[12].mxu1 %vm722_vm0, %v3422_v38 }
 0x29c   :  { %8540 = vmatprep.mubr.msk.bf16.mxu1 %vm722_vm0, %v11268_v1  ;;  %8385 = vmatmul.mubr.msk.bf16.gmra.mrb[68].mxu0 %vm722_vm0, %v11481_v14  ;;  %v11495_v1 = vpack.c.bf16 %v11203_v54, %v11201_v45  ;;  %v3596_v54 = vpack.c.bf16 %v11500_v17, %v11194_v9  ;;  %v11527_v9 = vld [vmem:[#allocation3 + $0x150] sm:$0xff] }
 0x29d   :  { %8388 = vmatprep.mubr.msk.bf16.mxu0 %vm722_vm0, %v2172_v50  ;;  %v3600_v63 = vpack.c.bf16 %v11527_v9, %v11223_v6  ;;  %v9289_v6 = vld [vmem:[%s12574_s5 + $0xc8] sm:$0xff]   ;;  %v2524_v50 = vpack.c.bf16 %v11279_v36, %v2508_v20  ;;  %v12860_v36 = vld [vmem:[#allocation26_spill] sm:$0xff] }
 0x29e   :  { %v12864_v20 = vld [vmem:[#allocation37_spill] sm:$0xff] }
 0x2a3   :  { %8541 = vmatmul.mubr.msk.bf16.vlgmr.msra.gmra.mrb[0].mxu1 %vm722_vm0, %v11283_v2  ;;  %v2330_v2 = vld [vmem:[#allocation3 + $0x3] sm:$0xff] }
 0x2a4   :  { %8557 = vmatpush3.bf16.msra.mxu1 %v9284_v15  ;;  %8544 = vmatprep.mubr.msk.bf16.mxu1 %vm722_vm0, %v11344_v44  ;;  %v2346_v44 = vpack.c.bf16 %v11021_v3, %v2330_v2  ;;  %v2338_v3 = vld [vmem:[#allocation3 + $0xc3] sm:$0xff]  ;;  %v9295_v2 = vld [vmem:[%s12574_s5 + $0x58] sm:$0xff]  }
 0x2a5   :  { %8558 = vmatprep.subr.bf16.mxu1 %v9285_v47  ;;  %8389 = vmatmul.mubr.msk.bf16.gmra.mrb[72].mxu0 %vm722_vm0, %v11495_v1  ;;  %v12849_v15 = vld [vmem:[#allocation16_spill] sm:$0xff] }
 0x2a6   :  { %8392 = vmatprep.mubr.msk.bf16.mxu0 %vm722_vm0, %v11504_v52 }
 0x2a8   :  { %8559 = vmatpush3.bf16.msra.mxu1 %v9285_v47  ;;  %v12856_v47 = vld [vmem:[#allocation22_spill] sm:$0xff] }
 0x2a9   :  { %8576 = vmatprep.subr.bf16.mxu1 %v9288_v29 }
 0x2ab   :  { %8545 = vmatmul.mubr.msk.bf16.gmra.mrb[4].mxu1 %vm722_vm0, %v3596_v54  ;;  %v12858_v54 = vld [vmem:[#allocation45_spill] sm:$0xff] }
 0x2ac   :  { %8548 = vmatprep.mubr.msk.bf16.mxu1 %vm722_vm0, %v1850_v41  ;;  %v2350_v41 = vpack.c.bf16 %v11156_v21, %v2338_v3  ;;  %v11555_v21 = vld [vmem:[#allocation3 + $0x91] sm:$0xff] }
 0x2ad   :  { %8393 = vmatmul.mubr.msk.bf16.gmra.mrb[76].mxu0 %vm722_vm0, %v11517_v34  ;;  %v3774_v38 = vpack.c.bf16 %v11555_v21, %v12854_v31 }
 0x2ae   :  { %8400 = vmatprep.mubr.msk.bf16.mxu0 %vm722_vm0, %v2346_v44  ;;  %v11577_v44 = vld [vmem:[#allocation3 + $0x151] sm:$0xff] }
 0x2b3   :  { %8549 = vmatmul.mubr.msk.bf16.gmra.mrb[8].mxu1 %vm722_vm0, %v1851_v32  ;;  %v12850_v32 = vld [vmem:[#allocation9_spill] sm:$0xff] }
 0x2b4   :  { %8552 = vmatprep.mubr.msk.bf16.mxu1 %vm722_vm0, %v1852_v33  ;;  %v12851_v33 = vld [vmem:[#allocation19_spill] sm:$0xff] }
 0x2b5   :  { %8401 = vmatmul.mubr.msk.bf16.vlgmr.msra.gmra.mrb[64].mxu0 %vm722_vm0, %v11063_v0 }
 0x2b6   :  { %8404 = vmatprep.mubr.msk.bf16.mxu0 %vm722_vm0, %v11005_v62  ;;  %8417 = vmatpush3.bf16.msra.mxu0 %v9290_v11  ;;  %v12855_v11 = vld [vmem:[#allocation35_spill] sm:$0xff] }
 0x2b7   :  { %8418 = vmatprep.subr.bf16.mxu0 %v9291_v24 }
 0x2ba   :  { %8419 = vmatpush3.bf16.msra.mxu0 %v9291_v24  ;;  %v12859_v24 = vld [vmem:[#allocation23_spill] sm:$0xff] }
 0x2bb   :  { %8553 = vmatmul.mubr.msk.bf16.gmra.mrb[12].mxu1 %vm722_vm0, %v3600_v63  ;;  %8436 = vmatprep.subr.bf16.mxu0 %v9294_v28  ;;  %v12861_v63 = vld [vmem:[#allocation50_spill] sm:$0xff] }
 0x2bc   :  { %8560 = vmatprep.mubr.msk.bf16.mxu1 %vm722_vm0, %v10954_v5  ;;  %v9292_v5 = vld [vmem:[%s12574_s5 + $0xd0] sm:$0xff]   ;;  %v3778_v3 = vpack.c.bf16 %v11577_v44, %v12861_v63 }
 0x2bd   :  { %8405 = vmatmul.mubr.msk.bf16.gmra.mrb[68].mxu0 %vm722_vm0, %v12849_v15 }
 0x2be   :  { %8408 = vmatprep.mubr.msk.bf16.mxu0 %vm722_vm0, %v2350_v41  ;;  %v2516_v41 = vld [vmem:[#allocation3 + $0xc4] sm:$0xff] }
 0x2c3   :  { %8561 = vmatmul.mubr.msk.bf16.vlgmr.msra.gmra.mrb[0].mxu1 %vm722_vm0, %v12850_v32  ;;  %v2528_v32 = vpack.c.bf16 %v11431_v59, %v2516_v41  ;;  %v9296_v59 = vld [vmem:[%s12574_s5 + $0xe0] sm:$0xff]   ;;  %v12871_v41 = vld [vmem:[#allocation53_spill] sm:$0xff] }
 0x2c4   :  { %8577 = vmatpush3.bf16.msra.mxu1 %v9288_v29  ;;  %8564 = vmatprep.mubr.msk.bf16.mxu1 %vm722_vm0, %v12851_v33  ;;  %v12857_v29 = vld [vmem:[#allocation39_spill] sm:$0xff] }
 0x2c5   :  { %8578 = vmatprep.subr.bf16.mxu1 %v9289_v6  ;;  %8409 = vmatmul.mubr.msk.bf16.gmra.mrb[72].mxu0 %vm722_vm0, %v12852_v12  ;;  %v12862_v33 = vld [vmem:[#allocation27_spill] sm:$0xff] }
 0x2c6   :  { %8412 = vmatprep.mubr.msk.bf16.mxu0 %vm722_vm0, %v12853_v18 }
 0x2c8   :  { %8579 = vmatpush3.bf16.msra.mxu1 %v9289_v6  ;;  %v9298_v6 = vld [vmem:[%s12574_s5 + $0x60] sm:$0xff]  }
 0x2c9   :  { %8596 = vmatprep.subr.bf16.mxu1 %v9292_v5 }
 0x2cb   :  { %8565 = vmatmul.mubr.msk.bf16.gmra.mrb[4].mxu1 %vm722_vm0, %v3774_v38  ;;  %v12863_v38 = vld [vmem:[#allocation36_spill] sm:$0xff] }
 0x2cc   :  { %8568 = vmatprep.mubr.msk.bf16.mxu1 %vm722_vm0, %v12855_v11  ;;  %v12865_v11 = vld [vmem:[#allocation52_spill] sm:$0xff] }
 0x2cd   :  { %8413 = vmatmul.mubr.msk.bf16.gmra.mrb[76].mxu0 %vm722_vm0, %v12856_v47 }
 0x2ce   :  { %8420 = vmatprep.mubr.msk.bf16.mxu0 %vm722_vm0, %v2524_v50 }
 0x2d3   :  { %8569 = vmatmul.mubr.msk.bf16.gmra.mrb[8].mxu1 %vm722_vm0, %v12857_v29  ;;  %v12868_v29 = vld [vmem:[#allocation41_spill] sm:$0xff] }
 0x2d4   :  { %8572 = vmatprep.mubr.msk.bf16.mxu1 %vm722_vm0, %v12858_v54  ;;  %v9299_v54 = vld [vmem:[%s12574_s5 + $0x68] sm:$0xff]  }
 0x2d5   :  { %8421 = vmatmul.mubr.msk.bf16.vlgmr.msra.gmra.mrb[64].mxu0 %vm722_vm0, %v12859_v24 }
 0x2d6   :  { %8424 = vmatprep.mubr.msk.bf16.mxu0 %vm722_vm0, %v12860_v36  ;;  %8437 = vmatpush3.bf16.msra.mxu0 %v9294_v28  ;;  %v9293_v28 = vld [vmem:[%s12574_s5 + $0xd8] sm:$0xff]  }
 0x2d7   :  { %8438 = vmatprep.subr.bf16.mxu0 %v9295_v2 }
 0x2da   :  { %8439 = vmatpush3.bf16.msra.mxu0 %v9295_v2  ;;  %v11628_v2 = vld [vmem:[#allocation3 + $0x152] sm:$0xff] }
 0x2db   :  { %8573 = vmatmul.mubr.msk.bf16.gmra.mrb[12].mxu1 %vm722_vm0, %v3778_v3  ;;  %8456 = vmatprep.subr.bf16.mxu0 %v9298_v6  ;;  %v12870_v3 = vld [vmem:[#allocation24_spill] sm:$0xff] }
 0x2dc   :  { %8580 = vmatprep.mubr.msk.bf16.mxu1 %vm722_vm0, %v11454_v43  ;;  %v11605_v43 = vld [vmem:[#allocation3 + $0x92] sm:$0xff] }
 0x2dd   :  { %8425 = vmatmul.mubr.msk.bf16.gmra.mrb[68].mxu0 %vm722_vm0, %v12862_v33 }
 0x2de   :  { %8428 = vmatprep.mubr.msk.bf16.mxu0 %vm722_vm0, %v2528_v32  ;;  %v3956_v32 = vpack.c.bf16 %v11628_v2, %v12871_v41  ;;  %v12879_v41 = vld [vmem:[#allocation31_spill] sm:$0xff] }
 0x2e3   :  { %8581 = vmatmul.mubr.msk.bf16.vlgmr.msra.gmra.mrb[0].mxu1 %vm722_vm0, %v11463_v35  ;;  %v3952_v35 = vpack.c.bf16 %v11605_v43, %v12865_v11 }
 0x2e4   :  { %8597 = vmatpush3.bf16.msra.mxu1 %v9292_v5  ;;  %8584 = vmatprep.mubr.msk.bf16.mxu1 %vm722_vm0, %v11481_v14  ;;  %v12866_v14 = vld [vmem:[#allocation43_spill] sm:$0xff] }
 0x2e5   :  { %8598 = vmatprep.subr.bf16.mxu1 %v9293_v28  ;;  %8429 = vmatmul.mubr.msk.bf16.gmra.mrb[72].mxu0 %vm722_vm0, %v12863_v38  ;;  %v12867_v5 = vld [vmem:[#allocation51_spill] sm:$0xff] }
 0x2e6   :  { %8432 = vmatprep.mubr.msk.bf16.mxu0 %vm722_vm0, %v12864_v20  ;;  %v2703_v50 = vpack.c.bf16 %v12867_v5, %v12866_v14  ;;  %v12876_v14 = vld [vmem:[#allocation38_spill] sm:$0xff] }
 0x2e8   :  { %8599 = vmatpush3.bf16.msra.mxu1 %v9293_v28  ;;  %v9297_v28 = vld [vmem:[%s12574_s5 + $0xe8] sm:$0xff]  }
 0x2e9   :  { %8616 = vmatprep.subr.bf16.mxu1 %v9296_v59 }
 0x2eb   :  { %8585 = vmatmul.mubr.msk.bf16.gmra.mrb[4].mxu1 %vm722_vm0, %v3952_v35  ;;  %v11658_v35 = vld [vmem:[#allocation3 + $0x93] sm:$0xff] }
 0x2ec   :  { %8588 = vmatprep.mubr.msk.bf16.mxu1 %vm722_vm0, %v11495_v1  ;;  %v12869_v1 = vld [vmem:[#allocation18_spill] sm:$0xff] }
 0x2ed   :  { %8433 = vmatmul.mubr.msk.bf16.gmra.mrb[76].mxu0 %vm722_vm0, %v12868_v29 }
 0x2ee   :  { %8440 = vmatprep.mubr.msk.bf16.mxu0 %vm722_vm0, %v2703_v50  ;;  %v12878_v50 = vld [vmem:[#allocation48_spill] sm:$0xff] }
 0x2f3   :  { %8589 = vmatmul.mubr.msk.bf16.gmra.mrb[8].mxu1 %vm722_vm0, %v11504_v52  ;;  %v9302_v52 = vld [vmem:[%s12574_s5 + $0x70] sm:$0xff]  }
 0x2f4   :  { %8592 = vmatprep.mubr.msk.bf16.mxu1 %vm722_vm0, %v11517_v34  ;;  %v12872_v34 = vld [vmem:[#allocation44_spill] sm:$0xff] }
 0x2f5   :  { %8441 = vmatmul.mubr.msk.bf16.vlgmr.msra.gmra.mrb[64].mxu0 %vm722_vm0, %v12869_v1 }
 0x2f6   :  { %8444 = vmatprep.mubr.msk.bf16.mxu0 %vm722_vm0, %v12870_v3  ;;  %8457 = vmatpush3.bf16.msra.mxu0 %v9298_v6  ;;  %v12873_v6 = vpack.c.bf16 %v11087_v58, %v11061_v56  ;;  %v12874_v56 = vld [vmem:[#allocation29_spill] sm:$0xff]  ;;  %v12875_v58 = vld [vmem:[#allocation40_spill] sm:$0xff] }
 0x2f7   :  { %8458 = vmatprep.subr.bf16.mxu0 %v9299_v54 }
 0x2fa   :  { %8459 = vmatpush3.bf16.msra.mxu0 %v9299_v54  ;;  %v9303_v54 = vld [vmem:[%s12574_s5 + $0x78] sm:$0xff]  }
 0x2fb   :  { %8593 = vmatmul.mubr.msk.bf16.gmra.mrb[12].mxu1 %vm722_vm0, %v3956_v32  ;;  %8476 = vmatprep.subr.bf16.mxu0 %v9302_v52 }
 0x2fc   :  { %8600 = vmatprep.mubr.msk.bf16.mxu1 %vm722_vm0, %v11063_v0  ;;  %v9300_v0 = vld [vmem:[%s12574_s5 + $0xf0] sm:$0xff]  }
 0x2fd   :  { %8445 = vmatmul.mubr.msk.bf16.gmra.mrb[68].mxu0 %vm722_vm0, %v12872_v34 }
 0x2fe   :  { %8448 = vmatprep.mubr.msk.bf16.mxu0 %vm722_vm0, %v12873_v6  ;;  %v12882_v6 = vld [vmem:[#allocation10_spill] sm:$0xff] }
 0x303   :  { %8601 = vmatmul.mubr.msk.bf16.vlgmr.msra.gmra.mrb[0].mxu1 %vm722_vm0, %v11005_v62  ;;  %v4130_v62 = vpack.c.bf16 %v11658_v35, %v12876_v14 }
 0x304   :  { %8617 = vmatpush3.bf16.msra.mxu1 %v9296_v59  ;;  %8604 = vmatprep.mubr.msk.bf16.mxu1 %vm722_vm0, %v12849_v15  ;;  %v9425_v15 = vld [vmem:[#allocation3 + $0x11] sm:$0xff]  ;;  %v12877_v59 = vld [vmem:[#allocation28_spill] sm:$0xff] }
 0x305   :  { %8618 = vmatprep.subr.bf16.mxu1 %v9297_v28  ;;  %8449 = vmatmul.mubr.msk.bf16.gmra.mrb[72].mxu0 %vm722_vm0, %v12874_v56  ;;  %v2881_v5 = vpack.c.bf16 %v12877_v59, %v9425_v15  ;;  %v12887_v15 = vld [vmem:[#allocation25_spill] sm:$0xff] }
 0x306   :  { %8452 = vmatprep.mubr.msk.bf16.mxu0 %vm722_vm0, %v12875_v58 }
 0x308   :  { %8619 = vmatpush3.bf16.msra.mxu1 %v9297_v28  ;;  %v12883_v28 = vld [vmem:[#allocation32_spill] sm:$0xff] }
 0x309   :  { %8636 = vmatprep.subr.bf16.mxu1 %v9300_v0  ;;  %v12884_v14 = vpack.c.bf16 %v12882_v6, %v12883_v28  ;;  %v12893_v6 = vld [vmem:[#allocation14_spill] sm:$0xff]  ;;  %v12894_v28 = vld [vmem:[#allocation12_spill] sm:$0xff] }
 0x30b   :  { %8605 = vmatmul.mubr.msk.bf16.gmra.mrb[4].mxu1 %vm722_vm0, %v4130_v62  ;;  %v12885_v62 = vld [vmem:[#allocation55_spill] sm:$0xff] }
 0x30c   :  { %8608 = vmatprep.mubr.msk.bf16.mxu1 %vm722_vm0, %v12852_v12  ;;  %v12880_v12 = vld [vmem:[#allocation30_spill] sm:$0xff] }
 0x30d   :  { %8453 = vmatmul.mubr.msk.bf16.gmra.mrb[76].mxu0 %vm722_vm0, %v12878_v50  ;;  %v12881_v32 = vpack.c.bf16 %v12879_v41, %v12880_v12  ;;  %v12891_v12 = vld [vmem:[#allocation11_spill] sm:$0xff] }
 0x30e   :  { %8460 = vmatprep.mubr.msk.bf16.mxu0 %vm722_vm0, %v2881_v5  ;;  %v12888_v5 = vld [vmem:[#allocation15_spill] sm:$0xff] }
 0x30f   :  { %v12889_v41 = vpack.c.bf16 %v12854_v31, %v12888_v5  ;;  %v12909_v5 = vld [vmem:[#allocation59_spill] sm:$0xff] }
 0x313   :  { %8609 = vmatmul.mubr.msk.bf16.gmra.mrb[8].mxu1 %vm722_vm0, %v12853_v18  ;;  %v4134_v18 = vpack.c.bf16 %v11347_v25, %v12885_v62  ;;  %v12898_v62 = vpack.c.bf16 %v11160_v4, %v11100_v37  ;;  %v4312_v4 = vpack.c.bf16 %v11397_v19, %v11459_v30  ;;  %v12901_v37 = vpack.c.bf16 %v12865_v11, %v11242_v23  ;;  %v9306_v23 = vld [vmem:[%s12574_s5 + $0x110] sm:$0xff]  }
 0x314   :  { %8612 = vmatprep.mubr.msk.bf16.mxu1 %vm722_vm0, %v12856_v47  ;;  %v12886_v47 = vld [vmem:[#allocation17_spill] sm:$0xff]  ;;  %v12905_v30 = vld [vmem:[#allocation54_spill] sm:$0xff] }
 0x315   :  { %8461 = vmatmul.mubr.msk.bf16.vlgmr.msra.gmra.mrb[64].mxu0 %vm722_vm0, %v12881_v32  ;;  %v2885_v59 = vpack.c.bf16 %v12887_v15, %v12886_v47  ;;  %v4654_v47 = vld [vmem:[#allocation3 + $0xf1] sm:$0xff] }
 0x316   :  { %8464 = vmatprep.mubr.msk.bf16.mxu0 %vm722_vm0, %v12884_v14  ;;  %8477 = vmatpush3.bf16.msra.mxu0 %v9302_v52  ;;  %v9301_v52 = vld [vmem:[%s12574_s5 + $0xf8] sm:$0xff]   ;;  %v12895_v14 = vpack.c.bf16 %v12893_v6, %v12894_v28 }
 0x317   :  { %8478 = vmatprep.subr.bf16.mxu0 %v9303_v54  ;;  %v12912_v6 = vld [vmem:[#allocation62_spill] sm:$0xff] }
 0x31a   :  { %8479 = vmatpush3.bf16.msra.mxu0 %v9303_v54  ;;  %v12890_v54 = vld [vmem:[#allocation13_spill] sm:$0xff] }
 0x31b   :  { %8613 = vmatmul.mubr.msk.bf16.gmra.mrb[12].mxu1 %vm722_vm0, %v4134_v18  ;;  %v12892_v32 = vpack.c.bf16 %v12890_v54, %v12891_v12  ;;  %v11802_v18 = vld [vmem:[#allocation3 + $0xa1] sm:$0xff] }
 0x31c   :  { %8620 = vmatprep.mubr.msk.bf16.mxu1 %vm722_vm0, %v12859_v24  ;;  %v9304_v24 = vld [vmem:[%s12574_s5 + $0x100] sm:$0xff]   ;;  %v4665_v15 = vpack.c.bf16 %v11802_v18, %v11555_v21  ;;  %v4824_v21 = vld [vmem:[#allocation3 + $0x32] sm:$0xff] }
 0x31d   :  { %8465 = vmatmul.mubr.msk.bf16.gmra.mrb[68].mxu0 %vm722_vm0, %v12889_v41  ;;  %v12910_v41 = vld [vmem:[#allocation60_spill] sm:$0xff]  ;;  %v4840_v28 = vpack.c.bf16 %v12912_v6, %v4824_v21 }
 0x31e   :  { %8468 = vmatprep.mubr.msk.bf16.mxu0 %vm722_vm0, %v2885_v59  ;;  %v12908_v59 = vld [vmem:[#allocation58_spill] sm:$0xff]  ;;  %v11815_v12 = vld [vmem:[#allocation3 + $0x161] sm:$0xff] }
 0x323   :  { %8621 = vmatmul.mubr.msk.bf16.vlgmr.msra.gmra.mrb[0].mxu1 %vm722_vm0, %v12860_v36  ;;  %v4308_v36 = vpack.c.bf16 %v11355_v13, %v11427_v42  ;;  %v12899_v42 = vpack.c.bf16 %v11174_v55, %v11172_v51  ;;  %v12902_v55 = vpack.c.bf16 %v11201_v45, %v11162_v48  ;;  %v9305_v51 = vld [vmem:[%s12574_s5 + $0x108] sm:$0xff]   ;;  %v12903_v48 = vld [vmem:[#allocation46_spill] sm:$0xff]  ;;  %v12904_v45 = vld [vmem:[#allocation47_spill] sm:$0xff] }
 0x324   :  { %8637 = vmatpush3.bf16.msra.mxu1 %v9300_v0  ;;  %8624 = vmatprep.mubr.msk.bf16.mxu1 %vm722_vm0, %v12862_v33  ;;  %v12896_v33 = vld [vmem:[#allocation42_spill] sm:$0xff] }
 0x325   :  { %8638 = vmatprep.subr.bf16.mxu1 %v9301_v52  ;;  %8469 = vmatmul.mubr.msk.bf16.gmra.mrb[72].mxu0 %vm722_vm0, %v12892_v32  ;;  %v12897_v0 = vpack.c.bf16 %v12861_v63, %v12896_v33  ;;  %v4669_v32 = vpack.c.bf16 %v11815_v12, %v11577_v44  ;;  %v9310_v44 = vld [vmem:[%s12574_s5 + $0x130] sm:$0xff]  }
 0x326   :  { %8472 = vmatprep.mubr.msk.bf16.mxu0 %vm722_vm0, %v12895_v14  ;;  %v12913_v14 = vld [vmem:[#allocation63_spill] sm:$0xff] }
 0x328   :  { %8639 = vmatpush3.bf16.msra.mxu1 %v9301_v52  ;;  %v4667_v52 = vpack.c.bf16 %v12910_v41, %v12909_v5 }
 0x329   :  { %8656 = vmatprep.subr.bf16.mxu1 %v9304_v24 }
 0x32b   :  { %8625 = vmatmul.mubr.msk.bf16.gmra.mrb[4].mxu1 %vm722_vm0, %v4308_v36  ;;  %v12914_v36 = vld [vmem:[#allocation64_spill] sm:$0xff] }
 0x32c   :  { %8628 = vmatprep.mubr.msk.bf16.mxu1 %vm722_vm0, %v12863_v38  ;;  %v12900_v38 = vpack.c.bf16 %v11184_v53, %v11182_v61  ;;  %v11766_v61 = vld [vmem:[#allocation3 + $0xa0] sm:$0xff]  ;;  %v4841_v33 = vpack.c.bf16 %v12914_v36, %v12913_v14 }
 0x32d   :  { %8473 = vmatmul.mubr.msk.bf16.gmra.mrb[76].mxu0 %vm722_vm0, %v12897_v0  ;;  %v4487_v53 = vpack.c.bf16 %v11766_v61, %v11500_v17  ;;  %v12915_v0 = vld [vmem:[#allocation65_spill] sm:$0xff] }
 0x32e   :  { %8480 = vmatprep.mubr.msk.bf16.mxu0 %vm722_vm0, %v12898_v62  ;;  %v4842_v62 = vpack.c.bf16 %v12865_v11, %v12915_v0  ;;  %v11845_v11 = vld [vmem:[#allocation3 + $0x162] sm:$0xff] }
 0x333   :  { %8629 = vmatmul.mubr.msk.bf16.gmra.mrb[8].mxu1 %vm722_vm0, %v12864_v20  ;;  %v11783_v20 = vld [vmem:[#allocation3 + $0x160] sm:$0xff] }
 0x334   :  { %8632 = vmatprep.mubr.msk.bf16.mxu1 %vm722_vm0, %v12868_v29  ;;  %v4646_v29 = vld [vmem:[#allocation3 + $0x31] sm:$0xff]  ;;  %v4491_v17 = vpack.c.bf16 %v11783_v20, %v11527_v9  ;;  %v9308_v9 = vld [vmem:[%s12574_s5 + $0x120] sm:$0xff]  }
 0x335   :  { %8481 = vmatmul.mubr.msk.bf16.vlgmr.msra.gmra.mrb[64].mxu0 %vm722_vm0, %v12899_v42  ;;  %v11834_v42 = vld [vmem:[#allocation3 + $0xa2] sm:$0xff] }
 0x336   :  { %8484 = vmatprep.mubr.msk.bf16.mxu0 %vm722_vm0, %v12900_v38  ;;  %v4843_v38 = vpack.c.bf16 %v11834_v42, %v11605_v43 }
 0x33b   :  { %8633 = vmatmul.mubr.msk.bf16.gmra.mrb[12].mxu1 %vm722_vm0, %v4312_v4  ;;  %v5002_v4 = vld [vmem:[#allocation3 + $0x33] sm:$0xff] }
 0x33c   :  { %8640 = vmatprep.mubr.msk.bf16.mxu1 %vm722_vm0, %v12869_v1  ;;  %v12906_v1 = vld [vmem:[#allocation56_spill] sm:$0xff] }
 0x33d   :  { %8485 = vmatmul.mubr.msk.bf16.gmra.mrb[68].mxu0 %vm722_vm0, %v12901_v37  ;;  %v4847_v37 = vpack.c.bf16 %v11845_v11, %v11628_v2  ;;  %v9312_v2 = vld [vmem:[%s12574_s5 + $0x140] sm:$0xff]  }
 0x33e   :  { %8488 = vmatprep.mubr.msk.bf16.mxu0 %vm722_vm0, %v12902_v55  ;;  %v12916_v55 = vld [vmem:[#allocation66_spill] sm:$0xff] }
 0x33f   :  { %v5018_v43 = vpack.c.bf16 %v12916_v55, %v5002_v4  ;;  %v5188_v4 = vld [vmem:[#allocation3 + $0xf4] sm:$0xff] }
 0x343   :  { %8641 = vmatmul.mubr.msk.bf16.vlgmr.msra.gmra.mrb[0].mxu1 %vm722_vm0, %v12870_v3  ;;  %v4662_v3 = vpack.c.bf16 %v12906_v1, %v4646_v29 }
 0x344   :  { %8657 = vmatpush3.bf16.msra.mxu1 %v9304_v24  ;;  %8644 = vmatprep.mubr.msk.bf16.mxu1 %vm722_vm0, %v12872_v34  ;;  %v12907_v34 = vld [vmem:[#allocation57_spill] sm:$0xff] }
 0x345   :  { %8658 = vmatprep.subr.bf16.mxu1 %v9305_v51  ;;  %8489 = vmatmul.mubr.msk.bf16.gmra.mrb[72].mxu0 %vm722_vm0, %v12903_v48  ;;  %v12911_v24 = vld [vmem:[#allocation61_spill] sm:$0xff] }
 0x346   :  { %8492 = vmatprep.mubr.msk.bf16.mxu0 %vm722_vm0, %v12904_v45  ;;  %v4668_v54 = vpack.c.bf16 %v12861_v63, %v12911_v24  ;;  %v9309_v63 = vld [vmem:[%s12574_s5 + $0x128] sm:$0xff]  }
 0x348   :  { %8659 = vmatpush3.bf16.msra.mxu1 %v9305_v51  ;;  %v11852_v51 = vld [vmem:[#allocation3 + $0x83] sm:$0xff] }
 0x349   :  { %8676 = vmatprep.subr.bf16.mxu1 %v9306_v23 }
 0x34b   :  { %8645 = vmatmul.mubr.msk.bf16.gmra.mrb[4].mxu1 %vm722_vm0, %v4487_v53  ;;  %v9311_v53 = vld [vmem:[%s12574_s5 + $0x138] sm:$0xff]  }
 0x34c   :  { %8648 = vmatprep.mubr.msk.bf16.mxu1 %vm722_vm0, %v12874_v56  ;;  %v4663_v56 = vpack.c.bf16 %v11291_v26, %v12907_v34 }
 0x34d   :  { %8493 = vmatmul.mubr.msk.bf16.gmra.mrb[76].mxu0 %vm722_vm0, %v12905_v30 }
 0x353   :  { %8649 = vmatmul.mubr.msk.bf16.gmra.mrb[8].mxu1 %vm722_vm0, %v12875_v58  ;;  %v9307_v58 = vld [vmem:[%s12574_s5 + $0x118] sm:$0xff]  }
 0x354   :  { %8652 = vmatprep.mubr.msk.bf16.mxu1 %vm722_vm0, %v12878_v50  ;;  %v4664_v50 = vpack.c.bf16 %v12854_v31, %v11293_v10  ;;  %v4666_v31 = vpack.c.bf16 %v12908_v59, %v4654_v47 }
 0x35b   :  { %8653 = vmatmul.mubr.msk.bf16.gmra.mrb[12].mxu1 %vm722_vm0, %v4491_v17  ;;  %v11866_v17 = vld [vmem:[#allocation3 + $0xa3] sm:$0xff] }
 0x35c   :  { %8660 = vmatprep.mubr.msk.bf16.mxu1 %vm722_vm0, %v4662_v3  ;;  %v5010_v3 = vld [vmem:[#allocation3 + $0xf3] sm:$0xff] }
 0x363   :  { %8661 = vmatmul.mubr.msk.bf16.vlgmr.msra.gmra.mrb[0].mxu1 %vm722_vm0, %v4663_v56  ;;  %v5021_v56 = vpack.c.bf16 %v11866_v17, %v11658_v35  ;;  %v5180_v35 = vld [vmem:[#allocation3 + $0x34] sm:$0xff] }
 0x364   :  { %8677 = vmatpush3.bf16.msra.mxu1 %v9306_v23  ;;  %8664 = vmatprep.mubr.msk.bf16.mxu1 %vm722_vm0, %v4664_v50  ;;  %v12917_v23 = vld [vmem:[#allocation67_spill] sm:$0xff]  ;;  %v5196_v21 = vpack.c.bf16 %v11377_v7, %v5180_v35 }
 0x365   :  { %8678 = vmatprep.subr.bf16.mxu1 %v9307_v58  ;;  %v5363_v35 = vld [vmem:[#allocation3 + $0x80] sm:$0xff] }
 0x368   :  { %8679 = vmatpush3.bf16.msra.mxu1 %v9307_v58  ;;  %v12920_v58 = vld [vmem:[#allocation70_spill] sm:$0xff] }
 0x369   :  { %8696 = vmatprep.subr.bf16.mxu1 %v9308_v9  ;;  %v5022_v50 = vpack.c.bf16 %v12920_v58, %v5010_v3  ;;  %v5360_v3 = vld [vmem:[#allocation3 + $0x50] sm:$0xff] }
 0x36b   :  { %8665 = vmatmul.mubr.msk.bf16.gmra.mrb[4].mxu1 %vm722_vm0, %v4665_v15  ;;  %v12922_v15 = vld [vmem:[#allocation72_spill] sm:$0xff] }
 0x36c   :  { %8668 = vmatprep.mubr.msk.bf16.mxu1 %vm722_vm0, %v4666_v31  ;;  %v5024_v31 = vpack.c.bf16 %v12922_v15, %v11367_v27 }
 0x373   :  { %8669 = vmatmul.mubr.msk.bf16.gmra.mrb[8].mxu1 %vm722_vm0, %v4667_v52  ;;  %v11879_v52 = vld [vmem:[#allocation3 + $0x163] sm:$0xff] }
 0x374   :  { %8672 = vmatprep.mubr.msk.bf16.mxu1 %vm722_vm0, %v4668_v54  ;;  %v5025_v54 = vpack.c.bf16 %v11879_v52, %v11347_v25 }
 0x37b   :  { %8673 = vmatmul.mubr.msk.bf16.gmra.mrb[12].mxu1 %vm722_vm0, %v4669_v32  ;;  %v12923_v32 = vld [vmem:[#allocation73_spill] sm:$0xff] }
 0x37c   :  { %8680 = vmatprep.mubr.msk.bf16.mxu1 %vm722_vm0, %v4840_v28  ;;  %v5197_v28 = vpack.c.bf16 %v11387_v49, %v12923_v32 }
 0x383   :  { %8681 = vmatmul.mubr.msk.bf16.vlgmr.msra.gmra.mrb[0].mxu1 %vm722_vm0, %v4841_v33  ;;  %v9313_v33 = vld [vmem:[%s12574_s5 + $0x148] sm:$0xff]  }
 0x384   :  { %8697 = vmatpush3.bf16.msra.mxu1 %v9308_v9  ;;  %8684 = vmatprep.mubr.msk.bf16.mxu1 %vm722_vm0, %v4842_v62  ;;  %v12921_v9 = vld [vmem:[#allocation71_spill] sm:$0xff] }
 0x385   :  { %8698 = vmatprep.subr.bf16.mxu1 %v9309_v63  ;;  %v5023_v47 = vpack.c.bf16 %v11365_v57, %v12921_v9 }
 0x388   :  { %8699 = vmatpush3.bf16.msra.mxu1 %v9309_v63  ;;  %v12924_v63 = vld [vmem:[#allocation74_spill] sm:$0xff] }
 0x389   :  { %8716 = vmatprep.subr.bf16.mxu1 %v9310_v44  ;;  %v5198_v62 = vpack.c.bf16 %v12924_v63, %v11389_v40 }
 0x38b   :  { %8685 = vmatmul.mubr.msk.bf16.gmra.mrb[4].mxu1 %vm722_vm0, %v4843_v38  ;;  %v11898_v38 = vld [vmem:[#allocation3 + $0xa4] sm:$0xff] }
 0x38c   :  { %8688 = vmatprep.mubr.msk.bf16.mxu1 %vm722_vm0, %v12903_v48  ;;  %v12918_v48 = vld [vmem:[#allocation68_spill] sm:$0xff] }
 0x393   :  { %8689 = vmatmul.mubr.msk.bf16.gmra.mrb[8].mxu1 %vm722_vm0, %v12904_v45  ;;  %v5019_v45 = vpack.c.bf16 %v12918_v48, %v12917_v23 }
 0x394   :  { %8692 = vmatprep.mubr.msk.bf16.mxu1 %vm722_vm0, %v12905_v30  ;;  %v12919_v30 = vld [vmem:[#allocation69_spill] sm:$0xff] }
 0x395   :  { %v5020_v29 = vpack.c.bf16 %v11852_v51, %v12919_v30 }
 0x39b   :  { %8693 = vmatmul.mubr.msk.bf16.gmra.mrb[12].mxu1 %vm722_vm0, %v4847_v37  ;;  %v5199_v37 = vpack.c.bf16 %v11898_v38, %v11355_v13 }
 0x39c   :  { %8700 = vmatprep.mubr.msk.bf16.mxu1 %vm722_vm0, %v5018_v43  ;;  %v5200_v43 = vpack.c.bf16 %v11399_v60, %v5188_v4  ;;  %v9316_v4 = vld [vmem:[%s12574_s5 + $0x160] sm:$0xff]  }
 0x39d   :  { %v12074_v60 = vld [vmem:[%s12575_s6] ss:$0 sm:$0xff] }
 0x3a3   :  { %8701 = vmatmul.mubr.msk.bf16.vlgmr.msra.gmra.mrb[0].mxu1 %vm722_vm0, %v5019_v45  ;;  %v5201_v45 = vpack.c.bf16 %v11408_v39, %v11401_v8 }
 0x3a4   :  { %8717 = vmatpush3.bf16.msra.mxu1 %v9310_v44  ;;  %8704 = vmatprep.mubr.msk.bf16.mxu1 %vm722_vm0, %v5020_v29  ;;  %v9314_v44 = vld [vmem:[%s12574_s5 + $0x150] sm:$0xff]   ;;  %v11911_v29 = vld [vmem:[#allocation3 + $0x164] sm:$0xff] }
 0x3a5   :  { %8718 = vmatprep.subr.bf16.mxu1 %v9311_v53 }
 0x3a8   :  { %8719 = vmatpush3.bf16.msra.mxu1 %v9311_v53  ;;  %v5202_v53 = vpack.c.bf16 %v11412_v46, %v11410_v22 }
 0x3a9   :  { %8736 = vmatprep.subr.bf16.mxu1 %v9312_v2 }
 0x3ab   :  { %8705 = vmatmul.mubr.msk.bf16.gmra.mrb[4].mxu1 %vm722_vm0, %v5021_v56  ;;  %v5203_v56 = vpack.c.bf16 %v11911_v29, %v11397_v19 }
 0x3ac   :  { %8708 = vmatprep.mubr.msk.bf16.mxu1 %vm722_vm0, %v5022_v50 }
 0x3b3   :  { %8709 = vmatmul.mubr.msk.bf16.gmra.mrb[8].mxu1 %vm722_vm0, %v5023_v47  ;;  %v5361_v47 = vld [vmem:[#allocation3 + $0x60] sm:$0xff] }
 0x3b4   :  { %8712 = vmatprep.mubr.msk.bf16.mxu1 %vm722_vm0, %v5024_v31  ;;  %v5362_v31 = vld [vmem:[#allocation3 + $0x70] sm:$0xff] }
 0x3bb   :  { %8713 = vmatmul.mubr.msk.bf16.gmra.mrb[12].mxu1 %vm722_vm0, %v5025_v54  ;;  %v5364_v54 = vld [vmem:[#allocation3 + $0x90] sm:$0xff] }
 0x3bc   :  { %8720 = vmatprep.mubr.msk.bf16.mxu1 %vm722_vm0, %v5196_v21  ;;  %v5376_v21 = vpack.c.bf16 %v5362_v31, %v5361_v47 }
 0x3c3   :  { %8721 = vmatmul.mubr.msk.bf16.vlgmr.msra.gmra.mrb[0].mxu1 %vm722_vm0, %v5197_v28  ;;  %v9315_v28 = vld [vmem:[%s12574_s5 + $0x158] sm:$0xff]  }
 0x3c4   :  { %8737 = vmatpush3.bf16.msra.mxu1 %v9312_v2  ;;  %8724 = vmatprep.mubr.msk.bf16.mxu1 %vm722_vm0, %v5198_v62  ;;  %v5359_v2 = vld [vmem:[#allocation3 + $0x40] sm:$0xff]  ;;  %v5366_v62 = vld [vmem:[#allocation3 + $0xb0] sm:$0xff] }
 0x3c5   :  { %8738 = vmatprep.subr.bf16.mxu1 %v9313_v33  ;;  %v5375_v50 = vpack.c.bf16 %v5360_v3, %v5359_v2  ;;  %v5370_v2 = vld [vmem:[#allocation3 + $0x130] sm:$0xff]  ;;  %v5371_v3 = vld [vmem:[#allocation3 + $0x140] sm:$0xff] }
 0x3c8   :  { %8739 = vmatpush3.bf16.msra.mxu1 %v9313_v33  ;;  %v5377_v33 = vpack.c.bf16 %v5364_v54, %v5363_v35  ;;  %v12925_v35 = vpack.c.bf16 %v12907_v34, %v12906_v1  ;;  %v5541_v54 = vld [vmem:[#allocation3 + $0x81] sm:$0xff]  ;;  %v9318_v1 = vld [vmem:[%s12574_s5 + $0x170] sm:$0xff]  }
 0x3c9   :  { %8756 = vmatprep.subr.bf16.mxu1 %v9314_v44 }
 0x3cb   :  { %8725 = vmatmul.mubr.msk.bf16.gmra.mrb[4].mxu1 %vm722_vm0, %v5199_v37  ;;  %v5378_v37 = vpack.c.bf16 %v5366_v62, %v11766_v61  ;;  %v5374_v61 = vld [vmem:[#allocation3 + $0x170] sm:$0xff]  ;;  %v12926_v62 = vpack.c.bf16 %v11293_v10, %v11291_v26  ;;  %v12927_v10 = vpack.c.bf16 %v12909_v5, %v12908_v59 }
 0x3cc   :  { %8728 = vmatprep.mubr.msk.bf16.mxu1 %vm722_vm0, %v5200_v43  ;;  %v5367_v43 = vld [vmem:[#allocation3 + $0x100] sm:$0xff]  ;;  %v5382_v31 = vpack.c.bf16 %v5374_v61, %v11783_v20  ;;  %v5544_v20 = vld [vmem:[#allocation3 + $0xb1] sm:$0xff] }
 0x3cd   :  { %v5556_v34 = vpack.c.bf16 %v5544_v20, %v11802_v18  ;;  %v5552_v59 = vld [vmem:[#allocation3 + $0x171] sm:$0xff] }
 0x3d3   :  { %8729 = vmatmul.mubr.msk.bf16.gmra.mrb[8].mxu1 %vm722_vm0, %v5201_v45  ;;  %v5368_v45 = vld [vmem:[#allocation3 + $0x110] sm:$0xff] }
 0x3d4   :  { %8732 = vmatprep.mubr.msk.bf16.mxu1 %vm722_vm0, %v5202_v53  ;;  %v5379_v53 = vpack.c.bf16 %v5368_v45, %v5367_v43  ;;  %v5549_v45 = vld [vmem:[#allocation3 + $0x141] sm:$0xff] }
 0x3db   :  { %8733 = vmatmul.mubr.msk.bf16.gmra.mrb[12].mxu1 %vm722_vm0, %v5203_v56  ;;  %v5372_v56 = vld [vmem:[#allocation3 + $0x150] sm:$0xff] }
 0x3dc   :  { %8740 = vmatprep.mubr.msk.bf16.mxu1 %vm722_vm0, %v5375_v50  ;;  %v5381_v47 = vpack.c.bf16 %v5372_v56, %v5371_v3 }
 0x3e3   :  { %8741 = vmatmul.mubr.msk.bf16.vlgmr.msra.gmra.mrb[0].mxu1 %vm722_vm0, %v5376_v21  ;;  %v5542_v21 = vld [vmem:[#allocation3 + $0x91] sm:$0xff] }
 0x3e4   :  { %8757 = vmatpush3.bf16.msra.mxu1 %v9314_v44  ;;  %8744 = vmatprep.mubr.msk.bf16.mxu1 %vm722_vm0, %v5377_v33  ;;  %v5369_v44 = vld [vmem:[#allocation3 + $0x120] sm:$0xff]  ;;  %v5555_v33 = vpack.c.bf16 %v5542_v21, %v5541_v54  ;;  %v5720_v54 = vld [vmem:[#allocation3 + $0x92] sm:$0xff] }
 0x3e5   :  { %8758 = vmatprep.subr.bf16.mxu1 %v9315_v28  ;;  %v5380_v50 = vpack.c.bf16 %v5370_v2, %v5369_v44  ;;  %v12928_v2 = vpack.c.bf16 %v12911_v24, %v12910_v41  ;;  %v12929_v41 = vpack.c.bf16 %v12913_v14, %v12912_v6  ;;  %v5722_v14 = vld [vmem:[#allocation3 + $0xb2] sm:$0xff] }
 0x3e8   :  { %8759 = vmatpush3.bf16.msra.mxu1 %v9315_v28  ;;  %v9317_v28 = vld [vmem:[%s12574_s5 + $0x168] sm:$0xff]  }
 0x3e9   :  { %8776 = vmatprep.subr.bf16.mxu1 %v9316_v4 }
 0x3eb   :  { %8745 = vmatmul.mubr.msk.bf16.gmra.mrb[4].mxu1 %vm722_vm0, %v5378_v37 }
 0x3ec   :  { %8748 = vmatprep.mubr.msk.bf16.mxu1 %vm722_vm0, %v5379_v53  ;;  %v5550_v53 = vld [vmem:[#allocation3 + $0x151] sm:$0xff] }
 0x3ed   :  { %v5559_v18 = vpack.c.bf16 %v5550_v53, %v5549_v45  ;;  %v5726_v53 = vld [vmem:[#allocation3 + $0x132] sm:$0xff] }
 0x3f3   :  { %8749 = vmatmul.mubr.msk.bf16.gmra.mrb[8].mxu1 %vm722_vm0, %v5380_v50  ;;  %v5560_v50 = vpack.c.bf16 %v5552_v59, %v11815_v12  ;;  %v9319_v12 = vld [vmem:[%s12574_s5 + $0x178] sm:$0xff]  }
 0x3f4   :  { %8752 = vmatprep.mubr.msk.bf16.mxu1 %vm722_vm0, %v5381_v47 }
 0x3fb   :  { %8753 = vmatmul.mubr.msk.bf16.gmra.mrb[12].mxu1 %vm722_vm0, %v5382_v31 }
 0x3fc   :  { %8760 = vmatprep.mubr.msk.bf16.mxu1 %vm722_vm0, %v12925_v35  ;;  %v5719_v35 = vld [vmem:[#allocation3 + $0x82] sm:$0xff] }
 0x3fd   :  { %v5733_v21 = vpack.c.bf16 %v5720_v54, %v5719_v35  ;;  %v12931_v35 = vpack.c.bf16 %v12917_v23, %v12916_v55  ;;  %v5898_v54 = vld [vmem:[#allocation3 + $0x93] sm:$0xff]  ;;  %v12933_v23 = vpack.c.bf16 %v12921_v9, %v12920_v58  ;;  %v12936_v58 = vpack.c.bf16 %v12923_v32, %v11377_v7 }
 0x3fe   :  { %v12939_v7 = vpack.c.bf16 %v11410_v22, %v11408_v39  ;;  %v9324_v22 = vld [vmem:[%s12578_s9 + $0x4] ss:$8 sps:$4 sm:$0xff]  }
 0x3ff   :  { %7405 = vmatprep.subr.bf16.mxu0 %v9324_v22 }
 0x403   :  { %8761 = vmatmul.mubr.msk.bf16.vlgmr.msra.gmra.mrb[0].mxu1 %vm722_vm0, %v12926_v62 }
 0x404   :  { %8777 = vmatpush3.bf16.msra.mxu1 %v9316_v4  ;;  %8764 = vmatprep.mubr.msk.bf16.mxu1 %vm722_vm0, %v5555_v33  ;;  %v12930_v33 = vpack.c.bf16 %v12915_v0, %v12914_v36  ;;  %v5723_v36 = vld [vmem:[#allocation3 + $0x102] sm:$0xff]  ;;  %v5724_v0 = vld [vmem:[#allocation3 + $0x112] sm:$0xff] }
 0x405   :  { %8778 = vmatprep.subr.bf16.mxu1 %v9317_v28  ;;  %v5735_v45 = vpack.c.bf16 %v5724_v0, %v5723_v36 }
 0x408   :  { %8779 = vmatpush3.bf16.msra.mxu1 %v9317_v28  ;;  %v11948_v37 = vpop.f32.mrb[64].mxu0 }
 0x409   :  { %8796 = vmatprep.subr.bf16.mxu1 %v9318_v1  ;;  %v11951_v26 = vpop.f32.mrb[65].mxu0 }
 0x40a   :  { %v11957_v4 = vpop.f32.mrb[66].mxu0 }
 0x40b   :  { %8765 = vmatmul.mubr.msk.bf16.gmra.mrb[4].mxu1 %vm722_vm0, %v5556_v34  ;;  %v11959_v43 = vpop.f32.mrb[67].mxu0  ;;  %v9320_v34 = vld [vmem:[%s12574_s5 + $0x180] sm:$0xff]  }
 0x40c   :  { %8768 = vmatprep.mubr.msk.bf16.mxu1 %vm722_vm0, %v12927_v10  ;;  %v5734_v10 = vpack.c.bf16 %v5722_v14, %v11834_v42  ;;  %v5730_v42 = vld [vmem:[#allocation3 + $0x172] sm:$0xff] }
 0x410   :  { %v11961_v44 = vpop.f32.mrb[68].mxu0 }
 0x411   :  { %v11967_v3 = vpop.f32.mrb[69].mxu0 }
 0x412   :  { %v11970_v5 = vpop.f32.mrb[70].mxu0 }
 0x413   :  { %8769 = vmatmul.mubr.msk.bf16.gmra.mrb[8].mxu1 %vm722_vm0, %v12928_v2  ;;  %v11972_v56 = vpop.f32.mrb[71].mxu0  ;;  %v5728_v2 = vld [vmem:[#allocation3 + $0x152] sm:$0xff] }
 0x414   :  { %8772 = vmatprep.mubr.msk.bf16.mxu1 %vm722_vm0, %v5559_v18  ;;  %v5727_v18 = vld [vmem:[#allocation3 + $0x142] sm:$0xff] }
 0x418   :  { %v11975_v47 = vpop.f32.mrb[72].mxu0 }
 0x419   :  { %v11978_v61 = vpop.f32.mrb[73].mxu0 }
 0x41a   :  { %v11984_v24 = vpop.f32.mrb[74].mxu0 }
 0x41b   :  { %8773 = vmatmul.mubr.msk.bf16.gmra.mrb[12].mxu1 %vm722_vm0, %v5560_v50  ;;  %v11986_v31 = vpop.f32.mrb[75].mxu0  ;;  %v5737_v50 = vpack.c.bf16 %v5728_v2, %v5727_v18 }
 0x41c   :  { %8780 = vmatprep.mubr.msk.bf16.mxu1 %vm722_vm0, %v12929_v41  ;;  %v5738_v41 = vpack.c.bf16 %v5730_v42, %v11845_v11  ;;  %v5900_v11 = vld [vmem:[#allocation3 + $0xb3] sm:$0xff] }
 0x41d   :  { %v5912_v55 = vpack.c.bf16 %v5900_v11, %v11866_v17  ;;  %v9333_v42 = vld [vmem:[%s12578_s9 + $0x34] ss:$8 sps:$4 sm:$0xff]  }
 0x420   :  { %v11991_v28 = vpop.f32.mrb[76].mxu0 }
 0x421   :  { %v11997_v6 = vpop.f32.mrb[77].mxu0 }
 0x422   :  { %v12000_v62 = vpop.f32.mrb[78].mxu0 }
 0x423   :  { %8781 = vmatmul.mubr.msk.bf16.vlgmr.msra.gmra.mrb[0].mxu1 %vm722_vm0, %v12930_v33  ;;  %v12002_v20 = vpop.f32.mrb[79].mxu0  ;;  %v12932_v33 = vpack.c.bf16 %v12919_v30, %v12918_v48  ;;  %v12935_v48 = vpack.c.bf16 %v11347_v25, %v12922_v15  ;;  %v5908_v30 = vld [vmem:[#allocation3 + $0x173] sm:$0xff]  ;;  %v12938_v25 = vpack.c.bf16 %v11355_v13, %v12924_v63 }
 0x424   :  { %8797 = vmatpush3.bf16.msra.mxu1 %v9318_v1  ;;  %8784 = vmatprep.mubr.msk.bf16.mxu1 %vm722_vm0, %v5733_v21  ;;  %v5725_v1 = vld [vmem:[#allocation3 + $0x122] sm:$0xff]  ;;  %v5911_v21 = vpack.c.bf16 %v5898_v54, %v11852_v51  ;;  %v12934_v51 = vpack.c.bf16 %v11367_v27, %v11365_v57  ;;  %v5916_v17 = vpack.c.bf16 %v5908_v30, %v11879_v52  ;;  %v6078_v57 = vld [vmem:[#allocation3 + $0xb4] sm:$0xff] }
 0x425   :  { %8798 = vmatprep.subr.bf16.mxu1 %v9319_v12  ;;  %v5736_v59 = vpack.c.bf16 %v5726_v53, %v5725_v1  ;;  %v12937_v27 = vpack.c.bf16 %v11389_v40, %v11387_v49  ;;  %v6090_v9 = vpack.c.bf16 %v6078_v57, %v11898_v38  ;;  %v12940_v49 = vpack.c.bf16 %v11397_v19, %v11412_v46  ;;  %v6086_v13 = vld [vmem:[#allocation3 + $0x174] sm:$0xff]  ;;  %v9322_v19 = vld [vmem:[%s12578_s9] ss:$8 sps:$4 sm:$0xff]   ;;  %v9336_v57 = vld [vmem:[%s12578_s9 + $0x44] ss:$8 sps:$4 sm:$0xff]  }
 0x426   :  { %v6094_v40 = vpack.c.bf16 %v6086_v13, %v11911_v29  ;;  %v9327_v52 = vld [vmem:[%s12578_s9 + $0x14] ss:$8 sps:$4 sm:$0xff]   ;;  %7406 = vmatpush1.bf16.msra.mxu0 %v9322_v19  ;;  %v9328_v53 = vld [vmem:[%s12578_s9 + $0x20] ss:$8 sps:$4 sm:$0xff]  }
 0x427   :  { %7407 = vmatprep.subr.bf16.mxu0 %v9327_v52 }
 0x428   :  { %8799 = vmatpush3.bf16.msra.mxu1 %v9319_v12  ;;  %v9321_v12 = vld [vmem:[%s12574_s5 + $0x188] sm:$0xff]  }
 0x429   :  { %8816 = vmatprep.subr.bf16.mxu1 %v9320_v34 }
 0x42b   :  { %8785 = vmatmul.mubr.msk.bf16.gmra.mrb[4].mxu1 %vm722_vm0, %v5734_v10 }
 0x42c   :  { %8788 = vmatprep.mubr.msk.bf16.mxu1 %vm722_vm0, %v5735_v45 }
 0x433   :  { %8789 = vmatmul.mubr.msk.bf16.gmra.mrb[8].mxu1 %vm722_vm0, %v5736_v59 }
 0x434   :  { %8792 = vmatprep.mubr.msk.bf16.mxu1 %vm722_vm0, %v5737_v50 }
 0x43b   :  { %8793 = vmatmul.mubr.msk.bf16.gmra.mrb[12].mxu1 %vm722_vm0, %v5738_v41 }
 0x43c   :  { %8800 = vmatprep.mubr.msk.bf16.mxu1 %vm722_vm0, %v12931_v35 }
 0x443   :  { %8801 = vmatmul.mubr.msk.bf16.vlgmr.msra.gmra.mrb[0].mxu1 %vm722_vm0, %v12932_v33 }
 0x444   :  { %8817 = vmatpush3.bf16.msra.mxu1 %v9320_v34  ;;  %8804 = vmatprep.mubr.msk.bf16.mxu1 %vm722_vm0, %v5911_v21 }
 0x445   :  { %8818 = vmatprep.subr.bf16.mxu1 %v9321_v12 }
 0x448   :  { %8819 = vmatpush3.bf16.msra.mxu1 %v9321_v12 }
 0x44b   :  { %8805 = vmatmul.mubr.msk.bf16.gmra.mrb[4].mxu1 %vm722_vm0, %v5912_v55 }
 0x44c   :  { %8808 = vmatprep.mubr.msk.bf16.mxu1 %vm722_vm0, %v12933_v23 }
 0x453   :  { %8809 = vmatmul.mubr.msk.bf16.gmra.mrb[8].mxu1 %vm722_vm0, %v12934_v51 }
 0x454   :  { %8812 = vmatprep.mubr.msk.bf16.mxu1 %vm722_vm0, %v12935_v48 }
 0x45b   :  { %8813 = vmatmul.mubr.msk.bf16.gmra.mrb[12].mxu1 %vm722_vm0, %v5916_v17 }
 0x45c   :  { %8820 = vmatprep.mubr.msk.bf16.mxu1 %vm722_vm0, %v12936_v58 }
 0x463   :  { %8821 = vmatmul.mubr.msk.bf16.vlgmr.msra.gmra.mrb[0].mxu1 %vm722_vm0, %v12937_v27 }
 0x464   :  { %8824 = vmatprep.mubr.msk.bf16.mxu1 %vm722_vm0, %v12938_v25 }
 0x46b   :  { %8825 = vmatmul.mubr.msk.bf16.gmra.mrb[4].mxu1 %vm722_vm0, %v6090_v9 }
 0x46c   :  { %8828 = vmatprep.mubr.msk.bf16.mxu1 %vm722_vm0, %v6091_v16 }
 0x473   :  { %8829 = vmatmul.mubr.msk.bf16.gmra.mrb[8].mxu1 %vm722_vm0, %v12939_v7 }
 0x474   :  { %8832 = vmatprep.mubr.msk.bf16.mxu1 %vm722_vm0, %v12940_v49 }
 0x47b   :  { %8833 = vmatmul.mubr.msk.bf16.gmra.mrb[12].mxu1 %vm722_vm0, %v6094_v40 }
 0x536   :  { %v8822_v15 = vpop.f32.mrb[0].mxu1 }
 0x537   :  { %v8836_v8 = vadd.f32 %v8822_v15, %v11948_v37  ;;  %v6170_v39 = vpop.f32.mrb[1].mxu1 }
 0x538   :  { %v8837_v46 = vadd.f32 %v6170_v39, %v11951_v26  ;;  %v8823_v16 = vpop.f32.mrb[2].mxu1  ;;  %v9325_v26 = vld [vmem:[%s12578_s9 + $0x10] ss:$8 sps:$4 sm:$0xff]  }
 0x539   :  { %v6260_v32 = vadd.f32 %v8836_v8, %v12074_v60  ;;  %v8838_v63 = vadd.f32 %v8823_v16, %v11957_v4  ;;  %v6173_v38 = vpop.f32.mrb[3].mxu1  ;;  %v9330_v4 = vld [vmem:[%s12578_s9 + $0x24] ss:$8 sps:$4 sm:$0xff]   ;;  %7408 = vmatpush1.bf16.msra.mxu0 %v9325_v26 }
 0x53a   :  { %v6258_v29 = vadd.f32 %v8837_v46, %v12074_v60  ;;  %v8839_v37 = vadd.f32 %v6173_v38, %v11959_v43  ;;  %7409 = vmatprep.subr.bf16.mxu0 %v9330_v4  ;;  %v9334_v46 = vld [vmem:[%s12578_s9 + $0x40] ss:$8 sps:$4 sm:$0xff]  }
 0x53b   :  { %v12094_v14 = vmax.f32 %v6260_v32, 0.0  ;;  %v6261_v34 = vadd.f32 %v8838_v63, %v12074_v60 }
 0x53c   :  { %v12100_v10 = vmax.f32 %v6258_v29, 0.0  ;;  %v6259_v36 = vadd.f32 %v8839_v37, %v12074_v60  ;;  %v9339_v29 = vld [vmem:[%s12578_s9 + $0x54] ss:$8 sps:$4 sm:$0xff]  }
 0x53d   :  { %v12103_v0 = vmax.f32 %v6261_v34, 0.0  ;;  %v6293_v18 = vsel %vm722_vm0, %v12094_v14, 0.0  ;;  %v6329_v2 = vmul.f32 %v12094_v14, %v12094_v14  ;;  %7410 = vmatpush1.bf16.msra.mxu0 %v9328_v53 }
 0x53e   :  { %v6327_v43 = vmul.f32 %v12100_v10, %v12100_v10  ;;  %v12107_v45 = vmax.f32 %v6259_v36, 0.0  ;;  %v8826_v1 = vpop.f32.mrb[4].mxu1  ;;  %v6290_v41 = vsel %vm722_vm0, %v12100_v10, 0.0  ;;  %7411 = vmatprep.subr.bf16.mxu0 %v9333_v42  ;;  %v9337_v42 = vld [vmem:[%s12578_s9 + $0x50] ss:$8 sps:$4 sm:$0xff]  }
 0x53f   :  { %v8840_v59 = vadd.f32 %v8826_v1, %v11961_v44  ;;  %v6186_v50 = vpop.f32.mrb[5].mxu1  ;;  %v6330_v44 = vmul.f32 %v12103_v0, %v12103_v0  ;;  %v6346_v58 = vsel %vm722_vm0, %v6329_v2, 0.0  ;;  %v6295_v9 = vsel %vm722_vm0, %v12103_v0, 0.0 }
 0x540   :  { %v6291_v35 = vsel %vm722_vm0, %v12107_v45, 0.0  ;;  %v6328_v54 = vmul.f32 %v12107_v45, %v12107_v45  ;;  %v8841_v12 = vadd.f32 %v6186_v50, %v11967_v3  ;;  %v8827_v21 = vpop.f32.mrb[6].mxu1  ;;  %v6343_v51 = vsel %vm722_vm0, %v6327_v43, 0.0  ;;  %v9331_v3 = vld [vmem:[%s12578_s9 + $0x30] ss:$8 sps:$4 sm:$0xff]  }
 0x541   :  { %v6292_v33 = vadd.f32 %v6291_v35, %v6290_v41  ;;  %v6264_v11 = vadd.f32 %v8840_v59, %v12074_v60  ;;  %v8842_v55 = vadd.f32 %v8827_v21, %v11970_v5  ;;  %v6189_v23 = vpop.f32.mrb[7].mxu1  ;;  %v6348_v15 = vsel %vm722_vm0, %v6330_v44, 0.0  ;;  %7412 = vmatpush1.bf16.msra.mxu0 %v9331_v3 }
 0x542   :  { %v6344_v48 = vsel %vm722_vm0, %v6328_v54, 0.0  ;;  %v6262_v30 = vadd.f32 %v8841_v12, %v12074_v60  ;;  %v8843_v17 = vadd.f32 %v6189_v23, %v11972_v56  ;;  %7413 = vmatprep.subr.bf16.mxu0 %v9336_v57 }
 0x543   :  { %v6294_v27 = vadd.f32 %v6293_v18, %v6292_v33  ;;  %v6345_v25 = vadd.f32 %v6344_v48, %v6343_v51  ;;  %v6265_v5 = vadd.f32 %v8842_v55, %v12074_v60  ;;  %v12145_v56 = vmax.f32 %v6264_v11, 0.0 }
 0x544   :  { %v12147_v7 = vmax.f32 %v6262_v30, 0.0  ;;  %v6263_v49 = vadd.f32 %v8843_v17, %v12074_v60  ;;  %v9340_v17 = vld [vmem:[%s12578_s9 + $0x60] ss:$8 sps:$4 sm:$0xff]  }
 0x545   :  { %v6347_v13 = vadd.f32 %v6346_v58, %v6345_v25  ;;  %v6296_v40 = vadd.f32 %v6295_v9, %v6294_v27  ;;  %v12160_v32 = vmax.f32 %v6265_v5, 0.0  ;;  %v6301_v37 = vsel %vm722_vm0, %v12145_v56, 0.0  ;;  %7414 = vmatpush1.bf16.msra.mxu0 %v9334_v46  ;;  %v9345_v25 = vld [vmem:[%s12578_s9 + $0x74] ss:$8 sps:$4 sm:$0xff]  }
 0x546   :  { %v6297_v8 = vsel %vm722_vm0, %v12147_v7, 0.0  ;;  %v6331_v39 = vmul.f32 %v12147_v7, %v12147_v7  ;;  %v12155_v19 = vmax.f32 %v6263_v49, 0.0  ;;  %v8830_v22 = vpop.f32.mrb[8].mxu1  ;;  %v6333_v36 = vmul.f32 %v12145_v56, %v12145_v56  ;;  %7415 = vmatprep.subr.bf16.mxu0 %v9339_v29 }
 0x547   :  { %v6298_v16 = vadd.f32 %v6297_v8, %v6296_v40  ;;  %v6349_v52 = vadd.f32 %v6348_v15, %v6347_v13  ;;  %v8844_v63 = vadd.f32 %v8830_v22, %v11975_v47  ;;  %v6202_v38 = vpop.f32.mrb[9].mxu1  ;;  %v6303_v41 = vsel %vm722_vm0, %v12160_v32, 0.0 }
 0x548   :  { %v6350_v26 = vsel %vm722_vm0, %v6331_v39, 0.0  ;;  %v6299_v34 = vsel %vm722_vm0, %v12155_v19, 0.0  ;;  %v8831_v4 = vpop.f32.mrb[10].mxu1  ;;  %v6332_v1 = vmul.f32 %v12155_v19, %v12155_v19  ;;  %v8845_v2 = vadd.f32 %v6202_v38, %v11978_v61  ;;  %v9342_v61 = vld [vmem:[%s12578_s9 + $0x64] ss:$8 sps:$4 sm:$0xff]  }
 0x549   :  { %v6351_v43 = vadd.f32 %v6350_v26, %v6349_v52  ;;  %v6300_v47 = vadd.f32 %v6299_v34, %v6298_v16  ;;  %v6205_v53 = vpop.f32.mrb[11].mxu1  ;;  %v6268_v18 = vadd.f32 %v8844_v63, %v12074_v60  ;;  %v8846_v59 = vadd.f32 %v8831_v4, %v11984_v24  ;;  %7416 = vmatpush1.bf16.msra.mxu0 %v9337_v42  ;;  %v9343_v52 = vld [vmem:[%s12578_s9 + $0x70] ss:$8 sps:$4 sm:$0xff]  }
 0x54a   :  { %v8847_v50 = vadd.f32 %v6205_v53, %v11986_v31  ;;  %v6334_v35 = vmul.f32 %v12160_v32, %v12160_v32  ;;  %v6352_v12 = vsel %vm722_vm0, %v6332_v1, 0.0  ;;  %v6266_v31 = vadd.f32 %v8845_v2, %v12074_v60  ;;  %7417 = vmatprep.subr.bf16.mxu0 %v9342_v61 }
 0x54b   :  { %v6302_v54 = vadd.f32 %v6301_v37, %v6300_v47  ;;  %v6353_v24 = vadd.f32 %v6352_v12, %v6351_v43  ;;  %v6269_v21 = vadd.f32 %v8846_v59, %v12074_v60  ;;  %v6354_v33 = vsel %vm722_vm0, %v6333_v36, 0.0 }
 0x54c   :  { %v6267_v44 = vadd.f32 %v8847_v50, %v12074_v60  ;;  %v12194_v23 = vmax.f32 %v6268_v18, 0.0  ;;  %v12196_v51 = vmax.f32 %v6266_v31, 0.0  ;;  %v6356_v3 = vsel %vm722_vm0, %v6334_v35, 0.0 }
 0x54d   :  { %v6304_v11 = vadd.f32 %v6303_v41, %v6302_v54  ;;  %v6355_v55 = vadd.f32 %v6354_v33, %v6353_v24  ;;  %v12212_v49 = vmax.f32 %v6269_v21, 0.0  ;;  %7418 = vmatpush1.bf16.msra.mxu0 %v9340_v17 }
 0x54e   :  { %v12198_v48 = vmax.f32 %v6267_v44, 0.0  ;;  %v8834_v30 = vpop.f32.mrb[12].mxu1  ;;  %v6305_v5 = vsel %vm722_vm0, %v12196_v51, 0.0  ;;  %v6335_v57 = vmul.f32 %v12196_v51, %v12196_v51  ;;  %v6337_v39 = vmul.f32 %v12194_v23, %v12194_v23  ;;  %7419 = vmatprep.subr.bf16.mxu0 %v9345_v25 }
 0x54f   :  { %v8848_v58 = vadd.f32 %v8834_v30, %v11991_v28  ;;  %v6218_v27 = vpop.f32.mrb[13].mxu1  ;;  %v6357_v9 = vadd.f32 %v6356_v3, %v6355_v55  ;;  %v6306_v40 = vadd.f32 %v6305_v5, %v6304_v11  ;;  %v6309_v26 = vsel %vm722_vm0, %v12194_v23, 0.0 }
 0x550   :  { %v8835_v13 = vpop.f32.mrb[14].mxu1  ;;  %v6307_v28 = vsel %vm722_vm0, %v12198_v48, 0.0  ;;  %v6336_v15 = vmul.f32 %v12198_v48, %v12198_v48  ;;  %v6358_v22 = vsel %vm722_vm0, %v6335_v57, 0.0  ;;  %v8849_v46 = vadd.f32 %v6218_v27, %v11997_v6 }
 0x551   :  { %v6221_v8 = vpop.f32.mrb[15].mxu1  ;;  %v8850_v16 = vadd.f32 %v8835_v13, %v12000_v62  ;;  %v6359_v63 = vadd.f32 %v6358_v22, %v6357_v9  ;;  %v6308_v38 = vadd.f32 %v6307_v28, %v6306_v40  ;;  %v6272_v37 = vadd.f32 %v8848_v58, %v12074_v60  ;;  %7420 = vmatpush1.bf16.msra.mxu0 %v9343_v52 }
 0x552   :  { %v6360_v29 = vsel %vm722_vm0, %v6336_v15, 0.0  ;;  %v6338_v6 = vmul.f32 %v12212_v49, %v12212_v49  ;;  %v6270_v62 = vadd.f32 %v8849_v46, %v12074_v60  ;;  %v8851_v34 = vadd.f32 %v6221_v8, %v12002_v20 }
 0x553   :  { %v6310_v4 = vadd.f32 %v6309_v26, %v6308_v38  ;;  %v6361_v36 = vadd.f32 %v6360_v29, %v6359_v63  ;;  %v6273_v43 = vadd.f32 %v8850_v16, %v12074_v60  ;;  %v6362_v47 = vsel %vm722_vm0, %v6337_v39, 0.0 }
 0x554   :  { %v6311_v1 = vsel %vm722_vm0, %v12212_v49, 0.0  ;;  %v6286_v53 = vmax.f32 %v6270_v62, 0.0  ;;  %v12238_v2 = vmax.f32 %v6272_v37, 0.0  ;;  %v6271_v50 = vadd.f32 %v8851_v34, %v12074_v60  ;;  %v6250_v34 = vld [vmem:[%s12576_s7] sm:$0x1]  ;;  %s9452_s7 = smov 32  }
 0x555   :  { %v6363_v18 = vadd.f32 %v6362_v47, %v6361_v36  ;;  %v6312_v59 = vadd.f32 %v6311_v1, %v6310_v4  ;;  %v6364_v42 = vsel %vm722_vm0, %v6338_v6, 0.0  ;;  %v6289_v12 = vmax.f32 %v6273_v43, 0.0  ;;  %v6251_v43 = vld [vmem:[%s12577_s8] sm:$0x1]  ;;  %v12941_v1 = vld [vmem:[#allocation34_spill] sm:$0xff]  ;;  %s9453_s8 = smov 64  }
 0x556   :  { %v6313_v20 = vsel %vm722_vm0, %v6286_v53, 0.0  ;;  %v6339_v41 = vmul.f32 %v6286_v53, %v6286_v53  ;;  %v6287_v61 = vmax.f32 %v6271_v50, 0.0  ;;  %v6341_v31 = vmul.f32 %v12238_v2, %v12238_v2 }
 0x557   :  { %v6314_v35 = vadd.f32 %v6313_v20, %v6312_v59  ;;  %v6365_v54 = vadd.f32 %v6364_v42, %v6363_v18  ;;  %v6317_v60 = vsel %vm722_vm0, %v12238_v2, 0.0  ;;  %v6342_v55 = vmul.f32 %v6289_v12, %v6289_v12 }
 0x558   :  { %v6366_v24 = vsel %vm722_vm0, %v6339_v41, 0.0  ;;  %v6315_v44 = vsel %vm722_vm0, %v6287_v61, 0.0  ;;  %v6340_v33 = vmul.f32 %v6287_v61, %v6287_v61  ;;  %v6370_v58 = vsel %vm722_vm0, %v6341_v31, 0.0 }
 0x559   :  { %v6367_v21 = vadd.f32 %v6366_v24, %v6365_v54  ;;  %v6316_v11 = vadd.f32 %v6315_v44, %v6314_v35  ;;  %v6319_v27 = vsel %vm722_vm0, %v6289_v12, 0.0  ;;  %v6372_v57 = vsel %vm722_vm0, %v6342_v55, 0.0 }
 0x55a   :  { %v6368_v30 = vsel %vm722_vm0, %v6340_v33, 0.0  ;;  %v9451_v59 = vmov 1983009808  }
 0x55b   :  { %v6318_v17 = vadd.f32 %v6317_v60, %v6316_v11  ;;  %v6369_v3 = vadd.f32 %v6368_v30, %v6367_v21  ;;  %v6458_v50 = vunpack.c.l.s4 %v9451_v59 }
 0x55d   :  { %v6320_v25 = vadd.f32 %v6319_v27, %v6318_v17  ;;  %v6371_v5 = vadd.f32 %v6370_v58, %v6369_v3 }
 0x55f   :  { %v6321_v9 = vrot.slane %v6320_v25, 4  ;;  %v6373_v13 = vadd.f32 %v6372_v57, %v6371_v5 }
 0x561   :  { %v6322_v40 = vadd.f32 %v6321_v9, %v6320_v25  ;;  %v6374_v28 = vrot.slane %v6373_v13, 4 }
 0x563   :  { %v6323_v15 = vrot.slane %v6322_v40, 2  ;;  %v6375_v8 = vadd.f32 %v6374_v28, %v6373_v13 }
 0x565   :  { %v6324_v39 = vadd.f32 %v6323_v15, %v6322_v40  ;;  %v6376_v22 = vrot.slane %v6375_v8, 2 }
 0x567   :  { %v6325_v46 = vrot.slane %v6324_v39, 1  ;;  %v6377_v16 = vadd.f32 %v6376_v22, %v6375_v8  ;;  %v6459_v8 = vunpack.c.0.s8 %v6458_v50 }
 0x569   :  { %v6326_v52 = vadd.f32 %v6325_v46, %v6324_v39  ;;  %v6378_v63 = vrot.slane %v6377_v16, 1 }
 0x56b   :  { %v6379_v38 = vadd.f32 %v6378_v63, %v6377_v16  ;;  %v6380_v29 = vmul.f32 0.0078125, %v6326_v52 }
 0x56d   :  { %v6381_v37 = vmul.f32 0.0078125, %v6379_v38  ;;  %v6382_v26 = vmul.f32 %v6380_v29, %v6380_v29 }
 0x56f   :  { %v6383_v6 = vsub.f32 %v6381_v37, %v6382_v26 }
 0x571   :  { %v6384_v62 = vadd.f32 1e-05, %v6383_v6 }
 0x573   :  { %9421 = vrsqrt.f32 %v6384_v62 }
 0x57d   :  { %v9422_v4 = vpop.eup %9421 }
 0x57e   :  { %v6386_v36 = vmul.f32 %v9422_v4, %v6250_v34 }
 0x580   :  { %v6387_v47 = vmul.f32 %v6386_v36, %v6380_v29  ;;  %v6393_v18 = vrot.slane %v6386_v36, %v12941_v1 }
 0x582   :  { %v6388_v42 = vsub.f32 %v6251_v43, %v6387_v47  ;;  %v6407_v20 = vmul.f32 %v6393_v18, %v6286_v53  ;;  %v6408_v41 = vmul.f32 %v6393_v18, %v6287_v61  ;;  %v6399_v35 = vmul.f32 %v6393_v18, %v12147_v7 }
 0x583   :  { %v6400_v54 = vmul.f32 %v6393_v18, %v12155_v19  ;;  %v6395_v24 = vmul.f32 %v6393_v18, %v12100_v10  ;;  %v6396_v31 = vmul.f32 %v6393_v18, %v12107_v45  ;;  %v6403_v21 = vmul.f32 %v6393_v18, %v12196_v51 }
 0x584   :  { %v6415_v44 = vrot.slane %v6388_v42, %v12941_v1  ;;  %v6404_v33 = vmul.f32 %v6393_v18, %v12198_v48  ;;  %v6401_v11 = vmul.f32 %v6393_v18, %v12145_v56  ;;  %v6402_v60 = vmul.f32 %v6393_v18, %v12160_v32 }
 0x585   :  { %v6409_v53 = vmul.f32 %v6393_v18, %v12238_v2  ;;  %v6410_v61 = vmul.f32 %v6393_v18, %v6289_v12  ;;  %v6397_v7 = vmul.f32 %v6393_v18, %v12094_v14  ;;  %v6398_v19 = vmul.f32 %v6393_v18, %v12103_v0 }
 0x586   :  { %v6429_v10 = vadd.f32 %v6415_v44, %v6407_v20  ;;  %v6430_v55 = vadd.f32 %v6415_v44, %v6408_v41  ;;  %v6421_v45 = vadd.f32 %v6415_v44, %v6399_v35  ;;  %v6422_v30 = vadd.f32 %v6415_v44, %v6400_v54 }
 0x587   :  { %v6417_v51 = vadd.f32 %v6415_v44, %v6395_v24  ;;  %v6418_v17 = vadd.f32 %v6415_v44, %v6396_v31  ;;  %v6425_v3 = vadd.f32 %v6415_v44, %v6403_v21  ;;  %v6426_v58 = vadd.f32 %v6415_v44, %v6404_v33 }
 0x588   :  { %v6439_v48 = vmax.f32 %v6429_v10, %v6430_v55  ;;  %v6435_v27 = vmax.f32 %v6421_v45, %v6422_v30  ;;  %v6423_v56 = vadd.f32 %v6415_v44, %v6401_v11  ;;  %v6424_v25 = vadd.f32 %v6415_v44, %v6402_v60 }
 0x589   :  { %v6433_v32 = vmax.f32 %v6417_v51, %v6418_v17  ;;  %v6437_v5 = vmax.f32 %v6425_v3, %v6426_v58  ;;  %v6431_v2 = vadd.f32 %v6415_v44, %v6409_v53  ;;  %v6432_v12 = vadd.f32 %v6415_v44, %v6410_v61 }
 0x58a   :  { %6447 = vst.msk [vmem:[#allocation4 + $0x30] sm:$0xff] %vm722_vm0, %v6439_v48  ;;  %6443 = vst.msk [vmem:[#allocation4 + $0x10] sm:$0xff] %vm722_vm0, %v6435_v27  ;;  %v6436_v14 = vmax.f32 %v6423_v56, %v6424_v25  ;;  %v6405_v0 = vmul.f32 %v6393_v18, %v12194_v23  ;;  %v6406_v57 = vmul.f32 %v6393_v18, %v12212_v49  ;;  %v12942_v23 = vld [vmem:[#allocation33_spill] sm:$0xff] }
 0x58b   :  { %v6419_v9 = vadd.f32 %v6415_v44, %v6397_v7  ;;  %6441 = vst.msk [vmem:[#allocation4] sm:$0xff] %vm722_vm0, %v6433_v32  ;;  %6445 = vst.msk [vmem:[#allocation4 + $0x20] sm:$0xff] %vm722_vm0, %v6437_v5  ;;  %v6440_v13 = vmax.f32 %v6431_v2, %v6432_v12  ;;  %v6420_v40 = vadd.f32 %v6415_v44, %v6398_v19 }
 0x58c   :  { %6444 = vst.msk [vmem:[#allocation4 + $0x18] sm:$0xff] %vm722_vm0, %v6436_v14  ;;  %v6427_v28 = vadd.f32 %v6415_v44, %v6405_v0  ;;  %v6428_v15 = vadd.f32 %v6415_v44, %v6406_v57  ;;  %v12283_v49 = vsub.s32 %v6459_v8, %v12942_v23 }
 0x58d   :  { %6448 = vst.msk [vmem:[#allocation4 + $0x38] sm:$0xff] %vm722_vm0, %v6440_v13  ;;  %v6434_v39 = vmax.f32 %v6419_v9, %v6420_v40 }
 0x58e   :  { %v6438_v22 = vmax.f32 %v6427_v28, %v6428_v15 }
 0x58f   :  { %6442 = vst.msk [vmem:[#allocation4 + $0x8] sm:$0xff] %vm722_vm0, %v6434_v39 }
 0x590   :  { %6446 = vst.msk [vmem:[#allocation4 + $0x28] sm:$0xff] %vm722_vm0, %v6438_v22 }
 0x591   :  { %v6752_v46 = vld [vmem:[#allocation4 + $0x12] sm:$0x1]  ;;  %v6754_v52 = vld [vmem:[#allocation4 + $0x13] sm:$0x1] }
 0x592   :  { %v6753_v16 = vld [vmem:[#allocation4 + $0x32] sm:$0x1]  ;;  %v6755_v63 = vld [vmem:[#allocation4 + $0x33] sm:$0x1]  ;;  %v6756_v38 = vmax.f32 %v6752_v46, %v6754_v52  ;;  %v6487_v29 = vld [vmem:[#allocation4 + $0x2] sm:$0x1] }
 0x593   :  { %v6488_v37 = vld [vmem:[#allocation4 + $0x22] sm:$0x1]  ;;  %v6757_v26 = vmax.f32 %v6753_v16, %v6755_v63  ;;  %v6489_v6 = vld [vmem:[#allocation4 + $0x3] sm:$0x1]  ;;  %v6883_v34 = vld [vmem:[#allocation4 + $0x1a] sm:$0x1] }
 0x594   :  { %v6490_v62 = vld [vmem:[#allocation4 + $0x23] sm:$0x1]  ;;  %v6491_v4 = vmax.f32 %v6487_v29, %v6489_v6  ;;  %v6884_v43 = vld [vmem:[#allocation4 + $0x3a] sm:$0x1]  ;;  %v6885_v47 = vld [vmem:[#allocation4 + $0x1b] sm:$0x1]  ;;  %v6766_v35 = vrot.slane %v6756_v38, %v12283_v49 }
 0x595   :  { %v6492_v36 = vmax.f32 %v6488_v37, %v6490_v62  ;;  %v6886_v18 = vld [vmem:[#allocation4 + $0x3b] sm:$0x1]  ;;  %v6773_v59 = vrot.slane %v6757_v26, %v12283_v49  ;;  %v6887_v50 = vmax.f32 %v6883_v34, %v6885_v47  ;;  %v6521_v20 = vld [vmem:[#allocation4 + $0x4] sm:$0x1]  ;;  %v6523_v41 = vld [vmem:[#allocation4 + $0x5] sm:$0x1] }
 0x596   :  { %v6888_v42 = vmax.f32 %v6884_v43, %v6886_v18  ;;  %v6621_v24 = vld [vmem:[#allocation4 + $0xa] sm:$0x1]  ;;  %v6623_v31 = vld [vmem:[#allocation4 + $0xb] sm:$0x1]  ;;  %v6654_v21 = vld [vmem:[#allocation4 + $0xc] sm:$0x1]  ;;  %v6525_v44 = vmax.f32 %v6521_v20, %v6523_v41  ;;  %v6501_v11 = vrot.slane %v6491_v4, %v12283_v49 }
 0x597   :  { %v6508_v54 = vrot.slane %v6492_v36, %v12283_v49  ;;  %v6776_v33 = vrot.slane %v6773_v59, 7  ;;  %v6622_v53 = vld [vmem:[#allocation4 + $0x2a] sm:$0x1]  ;;  %v6624_v61 = vld [vmem:[#allocation4 + $0x2b] sm:$0x1]  ;;  %v6625_v7 = vmax.f32 %v6621_v24, %v6623_v31  ;;  %v6897_v10 = vrot.slane %v6887_v50, %v12283_v49 }
 0x598   :  { %v6904_v60 = vrot.slane %v6888_v42, %v12283_v49  ;;  %v6626_v55 = vmax.f32 %v6622_v53, %v6624_v61  ;;  %v6655_v45 = vld [vmem:[#allocation4 + $0x2c] sm:$0x1]  ;;  %v6656_v30 = vld [vmem:[#allocation4 + $0xd] sm:$0x1]  ;;  %v12292_v51 = vrot.slane %v6525_v44, %v12283_v49  ;;  %v6522_v2 = vld [vmem:[#allocation4 + $0x24] sm:$0x1] }
 0x599   :  { %v6511_v19 = vrot.slane %v6508_v54, 7  ;;  %v6777_v17 = vsel %vm6476_vm3, %v6776_v33, %v6766_v35  ;;  %v6635_v58 = vrot.slane %v6625_v7, %v12283_v49  ;;  %v6657_v48 = vld [vmem:[#allocation4 + $0x2d] sm:$0x1]  ;;  %v6658_v27 = vmax.f32 %v6654_v21, %v6656_v30  ;;  %v6524_v12 = vld [vmem:[#allocation4 + $0x25] sm:$0x1] }
 0x59a   :  { %v6907_v3 = vrot.slane %v6904_v60, 7  ;;  %v6778_v56 = vsel %vm6478_vm4, %v6776_v33, %v6777_v17  ;;  %v6642_v32 = vrot.slane %v6626_v55, %v12283_v49  ;;  %v6659_v5 = vmax.f32 %v6655_v45, %v6657_v48  ;;  %v6916_v14 = vld [vmem:[#allocation4 + $0x1c] sm:$0x1]  ;;  %v6918_v28 = vld [vmem:[#allocation4 + $0x1d] sm:$0x1] }
 0x59b   :  { %v6512_v25 = vsel %vm6476_vm3, %v6511_v19, %v6501_v11  ;;  %v6779_v0 = vsel %vm6480_vm5, %v6776_v33, %v6778_v56  ;;  %v6668_v13 = vrot.slane %v6658_v27, %v12283_v49  ;;  %v6917_v40 = vld [vmem:[#allocation4 + $0x3c] sm:$0x1]  ;;  %v6919_v15 = vld [vmem:[#allocation4 + $0x3d] sm:$0x1]  ;;  %v6785_v16 = vld [vmem:[#allocation4 + $0x14] sm:$0x1]  ;;  %v6526_v37 = vmax.f32 %v6522_v2, %v6524_v12 }
 0x59c   :  { %v6513_v57 = vsel %vm6478_vm4, %v6511_v19, %v6512_v25  ;;  %v6908_v9 = vsel %vm6476_vm3, %v6907_v3, %v6897_v10  ;;  %v6780_v8 = vsel %vm6482_vm6, %v6776_v33, %v6779_v0  ;;  %v6645_v46 = vrot.slane %v6642_v32, 7  ;;  %v6787_v52 = vld [vmem:[#allocation4 + $0x15] sm:$0x1]  ;;  %v6786_v26 = vld [vmem:[#allocation4 + $0x34] sm:$0x1] }
 0x59d   :  { %v6514_v39 = vsel %vm6480_vm5, %v6511_v19, %v6513_v57  ;;  %v6909_v22 = vsel %vm6478_vm4, %v6907_v3, %v6908_v9  ;;  %6781 = vrot.lane.b32.xlu1 %v6780_v8, %s9452_s7  ;;  %v6675_v29 = vrot.slane %v6659_v5, %v12283_v49  ;;  %v6788_v6 = vld [vmem:[#allocation4 + $0x35] sm:$0x1]  ;;  %v6920_v4 = vmax.f32 %v6916_v14, %v6918_v28  ;;  %v6687_v43 = vld [vmem:[#allocation4 + $0xe] sm:$0x1]  ;;  %v6689_v20 = vld [vmem:[#allocation4 + $0xf] sm:$0x1] }
 0x59e   :  { %v6515_v63 = vsel %vm6482_vm6, %v6511_v19, %v6514_v39  ;;  %v6910_v38 = vsel %vm6480_vm5, %v6907_v3, %v6909_v22  ;;  %v6646_v34 = vsel %vm6476_vm3, %v6645_v46, %v6635_v58  ;;  %v6921_v36 = vmax.f32 %v6917_v40, %v6919_v15  ;;  %v6688_v42 = vld [vmem:[#allocation4 + $0x2e] sm:$0x1]  ;;  %v6690_v31 = vld [vmem:[#allocation4 + $0x2f] sm:$0x1]  ;;  %v6555_v21 = vld [vmem:[#allocation4 + $0x6] sm:$0x1] }
 0x59f   :  { %6516 = vrot.lane.b32.xlu0 %v6515_v63, %s9452_s7  ;;  %v6911_v62 = vsel %vm6482_vm6, %v6907_v3, %v6910_v38  ;;  %v6647_v47 = vsel %vm6478_vm4, %v6645_v46, %v6646_v34  ;;  %v6678_v18 = vrot.slane %v6675_v29, 7  ;;  %v6542_v59 = vrot.slane %v6526_v37, %v12283_v49  ;;  %v6557_v44 = vld [vmem:[#allocation4 + $0x7] sm:$0x1]  ;;  %v6556_v55 = vld [vmem:[#allocation4 + $0x26] sm:$0x1] }
 0x5a0   :  { %v6789_v50 = vmax.f32 %v6785_v16, %v6787_v52  ;;  %v6648_v41 = vsel %vm6480_vm5, %v6645_v46, %v6647_v47  ;;  %v6930_v35 = vrot.slane %v6920_v4, %v12283_v49  ;;  %v6937_v54 = vrot.slane %v6921_v36, %v12283_v49  ;;  %v6558_v3 = vld [vmem:[#allocation4 + $0x27] sm:$0x1]  ;;  %v6949_v48 = vld [vmem:[#allocation4 + $0x1e] sm:$0x1]  ;;  %v6951_v2 = vld [vmem:[#allocation4 + $0x1f] sm:$0x1] }
 0x5a1   :  { %v6790_v24 = vmax.f32 %v6786_v26, %v6788_v6  ;;  %6912 = vrot.lane.b32.xlu1 %v6911_v62, %s9452_s7  ;;  %v6649_v33 = vsel %vm6482_vm6, %v6645_v46, %v6648_v41  ;;  %v6679_v11 = vsel %vm6476_vm3, %v6678_v18, %v6668_v13  ;;  %v6545_v60 = vrot.slane %v6542_v59, 7  ;;  %v6950_v27 = vld [vmem:[#allocation4 + $0x3e] sm:$0x1]  ;;  %v6952_v12 = vld [vmem:[#allocation4 + $0x3f] sm:$0x1] }
 0x5a2   :  { %v6799_v53 = vrot.slane %v6789_v50, %v12283_v49  ;;  %v6680_v61 = vsel %vm6478_vm4, %v6678_v18, %v6679_v11  ;;  %v6940_v7 = vrot.slane %v6937_v54, 7  ;;  %v6691_v10 = vmax.f32 %v6687_v43, %v6689_v20  ;;  %v6818_v9 = vld [vmem:[#allocation4 + $0x16] sm:$0x1]  ;;  %v6820_v40 = vld [vmem:[#allocation4 + $0x17] sm:$0x1] }
 0x5a3   :  { %6650 = vrot.lane.b32.xlu0 %v6649_v33, %s9452_s7  ;;  %v6806_v19 = vrot.slane %v6790_v24, %v12283_v49  ;;  %v6681_v45 = vsel %vm6480_vm5, %v6678_v18, %v6680_v61  ;;  %v6546_v30 = vsel %vm6476_vm3, %v6545_v60, %v12292_v51  ;;  %v6692_v17 = vmax.f32 %v6688_v42, %v6690_v31  ;;  %v6819_v13 = vld [vmem:[#allocation4 + $0x36] sm:$0x1]  ;;  %v6821_v22 = vld [vmem:[#allocation4 + $0x37] sm:$0x1]  ;;  %v9346_v46 = vld [vmem:[%s12578_s9 + $0x80] ss:$8 sps:$4 sm:$0xff]  }
 0x5a4   :  { %v6559_v58 = vmax.f32 %v6555_v21, %v6557_v44  ;;  %v6682_v56 = vsel %vm6482_vm6, %v6678_v18, %v6681_v45  ;;  %v6547_v25 = vsel %vm6478_vm4, %v6545_v60, %v6546_v30  ;;  %v6941_v32 = vsel %vm6476_vm3, %v6940_v7, %v6930_v35  ;;  %v9348_v16 = vld [vmem:[%s12578_s9 + $0x84] ss:$8 sps:$4 sm:$0xff]   ;;  %v6722_v34 = vld [vmem:[#allocation4 + $0x30] sm:$0x1]  ;;  %v6724_v4 = vld [vmem:[#allocation4 + $0x31] sm:$0x1] }
 0x5a5   :  { %v6809_v5 = vrot.slane %v6806_v19, 7  ;;  %6683 = vrot.lane.b32.xlu1 %v6682_v56, %s9453_s8  ;;  %v6548_v14 = vsel %vm6480_vm5, %v6545_v60, %v6547_v25  ;;  %v6942_v51 = vsel %vm6478_vm4, %v6940_v7, %v6941_v32  ;;  %v6701_v0 = vrot.slane %v6691_v10, %v12283_v49  ;;  %v6721_v36 = vld [vmem:[#allocation4 + $0x10] sm:$0x1]  ;;  %7421 = vmatprep.subr.bf16.mxu0 %v9348_v16  ;;  %v6723_v50 = vld [vmem:[#allocation4 + $0x11] sm:$0x1] }
 0x5a6   :  { %v6708_v57 = vrot.slane %v6692_v17, %v12283_v49  ;;  %v6549_v28 = vsel %vm6482_vm6, %v6545_v60, %v6548_v14  ;;  %v6943_v15 = vsel %vm6480_vm5, %v6940_v7, %v6942_v51  ;;  %v6560_v39 = vmax.f32 %v6556_v55, %v6558_v3  ;;  %v6450_v42 = vld [vmem:[#allocation4 + $0x20] sm:$0x1]  ;;  %v6452_v20 = vld [vmem:[#allocation4 + $0x21] sm:$0x1]  ;;  %7422 = vmatpush1.bf16.msra.mxu0 %v9346_v46  ;;  %v9349_v31 = vld [vmem:[%s12578_s9 + $0x90] ss:$8 sps:$4 sm:$0xff]  }
 0x5a7   :  { %v6810_v8 = vsel %vm6476_vm3, %v6809_v5, %v6799_v53  ;;  %6550 = vrot.lane.b32.xlu0 %v6549_v28, %s9453_s8  ;;  %v6944_v52 = vsel %vm6482_vm6, %v6940_v7, %v6943_v15  ;;  %v6569_v29 = vrot.slane %v6559_v58, %v12283_v49  ;;  %v6953_v6 = vmax.f32 %v6949_v48, %v6951_v2  ;;  %v9351_v21 = vld [vmem:[%s12578_s9 + $0x94] ss:$8 sps:$4 sm:$0xff]   ;;  %v6449_v53 = vld [vmem:[#allocation4] sm:$0x1]  ;;  %v6451_v61 = vld [vmem:[#allocation4 + $0x1] sm:$0x1] }
 0x5a8   :  { %v6811_v63 = vsel %vm6478_vm4, %v6809_v5, %v6810_v8  ;;  %v6711_v38 = vrot.slane %v6708_v57, 7  ;;  %v6576_v26 = vrot.slane %v6560_v39, %v12283_v49  ;;  %v6954_v62 = vmax.f32 %v6950_v27, %v6952_v12  ;;  %v9354_v7 = vld [vmem:[%s12578_s9 + $0xa4] ss:$8 sps:$4 sm:$0xff]   ;;  %7423 = vmatprep.subr.bf16.mxu0 %v9351_v21  ;;  %v6852_v48 = vld [vmem:[#allocation4 + $0x18] sm:$0x1] }
 0x5a9   :  { %v6812_v37 = vsel %vm6480_vm5, %v6809_v5, %v6811_v63  ;;  %6945 = vrot.lane.b32.xlu1 %v6944_v52, %s9453_s8  ;;  %v6822_v18 = vmax.f32 %v6818_v9, %v6820_v40  ;;  %v6823_v59 = vmax.f32 %v6819_v13, %v6821_v22  ;;  %v6963_v54 = vrot.slane %v6953_v6, %v12283_v49  ;;  %v6853_v27 = vld [vmem:[#allocation4 + $0x38] sm:$0x1]  ;;  %v6854_v2 = vld [vmem:[#allocation4 + $0x19] sm:$0x1]  ;;  %v9352_v14 = vld [vmem:[%s12578_s9 + $0xa0] ss:$8 sps:$4 sm:$0xff]  }
 0x5aa   :  { %v6813_v43 = vsel %vm6482_vm6, %v6809_v5, %v6812_v37  ;;  %v6712_v47 = vsel %vm6476_vm3, %v6711_v38, %v6701_v0  ;;  %v6579_v35 = vrot.slane %v6576_v26, 7  ;;  %v6970_v24 = vrot.slane %v6954_v62, %v12283_v49  ;;  %v6855_v12 = vld [vmem:[#allocation4 + $0x39] sm:$0x1]  ;;  %7424 = vmatpush1.bf16.msra.mxu0 %v9349_v31  ;;  %v6590_v13 = vld [vmem:[#allocation4 + $0x8] sm:$0x1] }
 0x5ab   :  { %v6713_v41 = vsel %vm6478_vm4, %v6711_v38, %v6712_v47  ;;  %6814 = vrot.lane.b32.xlu0 %v6813_v43, %s9453_s8  ;;  %v6832_v33 = vrot.slane %v6822_v18, %v12283_v49  ;;  %v6839_v11 = vrot.slane %v6823_v59, %v12283_v49  ;;  %v6726_v60 = vmax.f32 %v6722_v34, %v6724_v4  ;;  %v9357_v40 = vld [vmem:[%s12578_s9 + $0xb4] ss:$8 sps:$4 sm:$0xff]   ;;  %v6591_v39 = vld [vmem:[#allocation4 + $0x28] sm:$0x1]  ;;  %v6592_v22 = vld [vmem:[#allocation4 + $0x9] sm:$0x1] }
 0x5ac   :  { %v6714_v44 = vsel %vm6480_vm5, %v6711_v38, %v6713_v41  ;;  %v6580_v10 = vsel %vm6476_vm3, %v6579_v35, %v6569_v29  ;;  %v6973_v55 = vrot.slane %v6970_v24, 7  ;;  %v6725_v45 = vmax.f32 %v6721_v36, %v6723_v50  ;;  %7425 = vmatprep.subr.bf16.mxu0 %v9354_v7  ;;  %v6593_v46 = vld [vmem:[#allocation4 + $0x29] sm:$0x1]  ;;  %v9355_v62 = vld [vmem:[%s12578_s9 + $0xb0] ss:$8 sps:$4 sm:$0xff]  }
 0x5ad   :  { %v6715_v19 = vsel %vm6482_vm6, %v6711_v38, %v6714_v44  ;;  %v6581_v30 = vsel %vm6478_vm4, %v6579_v35, %v6580_v10  ;;  %v6842_v17 = vrot.slane %v6839_v11, 7  ;;  %v6742_v3 = vrot.slane %v6726_v60, %v12283_v49  ;;  %v9360_v47 = vld [vmem:[%s12578_s9 + $0xc4] ss:$8 sps:$4 sm:$0xff]   ;;  %v9358_v24 = vld [vmem:[%s12578_s9 + $0xc0] ss:$8 sps:$4 sm:$0xff]  }
 0x5ae   :  { %6716 = vrot.lane.b32.xlu1 %v6715_v19, %s9454_s24  ;;  %v6454_v58 = vmax.f32 %v6450_v42, %v6452_v20  ;;  %v6582_v56 = vsel %vm6480_vm5, %v6579_v35, %v6581_v30  ;;  %v6974_v25 = vsel %vm6476_vm3, %v6973_v55, %v6963_v54  ;;  %v6735_v32 = vrot.slane %v6725_v45, %v12283_v49  ;;  %v9361_v19 = vld [vmem:[%s12578_s9 + $0xd0] ss:$8 sps:$4 sm:$0xff]   ;;  %v9366_v45 = vld [vmem:[%s12578_s9 + $0xe4] ss:$8 sps:$4 sm:$0xff]  }
 0x5af   :  { %v6453_v5 = vmax.f32 %v6449_v53, %v6451_v61  ;;  %v6583_v51 = vsel %vm6482_vm6, %v6579_v35, %v6582_v56  ;;  %v6975_v0 = vsel %vm6478_vm4, %v6973_v55, %v6974_v25  ;;  %v6843_v57 = vsel %vm6476_vm3, %v6842_v17, %v6832_v33  ;;  %7426 = vmatpush1.bf16.msra.mxu0 %v9352_v14  ;;  %v9363_v33 = vld [vmem:[%s12578_s9 + $0xd4] ss:$8 sps:$4 sm:$0xff]  }
 0x5b0   :  { %v6745_v9 = vrot.slane %v6742_v3, 7  ;;  %6584 = vrot.lane.b32.xlu0 %v6583_v51, %s9454_s24  ;;  %v6976_v28 = vsel %vm6480_vm5, %v6973_v55, %v6975_v0  ;;  %v6844_v15 = vsel %vm6478_vm4, %v6842_v17, %v6843_v57  ;;  %v6470_v8 = vrot.slane %v6454_v58, %v12283_v49  ;;  %7427 = vmatprep.subr.bf16.mxu0 %v9357_v40  ;;  %v9369_v3 = vld [vmem:[%s12578_s9 + $0xf4] ss:$8 sps:$4 sm:$0xff]   ;;  %v9367_v58 = vld [vmem:[%s12578_s9 + $0xf0] ss:$8 sps:$4 sm:$0xff]  }
 0x5b1   :  { %v6977_v16 = vsel %vm6482_vm6, %v6973_v55, %v6976_v28  ;;  %v6845_v52 = vsel %vm6480_vm5, %v6842_v17, %v6844_v15  ;;  %v6463_v38 = vrot.slane %v6453_v5, %v12283_v49  ;;  %v6856_v26 = vmax.f32 %v6852_v48, %v6854_v2  ;;  %v9372_v48 = vld [vmem:[%s12578_s9 + $0x104] ss:$8 sps:$4 sm:$0xff]  }
 0x5b2   :  { %v6746_v63 = vsel %vm6476_vm3, %v6745_v9, %v6735_v32  ;;  %6978 = vrot.lane.b32.xlu1 %v6977_v16, %s9454_s24  ;;  %v6475_v37 = vrot.slane %v6470_v8, 7  ;;  %v6857_v6 = vmax.f32 %v6853_v27, %v6855_v12  ;;  %v6846_v34 = vsel %vm6482_vm6, %v6842_v17, %v6845_v52  ;;  %v9364_v17 = vld [vmem:[%s12578_s9 + $0xe0] ss:$8 sps:$4 sm:$0xff]   ;;  %v9376_v52 = vld [vmem:[%s12578_s9 + $0x114] ss:$8 sps:$4 sm:$0xff]  }
 0x5b3   :  { %v6747_v29 = vsel %vm6478_vm4, %v6745_v9, %v6746_v63  ;;  %v6594_v36 = vmax.f32 %v6590_v13, %v6592_v22  ;;  %v6595_v43 = vmax.f32 %v6591_v39, %v6593_v46  ;;  %v6866_v35 = vrot.slane %v6856_v26, %v12283_v49  ;;  %7428 = vmatpush1.bf16.msra.mxu0 %v9355_v62  ;;  %v9370_v22 = vld [vmem:[%s12578_s9 + $0x100] ss:$8 sps:$4 sm:$0xff]   ;;  %v9380_v26 = vld [vmem:[%s12578_s9 + $0x130] ss:$8 sps:$4 sm:$0xff]  }
 0x5b4   :  { %v6748_v4 = vsel %vm6480_vm5, %v6745_v9, %v6747_v29  ;;  %6847 = vrot.lane.b32.xlu0 %v6846_v34, %s9454_s24  ;;  %v6477_v59 = vsel %vm6476_vm3, %v6475_v37, %v6463_v38  ;;  %v6873_v50 = vrot.slane %v6857_v6, %v12283_v49  ;;  %7429 = vmatprep.subr.bf16.mxu0 %v9360_v47  ;;  %v9379_v38 = vld [vmem:[%s12578_s9 + $0x124] ss:$8 sps:$4 sm:$0xff]   ;;  %v9377_v29 = vld [vmem:[%s12578_s9 + $0x120] ss:$8 sps:$4 sm:$0xff]   ;;  %v9388_v34 = vld [vmem:[%s12578_s9 + $0x154] ss:$8 sps:$4 sm:$0xff]  }
 0x5b5   :  { %v6749_v18 = vsel %vm6482_vm6, %v6745_v9, %v6748_v4  ;;  %v6479_v42 = vsel %vm6478_vm4, %v6475_v37, %v6477_v59  ;;  %v6611_v20 = vrot.slane %v6595_v43, %v12283_v49  ;;  %v6604_v21 = vrot.slane %v6594_v36, %v12283_v49  ;;  %v9385_v6 = vld [vmem:[%s12578_s9 + $0x144] ss:$8 sps:$4 sm:$0xff]   ;;  %v9383_v62 = vld [vmem:[%s12578_s9 + $0x140] ss:$8 sps:$4 sm:$0xff]   ;;  %v9386_v4 = vld [vmem:[%s12578_s9 + $0x150] ss:$8 sps:$4 sm:$0xff]  }
 0x5b6   :  { %6751 = vst.msk [vmem:[#allocation5 + $0x4] sm:$0x3] %vm6485_vm7, %v6749_v18  ;;  %v6481_v41 = vsel %vm6480_vm5, %v6475_v37, %v6479_v42  ;;  %v6876_v54 = vrot.slane %v6873_v50, 7  ;;  %v9391_v36 = vld [vmem:[%s12578_s9 + $0x164] ss:$8 sps:$4 sm:$0xff]  }
 0x5b7   :  { %v6483_v31 = vsel %vm6482_vm6, %v6475_v37, %v6481_v41  ;;  %v6614_v44 = vrot.slane %v6611_v20, 7  ;;  %7430 = vmatpush1.bf16.msra.mxu0 %v9358_v24  ;;  %v9382_v37 = vld [vmem:[%s12578_s9 + $0x134] ss:$8 sps:$4 sm:$0xff]   ;;  %v9389_v43 = vld [vmem:[%s12578_s9 + $0x160] ss:$8 sps:$4 sm:$0xff]  }
 0x5b8   :  { %6486 = vst.msk [vmem:[#allocation5] sm:$0x3] %vm6485_vm7, %v6483_v31  ;;  %v6877_v11 = vsel %vm6476_vm3, %v6876_v54, %v6866_v35  ;;  %7431 = vmatprep.subr.bf16.mxu0 %v9363_v33  ;;  %v9394_v47 = vld [vmem:[%s12578_s9 + $0x174] ss:$8 sps:$4 sm:$0xff]   ;;  %v9392_v18 = vld [vmem:[%s12578_s9 + $0x170] ss:$8 sps:$4 sm:$0xff]  }
 0x5b9   :  { %v6878_v60 = vsel %vm6478_vm4, %v6876_v54, %v6877_v11  ;;  %v6615_v53 = vsel %vm6476_vm3, %v6614_v44, %v6604_v21  ;;  %v9397_v59 = vld [vmem:[%s12578_s9 + $0x184] ss:$8 sps:$4 sm:$0xff]   ;;  %v9395_v50 = vld [vmem:[%s12578_s9 + $0x180] ss:$8 sps:$4 sm:$0xff]   ;;  %v9400_v42 = vld [vmem:[%s12578_s9 + $0x194] ss:$8 sps:$4 sm:$0xff]  }
 0x5ba   :  { %v6879_v61 = vsel %vm6480_vm5, %v6876_v54, %v6878_v60  ;;  %v6616_v7 = vsel %vm6478_vm4, %v6614_v44, %v6615_v53  ;;  %v9398_v20 = vld [vmem:[%s12578_s9 + $0x190] ss:$8 sps:$4 sm:$0xff]   ;;  %v9403_v41 = vld [vmem:[%s12578_s9 + $0x1a4] ss:$8 sps:$4 sm:$0xff]   ;;  %v9401_v35 = vld [vmem:[%s12578_s9 + $0x1a0] ss:$8 sps:$4 sm:$0xff]  }
 0x5bb   :  { %v6880_v10 = vsel %vm6482_vm6, %v6876_v54, %v6879_v61  ;;  %v6617_v55 = vsel %vm6480_vm5, %v6614_v44, %v6616_v7  ;;  %7432 = vmatpush1.bf16.msra.mxu0 %v9361_v19  ;;  %v9406_v54 = vld [vmem:[%s12578_s9 + $0x1b4] ss:$8 sps:$4 sm:$0xff]   ;;  %v9404_v24 = vld [vmem:[%s12578_s9 + $0x1b0] ss:$8 sps:$4 sm:$0xff]   ;;  %v9409_v31 = vld [vmem:[%s12578_s9 + $0x1c4] ss:$8 sps:$4 sm:$0xff]  }
 0x5bc   :  { %6882 = vst.msk [vmem:[#allocation5 + $0x6] sm:$0x3] %vm6485_vm7, %v6880_v10  ;;  %v6618_v30 = vsel %vm6482_vm6, %v6614_v44, %v6617_v55  ;;  %7433 = vmatprep.subr.bf16.mxu0 %v9366_v45  ;;  %v9407_v21 = vld [vmem:[%s12578_s9 + $0x1c0] ss:$8 sps:$4 sm:$0xff]   ;;  %v9412_v44 = vld [vmem:[%s12578_s9 + $0x1d4] ss:$8 sps:$4 sm:$0xff]  }
 0x5bd   :  { %6620 = vst.msk [vmem:[#allocation5 + $0x2] sm:$0x3] %vm6485_vm7, %v6618_v30  ;;  %v9410_v33 = vld [vmem:[%s12578_s9 + $0x1d0] ss:$8 sps:$4 sm:$0xff]   ;;  %v9415_v11 = vld [vmem:[%s12578_s9 + $0x1e4] ss:$8 sps:$4 sm:$0xff]  }
 0x5be   :  { %v9413_v60 = vld [vmem:[%s12578_s9 + $0x1e0] ss:$8 sps:$4 sm:$0xff]   ;;  %v9418_v53 = vld [vmem:[%s12578_s9 + $0x1f4] ss:$8 sps:$4 sm:$0xff]   ;;  %v9416_v61 = vld [vmem:[%s12578_s9 + $0x1f0] ss:$8 sps:$4 sm:$0xff]  }
 0x5bf   :  { %7434 = vmatpush1.bf16.msra.mxu0 %v9364_v17  ;;  %v7073_v19 = vld [vmem:[%s12579_s10] sm:$0x3]  ;;  %v7081_v10 = vsub.s32 1, %v12942_v23 }
 0x5c0   :  { %7435 = vmatprep.subr.bf16.mxu0 %v9369_v3  ;;  %v7078_v55 = vrot.slane %v7073_v19, %v12941_v1 }
 0x5c1   :  { %v7082_v45 = vrot.slane %v7073_v19, %v7081_v10 }
 0x5c3   :  { %7436 = vmatpush1.bf16.msra.mxu0 %v9367_v58 }
 0x5c4   :  { %7446 = vmatprep.subr.bf16.mxu0 %v9372_v48 }
 0x60f   :  { %v6782_v27 = vpop.permute.xlu1 %6781 }
 0x610   :  { %6784 = vst.msk [vmem:[#allocation5 + $0x4] sm:$0x3] %vm6519_vm8, %v6782_v27 }
 0x611   :  { %v6517_v56 = vpop.permute.xlu0 %6516 }
 0x612   :  { %6520 = vst.msk [vmem:[#allocation5] sm:$0x3] %vm6519_vm8, %v6517_v56 }
 0x613   :  { %v6913_v25 = vpop.permute.xlu1 %6912 }
 0x614   :  { %6915 = vst.msk [vmem:[#allocation5 + $0x6] sm:$0x3] %vm6519_vm8, %v6913_v25 }
 0x615   :  { %v6651_v32 = vpop.permute.xlu0 %6650 }
 0x616   :  { %6653 = vst.msk [vmem:[#allocation5 + $0x2] sm:$0x3] %vm6519_vm8, %v6651_v32 }
 0x617   :  { %v6684_v5 = vpop.permute.xlu1 %6683 }
 0x618   :  { %6686 = vst.msk [vmem:[#allocation5 + $0x2] sm:$0x3] %vm6553_vm9, %v6684_v5 }
 0x619   :  { %v6551_v2 = vpop.permute.xlu0 %6550 }
 0x61a   :  { %6554 = vst.msk [vmem:[#allocation5] sm:$0x3] %vm6553_vm9, %v6551_v2 }
 0x61b   :  { %v6946_v12 = vpop.permute.xlu1 %6945 }
 0x61c   :  { %6948 = vst.msk [vmem:[#allocation5 + $0x6] sm:$0x3] %vm6553_vm9, %v6946_v12 }
 0x61d   :  { %v6815_v14 = vpop.permute.xlu0 %6814 }
 0x61e   :  { %6817 = vst.msk [vmem:[#allocation5 + $0x4] sm:$0x3] %vm6553_vm9, %v6815_v14 }
 0x620   :  { %v6717_v51 = vpop.permute.xlu1 %6716 }
 0x621   :  { %6719 = vst.msk [vmem:[#allocation5 + $0x2] sm:$0x3] %vm6587_vm10, %v6717_v51 }
 0x622   :  { %v6585_v0 = vpop.permute.xlu0 %6584 }
 0x623   :  { %6588 = vst.msk [vmem:[#allocation5] sm:$0x3] %vm6587_vm10, %v6585_v0 }
 0x624   :  { %v6979_v57 = vpop.permute.xlu1 %6978 }
 0x625   :  { %6981 = vst.msk [vmem:[#allocation5 + $0x6] sm:$0x3] %vm6587_vm10, %v6979_v57 }
 0x626   :  { %v6848_v9 = vpop.permute.xlu0 %6847 }
 0x627   :  { %6850 = vst.msk [vmem:[#allocation5 + $0x4] sm:$0x3] %vm6587_vm10, %v6848_v9 }
 0x62e   :  { %v6982_v13 = vld [vmem:[#allocation5] sm:$0xff] }
 0x62f   :  { %v6991_v40 = vrot.slane %v6982_v13, %v12283_v49  ;;  %v6984_v28 = vcombine.high %v6982_v13, %v6982_v13 }
 0x631   :  { %v6999_v15 = vcombine.high %v6991_v40, %v6991_v40  ;;  %v12453_v8 = vrot.slane %v6984_v28, %v12283_v49  ;;  %v7005_v16 = vpack.c.bf16 %v6991_v40, %v6991_v40  ;;  %v9374_v49 = vld [vmem:[%s12578_s9 + $0x110] ss:$8 sps:$4 sm:$0xff]   ;;  %s7505_s9 = sshll.u32 %s9455_s4, 4  ;;  %s7506_s9 = int_to_ptr.vmem [resolvable:$true] %s7505_s9 }
 0x632   :  { %s9426_s28 = scalar_lea.vmem %s7506_s9, 64  ;;  %p9431_p1 = scmp.lt.s32.totalorder %s7506_s9, %s7506_s9 }
 0x633   :  { %v7006_v39 = vpack.c.bf16 %v6999_v15, %v6999_v15  ;;  %v7000_v46 = vcombine.high %v12453_v8, %v12453_v8  ;;  %v7007_v7 = vpack.c.bf16 %v12453_v8, %v12453_v8  ;;  %p9427_p0 = scmp.ne.s32.totalorder %s7506_s9, %s9426_s28  ;;  %p9432_p2 = scmp.lt.s32.totalorder %s9426_s28, %s9426_s28 }
 0x635   :  { %7437 = vmatprep.mubr.bf16.mxu0 %v7006_v39  ;;  %v7008_v63 = vpack.c.bf16 %v7000_v46, %v7000_v46  ;;  %p9433_p3 = por %p9432_p2, %p9431_p1 }
 0x636   :  { %7438 = vmatmul.mubr.bf16.vlgmr.msra.gmra.mrb[80].mxu0 %v7005_v16 }
 0x637   :  { %7447 = vmatpush1.bf16.msra.mxu0 %v9370_v22  ;;  %7478 = vmatprep.mubr.bf16.mxu0 %v7008_v63  ;;  %p9434_p4 = pnand %p9433_p3, %p9427_p0 }
 0x638   :  { %7448 = vmatprep.subr.bf16.mxu0 %v9376_v52 }
 0x63b   :  { %7449 = vmatpush1.bf16.msra.mxu0 %v9374_v49 }
 0x63c   :  { %7450 = vmatprep.subr.bf16.mxu0 %v9379_v38 }
 0x63f   :  { %7451 = vmatpush1.bf16.msra.mxu0 %v9377_v29 }
 0x640   :  { %7452 = vmatprep.subr.bf16.mxu0 %v9382_v37 }
 0x643   :  { %7453 = vmatpush1.bf16.msra.mxu0 %v9380_v26 }
 0x644   :  { %7454 = vmatprep.subr.bf16.mxu0 %v9385_v6 }
 0x647   :  { %7455 = vmatpush1.bf16.msra.mxu0 %v9383_v62 }
 0x648   :  { %7456 = vmatprep.subr.bf16.mxu0 %v9388_v34 }
 0x64b   :  { %7457 = vmatpush1.bf16.msra.mxu0 %v9386_v4 }
 0x64c   :  { %7458 = vmatprep.subr.bf16.mxu0 %v9391_v36 }
 0x64f   :  { %7459 = vmatpush1.bf16.msra.mxu0 %v9389_v43 }
 0x650   :  { %7460 = vmatprep.subr.bf16.mxu0 %v9394_v47 }
 0x653   :  { %7461 = vmatpush1.bf16.msra.mxu0 %v9392_v18 }
 0x654   :  { %7462 = vmatprep.subr.bf16.mxu0 %v9397_v59 }
 0x657   :  { %7463 = vmatpush1.bf16.msra.mxu0 %v9395_v50 }
 0x658   :  { %7464 = vmatprep.subr.bf16.mxu0 %v9400_v42 }
 0x65b   :  { %7465 = vmatpush1.bf16.msra.mxu0 %v9398_v20 }
 0x65c   :  { %7466 = vmatprep.subr.bf16.mxu0 %v9403_v41 }
 0x65f   :  { %7467 = vmatpush1.bf16.msra.mxu0 %v9401_v35 }
 0x660   :  { %7468 = vmatprep.subr.bf16.mxu0 %v9406_v54 }
 0x663   :  { %7469 = vmatpush1.bf16.msra.mxu0 %v9404_v24 }
 0x664   :  { %7470 = vmatprep.subr.bf16.mxu0 %v9409_v31 }
 0x667   :  { %7471 = vmatpush1.bf16.msra.mxu0 %v9407_v21 }
 0x668   :  { %7472 = vmatprep.subr.bf16.mxu0 %v9412_v44 }
 0x66b   :  { %7473 = vmatpush1.bf16.msra.mxu0 %v9410_v33 }
 0x66c   :  { %7474 = vmatprep.subr.bf16.mxu0 %v9415_v11 }
 0x66f   :  { %7475 = vmatpush1.bf16.msra.mxu0 %v9413_v60 }
 0x670   :  { %7476 = vmatprep.subr.bf16.mxu0 %v9418_v53 }
 0x673   :  { %7477 = vmatpush1.bf16.msra.mxu0 %v9416_v61 }
 0x676   :  { %7479 = vmatmul.mubr.bf16.vlgmr.msra.gmra.mrb[80].mxu0 %v7007_v7 }
 0x749   :  { %v7480_v30 = vpop.f32.mrb[80].mxu0 }
 0x74a   :  { %v8852_v17 = vadd.f32 %v7480_v30, %v7078_v55  ;;  %v7482_v3 = vpop.f32.mrb[81].mxu0 }
 0x74b   :  { %v8853_v58 = vadd.f32 %v7482_v3, %v7082_v45  ;;  %v7484_v48 = vpop.f32.mrb[82].mxu0 }
 0x74c   :  { %v7485_v27 = vpop.f32.mrb[83].mxu0 }
 0x74d   :  { %v7489_v56 = vcombine.low %v8852_v17, %v8853_v58 }
 0x74f   :  { %7965 = vst.sshfl [vmem:[#allocation6] sm:$0x33 pattern:$0x76325410] %v7489_v56 }
 0x750   :  { %9437 = shalt.err (!%p9434_p4)
}
 0x751   :  { %s9438_s30 = scalar_lea.hbm %s12580_s11, 64 }
 0x752   :  { %p9439_p5 = scmp.ne.s32.totalorder %s12580_s11, %s9438_s30  ;;  %p9442_p6 = scmp.lt.u32.totalorder %s9438_s30, %s12580_s11 }
 0x754   :  { %p9444_p7 = pnand %p9442_p6, %p9439_p5 }
 0x756   :  { %9447 = shalt.err (!%p9444_p7)
}
 0x757   :  { %7508 = dma.vmem_to_hbm [thread:$0]  %s7506_s9, 64, %s12580_s11, [#allocation7]  }
 0x758   :  { %9448 = dma.done.wait [#allocation7], 64  }
 0x759   :  { %9449 = vsyncadd [#allocation7], 4294967232 }
 0x75a   :  { %7512 = vsyncpa [#allocation7], 1 }

</bundles_post_ra>
